<compile_context>
chip_gen: v7x
topology: tpu7x:2x2x1
jax: 0.10.0
libtpu: 0.0.40
codegen_flags: <defaults>
</compile_context>

<pallas_src>
import functools

import jax
import jax.numpy as jnp
from jax.experimental import pallas as pl
from jax.experimental.pallas import tpu as pltpu


_VMEM_LIMIT = 40 * 1024 * 1024     # explicit scoped-VMEM limit (safe on v5e/v6e/v7x)
_VMEM_BUDGET = 30 * 1024 * 1024    # planning budget for tile-size derivation
_FUSED_LIMIT = 20 * 1024 * 1024    # resident conv slab + weight tile cap (fused-BN path)
_HEADROOM = 2 * 1024 * 1024


def _round_up(x, m):
    return (x + m - 1) // m * m


def _pick_tile_m(m, k, cp, out_bytes, extra_bytes, tile_cap):
    """Largest 8-aligned M-tile whose double-buffered working set fits the budget."""
    fixed = 2 * k * cp * 2 + extra_bytes + _HEADROOM      # B (bf16, 2 bufs) + slab/vecs
    per_row = 2 * k * 2 + 2 * cp * out_bytes              # A (bf16, 2 bufs) + out (2 bufs)
    cap = max((_VMEM_BUDGET - fixed) // per_row, 8)
    cap = min(cap, tile_cap)
    n_tiles = pl.cdiv(m, cap)
    tm = _round_up(pl.cdiv(m, n_tiles), 8)
    return tm, n_tiles, tm * n_tiles


# ---------------------------------------------------------------------------
# Pallas kernels
# ---------------------------------------------------------------------------
def _conv_bias_act_kernel(a_ref, b_ref, bias_ref, o_ref, *, leaky, neg_slope):
    """One M-tile of  o = A @ B + bias  (+ optional LeakyReLU(0.2)), bf16 out."""
    acc = jnp.dot(a_ref[...], b_ref[...], preferred_element_type=jnp.float32)
    acc = acc + bias_ref[...]                       # [1, Cp] broadcast (f32)
    if leaky:
        acc = jnp.maximum(acc, neg_slope * acc)     # one max, no compare+select
    o_ref[...] = acc.astype(o_ref.dtype)


def _conv_bn_lrelu_kernel(a_ref, b_ref, gamma_ref, beta_ref, o_ref,
                          slab_ref, sum_ref, sq_ref, scale_ref, shift_ref,
                          *, m_valid, tm, eps, neg_slope):
    """Fused Conv(matmul) -> BatchNorm(batch stats) -> LeakyReLU(0.2).

    Grid = (2, n_tiles), phase axis leading (slow), tiles inner (fast):
      phase 0: per tile, matmul into the VMEM-resident f32 slab + accumulate
               per-channel sum / sum-of-squares in VMEM scratch.
      phase 1: per tile, scale/shift FMA + LeakyReLU and store to that tile's
               own output block, so the epilogue overlaps the HBM writeback.
    Conv bias is intentionally omitted: it cancels under train-mode BN.
    """
    p = pl.program_id(0)        # 0: matmul + stats, 1: normalize + store
    i = pl.program_id(1)

    @pl.when((p == 0) & (i == 0))
    def _():
        sum_ref[...] = jnp.zeros_like(sum_ref)
        sq_ref[...] = jnp.zeros_like(sq_ref)

    @pl.when(p == 0)
    def _():
        y = jnp.dot(a_ref[...], b_ref[...], preferred_element_type=jnp.float32)
        slab_ref[pl.ds(pl.multiple_of(i * tm, tm), tm), :] = y
        # Partial per-channel statistics (mask zero-padded rows if M was padded).
        if m_valid % tm != 0:
            row = jax.lax.broadcasted_iota(jnp.int32, (tm, 1), 0) + i * tm
            y = jnp.where(row < m_valid, y, 0.0)
        sum_ref[...] += jnp.sum(y, axis=0, keepdims=True)
        sq_ref[...] += jnp.sum(y * y, axis=0, keepdims=True)

    @pl.when((p == 1) & (i == 0))
    def _():
        inv_m = 1.0 / float(m_valid)
        mean = sum_ref[...] * inv_m                               # [1, Cp]
        # Clamp: E[x^2]-E[x]^2 can go slightly negative in f32.
        var = jnp.maximum(sq_ref[...] * inv_m - mean * mean, 0.0)  # biased, like torch
        scale_ref[...] = gamma_ref[...] * jax.lax.rsqrt(var + eps)
        shift_ref[...] = beta_ref[...] - mean * scale_ref[...]

    @pl.when(p == 1)
    def _():
        y = slab_ref[pl.ds(pl.multiple_of(i * tm, tm), tm), :]
        z = y * scale_ref[...] + shift_ref[...]                   # FMA epilogue, tiled
        o_ref[...] = jnp.maximum(z, neg_slope * z).astype(o_ref.dtype)


# ---------------------------------------------------------------------------
# Layer wrapper (im2col / reshapes in plain JAX, math in Pallas)
# ---------------------------------------------------------------------------
def _im2col_nhwc(x, kh, kw, stride, pad):
    """x: [N, H, W, C] (bf16) -> A: [N*Ho*Wo, kh*kw*C] (K ordered (kh, kw, C))."""
    n, h, w, c = x.shape
    ho = (h + 2 * pad - kh) // stride + 1
    wo = (w + 2 * pad - kw) // stride + 1
    xp = jnp.pad(x, ((0, 0), (pad, pad), (pad, pad), (0, 0)))
    cols = []
    for i in range(kh):
        for j in range(kw):
            cols.append(xp[:, i:i + stride * ho:stride,
                           j:j + stride * wo:stride, :])
    col = jnp.stack(cols, axis=3)                   # [N, Ho, Wo, kh*kw, C]
    return col.reshape(n * ho * wo, kh * kw * c), ho, wo


def disc_block(x, w, b, gamma=None, beta=None, *, stride, pad, leaky,
               eps=1e-5, tile_cap=2048):
    """Conv2d (+ optional train-mode BatchNorm2d) (+ optional LeakyReLU).

    NHWC bf16 in / NHWC bf16 out; MXU math is bf16 x bf16 -> f32 accumulate.
    """
    n = x.shape[0]
    cout, cin, kh, kw = w.shape
    a, ho, wo = _im2col_nhwc(x, kh, kw, stride, pad)      # bf16 (x is bf16)
    m, k = a.shape

    # Lane-dense output channels: pad C_out up to a multiple of 128.
    cp = _round_up(cout, 128)
    bmat = jnp.transpose(w, (2, 3, 1, 0)).reshape(k, cout)   # [K, C_out]
    if cp != cout:
        # Zero-padded weight columns (+ zero bias/gamma/beta pads below) keep the
        # padded output lanes exactly zero through bias/BN/LReLU.
        bmat = jnp.pad(bmat, ((0, 0), (0, cp - cout)))
    bmat = bmat.astype(jnp.bfloat16)                          # bf16 MXU operand

    use_bn = gamma is not None
    slab_est = (_round_up(m, 8) + tile_cap) * cp * 4          # upper bound on m_pad*cp*4
    fused = use_bn and (slab_est + 2 * k * cp * 2) <= _FUSED_LIMIT
    extra = slab_est if fused else 0
    tm, n_tiles, m_pad = _pick_tile_m(m, k, cp, out_bytes=2,
                                      extra_bytes=extra, tile_cap=tile_cap)
    if m_pad != m:
        a = jnp.pad(a, ((0, m_pad - m), (0, 0)))

    vec_shape = (1, cp)

    if not use_bn:
        bias2d = jnp.pad(b, (0, cp - cout)).reshape(vec_shape).astype(jnp.float32)
        flat = pl.pallas_call(
            functools.partial(_conv_bias_act_kernel, leaky=leaky, neg_slope=0.2),
            out_shape=jax.ShapeDtypeStruct((m_pad, cp), jnp.bfloat16),
            grid=(n_tiles,),
            in_specs=[pl.BlockSpec((tm, k), lambda i: (i, 0)),
                      pl.BlockSpec((k, cp), lambda i: (0, 0)),
                      pl.BlockSpec(vec_shape, lambda i: (0, 0))],
            out_specs=pl.BlockSpec((tm, cp), lambda i: (i, 0)),
            compiler_params=pltpu.CompilerParams(
                dimension_semantics=("parallel",),
                vmem_limit_bytes=_VMEM_LIMIT),
        )(a, bmat, bias2d)
    elif fused:
        # Conv bias `b` intentionally unused: cancels under train-mode BN.
        gamma2d = jnp.pad(gamma, (0, cp - cout)).reshape(vec_shape).astype(jnp.float32)
        beta2d = jnp.pad(beta, (0, cp - cout)).reshape(vec_shape).astype(jnp.float32)
        last = n_tiles - 1
        flat = pl.pallas_call(
            functools.partial(_conv_bn_lrelu_kernel, m_valid=m, tm=tm,
                              eps=eps, neg_slope=0.2),
            out_shape=jax.ShapeDtypeStruct((m_pad, cp), jnp.bfloat16),
            grid=(2, n_tiles),        # leading phase axis (slow), tiles inner (fast)
            in_specs=[
                # Phase 0 streams A tiles; phase 1 pins A at the last tile (no re-DMA).
                pl.BlockSpec((tm, k), lambda p, i: (i * (1 - p) + last * p, 0)),
                pl.BlockSpec((k, cp), lambda p, i: (0, 0)),
                pl.BlockSpec(vec_shape, lambda p, i: (0, 0)),
                pl.BlockSpec(vec_shape, lambda p, i: (0, 0))],
            # Phase 0 parks on block 0 (never written); phase 1 writes block i,
            # so normalized tiles stream back to HBM as they are produced.
            out_specs=pl.BlockSpec((tm, cp), lambda p, i: (i * p, 0)),
            scratch_shapes=[pltpu.VMEM((m_pad, cp), jnp.float32),   # resident conv slab
                            pltpu.VMEM(vec_shape, jnp.float32),     # channel sum
                            pltpu.VMEM(vec_shape, jnp.float32),     # channel sum-of-squares
                            pltpu.VMEM(vec_shape, jnp.float32),     # BN scale
                            pltpu.VMEM(vec_shape, jnp.float32)],    # BN shift
            compiler_params=pltpu.CompilerParams(
                dimension_semantics=("arbitrary", "arbitrary"),
                vmem_limit_bytes=_VMEM_LIMIT),
        )(a, bmat, gamma2d, beta2d)
    else:
        # Resident slab would not fit the VMEM budget (e.g. huge N*Ho*Wo on v7x):
        # Pallas conv, BN + LReLU in XLA.
        # TODO(synk): true two-pass Pallas scheme (stats kernel, then normalize kernel).
        zero_bias = jnp.zeros(vec_shape, jnp.float32)
        conv_flat = pl.pallas_call(
            functools.partial(_conv_bias_act_kernel, leaky=False, neg_slope=0.2),
            out_shape=jax.ShapeDtypeStruct((m_pad, cp), jnp.bfloat16),
            grid=(n_tiles,),
            in_specs=[pl.BlockSpec((tm, k), lambda i: (i, 0)),
                      pl.BlockSpec((k, cp), lambda i: (0, 0)),
                      pl.BlockSpec(vec_shape, lambda i: (0, 0))],
            out_specs=pl.BlockSpec((tm, cp), lambda i: (i, 0)),
            compiler_params=pltpu.CompilerParams(
                dimension_semantics=("parallel",),
                vmem_limit_bytes=_VMEM_LIMIT),
        )(a, bmat, zero_bias)
        y = conv_flat[:m, :cout].astype(jnp.float32)
        mean = jnp.mean(y, axis=0)
        var = jnp.maximum(jnp.mean(jnp.square(y), axis=0) - mean * mean, 0.0)
        scale = gamma * jax.lax.rsqrt(var + eps)
        shift = beta - mean * scale
        z = y * scale + shift
        z = jnp.maximum(z, 0.2 * z).astype(jnp.bfloat16)
        return z.reshape(n, ho, wo, cout)

    return flat[:m, :cout].reshape(n, ho, wo, cout)   # stays NHWC bf16 (no transpose)


# ---------------------------------------------------------------------------
# Parameter init (deterministic, PyTorch-default-like)
# ---------------------------------------------------------------------------
def init_params(key, in_channels=1):
    chans = [(in_channels, 64, 4), (64, 128, 4), (128, 256, 4), (256, 512, 4),
             (512, 1, 3)]
    params = []
    for li, (cin, cout, k) in enumerate(chans):
        key, kw_, kb_ = jax.random.split(key, 3)
        fan_in = cin * k * k
        bound = 1.0 / jnp.sqrt(fan_in)
        w = jax.random.uniform(kw_, (cout, cin, k, k), jnp.float32, -bound, bound)
        b = jax.random.uniform(kb_, (cout,), jnp.float32, -bound, bound)
        has_bn = li in (1, 2, 3)
        gamma = jnp.ones((cout,), jnp.float32) if has_bn else None
        beta = jnp.zeros((cout,), jnp.float32) if has_bn else None
        params.append((w, b, gamma, beta))
    return params


def discriminator_forward(img, params, tile_cap=2048):
    # Torch NCHW boundary -> NHWC once; bf16 activations end-to-end, f32 MXU accum.
    x = jnp.transpose(img, (0, 2, 3, 1)).astype(jnp.bfloat16)
    # block(in_channels, 64, normalize=False)
    x = disc_block(x, params[0][0], params[0][1], stride=2, pad=1, leaky=True,
                   tile_cap=tile_cap)
    # block(64, 128), block(128, 256), block(256, 512) with BatchNorm
    for li in (1, 2, 3):
        w, b, g, bt = params[li]
        x = disc_block(x, w, b, g, bt, stride=2, pad=1, leaky=True,
                       tile_cap=tile_cap)
    # final Conv2d(512, 1, 3, stride=1, padding=1)
    w, b, _, _ = params[4]
    x = disc_block(x, w, b, stride=1, pad=1, leaky=False, tile_cap=tile_cap)
    return jnp.transpose(x, (0, 3, 1, 2)).astype(jnp.float32)   # back to NCHW


# ---------------------------------------------------------------------------
# Pure-JAX reference (f32, HIGHEST precision) for correctness checking
# ---------------------------------------------------------------------------
def _reference_forward(img, params, eps=1e-5):
    def conv(x, w, b, stride, pad):
        y = jax.lax.conv_general_dilated(
            x, w, (stride, stride), [(pad, pad), (pad, pad)],
            dimension_numbers=("NCHW", "OIHW", "NCHW"),
            precision=jax.lax.Precision.HIGHEST)
        return y + b.reshape(1, -1, 1, 1)

    def lrelu(x):
        return jnp.where(x > 0, x, 0.2 * x)

    def bn(x, g, bt):
        mean = x.mean(axis=(0, 2, 3), keepdims=True)
        var = ((x - mean) ** 2).mean(axis=(0, 2, 3), keepdims=True)
        return ((x - mean) * jax.lax.rsqrt(var + eps)
                * g.reshape(1, -1, 1, 1) + bt.reshape(1, -1, 1, 1))

    x = img.astype(jnp.float32)
    x = lrelu(conv(x, params[0][0], params[0][1], 2, 1))
    for li in (1, 2, 3):
        w, b, g, bt = params[li]
        x = lrelu(bn(conv(x, w, b, 2, 1), g, bt))
    w, b, _, _ = params[4]
    return conv(x, w, b, 1, 1)


# ---------------------------------------------------------------------------
if __name__ == "__main__":
    key = jax.random.PRNGKey(0)
    k_img, k_par = jax.random.split(key)

    # Small example input (NCHW, like torch): batch=2, 1 channel, 32x32 image.
    img = jax.random.normal(k_img, (2, 1, 32, 32), jnp.float32)
    params = init_params(k_par, in_channels=1)

    fwd = jax.jit(discriminator_forward, static_argnames="tile_cap")
    out = jax.block_until_ready(fwd(img, params, tile_cap=2048))
    assert out.shape == (2, 1, 2, 2), out.shape
    assert jnp.all(jnp.isfinite(out))

    ref = jax.block_until_ready(_reference_forward(img, params))
    # bf16 activations + bf16 MXU operands across 5 layers -> looser than pure f32.
    assert jnp.allclose(out, ref, atol=8e-2, rtol=8e-2), (
        float(jnp.max(jnp.abs(out - ref))))

    # Exercise the multi-tile / two-phase fused-BN path with a forced small tile.
    img2 = jax.random.normal(k_img, (2, 1, 64, 64), jnp.float32)
    out2 = jax.block_until_ready(fwd(img2, params, tile_cap=128))
    ref2 = jax.block_until_ready(_reference_forward(img2, params))
    assert out2.shape == (2, 1, 4, 4), out2.shape
    assert jnp.allclose(out2, ref2, atol=8e-2, rtol=8e-2), (
        float(jnp.max(jnp.abs(out2 - ref2))))

    print("KERNEL_OK")
</pallas_src>

<mosaic_0001>
module attributes {stable_mosaic.version = 11 : i64} {
  func.func @_conv_bias_act_kernel(%arg0: i32, %arg1: memref<512x16xbf16, #tpu.memory_space<vmem>>, %arg2: memref<16x128xbf16, #tpu.memory_space<vmem>>, %arg3: memref<1x128xf32, #tpu.memory_space<vmem>>, %arg4: memref<512x128xbf16, #tpu.memory_space<vmem>>) attributes {dimension_semantics = [#tpu.dimension_semantics<parallel>], iteration_bounds = array<i64: 1>, scalar_prefetch = 0 : i64, scratch_operands = 0 : i64, tpu.core_type = #tpu.core_type<tc>, window_params = [{transform_indices = @transform_0, window_bounds = array<i64: 512, 16>}, {pipeline_mode = #tpu.pipeline_mode<synchronous>, transform_indices = @transform_1, window_bounds = array<i64: 16, 128>}, {pipeline_mode = #tpu.pipeline_mode<synchronous>, transform_indices = @transform_2, window_bounds = array<i64: 1, 128>}, {transform_indices = @transform_3, window_bounds = array<i64: 512, 128>}]} {
    %c0 = arith.constant 0 : index
    %c0_0 = arith.constant 0 : index
    %0 = vector.load %arg1[%c0, %c0_0] : memref<512x16xbf16, #tpu.memory_space<vmem>>, vector<512x16xbf16>
    %c0_1 = arith.constant 0 : index
    %c0_2 = arith.constant 0 : index
    %1 = vector.load %arg2[%c0_1, %c0_2] : memref<16x128xbf16, #tpu.memory_space<vmem>>, vector<16x128xbf16>
    %cst = arith.constant dense<0.000000e+00> : vector<512x128xf32>
    %2 = tpu.matmul %0, %1, %cst {dimension_numbers = #tpu.dot_dimension_numbers<[1], [0], [0], [1], [0, 0, 1, 1], [], []>} : vector<512x16xbf16>, vector<16x128xbf16>, vector<512x128xf32> -> vector<512x128xf32>
    %c0_3 = arith.constant 0 : index
    %c0_4 = arith.constant 0 : index
    %3 = vector.load %arg3[%c0_3, %c0_4] : memref<1x128xf32, #tpu.memory_space<vmem>>, vector<1x128xf32>
    %4 = vector.broadcast %3 : vector<1x128xf32> to vector<512x128xf32>
    %5 = arith.addf %2, %4 : vector<512x128xf32>
    %cst_5 = arith.constant 2.000000e-01 : f32
    %6 = vector.broadcast %cst_5 : f32 to vector<512x128xf32>
    %7 = arith.mulf %6, %5 : vector<512x128xf32>
    %8 = arith.maximumf %5, %7 : vector<512x128xf32>
    %9 = arith.truncf %8 : vector<512x128xf32> to vector<512x128xbf16>
    %c0_6 = arith.constant 0 : index
    %c0_7 = arith.constant 0 : index
    %10 = vector.load %arg4[%c0_6, %c0_7] : memref<512x128xbf16, #tpu.memory_space<vmem>>, vector<512x128xbf16>
    tpu.vector_store %arg4[%c0_6, %c0_7], %9 {strides = array<i32>} : memref<512x128xbf16, #tpu.memory_space<vmem>>, vector<512x128xbf16>,
    return
  }
  func.func @transform_0(%arg0: i32) -> (i32, i32) {
    %c0_i32 = arith.constant 0 : i32
    %c0_i32_0 = arith.constant 0 : i32
    return %arg0, %c0_i32 : i32, i32
  }
  func.func @transform_1(%arg0: i32) -> (i32, i32) {
    %c0_i32 = arith.constant 0 : i32
    %c0_i32_0 = arith.constant 0 : i32
    %c0_i32_1 = arith.constant 0 : i32
    return %c0_i32, %c0_i32_0 : i32, i32
  }
  func.func @transform_2(%arg0: i32) -> (i32, i32) {
    %c0_i32 = arith.constant 0 : i32
    %c0_i32_0 = arith.constant 0 : i32
    %c0_i32_1 = arith.constant 0 : i32
    return %c0_i32, %c0_i32_0 : i32, i32
  }
  func.func @transform_3(%arg0: i32) -> (i32, i32) {
    %c0_i32 = arith.constant 0 : i32
    %c0_i32_0 = arith.constant 0 : i32
    return %arg0, %c0_i32 : i32, i32
  }
}

module attributes {stable_mosaic.version = 11 : i64} {
  func.func @_conv_bn_lrelu_kernel(%arg0: i32, %arg1: i32, %arg2: memref<128x1024xbf16, #tpu.memory_space<vmem>>, %arg3: memref<1024x128xbf16, #tpu.memory_space<vmem>>, %arg4: memref<1x128xf32, #tpu.memory_space<vmem>>, %arg5: memref<1x128xf32, #tpu.memory_space<vmem>>, %arg6: memref<128x128xbf16, #tpu.memory_space<vmem>>, %arg7: memref<128x128xf32, #tpu.memory_space<vmem>>, %arg8: memref<1x128xf32, #tpu.memory_space<vmem>>, %arg9: memref<1x128xf32, #tpu.memory_space<vmem>>, %arg10: memref<1x128xf32, #tpu.memory_space<vmem>>, %arg11: memref<1x128xf32, #tpu.memory_space<vmem>>) attributes {dimension_semantics = [#tpu.dimension_semantics<arbitrary>, #tpu.dimension_semantics<arbitrary>], iteration_bounds = array<i64: 2, 1>, scalar_prefetch = 0 : i64, scratch_operands = 5 : i64, tpu.core_type = #tpu.core_type<tc>, window_params = [{transform_indices = @transform_0, window_bounds = array<i64: 128, 1024>}, {pipeline_mode = #tpu.pipeline_mode<synchronous>, transform_indices = @transform_1, window_bounds = array<i64: 1024, 128>}, {pipeline_mode = #tpu.pipeline_mode<synchronous>, transform_indices = @transform_2, window_bounds = array<i64: 1, 128>}, {pipeline_mode = #tpu.pipeline_mode<synchronous>, transform_indices = @transform_3, window_bounds = array<i64: 1, 128>}, {transform_indices = @transform_4, window_bounds = array<i64: 128, 128>}]} {
    %c0_i32 = arith.constant 0 : i32
    %0 = arith.cmpi eq, %arg0, %c0_i32 : i32
    %c0_i32_0 = arith.constant 0 : i32
    %1 = arith.cmpi eq, %arg1, %c0_i32_0 : i32
    %2 = arith.andi %0, %1 : i1
    %3 = arith.extui %2 : i1 to i32
    %c0_i32_1 = arith.constant 0 : i32
    %4 = arith.cmpi ne, %3, %c0_i32_1 : i32
    scf.if %4 {
      %cst = arith.constant 0.000000e+00 : f32
      %16 = vector.broadcast %cst : f32 to vector<1x128xf32>
      %c0 = arith.constant 0 : index
      %c0_8 = arith.constant 0 : index
      %17 = vector.load %arg8[%c0, %c0_8] : memref<1x128xf32, #tpu.memory_space<vmem>>, vector<1x128xf32>
      tpu.vector_store %arg8[%c0, %c0_8], %16 {strides = array<i32>} : memref<1x128xf32, #tpu.memory_space<vmem>>, vector<1x128xf32>,
      %cst_9 = arith.constant 0.000000e+00 : f32
      %18 = vector.broadcast %cst_9 : f32 to vector<1x128xf32>
      %c0_10 = arith.constant 0 : index
      %c0_11 = arith.constant 0 : index
      %19 = vector.load %arg9[%c0_10, %c0_11] : memref<1x128xf32, #tpu.memory_space<vmem>>, vector<1x128xf32>
      tpu.vector_store %arg9[%c0_10, %c0_11], %18 {strides = array<i32>} : memref<1x128xf32, #tpu.memory_space<vmem>>, vector<1x128xf32>,
    } else {
    }
    %c0_i32_2 = arith.constant 0 : i32
    %5 = arith.cmpi eq, %arg0, %c0_i32_2 : i32
    %6 = arith.extui %5 : i1 to i32
    %c0_i32_3 = arith.constant 0 : i32
    %7 = arith.cmpi ne, %6, %c0_i32_3 : i32
    scf.if %7 {
      %c0 = arith.constant 0 : index
      %c0_8 = arith.constant 0 : index
      %16 = vector.load %arg2[%c0, %c0_8] : memref<128x1024xbf16, #tpu.memory_space<vmem>>, vector<128x1024xbf16>
      %c0_9 = arith.constant 0 : index
      %c0_10 = arith.constant 0 : index
      %17 = vector.load %arg3[%c0_9, %c0_10] : memref<1024x128xbf16, #tpu.memory_space<vmem>>, vector<1024x128xbf16>
      %cst = arith.constant dense<0.000000e+00> : vector<128x128xf32>
      %18 = tpu.matmul %16, %17, %cst {dimension_numbers = #tpu.dot_dimension_numbers<[1], [0], [0], [1], [0, 0, 1, 1], [], []>} : vector<128x1024xbf16>, vector<1024x128xbf16>, vector<128x128xf32> -> vector<128x128xf32>
      %c128_i32 = arith.constant 128 : i32
      %19 = arith.muli %arg1, %c128_i32 : i32
      %20 = tpu.assume_multiple %19, 128 : i32
      %21 = arith.index_cast %20 : i32 to index
      %c0_11 = arith.constant 0 : index
      %22 = vector.load %arg7[%21, %c0_11] : memref<128x128xf32, #tpu.memory_space<vmem>>, vector<128x128xf32>
      tpu.vector_store %arg7[%21, %c0_11], %18 {strides = array<i32>} : memref<128x128xf32, #tpu.memory_space<vmem>>, vector<128x128xf32>,
      %c0_12 = arith.constant 0 : index
      %c0_13 = arith.constant 0 : index
      %23 = vector.load %arg8[%c0_12, %c0_13] : memref<1x128xf32, #tpu.memory_space<vmem>>, vector<1x128xf32>
      %cst_14 = arith.constant dense<0.000000e+00> : vector<128xf32>
      %24 = vector.multi_reduction <add>, %18, %cst_14 [0] : vector<128x128xf32> to vector<128xf32>
      %25 = vector.shape_cast %24 : vector<128xf32> to vector<1x128xf32>
      %26 = arith.addf %23, %25 : vector<1x128xf32>
      %c0_15 = arith.constant 0 : index
      %c0_16 = arith.constant 0 : index
      %27 = vector.load %arg8[%c0_15, %c0_16] : memref<1x128xf32, #tpu.memory_space<vmem>>, vector<1x128xf32>
      tpu.vector_store %arg8[%c0_15, %c0_16], %26 {strides = array<i32>} : memref<1x128xf32, #tpu.memory_space<vmem>>, vector<1x128xf32>,
      %c0_17 = arith.constant 0 : index
      %c0_18 = arith.constant 0 : index
      %28 = vector.load %arg9[%c0_17, %c0_18] : memref<1x128xf32, #tpu.memory_space<vmem>>, vector<1x128xf32>
      %29 = arith.mulf %18, %18 : vector<128x128xf32>
      %cst_19 = arith.constant dense<0.000000e+00> : vector<128xf32>
      %30 = vector.multi_reduction <add>, %29, %cst_19 [0] : vector<128x128xf32> to vector<128xf32>
      %31 = vector.shape_cast %30 : vector<128xf32> to vector<1x128xf32>
      %32 = arith.addf %28, %31 : vector<1x128xf32>
      %c0_20 = arith.constant 0 : index
      %c0_21 = arith.constant 0 : index
      %33 = vector.load %arg9[%c0_20, %c0_21] : memref<1x128xf32, #tpu.memory_space<vmem>>, vector<1x128xf32>
      tpu.vector_store %arg9[%c0_20, %c0_21], %32 {strides = array<i32>} : memref<1x128xf32, #tpu.memory_space<vmem>>, vector<1x128xf32>,
    } else {
    }
    %c1_i32 = arith.constant 1 : i32
    %8 = arith.cmpi eq, %arg0, %c1_i32 : i32
    %c0_i32_4 = arith.constant 0 : i32
    %9 = arith.cmpi eq, %arg1, %c0_i32_4 : i32
    %10 = arith.andi %8, %9 : i1
    %11 = arith.extui %10 : i1 to i32
    %c0_i32_5 = arith.constant 0 : i32
    %12 = arith.cmpi ne, %11, %c0_i32_5 : i32
    scf.if %12 {
      %c0 = arith.constant 0 : index
      %c0_8 = arith.constant 0 : index
      %16 = vector.load %arg8[%c0, %c0_8] : memref<1x128xf32, #tpu.memory_space<vmem>>, vector<1x128xf32>
      %cst = arith.constant 7.812500e-03 : f32
      %17 = vector.broadcast %cst : f32 to vector<1x128xf32>
      %18 = arith.mulf %16, %17 : vector<1x128xf32>
      %c0_9 = arith.constant 0 : index
      %c0_10 = arith.constant 0 : index
      %19 = vector.load %arg9[%c0_9, %c0_10] : memref<1x128xf32, #tpu.memory_space<vmem>>, vector<1x128xf32>
      %cst_11 = arith.constant 7.812500e-03 : f32
      %20 = vector.broadcast %cst_11 : f32 to vector<1x128xf32>
      %21 = arith.mulf %19, %20 : vector<1x128xf32>
      %22 = arith.mulf %18, %18 : vector<1x128xf32>
      %23 = arith.subf %21, %22 : vector<1x128xf32>
      %cst_12 = arith.constant 0.000000e+00 : f32
      %24 = vector.broadcast %cst_12 : f32 to vector<1x128xf32>
      %25 = arith.maximumf %23, %24 : vector<1x128xf32>
      %c0_13 = arith.constant 0 : index
      %c0_14 = arith.constant 0 : index
      %26 = vector.load %arg4[%c0_13, %c0_14] : memref<1x128xf32, #tpu.memory_space<vmem>>, vector<1x128xf32>
      %cst_15 = arith.constant 9.99999974E-6 : f32
      %27 = vector.broadcast %cst_15 : f32 to vector<1x128xf32>
      %28 = arith.addf %25, %27 : vector<1x128xf32>
      %29 = math.rsqrt %28 : vector<1x128xf32>
      %30 = arith.mulf %26, %29 : vector<1x128xf32>
      %c0_16 = arith.constant 0 : index
      %c0_17 = arith.constant 0 : index
      %31 = vector.load %arg10[%c0_16, %c0_17] : memref<1x128xf32, #tpu.memory_space<vmem>>, vector<1x128xf32>
      tpu.vector_store %arg10[%c0_16, %c0_17], %30 {strides = array<i32>} : memref<1x128xf32, #tpu.memory_space<vmem>>, vector<1x128xf32>,
      %c0_18 = arith.constant 0 : index
      %c0_19 = arith.constant 0 : index
      %32 = vector.load %arg5[%c0_18, %c0_19] : memref<1x128xf32, #tpu.memory_space<vmem>>, vector<1x128xf32>
      %c0_20 = arith.constant 0 : index
      %c0_21 = arith.constant 0 : index
      %33 = vector.load %arg10[%c0_20, %c0_21] : memref<1x128xf32, #tpu.memory_space<vmem>>, vector<1x128xf32>
      %34 = arith.mulf %18, %33 : vector<1x128xf32>
      %35 = arith.subf %32, %34 : vector<1x128xf32>
      %c0_22 = arith.constant 0 : index
      %c0_23 = arith.constant 0 : index
      %36 = vector.load %arg11[%c0_22, %c0_23] : memref<1x128xf32, #tpu.memory_space<vmem>>, vector<1x128xf32>
      tpu.vector_store %arg11[%c0_22, %c0_23], %35 {strides = array<i32>} : memref<1x128xf32, #tpu.memory_space<vmem>>, vector<1x128xf32>,
    } else {
    }
    %c1_i32_6 = arith.constant 1 : i32
    %13 = arith.cmpi eq, %arg0, %c1_i32_6 : i32
    %14 = arith.extui %13 : i1 to i32
    %c0_i32_7 = arith.constant 0 : i32
    %15 = arith.cmpi ne, %14, %c0_i32_7 : i32
    scf.if %15 {
      %c128_i32 = arith.constant 128 : i32
      %16 = arith.muli %arg1, %c128_i32 : i32
      %17 = tpu.assume_multiple %16, 128 : i32
      %18 = arith.index_cast %17 : i32 to index
      %c0 = arith.constant 0 : index
      %19 = vector.load %arg7[%18, %c0] : memref<128x128xf32, #tpu.memory_space<vmem>>, vector<128x128xf32>
      %c0_8 = arith.constant 0 : index
      %c0_9 = arith.constant 0 : index
      %20 = vector.load %arg10[%c0_8, %c0_9] : memref<1x128xf32, #tpu.memory_space<vmem>>, vector<1x128xf32>
      %21 = vector.broadcast %20 : vector<1x128xf32> to vector<128x128xf32>
      %22 = arith.mulf %19, %21 : vector<128x128xf32>
      %c0_10 = arith.constant 0 : index
      %c0_11 = arith.constant 0 : index
      %23 = vector.load %arg11[%c0_10, %c0_11] : memref<1x128xf32, #tpu.memory_space<vmem>>, vector<1x128xf32>
      %24 = vector.broadcast %23 : vector<1x128xf32> to vector<128x128xf32>
      %25 = arith.addf %22, %24 : vector<128x128xf32>
      %cst = arith.constant 2.000000e-01 : f32
      %26 = vector.broadcast %cst : f32 to vector<128x128xf32>
      %27 = arith.mulf %26, %25 : vector<128x128xf32>
      %28 = arith.maximumf %25, %27 : vector<128x128xf32>
      %29 = arith.truncf %28 : vector<128x128xf32> to vector<128x128xbf16>
      %c0_12 = arith.constant 0 : index
      %c0_13 = arith.constant 0 : index
      %30 = vector.load %arg6[%c0_12, %c0_13] : memref<128x128xbf16, #tpu.memory_space<vmem>>, vector<128x128xbf16>
      tpu.vector_store %arg6[%c0_12, %c0_13], %29 {strides = array<i32>} : memref<128x128xbf16, #tpu.memory_space<vmem>>, vector<128x128xbf16>,
    } else {
    }
    return
  }
  func.func @transform_0(%arg0: i32, %arg1: i32) -> (i32, i32) {
    %c1_i32 = arith.constant 1 : i32
    %0 = arith.subi %c1_i32, %arg0 : i32
    %1 = arith.muli %arg1, %0 : i32
    %c0_i32 = arith.constant 0 : i32
    %2 = arith.muli %c0_i32, %arg0 : i32
    %3 = arith.addi %1, %2 : i32
    %c0_i32_0 = arith.constant 0 : i32
    %c0_i32_1 = arith.constant 0 : i32
    return %3, %c0_i32_0 : i32, i32
  }
  func.func @transform_1(%arg0: i32, %arg1: i32) -> (i32, i32) {
    %c0_i32 = arith.constant 0 : i32
    %c0_i32_0 = arith.constant 0 : i32
    %c0_i32_1 = arith.constant 0 : i32
    return %c0_i32, %c0_i32_0 : i32, i32
  }
  func.func @transform_2(%arg0: i32, %arg1: i32) -> (i32, i32) {
    %c0_i32 = arith.constant 0 : i32
    %c0_i32_0 = arith.constant 0 : i32
    %c0_i32_1 = arith.constant 0 : i32
    return %c0_i32, %c0_i32_0 : i32, i32
  }
  func.func @transform_3(%arg0: i32, %arg1: i32) -> (i32, i32) {
    %c0_i32 = arith.constant 0 : i32
    %c0_i32_0 = arith.constant 0 : i32
    %c0_i32_1 = arith.constant 0 : i32
    return %c0_i32, %c0_i32_0 : i32, i32
  }
  func.func @transform_4(%arg0: i32, %arg1: i32) -> (i32, i32) {
    %0 = arith.muli %arg1, %arg0 : i32
    %c0_i32 = arith.constant 0 : i32
    %c0_i32_0 = arith.constant 0 : i32
    return %0, %c0_i32 : i32, i32
  }
}

module attributes {stable_mosaic.version = 11 : i64} {
  func.func @_conv_bn_lrelu_kernel(%arg0: i32, %arg1: i32, %arg2: memref<32x2048xbf16, #tpu.memory_space<vmem>>, %arg3: memref<2048x256xbf16, #tpu.memory_space<vmem>>, %arg4: memref<1x256xf32, #tpu.memory_space<vmem>>, %arg5: memref<1x256xf32, #tpu.memory_space<vmem>>, %arg6: memref<32x256xbf16, #tpu.memory_space<vmem>>, %arg7: memref<32x256xf32, #tpu.memory_space<vmem>>, %arg8: memref<1x256xf32, #tpu.memory_space<vmem>>, %arg9: memref<1x256xf32, #tpu.memory_space<vmem>>, %arg10: memref<1x256xf32, #tpu.memory_space<vmem>>, %arg11: memref<1x256xf32, #tpu.memory_space<vmem>>) attributes {dimension_semantics = [#tpu.dimension_semantics<arbitrary>, #tpu.dimension_semantics<arbitrary>], iteration_bounds = array<i64: 2, 1>, scalar_prefetch = 0 : i64, scratch_operands = 5 : i64, tpu.core_type = #tpu.core_type<tc>, window_params = [{transform_indices = @transform_0, window_bounds = array<i64: 32, 2048>}, {pipeline_mode = #tpu.pipeline_mode<synchronous>, transform_indices = @transform_1, window_bounds = array<i64: 2048, 256>}, {pipeline_mode = #tpu.pipeline_mode<synchronous>, transform_indices = @transform_2, window_bounds = array<i64: 1, 256>}, {pipeline_mode = #tpu.pipeline_mode<synchronous>, transform_indices = @transform_3, window_bounds = array<i64: 1, 256>}, {transform_indices = @transform_4, window_bounds = array<i64: 32, 256>}]} {
    %c0_i32 = arith.constant 0 : i32
    %0 = arith.cmpi eq, %arg0, %c0_i32 : i32
    %c0_i32_0 = arith.constant 0 : i32
    %1 = arith.cmpi eq, %arg1, %c0_i32_0 : i32
    %2 = arith.andi %0, %1 : i1
    %3 = arith.extui %2 : i1 to i32
    %c0_i32_1 = arith.constant 0 : i32
    %4 = arith.cmpi ne, %3, %c0_i32_1 : i32
    scf.if %4 {
      %cst = arith.constant 0.000000e+00 : f32
      %16 = vector.broadcast %cst : f32 to vector<1x256xf32>
      %c0 = arith.constant 0 : index
      %c0_8 = arith.constant 0 : index
      %17 = vector.load %arg8[%c0, %c0_8] : memref<1x256xf32, #tpu.memory_space<vmem>>, vector<1x256xf32>
      tpu.vector_store %arg8[%c0, %c0_8], %16 {strides = array<i32>} : memref<1x256xf32, #tpu.memory_space<vmem>>, vector<1x256xf32>,
      %cst_9 = arith.constant 0.000000e+00 : f32
      %18 = vector.broadcast %cst_9 : f32 to vector<1x256xf32>
      %c0_10 = arith.constant 0 : index
      %c0_11 = arith.constant 0 : index
      %19 = vector.load %arg9[%c0_10, %c0_11] : memref<1x256xf32, #tpu.memory_space<vmem>>, vector<1x256xf32>
      tpu.vector_store %arg9[%c0_10, %c0_11], %18 {strides = array<i32>} : memref<1x256xf32, #tpu.memory_space<vmem>>, vector<1x256xf32>,
    } else {
    }
    %c0_i32_2 = arith.constant 0 : i32
    %5 = arith.cmpi eq, %arg0, %c0_i32_2 : i32
    %6 = arith.extui %5 : i1 to i32
    %c0_i32_3 = arith.constant 0 : i32
    %7 = arith.cmpi ne, %6, %c0_i32_3 : i32
    scf.if %7 {
      %c0 = arith.constant 0 : index
      %c0_8 = arith.constant 0 : index
      %16 = vector.load %arg2[%c0, %c0_8] : memref<32x2048xbf16, #tpu.memory_space<vmem>>, vector<32x2048xbf16>
      %c0_9 = arith.constant 0 : index
      %c0_10 = arith.constant 0 : index
      %17 = vector.load %arg3[%c0_9, %c0_10] : memref<2048x256xbf16, #tpu.memory_space<vmem>>, vector<2048x256xbf16>
      %cst = arith.constant dense<0.000000e+00> : vector<32x256xf32>
      %18 = tpu.matmul %16, %17, %cst {dimension_numbers = #tpu.dot_dimension_numbers<[1], [0], [0], [1], [0, 0, 1, 1], [], []>} : vector<32x2048xbf16>, vector<2048x256xbf16>, vector<32x256xf32> -> vector<32x256xf32>
      %c32_i32 = arith.constant 32 : i32
      %19 = arith.muli %arg1, %c32_i32 : i32
      %20 = tpu.assume_multiple %19, 32 : i32
      %21 = arith.index_cast %20 : i32 to index
      %c0_11 = arith.constant 0 : index
      %22 = vector.load %arg7[%21, %c0_11] : memref<32x256xf32, #tpu.memory_space<vmem>>, vector<32x256xf32>
      tpu.vector_store %arg7[%21, %c0_11], %18 {strides = array<i32>} : memref<32x256xf32, #tpu.memory_space<vmem>>, vector<32x256xf32>,
      %c0_12 = arith.constant 0 : index
      %c0_13 = arith.constant 0 : index
      %23 = vector.load %arg8[%c0_12, %c0_13] : memref<1x256xf32, #tpu.memory_space<vmem>>, vector<1x256xf32>
      %cst_14 = arith.constant dense<0.000000e+00> : vector<256xf32>
      %24 = vector.multi_reduction <add>, %18, %cst_14 [0] : vector<32x256xf32> to vector<256xf32>
      %25 = vector.shape_cast %24 : vector<256xf32> to vector<1x256xf32>
      %26 = arith.addf %23, %25 : vector<1x256xf32>
      %c0_15 = arith.constant 0 : index
      %c0_16 = arith.constant 0 : index
      %27 = vector.load %arg8[%c0_15, %c0_16] : memref<1x256xf32, #tpu.memory_space<vmem>>, vector<1x256xf32>
      tpu.vector_store %arg8[%c0_15, %c0_16], %26 {strides = array<i32>} : memref<1x256xf32, #tpu.memory_space<vmem>>, vector<1x256xf32>,
      %c0_17 = arith.constant 0 : index
      %c0_18 = arith.constant 0 : index
      %28 = vector.load %arg9[%c0_17, %c0_18] : memref<1x256xf32, #tpu.memory_space<vmem>>, vector<1x256xf32>
      %29 = arith.mulf %18, %18 : vector<32x256xf32>
      %cst_19 = arith.constant dense<0.000000e+00> : vector<256xf32>
      %30 = vector.multi_reduction <add>, %29, %cst_19 [0] : vector<32x256xf32> to vector<256xf32>
      %31 = vector.shape_cast %30 : vector<256xf32> to vector<1x256xf32>
      %32 = arith.addf %28, %31 : vector<1x256xf32>
      %c0_20 = arith.constant 0 : index
      %c0_21 = arith.constant 0 : index
      %33 = vector.load %arg9[%c0_20, %c0_21] : memref<1x256xf32, #tpu.memory_space<vmem>>, vector<1x256xf32>
      tpu.vector_store %arg9[%c0_20, %c0_21], %32 {strides = array<i32>} : memref<1x256xf32, #tpu.memory_space<vmem>>, vector<1x256xf32>,
    } else {
    }
    %c1_i32 = arith.constant 1 : i32
    %8 = arith.cmpi eq, %arg0, %c1_i32 : i32
    %c0_i32_4 = arith.constant 0 : i32
    %9 = arith.cmpi eq, %arg1, %c0_i32_4 : i32
    %10 = arith.andi %8, %9 : i1
    %11 = arith.extui %10 : i1 to i32
    %c0_i32_5 = arith.constant 0 : i32
    %12 = arith.cmpi ne, %11, %c0_i32_5 : i32
    scf.if %12 {
      %c0 = arith.constant 0 : index
      %c0_8 = arith.constant 0 : index
      %16 = vector.load %arg8[%c0, %c0_8] : memref<1x256xf32, #tpu.memory_space<vmem>>, vector<1x256xf32>
      %cst = arith.constant 3.125000e-02 : f32
      %17 = vector.broadcast %cst : f32 to vector<1x256xf32>
      %18 = arith.mulf %16, %17 : vector<1x256xf32>
      %c0_9 = arith.constant 0 : index
      %c0_10 = arith.constant 0 : index
      %19 = vector.load %arg9[%c0_9, %c0_10] : memref<1x256xf32, #tpu.memory_space<vmem>>, vector<1x256xf32>
      %cst_11 = arith.constant 3.125000e-02 : f32
      %20 = vector.broadcast %cst_11 : f32 to vector<1x256xf32>
      %21 = arith.mulf %19, %20 : vector<1x256xf32>
      %22 = arith.mulf %18, %18 : vector<1x256xf32>
      %23 = arith.subf %21, %22 : vector<1x256xf32>
      %cst_12 = arith.constant 0.000000e+00 : f32
      %24 = vector.broadcast %cst_12 : f32 to vector<1x256xf32>
      %25 = arith.maximumf %23, %24 : vector<1x256xf32>
      %c0_13 = arith.constant 0 : index
      %c0_14 = arith.constant 0 : index
      %26 = vector.load %arg4[%c0_13, %c0_14] : memref<1x256xf32, #tpu.memory_space<vmem>>, vector<1x256xf32>
      %cst_15 = arith.constant 9.99999974E-6 : f32
      %27 = vector.broadcast %cst_15 : f32 to vector<1x256xf32>
      %28 = arith.addf %25, %27 : vector<1x256xf32>
      %29 = math.rsqrt %28 : vector<1x256xf32>
      %30 = arith.mulf %26, %29 : vector<1x256xf32>
      %c0_16 = arith.constant 0 : index
      %c0_17 = arith.constant 0 : index
      %31 = vector.load %arg10[%c0_16, %c0_17] : memref<1x256xf32, #tpu.memory_space<vmem>>, vector<1x256xf32>
      tpu.vector_store %arg10[%c0_16, %c0_17], %30 {strides = array<i32>} : memref<1x256xf32, #tpu.memory_space<vmem>>, vector<1x256xf32>,
      %c0_18 = arith.constant 0 : index
      %c0_19 = arith.constant 0 : index
      %32 = vector.load %arg5[%c0_18, %c0_19] : memref<1x256xf32, #tpu.memory_space<vmem>>, vector<1x256xf32>
      %c0_20 = arith.constant 0 : index
      %c0_21 = arith.constant 0 : index
      %33 = vector.load %arg10[%c0_20, %c0_21] : memref<1x256xf32, #tpu.memory_space<vmem>>, vector<1x256xf32>
      %34 = arith.mulf %18, %33 : vector<1x256xf32>
      %35 = arith.subf %32, %34 : vector<1x256xf32>
      %c0_22 = arith.constant 0 : index
      %c0_23 = arith.constant 0 : index
      %36 = vector.load %arg11[%c0_22, %c0_23] : memref<1x256xf32, #tpu.memory_space<vmem>>, vector<1x256xf32>
      tpu.vector_store %arg11[%c0_22, %c0_23], %35 {strides = array<i32>} : memref<1x256xf32, #tpu.memory_space<vmem>>, vector<1x256xf32>,
    } else {
    }
    %c1_i32_6 = arith.constant 1 : i32
    %13 = arith.cmpi eq, %arg0, %c1_i32_6 : i32
    %14 = arith.extui %13 : i1 to i32
    %c0_i32_7 = arith.constant 0 : i32
    %15 = arith.cmpi ne, %14, %c0_i32_7 : i32
    scf.if %15 {
      %c32_i32 = arith.constant 32 : i32
      %16 = arith.muli %arg1, %c32_i32 : i32
      %17 = tpu.assume_multiple %16, 32 : i32
      %18 = arith.index_cast %17 : i32 to index
      %c0 = arith.constant 0 : index
      %19 = vector.load %arg7[%18, %c0] : memref<32x256xf32, #tpu.memory_space<vmem>>, vector<32x256xf32>
      %c0_8 = arith.constant 0 : index
      %c0_9 = arith.constant 0 : index
      %20 = vector.load %arg10[%c0_8, %c0_9] : memref<1x256xf32, #tpu.memory_space<vmem>>, vector<1x256xf32>
      %21 = vector.broadcast %20 : vector<1x256xf32> to vector<32x256xf32>
      %22 = arith.mulf %19, %21 : vector<32x256xf32>
      %c0_10 = arith.constant 0 : index
      %c0_11 = arith.constant 0 : index
      %23 = vector.load %arg11[%c0_10, %c0_11] : memref<1x256xf32, #tpu.memory_space<vmem>>, vector<1x256xf32>
      %24 = vector.broadcast %23 : vector<1x256xf32> to vector<32x256xf32>
      %25 = arith.addf %22, %24 : vector<32x256xf32>
      %cst = arith.constant 2.000000e-01 : f32
      %26 = vector.broadcast %cst : f32 to vector<32x256xf32>
      %27 = arith.mulf %26, %25 : vector<32x256xf32>
      %28 = arith.maximumf %25, %27 : vector<32x256xf32>
      %29 = arith.truncf %28 : vector<32x256xf32> to vector<32x256xbf16>
      %c0_12 = arith.constant 0 : index
      %c0_13 = arith.constant 0 : index
      %30 = vector.load %arg6[%c0_12, %c0_13] : memref<32x256xbf16, #tpu.memory_space<vmem>>, vector<32x256xbf16>
      tpu.vector_store %arg6[%c0_12, %c0_13], %29 {strides = array<i32>} : memref<32x256xbf16, #tpu.memory_space<vmem>>, vector<32x256xbf16>,
    } else {
    }
    return
  }
  func.func @transform_0(%arg0: i32, %arg1: i32) -> (i32, i32) {
    %c1_i32 = arith.constant 1 : i32
    %0 = arith.subi %c1_i32, %arg0 : i32
    %1 = arith.muli %arg1, %0 : i32
    %c0_i32 = arith.constant 0 : i32
    %2 = arith.muli %c0_i32, %arg0 : i32
    %3 = arith.addi %1, %2 : i32
    %c0_i32_0 = arith.constant 0 : i32
    %c0_i32_1 = arith.constant 0 : i32
    return %3, %c0_i32_0 : i32, i32
  }
  func.func @transform_1(%arg0: i32, %arg1: i32) -> (i32, i32) {
    %c0_i32 = arith.constant 0 : i32
    %c0_i32_0 = arith.constant 0 : i32
    %c0_i32_1 = arith.constant 0 : i32
    return %c0_i32, %c0_i32_0 : i32, i32
  }
  func.func @transform_2(%arg0: i32, %arg1: i32) -> (i32, i32) {
    %c0_i32 = arith.constant 0 : i32
    %c0_i32_0 = arith.constant 0 : i32
    %c0_i32_1 = arith.constant 0 : i32
    return %c0_i32, %c0_i32_0 : i32, i32
  }
  func.func @transform_3(%arg0: i32, %arg1: i32) -> (i32, i32) {
    %c0_i32 = arith.constant 0 : i32
    %c0_i32_0 = arith.constant 0 : i32
    %c0_i32_1 = arith.constant 0 : i32
    return %c0_i32, %c0_i32_0 : i32, i32
  }
  func.func @transform_4(%arg0: i32, %arg1: i32) -> (i32, i32) {
    %0 = arith.muli %arg1, %arg0 : i32
    %c0_i32 = arith.constant 0 : i32
    %c0_i32_0 = arith.constant 0 : i32
    return %0, %c0_i32 : i32, i32
  }
}

module attributes {stable_mosaic.version = 11 : i64} {
  func.func @_conv_bn_lrelu_kernel(%arg0: i32, %arg1: i32, %arg2: memref<8x4096xbf16, #tpu.memory_space<vmem>>, %arg3: memref<4096x512xbf16, #tpu.memory_space<vmem>>, %arg4: memref<1x512xf32, #tpu.memory_space<vmem>>, %arg5: memref<1x512xf32, #tpu.memory_space<vmem>>, %arg6: memref<8x512xbf16, #tpu.memory_space<vmem>>, %arg7: memref<8x512xf32, #tpu.memory_space<vmem>>, %arg8: memref<1x512xf32, #tpu.memory_space<vmem>>, %arg9: memref<1x512xf32, #tpu.memory_space<vmem>>, %arg10: memref<1x512xf32, #tpu.memory_space<vmem>>, %arg11: memref<1x512xf32, #tpu.memory_space<vmem>>) attributes {dimension_semantics = [#tpu.dimension_semantics<arbitrary>, #tpu.dimension_semantics<arbitrary>], iteration_bounds = array<i64: 2, 1>, scalar_prefetch = 0 : i64, scratch_operands = 5 : i64, tpu.core_type = #tpu.core_type<tc>, window_params = [{transform_indices = @transform_0, window_bounds = array<i64: 8, 4096>}, {pipeline_mode = #tpu.pipeline_mode<synchronous>, transform_indices = @transform_1, window_bounds = array<i64: 4096, 512>}, {pipeline_mode = #tpu.pipeline_mode<synchronous>, transform_indices = @transform_2, window_bounds = array<i64: 1, 512>}, {pipeline_mode = #tpu.pipeline_mode<synchronous>, transform_indices = @transform_3, window_bounds = array<i64: 1, 512>}, {transform_indices = @transform_4, window_bounds = array<i64: 8, 512>}]} {
    %c0_i32 = arith.constant 0 : i32
    %0 = arith.cmpi eq, %arg0, %c0_i32 : i32
    %c0_i32_0 = arith.constant 0 : i32
    %1 = arith.cmpi eq, %arg1, %c0_i32_0 : i32
    %2 = arith.andi %0, %1 : i1
    %3 = arith.extui %2 : i1 to i32
    %c0_i32_1 = arith.constant 0 : i32
    %4 = arith.cmpi ne, %3, %c0_i32_1 : i32
    scf.if %4 {
      %cst = arith.constant 0.000000e+00 : f32
      %16 = vector.broadcast %cst : f32 to vector<1x512xf32>
      %c0 = arith.constant 0 : index
      %c0_8 = arith.constant 0 : index
      %17 = vector.load %arg8[%c0, %c0_8] : memref<1x512xf32, #tpu.memory_space<vmem>>, vector<1x512xf32>
      tpu.vector_store %arg8[%c0, %c0_8], %16 {strides = array<i32>} : memref<1x512xf32, #tpu.memory_space<vmem>>, vector<1x512xf32>,
      %cst_9 = arith.constant 0.000000e+00 : f32
      %18 = vector.broadcast %cst_9 : f32 to vector<1x512xf32>
      %c0_10 = arith.constant 0 : index
      %c0_11 = arith.constant 0 : index
      %19 = vector.load %arg9[%c0_10, %c0_11] : memref<1x512xf32, #tpu.memory_space<vmem>>, vector<1x512xf32>
      tpu.vector_store %arg9[%c0_10, %c0_11], %18 {strides = array<i32>} : memref<1x512xf32, #tpu.memory_space<vmem>>, vector<1x512xf32>,
    } else {
    }
    %c0_i32_2 = arith.constant 0 : i32
    %5 = arith.cmpi eq, %arg0, %c0_i32_2 : i32
    %6 = arith.extui %5 : i1 to i32
    %c0_i32_3 = arith.constant 0 : i32
    %7 = arith.cmpi ne, %6, %c0_i32_3 : i32
    scf.if %7 {
      %c0 = arith.constant 0 : index
      %c0_8 = arith.constant 0 : index
      %16 = vector.load %arg2[%c0, %c0_8] : memref<8x4096xbf16, #tpu.memory_space<vmem>>, vector<8x4096xbf16>
      %c0_9 = arith.constant 0 : index
      %c0_10 = arith.constant 0 : index
      %17 = vector.load %arg3[%c0_9, %c0_10] : memref<4096x512xbf16, #tpu.memory_space<vmem>>, vector<4096x512xbf16>
      %cst = arith.constant dense<0.000000e+00> : vector<8x512xf32>
      %18 = tpu.matmul %16, %17, %cst {dimension_numbers = #tpu.dot_dimension_numbers<[1], [0], [0], [1], [0, 0, 1, 1], [], []>} : vector<8x4096xbf16>, vector<4096x512xbf16>, vector<8x512xf32> -> vector<8x512xf32>
      %c8_i32 = arith.constant 8 : i32
      %19 = arith.muli %arg1, %c8_i32 : i32
      %20 = tpu.assume_multiple %19, 8 : i32
      %21 = arith.index_cast %20 : i32 to index
      %c0_11 = arith.constant 0 : index
      %22 = vector.load %arg7[%21, %c0_11] : memref<8x512xf32, #tpu.memory_space<vmem>>, vector<8x512xf32>
      tpu.vector_store %arg7[%21, %c0_11], %18 {strides = array<i32>} : memref<8x512xf32, #tpu.memory_space<vmem>>, vector<8x512xf32>,
      %c0_12 = arith.constant 0 : index
      %c0_13 = arith.constant 0 : index
      %23 = vector.load %arg8[%c0_12, %c0_13] : memref<1x512xf32, #tpu.memory_space<vmem>>, vector<1x512xf32>
      %cst_14 = arith.constant dense<0.000000e+00> : vector<512xf32>
      %24 = vector.multi_reduction <add>, %18, %cst_14 [0] : vector<8x512xf32> to vector<512xf32>
      %25 = vector.shape_cast %24 : vector<512xf32> to vector<1x512xf32>
      %26 = arith.addf %23, %25 : vector<1x512xf32>
      %c0_15 = arith.constant 0 : index
      %c0_16 = arith.constant 0 : index
      %27 = vector.load %arg8[%c0_15, %c0_16] : memref<1x512xf32, #tpu.memory_space<vmem>>, vector<1x512xf32>
      tpu.vector_store %arg8[%c0_15, %c0_16], %26 {strides = array<i32>} : memref<1x512xf32, #tpu.memory_space<vmem>>, vector<1x512xf32>,
      %c0_17 = arith.constant 0 : index
      %c0_18 = arith.constant 0 : index
      %28 = vector.load %arg9[%c0_17, %c0_18] : memref<1x512xf32, #tpu.memory_space<vmem>>, vector<1x512xf32>
      %29 = arith.mulf %18, %18 : vector<8x512xf32>
      %cst_19 = arith.constant dense<0.000000e+00> : vector<512xf32>
      %30 = vector.multi_reduction <add>, %29, %cst_19 [0] : vector<8x512xf32> to vector<512xf32>
      %31 = vector.shape_cast %30 : vector<512xf32> to vector<1x512xf32>
      %32 = arith.addf %28, %31 : vector<1x512xf32>
      %c0_20 = arith.constant 0 : index
      %c0_21 = arith.constant 0 : index
      %33 = vector.load %arg9[%c0_20, %c0_21] : memref<1x512xf32, #tpu.memory_space<vmem>>, vector<1x512xf32>
      tpu.vector_store %arg9[%c0_20, %c0_21], %32 {strides = array<i32>} : memref<1x512xf32, #tpu.memory_space<vmem>>, vector<1x512xf32>,
    } else {
    }
    %c1_i32 = arith.constant 1 : i32
    %8 = arith.cmpi eq, %arg0, %c1_i32 : i32
    %c0_i32_4 = arith.constant 0 : i32
    %9 = arith.cmpi eq, %arg1, %c0_i32_4 : i32
    %10 = arith.andi %8, %9 : i1
    %11 = arith.extui %10 : i1 to i32
    %c0_i32_5 = arith.constant 0 : i32
    %12 = arith.cmpi ne, %11, %c0_i32_5 : i32
    scf.if %12 {
      %c0 = arith.constant 0 : index
      %c0_8 = arith.constant 0 : index
      %16 = vector.load %arg8[%c0, %c0_8] : memref<1x512xf32, #tpu.memory_space<vmem>>, vector<1x512xf32>
      %cst = arith.constant 1.250000e-01 : f32
      %17 = vector.broadcast %cst : f32 to vector<1x512xf32>
      %18 = arith.mulf %16, %17 : vector<1x512xf32>
      %c0_9 = arith.constant 0 : index
      %c0_10 = arith.constant 0 : index
      %19 = vector.load %arg9[%c0_9, %c0_10] : memref<1x512xf32, #tpu.memory_space<vmem>>, vector<1x512xf32>
      %cst_11 = arith.constant 1.250000e-01 : f32
      %20 = vector.broadcast %cst_11 : f32 to vector<1x512xf32>
      %21 = arith.mulf %19, %20 : vector<1x512xf32>
      %22 = arith.mulf %18, %18 : vector<1x512xf32>
      %23 = arith.subf %21, %22 : vector<1x512xf32>
      %cst_12 = arith.constant 0.000000e+00 : f32
      %24 = vector.broadcast %cst_12 : f32 to vector<1x512xf32>
      %25 = arith.maximumf %23, %24 : vector<1x512xf32>
      %c0_13 = arith.constant 0 : index
      %c0_14 = arith.constant 0 : index
      %26 = vector.load %arg4[%c0_13, %c0_14] : memref<1x512xf32, #tpu.memory_space<vmem>>, vector<1x512xf32>
      %cst_15 = arith.constant 9.99999974E-6 : f32
      %27 = vector.broadcast %cst_15 : f32 to vector<1x512xf32>
      %28 = arith.addf %25, %27 : vector<1x512xf32>
      %29 = math.rsqrt %28 : vector<1x512xf32>
      %30 = arith.mulf %26, %29 : vector<1x512xf32>
      %c0_16 = arith.constant 0 : index
      %c0_17 = arith.constant 0 : index
      %31 = vector.load %arg10[%c0_16, %c0_17] : memref<1x512xf32, #tpu.memory_space<vmem>>, vector<1x512xf32>
      tpu.vector_store %arg10[%c0_16, %c0_17], %30 {strides = array<i32>} : memref<1x512xf32, #tpu.memory_space<vmem>>, vector<1x512xf32>,
      %c0_18 = arith.constant 0 : index
      %c0_19 = arith.constant 0 : index
      %32 = vector.load %arg5[%c0_18, %c0_19] : memref<1x512xf32, #tpu.memory_space<vmem>>, vector<1x512xf32>
      %c0_20 = arith.constant 0 : index
      %c0_21 = arith.constant 0 : index
      %33 = vector.load %arg10[%c0_20, %c0_21] : memref<1x512xf32, #tpu.memory_space<vmem>>, vector<1x512xf32>
      %34 = arith.mulf %18, %33 : vector<1x512xf32>
      %35 = arith.subf %32, %34 : vector<1x512xf32>
      %c0_22 = arith.constant 0 : index
      %c0_23 = arith.constant 0 : index
      %36 = vector.load %arg11[%c0_22, %c0_23] : memref<1x512xf32, #tpu.memory_space<vmem>>, vector<1x512xf32>
      tpu.vector_store %arg11[%c0_22, %c0_23], %35 {strides = array<i32>} : memref<1x512xf32, #tpu.memory_space<vmem>>, vector<1x512xf32>,
    } else {
    }
    %c1_i32_6 = arith.constant 1 : i32
    %13 = arith.cmpi eq, %arg0, %c1_i32_6 : i32
    %14 = arith.extui %13 : i1 to i32
    %c0_i32_7 = arith.constant 0 : i32
    %15 = arith.cmpi ne, %14, %c0_i32_7 : i32
    scf.if %15 {
      %c8_i32 = arith.constant 8 : i32
      %16 = arith.muli %arg1, %c8_i32 : i32
      %17 = tpu.assume_multiple %16, 8 : i32
      %18 = arith.index_cast %17 : i32 to index
      %c0 = arith.constant 0 : index
      %19 = vector.load %arg7[%18, %c0] : memref<8x512xf32, #tpu.memory_space<vmem>>, vector<8x512xf32>
      %c0_8 = arith.constant 0 : index
      %c0_9 = arith.constant 0 : index
      %20 = vector.load %arg10[%c0_8, %c0_9] : memref<1x512xf32, #tpu.memory_space<vmem>>, vector<1x512xf32>
      %21 = vector.broadcast %20 : vector<1x512xf32> to vector<8x512xf32>
      %22 = arith.mulf %19, %21 : vector<8x512xf32>
      %c0_10 = arith.constant 0 : index
      %c0_11 = arith.constant 0 : index
      %23 = vector.load %arg11[%c0_10, %c0_11] : memref<1x512xf32, #tpu.memory_space<vmem>>, vector<1x512xf32>
      %24 = vector.broadcast %23 : vector<1x512xf32> to vector<8x512xf32>
      %25 = arith.addf %22, %24 : vector<8x512xf32>
      %cst = arith.constant 2.000000e-01 : f32
      %26 = vector.broadcast %cst : f32 to vector<8x512xf32>
      %27 = arith.mulf %26, %25 : vector<8x512xf32>
      %28 = arith.maximumf %25, %27 : vector<8x512xf32>
      %29 = arith.truncf %28 : vector<8x512xf32> to vector<8x512xbf16>
      %c0_12 = arith.constant 0 : index
      %c0_13 = arith.constant 0 : index
      %30 = vector.load %arg6[%c0_12, %c0_13] : memref<8x512xbf16, #tpu.memory_space<vmem>>, vector<8x512xbf16>
      tpu.vector_store %arg6[%c0_12, %c0_13], %29 {strides = array<i32>} : memref<8x512xbf16, #tpu.memory_space<vmem>>, vector<8x512xbf16>,
    } else {
    }
    return
  }
  func.func @transform_0(%arg0: i32, %arg1: i32) -> (i32, i32) {
    %c1_i32 = arith.constant 1 : i32
    %0 = arith.subi %c1_i32, %arg0 : i32
    %1 = arith.muli %arg1, %0 : i32
    %c0_i32 = arith.constant 0 : i32
    %2 = arith.muli %c0_i32, %arg0 : i32
    %3 = arith.addi %1, %2 : i32
    %c0_i32_0 = arith.constant 0 : i32
    %c0_i32_1 = arith.constant 0 : i32
    return %3, %c0_i32_0 : i32, i32
  }
  func.func @transform_1(%arg0: i32, %arg1: i32) -> (i32, i32) {
    %c0_i32 = arith.constant 0 : i32
    %c0_i32_0 = arith.constant 0 : i32
    %c0_i32_1 = arith.constant 0 : i32
    return %c0_i32, %c0_i32_0 : i32, i32
  }
  func.func @transform_2(%arg0: i32, %arg1: i32) -> (i32, i32) {
    %c0_i32 = arith.constant 0 : i32
    %c0_i32_0 = arith.constant 0 : i32
    %c0_i32_1 = arith.constant 0 : i32
    return %c0_i32, %c0_i32_0 : i32, i32
  }
  func.func @transform_3(%arg0: i32, %arg1: i32) -> (i32, i32) {
    %c0_i32 = arith.constant 0 : i32
    %c0_i32_0 = arith.constant 0 : i32
    %c0_i32_1 = arith.constant 0 : i32
    return %c0_i32, %c0_i32_0 : i32, i32
  }
  func.func @transform_4(%arg0: i32, %arg1: i32) -> (i32, i32) {
    %0 = arith.muli %arg1, %arg0 : i32
    %c0_i32 = arith.constant 0 : i32
    %c0_i32_0 = arith.constant 0 : i32
    return %0, %c0_i32 : i32, i32
  }
}

module attributes {stable_mosaic.version = 11 : i64} {
  func.func @_conv_bias_act_kernel(%arg0: i32, %arg1: memref<8x4608xbf16, #tpu.memory_space<vmem>>, %arg2: memref<4608x128xbf16, #tpu.memory_space<vmem>>, %arg3: memref<1x128xf32, #tpu.memory_space<vmem>>, %arg4: memref<8x128xbf16, #tpu.memory_space<vmem>>) attributes {dimension_semantics = [#tpu.dimension_semantics<parallel>], iteration_bounds = array<i64: 1>, scalar_prefetch = 0 : i64, scratch_operands = 0 : i64, tpu.core_type = #tpu.core_type<tc>, window_params = [{transform_indices = @transform_0, window_bounds = array<i64: 8, 4608>}, {pipeline_mode = #tpu.pipeline_mode<synchronous>, transform_indices = @transform_1, window_bounds = array<i64: 4608, 128>}, {pipeline_mode = #tpu.pipeline_mode<synchronous>, transform_indices = @transform_2, window_bounds = array<i64: 1, 128>}, {transform_indices = @transform_3, window_bounds = array<i64: 8, 128>}]} {
    %c0 = arith.constant 0 : index
    %c0_0 = arith.constant 0 : index
    %0 = vector.load %arg1[%c0, %c0_0] : memref<8x4608xbf16, #tpu.memory_space<vmem>>, vector<8x4608xbf16>
    %c0_1 = arith.constant 0 : index
    %c0_2 = arith.constant 0 : index
    %1 = vector.load %arg2[%c0_1, %c0_2] : memref<4608x128xbf16, #tpu.memory_space<vmem>>, vector<4608x128xbf16>
    %cst = arith.constant dense<0.000000e+00> : vector<8x128xf32>
    %2 = tpu.matmul %0, %1, %cst {dimension_numbers = #tpu.dot_dimension_numbers<[1], [0], [0], [1], [0, 0, 1, 1], [], []>} : vector<8x4608xbf16>, vector<4608x128xbf16>, vector<8x128xf32> -> vector<8x128xf32>
    %c0_3 = arith.constant 0 : index
    %c0_4 = arith.constant 0 : index
    %3 = vector.load %arg3[%c0_3, %c0_4] : memref<1x128xf32, #tpu.memory_space<vmem>>, vector<1x128xf32>
    %4 = vector.broadcast %3 : vector<1x128xf32> to vector<8x128xf32>
    %5 = arith.addf %2, %4 : vector<8x128xf32>
    %6 = arith.truncf %5 : vector<8x128xf32> to vector<8x128xbf16>
    %c0_5 = arith.constant 0 : index
    %c0_6 = arith.constant 0 : index
    %7 = vector.load %arg4[%c0_5, %c0_6] : memref<8x128xbf16, #tpu.memory_space<vmem>>, vector<8x128xbf16>
    tpu.vector_store %arg4[%c0_5, %c0_6], %6 {strides = array<i32>} : memref<8x128xbf16, #tpu.memory_space<vmem>>, vector<8x128xbf16>,
    return
  }
  func.func @transform_0(%arg0: i32) -> (i32, i32) {
    %c0_i32 = arith.constant 0 : i32
    %c0_i32_0 = arith.constant 0 : i32
    return %arg0, %c0_i32 : i32, i32
  }
  func.func @transform_1(%arg0: i32) -> (i32, i32) {
    %c0_i32 = arith.constant 0 : i32
    %c0_i32_0 = arith.constant 0 : i32
    %c0_i32_1 = arith.constant 0 : i32
    return %c0_i32, %c0_i32_0 : i32, i32
  }
  func.func @transform_2(%arg0: i32) -> (i32, i32) {
    %c0_i32 = arith.constant 0 : i32
    %c0_i32_0 = arith.constant 0 : i32
    %c0_i32_1 = arith.constant 0 : i32
    return %c0_i32, %c0_i32_0 : i32, i32
  }
  func.func @transform_3(%arg0: i32) -> (i32, i32) {
    %c0_i32 = arith.constant 0 : i32
    %c0_i32_0 = arith.constant 0 : i32
    return %arg0, %c0_i32 : i32, i32
  }
}

</mosaic_0001>

<bundles_post_ra>
// kernel: discriminator_forward.5
= control target key start
LH: loop header
LB: loop body
LE: loop exit
PB: predicated region body
PF: predicated region fallthrough
CT: control target
= control target key end

     0   :  { %vm254_vm0 = vcmask 130048   ;;  %s1927_s1 = inlined_call_operand.vmem [shape: bf16[16,128], index: 1, kind: input, shape index: {}]   ;;  %s1928_s0 = inlined_call_operand.vmem [shape: bf16[512,16], index: 0, kind: input, shape index: {}]   ;;  %s1929_s2 = inlined_call_operand.vmem [shape: f32[1,128], index: 2, kind: input, shape index: {}]   ;;  %s1930_s3 = inlined_call_operand.vmem [shape: bf16[512,128], index: 3, kind: output, shape index: {}]  }
   0x1   :  { %v1578_v0 = vld [vmem:[%s1927_s1] sm:$0xff]   ;;  %v1581_v3 = vld [vmem:[%s1928_s0 + $0x8] sm:$0xff]   ;;  %v1583_v5 = vld [vmem:[%s1928_s0 + $0x10] sm:$0xff]  }
   0x2   :  { %v1579_v1 = vld [vmem:[%s1928_s0] sm:$0xff]   ;;  %1510 = vmatprep.subr.bf16.mxu0 %v1578_v0  ;;  %1576 = vmatprep.subr.bf16.mxu1 %v1578_v0  ;;  %v1582_v4 = vld [vmem:[%s1928_s0 + $0x88] sm:$0xff]   ;;  %v1584_v6 = vld [vmem:[%s1928_s0 + $0x90] sm:$0xff]  }
   0x3   :  { %v1580_v2 = vld [vmem:[%s1928_s0 + $0x80] sm:$0xff]   ;;  %1511 = vmatpush3.bf16.msra.mxu0 %v1578_v0  ;;  %1577 = vmatpush3.bf16.msra.mxu1 %v1578_v0  ;;  %v1585_v7 = vld [vmem:[%s1928_s0 + $0x18] sm:$0xff]   ;;  %v1589_v11 = vld [vmem:[%s1928_s0 + $0x28] sm:$0xff]  }
   0x4   :  { %1512 = vmatprep.mubr.msk.bf16.mxu0 %vm254_vm0, %v1579_v1  ;;  %1544 = vmatprep.mubr.msk.bf16.mxu1 %vm254_vm0, %v1580_v2  ;;  %v1586_v8 = vld [vmem:[%s1928_s0 + $0x98] sm:$0xff]   ;;  %v1587_v9 = vld [vmem:[%s1928_s0 + $0x20] sm:$0xff]   ;;  %v1590_v12 = vld [vmem:[%s1928_s0 + $0xa8] sm:$0xff]  }
   0x5   :  { %v1588_v10 = vld [vmem:[%s1928_s0 + $0xa0] sm:$0xff]   ;;  %v1591_v13 = vld [vmem:[%s1928_s0 + $0x30] sm:$0xff]   ;;  %v1593_v15 = vld [vmem:[%s1928_s0 + $0x38] sm:$0xff]  }
   0x6   :  { %1513 = vmatmul.mubr.msk.bf16.vlgmr.msra.gmra.mrb[0].mxu0 %vm254_vm0, %v1581_v3  ;;  %1545 = vmatmul.mubr.msk.bf16.vlgmr.msra.gmra.mrb[0].mxu1 %vm254_vm0, %v1582_v4  ;;  %v1592_v14 = vld [vmem:[%s1928_s0 + $0xb0] sm:$0xff]   ;;  %v1594_v16 = vld [vmem:[%s1928_s0 + $0xb8] sm:$0xff]   ;;  %v1595_v17 = vld [vmem:[%s1928_s0 + $0x40] sm:$0xff]  }
   0x7   :  { %1516 = vmatprep.mubr.msk.bf16.mxu0 %vm254_vm0, %v1583_v5  ;;  %1548 = vmatprep.mubr.msk.bf16.mxu1 %vm254_vm0, %v1584_v6  ;;  %v1596_v18 = vld [vmem:[%s1928_s0 + $0xc0] sm:$0xff]   ;;  %v1597_v19 = vld [vmem:[%s1928_s0 + $0x48] sm:$0xff]   ;;  %v1599_v21 = vld [vmem:[%s1928_s0 + $0x50] sm:$0xff]  }
   0x8   :  { %v1598_v20 = vld [vmem:[%s1928_s0 + $0xc8] sm:$0xff]   ;;  %v1600_v22 = vld [vmem:[%s1928_s0 + $0xd0] sm:$0xff]   ;;  %v1601_v23 = vld [vmem:[%s1928_s0 + $0x58] sm:$0xff]  }
   0x9   :  { %v1602_v24 = vld [vmem:[%s1928_s0 + $0xd8] sm:$0xff]   ;;  %v1603_v25 = vld [vmem:[%s1928_s0 + $0x60] sm:$0xff]   ;;  %v1605_v27 = vld [vmem:[%s1928_s0 + $0x68] sm:$0xff]  }
   0xa   :  { %v1604_v26 = vld [vmem:[%s1928_s0 + $0xe0] sm:$0xff]   ;;  %v1606_v28 = vld [vmem:[%s1928_s0 + $0xe8] sm:$0xff]   ;;  %v1607_v29 = vld [vmem:[%s1928_s0 + $0x70] sm:$0xff]  }
   0xb   :  { %v1608_v30 = vld [vmem:[%s1928_s0 + $0xf0] sm:$0xff]   ;;  %v1609_v31 = vld [vmem:[%s1928_s0 + $0x78] sm:$0xff]   ;;  %v1765_v33 = vld [vmem:[%s1929_s2] ss:$0 sm:$0xff] }
   0xc   :  { %v1610_v32 = vld [vmem:[%s1928_s0 + $0xf8] sm:$0xff]  }
   0xe   :  { %1517 = vmatmul.mubr.msk.bf16.gmra.mrb[4].mxu0 %vm254_vm0, %v1585_v7  ;;  %1549 = vmatmul.mubr.msk.bf16.gmra.mrb[4].mxu1 %vm254_vm0, %v1586_v8 }
   0xf   :  { %1520 = vmatprep.mubr.msk.bf16.mxu0 %vm254_vm0, %v1587_v9  ;;  %1552 = vmatprep.mubr.msk.bf16.mxu1 %vm254_vm0, %v1588_v10 }
  0x16   :  { %1521 = vmatmul.mubr.msk.bf16.gmra.mrb[8].mxu0 %vm254_vm0, %v1589_v11  ;;  %1553 = vmatmul.mubr.msk.bf16.gmra.mrb[8].mxu1 %vm254_vm0, %v1590_v12 }
  0x17   :  { %1524 = vmatprep.mubr.msk.bf16.mxu0 %vm254_vm0, %v1591_v13  ;;  %1556 = vmatprep.mubr.msk.bf16.mxu1 %vm254_vm0, %v1592_v14 }
  0x1e   :  { %1525 = vmatmul.mubr.msk.bf16.gmra.mrb[12].mxu0 %vm254_vm0, %v1593_v15  ;;  %1557 = vmatmul.mubr.msk.bf16.gmra.mrb[12].mxu1 %vm254_vm0, %v1594_v16 }
  0x1f   :  { %1528 = vmatprep.mubr.msk.bf16.mxu0 %vm254_vm0, %v1595_v17  ;;  %1560 = vmatprep.mubr.msk.bf16.mxu1 %vm254_vm0, %v1596_v18 }
  0x26   :  { %1529 = vmatmul.mubr.msk.bf16.gmra.mrb[16].mxu0 %vm254_vm0, %v1597_v19  ;;  %1561 = vmatmul.mubr.msk.bf16.gmra.mrb[16].mxu1 %vm254_vm0, %v1598_v20 }
  0x27   :  { %1532 = vmatprep.mubr.msk.bf16.mxu0 %vm254_vm0, %v1599_v21  ;;  %1564 = vmatprep.mubr.msk.bf16.mxu1 %vm254_vm0, %v1600_v22 }
  0x2e   :  { %1533 = vmatmul.mubr.msk.bf16.gmra.mrb[20].mxu0 %vm254_vm0, %v1601_v23  ;;  %1565 = vmatmul.mubr.msk.bf16.gmra.mrb[20].mxu1 %vm254_vm0, %v1602_v24 }
  0x2f   :  { %1536 = vmatprep.mubr.msk.bf16.mxu0 %vm254_vm0, %v1603_v25  ;;  %1568 = vmatprep.mubr.msk.bf16.mxu1 %vm254_vm0, %v1604_v26 }
  0x36   :  { %1537 = vmatmul.mubr.msk.bf16.gmra.mrb[24].mxu0 %vm254_vm0, %v1605_v27  ;;  %1569 = vmatmul.mubr.msk.bf16.gmra.mrb[24].mxu1 %vm254_vm0, %v1606_v28 }
  0x37   :  { %1540 = vmatprep.mubr.msk.bf16.mxu0 %vm254_vm0, %v1607_v29  ;;  %1572 = vmatprep.mubr.msk.bf16.mxu1 %vm254_vm0, %v1608_v30 }
  0x3e   :  { %1541 = vmatmul.mubr.msk.bf16.gmra.mrb[28].mxu0 %vm254_vm0, %v1609_v31  ;;  %1573 = vmatmul.mubr.msk.bf16.gmra.mrb[28].mxu1 %vm254_vm0, %v1610_v32 }
  0xd9   :  { %v1514_v34 = vpop.f32.mrb[0].mxu0  ;;  %v1546_v35 = vpop.f32.mrb[0].mxu1 }
  0xda   :  { %v394_v36 = vadd.f32 %v1514_v34, %v1765_v33  ;;  %v522_v37 = vadd.f32 %v1546_v35, %v1765_v33  ;;  %v385_v38 = vpop.f32.mrb[1].mxu0  ;;  %v513_v39 = vpop.f32.mrb[1].mxu1 }
  0xdb   :  { %v386_v40 = vadd.f32 %v1765_v33, %v385_v38  ;;  %v514_v41 = vadd.f32 %v1765_v33, %v513_v39  ;;  %v1515_v42 = vpop.f32.mrb[2].mxu0  ;;  %v1547_v43 = vpop.f32.mrb[2].mxu1 }
  0xdc   :  { %v642_v44 = vmul.f32 0.2, %v394_v36  ;;  %v674_v45 = vmul.f32 0.2, %v522_v37  ;;  %v397_v46 = vadd.f32 %v1515_v42, %v1765_v33  ;;  %v525_v47 = vadd.f32 %v1547_v43, %v1765_v33  ;;  %v388_v48 = vpop.f32.mrb[3].mxu0  ;;  %v516_v49 = vpop.f32.mrb[3].mxu1 }
  0xdd   :  { %v640_v50 = vmul.f32 0.2, %v386_v40  ;;  %v672_v51 = vmul.f32 0.2, %v514_v41  ;;  %v389_v52 = vadd.f32 %v1765_v33, %v388_v48  ;;  %v517_v53 = vadd.f32 %v1765_v33, %v516_v49 }
  0xde   :  { %v643_v54 = vmul.f32 0.2, %v397_v46  ;;  %v675_v55 = vmul.f32 0.2, %v525_v47  ;;  %v706_v58 = vmax.f32 %v394_v36, %v642_v44  ;;  %v738_v59 = vmax.f32 %v522_v37, %v674_v45 }
  0xdf   :  { %v641_v56 = vmul.f32 0.2, %v389_v52  ;;  %v673_v57 = vmul.f32 0.2, %v517_v53  ;;  %v704_v62 = vmax.f32 %v386_v40, %v640_v50  ;;  %v736_v63 = vmax.f32 %v514_v41, %v672_v51 }
  0xe0   :  { %v707_v60 = vmax.f32 %v397_v46, %v643_v54  ;;  %v739_v61 = vmax.f32 %v525_v47, %v675_v55 }
  0xe1   :  { %v705_v0 = vmax.f32 %v389_v52, %v641_v56  ;;  %v737_v1 = vmax.f32 %v517_v53, %v673_v57  ;;  %v1518_v2 = vpop.f32.mrb[4].mxu0  ;;  %v1550_v3 = vpop.f32.mrb[4].mxu1 }
  0xe2   :  { %v1294_v4 = vpack.c.bf16 %v707_v60, %v706_v58  ;;  %v1374_v5 = vpack.c.bf16 %v739_v61, %v738_v59  ;;  %v410_v6 = vadd.f32 %v1518_v2, %v1765_v33  ;;  %v538_v7 = vadd.f32 %v1550_v3, %v1765_v33  ;;  %v401_v8 = vpop.f32.mrb[5].mxu0  ;;  %v529_v9 = vpop.f32.mrb[5].mxu1 }
  0xe3   :  { %v1289_v10 = vpack.c.bf16 %v705_v0, %v704_v62  ;;  %v1369_v11 = vpack.c.bf16 %v737_v1, %v736_v63  ;;  %v402_v12 = vadd.f32 %v1765_v33, %v401_v8  ;;  %v530_v13 = vadd.f32 %v1765_v33, %v529_v9  ;;  %v1519_v14 = vpop.f32.mrb[6].mxu0  ;;  %v1551_v15 = vpop.f32.mrb[6].mxu1 }
  0xe4   :  { %1446 = vst [vmem:[%s1930_s3 + $0x8] sm:$0xff] %v1294_v4   ;;  %1462 = vst [vmem:[%s1930_s3 + $0x88] sm:$0xff] %v1374_v5   ;;  %v646_v16 = vmul.f32 0.2, %v410_v6  ;;  %v678_v17 = vmul.f32 0.2, %v538_v7  ;;  %v413_v18 = vadd.f32 %v1519_v14, %v1765_v33  ;;  %v541_v19 = vadd.f32 %v1551_v15, %v1765_v33 }
  0xe5   :  { %v404_v20 = vpop.f32.mrb[7].mxu0  ;;  %v532_v21 = vpop.f32.mrb[7].mxu1  ;;  %1290 = vst [vmem:[%s1930_s3] sm:$0xff] %v1289_v10   ;;  %1461 = vst [vmem:[%s1930_s3 + $0x80] sm:$0xff] %v1369_v11   ;;  %v644_v22 = vmul.f32 0.2, %v402_v12 }
  0xe6   :  { %v676_v23 = vmul.f32 0.2, %v530_v13  ;;  %v405_v24 = vadd.f32 %v1765_v33, %v404_v20  ;;  %v533_v25 = vadd.f32 %v1765_v33, %v532_v21  ;;  %v647_v26 = vmul.f32 0.2, %v413_v18 }
  0xe7   :  { %v679_v27 = vmul.f32 0.2, %v541_v19  ;;  %v710_v30 = vmax.f32 %v410_v6, %v646_v16  ;;  %v742_v31 = vmax.f32 %v538_v7, %v678_v17  ;;  %v708_v35 = vmax.f32 %v402_v12, %v644_v22 }
  0xe8   :  { %v645_v28 = vmul.f32 0.2, %v405_v24  ;;  %v677_v29 = vmul.f32 0.2, %v533_v25  ;;  %v711_v32 = vmax.f32 %v413_v18, %v647_v26  ;;  %v740_v36 = vmax.f32 %v530_v13, %v676_v23 }
  0xe9   :  { %v743_v34 = vmax.f32 %v541_v19, %v679_v27  ;;  %v1522_v39 = vpop.f32.mrb[8].mxu0  ;;  %v1554_v40 = vpop.f32.mrb[8].mxu1 }
  0xea   :  { %v709_v37 = vmax.f32 %v405_v24, %v645_v28  ;;  %v741_v38 = vmax.f32 %v533_v25, %v677_v29  ;;  %v1304_v41 = vpack.c.bf16 %v711_v32, %v710_v30  ;;  %v426_v43 = vadd.f32 %v1522_v39, %v1765_v33  ;;  %v417_v45 = vpop.f32.mrb[9].mxu0  ;;  %v545_v46 = vpop.f32.mrb[9].mxu1 }
  0xeb   :  { %v1384_v42 = vpack.c.bf16 %v743_v34, %v742_v31  ;;  %v554_v44 = vadd.f32 %v1554_v40, %v1765_v33  ;;  %v418_v49 = vadd.f32 %v1765_v33, %v417_v45  ;;  %v546_v50 = vadd.f32 %v1765_v33, %v545_v46  ;;  %v1523_v51 = vpop.f32.mrb[10].mxu0  ;;  %v1555_v52 = vpop.f32.mrb[10].mxu1 }
  0xec   :  { %v1299_v47 = vpack.c.bf16 %v709_v37, %v708_v35  ;;  %v1379_v48 = vpack.c.bf16 %v741_v38, %v740_v36  ;;  %1448 = vst [vmem:[%s1930_s3 + $0x18] sm:$0xff] %v1304_v41   ;;  %v650_v53 = vmul.f32 0.2, %v426_v43  ;;  %v429_v55 = vadd.f32 %v1523_v51, %v1765_v33  ;;  %v420_v57 = vpop.f32.mrb[11].mxu0  ;;  %v548_v58 = vpop.f32.mrb[11].mxu1 }
  0xed   :  { %1464 = vst [vmem:[%s1930_s3 + $0x98] sm:$0xff] %v1384_v42   ;;  %v682_v54 = vmul.f32 0.2, %v554_v44  ;;  %v557_v56 = vadd.f32 %v1555_v52, %v1765_v33  ;;  %v648_v59 = vmul.f32 0.2, %v418_v49  ;;  %v421_v61 = vadd.f32 %v1765_v33, %v420_v57 }
  0xee   :  { %1447 = vst [vmem:[%s1930_s3 + $0x10] sm:$0xff] %v1299_v47   ;;  %1463 = vst [vmem:[%s1930_s3 + $0x90] sm:$0xff] %v1379_v48   ;;  %v680_v60 = vmul.f32 0.2, %v546_v50  ;;  %v549_v62 = vadd.f32 %v1765_v33, %v548_v58  ;;  %v651_v63 = vmul.f32 0.2, %v429_v55  ;;  %v714_v3 = vmax.f32 %v426_v43, %v650_v53 }
  0xef   :  { %v683_v0 = vmul.f32 0.2, %v557_v56  ;;  %v649_v1 = vmul.f32 0.2, %v421_v61  ;;  %v746_v4 = vmax.f32 %v554_v44, %v682_v54  ;;  %v712_v7 = vmax.f32 %v418_v49, %v648_v59 }
  0xf0   :  { %v681_v2 = vmul.f32 0.2, %v549_v62  ;;  %v715_v5 = vmax.f32 %v429_v55, %v651_v63  ;;  %v744_v8 = vmax.f32 %v546_v50, %v680_v60 }
  0xf1   :  { %v747_v6 = vmax.f32 %v557_v56, %v683_v0  ;;  %v713_v9 = vmax.f32 %v421_v61, %v649_v1  ;;  %v1526_v11 = vpop.f32.mrb[12].mxu0  ;;  %v1558_v12 = vpop.f32.mrb[12].mxu1 }
  0xf2   :  { %v745_v10 = vmax.f32 %v549_v62, %v681_v2  ;;  %v1314_v13 = vpack.c.bf16 %v715_v5, %v714_v3  ;;  %v442_v15 = vadd.f32 %v1526_v11, %v1765_v33  ;;  %v570_v16 = vadd.f32 %v1558_v12, %v1765_v33  ;;  %v433_v17 = vpop.f32.mrb[13].mxu0  ;;  %v561_v18 = vpop.f32.mrb[13].mxu1 }
  0xf3   :  { %v1394_v14 = vpack.c.bf16 %v747_v6, %v746_v4  ;;  %v1309_v19 = vpack.c.bf16 %v713_v9, %v712_v7  ;;  %v434_v21 = vadd.f32 %v1765_v33, %v433_v17  ;;  %v562_v22 = vadd.f32 %v1765_v33, %v561_v18  ;;  %v1527_v23 = vpop.f32.mrb[14].mxu0  ;;  %v1559_v24 = vpop.f32.mrb[14].mxu1 }
  0xf4   :  { %v1389_v20 = vpack.c.bf16 %v745_v10, %v744_v8  ;;  %1450 = vst [vmem:[%s1930_s3 + $0x28] sm:$0xff] %v1314_v13   ;;  %v654_v25 = vmul.f32 0.2, %v442_v15  ;;  %v686_v26 = vmul.f32 0.2, %v570_v16  ;;  %v445_v27 = vadd.f32 %v1527_v23, %v1765_v33  ;;  %v436_v29 = vpop.f32.mrb[15].mxu0 }
  0xf5   :  { %1466 = vst [vmem:[%s1930_s3 + $0xa8] sm:$0xff] %v1394_v14   ;;  %v573_v28 = vadd.f32 %v1559_v24, %v1765_v33  ;;  %v564_v30 = vpop.f32.mrb[15].mxu1  ;;  %1449 = vst [vmem:[%s1930_s3 + $0x20] sm:$0xff] %v1309_v19   ;;  %v652_v31 = vmul.f32 0.2, %v434_v21  ;;  %v437_v34 = vadd.f32 %v1765_v33, %v436_v29 }
  0xf6   :  { %1465 = vst [vmem:[%s1930_s3 + $0xa0] sm:$0xff] %v1389_v20   ;;  %v684_v32 = vmul.f32 0.2, %v562_v22  ;;  %v565_v35 = vadd.f32 %v1765_v33, %v564_v30  ;;  %v655_v36 = vmul.f32 0.2, %v445_v27  ;;  %v718_v40 = vmax.f32 %v442_v15, %v654_v25 }
  0xf7   :  { %v687_v37 = vmul.f32 0.2, %v573_v28  ;;  %v653_v38 = vmul.f32 0.2, %v437_v34  ;;  %v750_v41 = vmax.f32 %v570_v16, %v686_v26  ;;  %v716_v44 = vmax.f32 %v434_v21, %v652_v31 }
  0xf8   :  { %v685_v39 = vmul.f32 0.2, %v565_v35  ;;  %v719_v42 = vmax.f32 %v445_v27, %v655_v36  ;;  %v748_v45 = vmax.f32 %v562_v22, %v684_v32 }
  0xf9   :  { %v751_v43 = vmax.f32 %v573_v28, %v687_v37  ;;  %v717_v46 = vmax.f32 %v437_v34, %v653_v38  ;;  %v1530_v48 = vpop.f32.mrb[16].mxu0  ;;  %v1562_v49 = vpop.f32.mrb[16].mxu1 }
  0xfa   :  { %v749_v47 = vmax.f32 %v565_v35, %v685_v39  ;;  %v1324_v50 = vpack.c.bf16 %v719_v42, %v718_v40  ;;  %v458_v52 = vadd.f32 %v1530_v48, %v1765_v33  ;;  %v586_v53 = vadd.f32 %v1562_v49, %v1765_v33  ;;  %v449_v54 = vpop.f32.mrb[17].mxu0  ;;  %v577_v55 = vpop.f32.mrb[17].mxu1 }
  0xfb   :  { %v1404_v51 = vpack.c.bf16 %v751_v43, %v750_v41  ;;  %v1319_v56 = vpack.c.bf16 %v717_v46, %v716_v44  ;;  %v450_v58 = vadd.f32 %v1765_v33, %v449_v54  ;;  %v578_v59 = vadd.f32 %v1765_v33, %v577_v55  ;;  %v1531_v60 = vpop.f32.mrb[18].mxu0  ;;  %v1563_v61 = vpop.f32.mrb[18].mxu1 }
  0xfc   :  { %v1399_v57 = vpack.c.bf16 %v749_v47, %v748_v45  ;;  %1452 = vst [vmem:[%s1930_s3 + $0x38] sm:$0xff] %v1324_v50   ;;  %v658_v62 = vmul.f32 0.2, %v458_v52  ;;  %v690_v63 = vmul.f32 0.2, %v586_v53  ;;  %v461_v0 = vadd.f32 %v1531_v60, %v1765_v33  ;;  %v452_v2 = vpop.f32.mrb[19].mxu0 }
  0xfd   :  { %1468 = vst [vmem:[%s1930_s3 + $0xb8] sm:$0xff] %v1404_v51   ;;  %v589_v1 = vadd.f32 %v1563_v61, %v1765_v33  ;;  %v580_v3 = vpop.f32.mrb[19].mxu1  ;;  %1451 = vst [vmem:[%s1930_s3 + $0x30] sm:$0xff] %v1319_v56   ;;  %v656_v4 = vmul.f32 0.2, %v450_v58  ;;  %v453_v6 = vadd.f32 %v1765_v33, %v452_v2 }
  0xfe   :  { %1467 = vst [vmem:[%s1930_s3 + $0xb0] sm:$0xff] %v1399_v57   ;;  %v688_v5 = vmul.f32 0.2, %v578_v59  ;;  %v581_v7 = vadd.f32 %v1765_v33, %v580_v3  ;;  %v659_v8 = vmul.f32 0.2, %v461_v0  ;;  %v722_v12 = vmax.f32 %v458_v52, %v658_v62 }
  0xff   :  { %v691_v9 = vmul.f32 0.2, %v589_v1  ;;  %v657_v10 = vmul.f32 0.2, %v453_v6  ;;  %v754_v13 = vmax.f32 %v586_v53, %v690_v63  ;;  %v720_v16 = vmax.f32 %v450_v58, %v656_v4 }
 0x100   :  { %v689_v11 = vmul.f32 0.2, %v581_v7  ;;  %v723_v14 = vmax.f32 %v461_v0, %v659_v8  ;;  %v752_v17 = vmax.f32 %v578_v59, %v688_v5 }
 0x101   :  { %v755_v15 = vmax.f32 %v589_v1, %v691_v9  ;;  %v721_v18 = vmax.f32 %v453_v6, %v657_v10  ;;  %v1534_v20 = vpop.f32.mrb[20].mxu0  ;;  %v1566_v21 = vpop.f32.mrb[20].mxu1 }
 0x102   :  { %v753_v19 = vmax.f32 %v581_v7, %v689_v11  ;;  %v1334_v22 = vpack.c.bf16 %v723_v14, %v722_v12  ;;  %v474_v24 = vadd.f32 %v1534_v20, %v1765_v33  ;;  %v602_v25 = vadd.f32 %v1566_v21, %v1765_v33  ;;  %v465_v26 = vpop.f32.mrb[21].mxu0  ;;  %v593_v27 = vpop.f32.mrb[21].mxu1 }
 0x103   :  { %v1414_v23 = vpack.c.bf16 %v755_v15, %v754_v13  ;;  %v1329_v28 = vpack.c.bf16 %v721_v18, %v720_v16  ;;  %v466_v30 = vadd.f32 %v1765_v33, %v465_v26  ;;  %v594_v31 = vadd.f32 %v1765_v33, %v593_v27  ;;  %v1535_v32 = vpop.f32.mrb[22].mxu0  ;;  %v1567_v34 = vpop.f32.mrb[22].mxu1 }
 0x104   :  { %v1409_v29 = vpack.c.bf16 %v753_v19, %v752_v17  ;;  %1454 = vst [vmem:[%s1930_s3 + $0x48] sm:$0xff] %v1334_v22   ;;  %v662_v35 = vmul.f32 0.2, %v474_v24  ;;  %v694_v36 = vmul.f32 0.2, %v602_v25  ;;  %v477_v37 = vadd.f32 %v1535_v32, %v1765_v33  ;;  %v468_v39 = vpop.f32.mrb[23].mxu0 }
 0x105   :  { %1470 = vst [vmem:[%s1930_s3 + $0xc8] sm:$0xff] %v1414_v23   ;;  %v605_v38 = vadd.f32 %v1567_v34, %v1765_v33  ;;  %v596_v40 = vpop.f32.mrb[23].mxu1  ;;  %1453 = vst [vmem:[%s1930_s3 + $0x40] sm:$0xff] %v1329_v28   ;;  %v660_v41 = vmul.f32 0.2, %v466_v30  ;;  %v469_v43 = vadd.f32 %v1765_v33, %v468_v39 }
 0x106   :  { %1469 = vst [vmem:[%s1930_s3 + $0xc0] sm:$0xff] %v1409_v29   ;;  %v692_v42 = vmul.f32 0.2, %v594_v31  ;;  %v597_v44 = vadd.f32 %v1765_v33, %v596_v40  ;;  %v663_v45 = vmul.f32 0.2, %v477_v37  ;;  %v726_v49 = vmax.f32 %v474_v24, %v662_v35 }
 0x107   :  { %v695_v46 = vmul.f32 0.2, %v605_v38  ;;  %v661_v47 = vmul.f32 0.2, %v469_v43  ;;  %v758_v50 = vmax.f32 %v602_v25, %v694_v36  ;;  %v724_v53 = vmax.f32 %v466_v30, %v660_v41 }
 0x108   :  { %v693_v48 = vmul.f32 0.2, %v597_v44  ;;  %v727_v51 = vmax.f32 %v477_v37, %v663_v45  ;;  %v756_v54 = vmax.f32 %v594_v31, %v692_v42 }
 0x109   :  { %v759_v52 = vmax.f32 %v605_v38, %v695_v46  ;;  %v725_v55 = vmax.f32 %v469_v43, %v661_v47  ;;  %v1538_v57 = vpop.f32.mrb[24].mxu0  ;;  %v1570_v58 = vpop.f32.mrb[24].mxu1 }
 0x10a   :  { %v757_v56 = vmax.f32 %v597_v44, %v693_v48  ;;  %v1344_v59 = vpack.c.bf16 %v727_v51, %v726_v49  ;;  %v490_v61 = vadd.f32 %v1538_v57, %v1765_v33  ;;  %v618_v62 = vadd.f32 %v1570_v58, %v1765_v33  ;;  %v481_v63 = vpop.f32.mrb[25].mxu0  ;;  %v609_v0 = vpop.f32.mrb[25].mxu1 }
 0x10b   :  { %v1424_v60 = vpack.c.bf16 %v759_v52, %v758_v50  ;;  %v1339_v1 = vpack.c.bf16 %v725_v55, %v724_v53  ;;  %v482_v3 = vadd.f32 %v1765_v33, %v481_v63  ;;  %v610_v4 = vadd.f32 %v1765_v33, %v609_v0  ;;  %v1539_v5 = vpop.f32.mrb[26].mxu0  ;;  %v1571_v6 = vpop.f32.mrb[26].mxu1 }
 0x10c   :  { %v1419_v2 = vpack.c.bf16 %v757_v56, %v756_v54  ;;  %1456 = vst [vmem:[%s1930_s3 + $0x58] sm:$0xff] %v1344_v59   ;;  %v666_v7 = vmul.f32 0.2, %v490_v61  ;;  %v698_v8 = vmul.f32 0.2, %v618_v62  ;;  %v493_v9 = vadd.f32 %v1539_v5, %v1765_v33  ;;  %v484_v11 = vpop.f32.mrb[27].mxu0 }
 0x10d   :  { %1472 = vst [vmem:[%s1930_s3 + $0xd8] sm:$0xff] %v1424_v60   ;;  %v621_v10 = vadd.f32 %v1571_v6, %v1765_v33  ;;  %v612_v12 = vpop.f32.mrb[27].mxu1  ;;  %1455 = vst [vmem:[%s1930_s3 + $0x50] sm:$0xff] %v1339_v1   ;;  %v664_v13 = vmul.f32 0.2, %v482_v3  ;;  %v485_v15 = vadd.f32 %v1765_v33, %v484_v11 }
 0x10e   :  { %1471 = vst [vmem:[%s1930_s3 + $0xd0] sm:$0xff] %v1419_v2   ;;  %v696_v14 = vmul.f32 0.2, %v610_v4  ;;  %v613_v16 = vadd.f32 %v1765_v33, %v612_v12  ;;  %v667_v17 = vmul.f32 0.2, %v493_v9  ;;  %v730_v21 = vmax.f32 %v490_v61, %v666_v7 }
 0x10f   :  { %v699_v18 = vmul.f32 0.2, %v621_v10  ;;  %v665_v19 = vmul.f32 0.2, %v485_v15  ;;  %v762_v22 = vmax.f32 %v618_v62, %v698_v8  ;;  %v728_v25 = vmax.f32 %v482_v3, %v664_v13 }
 0x110   :  { %v697_v20 = vmul.f32 0.2, %v613_v16  ;;  %v731_v23 = vmax.f32 %v493_v9, %v667_v17  ;;  %v760_v26 = vmax.f32 %v610_v4, %v696_v14 }
 0x111   :  { %v763_v24 = vmax.f32 %v621_v10, %v699_v18  ;;  %v729_v27 = vmax.f32 %v485_v15, %v665_v19  ;;  %v1542_v29 = vpop.f32.mrb[28].mxu0  ;;  %v1574_v30 = vpop.f32.mrb[28].mxu1 }
 0x112   :  { %v761_v28 = vmax.f32 %v613_v16, %v697_v20  ;;  %v1354_v31 = vpack.c.bf16 %v731_v23, %v730_v21  ;;  %v506_v34 = vadd.f32 %v1542_v29, %v1765_v33  ;;  %v634_v35 = vadd.f32 %v1574_v30, %v1765_v33  ;;  %v497_v36 = vpop.f32.mrb[29].mxu0  ;;  %v625_v37 = vpop.f32.mrb[29].mxu1 }
 0x113   :  { %v1434_v32 = vpack.c.bf16 %v763_v24, %v762_v22  ;;  %v1349_v38 = vpack.c.bf16 %v729_v27, %v728_v25  ;;  %v498_v40 = vadd.f32 %v1765_v33, %v497_v36  ;;  %v626_v41 = vadd.f32 %v1765_v33, %v625_v37  ;;  %v1543_v42 = vpop.f32.mrb[30].mxu0  ;;  %v1575_v43 = vpop.f32.mrb[30].mxu1 }
 0x114   :  { %v1429_v39 = vpack.c.bf16 %v761_v28, %v760_v26  ;;  %1458 = vst [vmem:[%s1930_s3 + $0x68] sm:$0xff] %v1354_v31   ;;  %v670_v44 = vmul.f32 0.2, %v506_v34  ;;  %v702_v45 = vmul.f32 0.2, %v634_v35  ;;  %v509_v46 = vadd.f32 %v1543_v42, %v1765_v33  ;;  %v500_v48 = vpop.f32.mrb[31].mxu0 }
 0x115   :  { %1474 = vst [vmem:[%s1930_s3 + $0xe8] sm:$0xff] %v1434_v32   ;;  %v637_v47 = vadd.f32 %v1575_v43, %v1765_v33  ;;  %v628_v49 = vpop.f32.mrb[31].mxu1  ;;  %1457 = vst [vmem:[%s1930_s3 + $0x60] sm:$0xff] %v1349_v38   ;;  %v668_v50 = vmul.f32 0.2, %v498_v40  ;;  %v501_v52 = vadd.f32 %v1765_v33, %v500_v48 }
 0x116   :  { %1473 = vst [vmem:[%s1930_s3 + $0xe0] sm:$0xff] %v1429_v39   ;;  %v700_v51 = vmul.f32 0.2, %v626_v41  ;;  %v629_v53 = vadd.f32 %v1765_v33, %v628_v49  ;;  %v671_v54 = vmul.f32 0.2, %v509_v46  ;;  %v734_v58 = vmax.f32 %v506_v34, %v670_v44 }
 0x117   :  { %v703_v55 = vmul.f32 0.2, %v637_v47  ;;  %v669_v56 = vmul.f32 0.2, %v501_v52  ;;  %v766_v59 = vmax.f32 %v634_v35, %v702_v45  ;;  %v732_v62 = vmax.f32 %v498_v40, %v668_v50 }
 0x118   :  { %v701_v57 = vmul.f32 0.2, %v629_v53  ;;  %v735_v60 = vmax.f32 %v509_v46, %v671_v54  ;;  %v764_v63 = vmax.f32 %v626_v41, %v700_v51 }
 0x119   :  { %v767_v61 = vmax.f32 %v637_v47, %v703_v55  ;;  %v733_v0 = vmax.f32 %v501_v52, %v669_v56 }
 0x11a   :  { %v765_v1 = vmax.f32 %v629_v53, %v701_v57  ;;  %v1364_v2 = vpack.c.bf16 %v735_v60, %v734_v58 }
 0x11b   :  { %v1444_v3 = vpack.c.bf16 %v767_v61, %v766_v59  ;;  %v1359_v4 = vpack.c.bf16 %v733_v0, %v732_v62 }
 0x11c   :  { %v1439_v5 = vpack.c.bf16 %v765_v1, %v764_v63  ;;  %1460 = vst [vmem:[%s1930_s3 + $0x78] sm:$0xff] %v1364_v2  }
 0x11d   :  { %1476 = vst [vmem:[%s1930_s3 + $0xf8] sm:$0xff] %v1444_v3   ;;  %1459 = vst [vmem:[%s1930_s3 + $0x70] sm:$0xff] %v1359_v4  }
 0x11e   :  { %1475 = vst [vmem:[%s1930_s3 + $0xf0] sm:$0xff] %v1439_v5  }

// kernel: discriminator_forward.6
= control target key start
LH: loop header
LB: loop body
LE: loop exit
PB: predicated region body
PF: predicated region fallthrough
CT: control target
= control target key end

     0   :  { %s2508_s15 = smov 0   ;;  %s2510_s16 = smov 0   ;;  %s3039_s0 = inlined_call_operand.vmem [shape: bf16[128,1024], index: 0, kind: input, shape index: {}]   ;;  %s3040_s1 = inlined_call_operand.vmem [shape: bf16[1024,128], index: 1, kind: input, shape index: {}]   ;;  %s3041_s2 = inlined_call_operand.vmem [shape: f32[1,128], index: 2, kind: input, shape index: {}]   ;;  %s3042_s3 = inlined_call_operand.vmem [shape: f32[1,128], index: 3, kind: input, shape index: {}]   ;;  %s3043_s4 = inlined_call_operand.vmem [shape: bf16[128,128], index: 4, kind: output, shape index: {}]  }
   0x1   :  { %s2512_s17 = smov 0  }
   0x2 LB: > { %s26_s18 = sadd.s32 1, %s2476_s16  ;;  %p1891_p0 = scmp.ge.s32.totalorder %s2480_s17, 1  ;;  %s2480_s17 = sphi %s2512_s17, %s14_s17   ;;  %s2476_s16 = sphi %s2510_s16, %s3045_s16   ;;  %s2472_s15 = sphi %s2508_s15, %s3044_s15  }
   0x3   : > { %p28_p1 = scmp.ge.s32.totalorder %s26_s18, 2  ;;  %p186_p2 = scmp.lt.s32.totalorder %s2480_s17, 3 }
   0x5   : > { %s3047_s18 = smov (%p28_p1, %s26_s18), 0  ;;  %p187_p3 = pnand %p1891_p0, %p186_p2 }
   0x6   : > { %p236_p4 = scmp.eq.s32.totalorder (!%p187_p3), %s2472_s15, 0 }
   0x7   : > { %190 = sbr.rel (%p187_p3) target bundleno = 484 (0x1e4), region = 36 }
   0xe   : > { %241 = sbr.rel (!%p236_p4) target bundleno = 21 (0x15), region = 40  ;;  %v2482_v0 = vmov (%p236_p4), 0.0  }
   0xf   : > { %242 = vst [vmem:[#allocation3] sm:$0x1] (%p236_p4), %v2482_v0  ;;  %243 = vst [vmem:[#allocation4] sm:$0x1] (%p236_p4), %v2482_v0 }
  0x15 PF: > { %p1893_p5 = scmp.ne.s32.totalorder %s2472_s15, 0 }
  0x16   : > { %v2392_v1 = vld [vmem:[%s3040_s1 + $0x40] sm:$0xff] (!%p1893_p5)   ;;  %v2396_v5 = vld [vmem:[%s3040_s1 + $0x48] sm:$0xff] (!%p1893_p5)   ;;  %v2400_v9 = vld [vmem:[%s3040_s1 + $0x50] sm:$0xff] (!%p1893_p5)  }
  0x17   : > { %246 = sbr.rel (%p1893_p5) target bundleno = 416 (0x1a0), region = 44  ;;  %v2393_v2 = vld [vmem:[%s3040_s1 + $0xc0] sm:$0xff] (!%p1893_p5)   ;;  %2111 = vmatprep.subr.bf16.mxu0 (!%p1893_p5), %v2392_v1  ;;  %v2397_v6 = vld [vmem:[%s3040_s1 + $0xc8] sm:$0xff] (!%p1893_p5)   ;;  %v2401_v10 = vld [vmem:[%s3040_s1 + $0xd0] sm:$0xff] (!%p1893_p5)  }
  0x18   : > { %v2394_v3 = vld [vmem:[%s3040_s1] sm:$0xff] (!%p1893_p5)   ;;  %2175 = vmatprep.subr.bf16.mxu1 (!%p1893_p5), %v2393_v2  ;;  %v2398_v7 = vld [vmem:[%s3040_s1 + $0x8] sm:$0xff] (!%p1893_p5)   ;;  %v2402_v11 = vld [vmem:[%s3040_s1 + $0x10] sm:$0xff] (!%p1893_p5)  }
  0x19   : > { %v2395_v4 = vld [vmem:[%s3040_s1 + $0x80] sm:$0xff] (!%p1893_p5)   ;;  %2112 = vmatpush3.bf16.msra.mxu0 (!%p1893_p5), %v2394_v3  ;;  %v2399_v8 = vld [vmem:[%s3040_s1 + $0x88] sm:$0xff] (!%p1893_p5)   ;;  %v2403_v12 = vld [vmem:[%s3040_s1 + $0x90] sm:$0xff] (!%p1893_p5)  }
  0x1a   : > { %2176 = vmatpush3.bf16.msra.mxu1 (!%p1893_p5), %v2395_v4  ;;  %2113 = vmatprep.subr.bf16.mxu0 (!%p1893_p5), %v2396_v5  ;;  %v2404_v13 = vld [vmem:[%s3040_s1 + $0x58] sm:$0xff] (!%p1893_p5)   ;;  %v2408_v17 = vld [vmem:[%s3040_s1 + $0x60] sm:$0xff] (!%p1893_p5)   ;;  %v2412_v21 = vld [vmem:[%s3040_s1 + $0x68] sm:$0xff] (!%p1893_p5)  }
  0x1b   : > { %2177 = vmatprep.subr.bf16.mxu1 (!%p1893_p5), %v2397_v6  ;;  %v2405_v14 = vld [vmem:[%s3040_s1 + $0xd8] sm:$0xff] (!%p1893_p5)   ;;  %v2409_v18 = vld [vmem:[%s3040_s1 + $0xe0] sm:$0xff] (!%p1893_p5)   ;;  %v2413_v22 = vld [vmem:[%s3040_s1 + $0xe8] sm:$0xff] (!%p1893_p5)  }
  0x1c   : > { %v2406_v15 = vld [vmem:[%s3040_s1 + $0x18] sm:$0xff] (!%p1893_p5)   ;;  %v2410_v19 = vld [vmem:[%s3040_s1 + $0x20] sm:$0xff] (!%p1893_p5)   ;;  %v2414_v23 = vld [vmem:[%s3040_s1 + $0x28] sm:$0xff] (!%p1893_p5)  }
  0x1d   : > { %2114 = vmatpush3.bf16.msra.mxu0 (!%p1893_p5), %v2398_v7  ;;  %v2407_v16 = vld [vmem:[%s3040_s1 + $0x98] sm:$0xff] (!%p1893_p5)   ;;  %v2411_v20 = vld [vmem:[%s3040_s1 + $0xa0] sm:$0xff] (!%p1893_p5)   ;;  %v2415_v24 = vld [vmem:[%s3040_s1 + $0xa8] sm:$0xff] (!%p1893_p5)  }
  0x1e   : > { %2178 = vmatpush3.bf16.msra.mxu1 %v2399_v8  ;;  %2115 = vmatprep.subr.bf16.mxu0 %v2400_v9  ;;  %v2416_v25 = vld [vmem:[%s3040_s1 + $0x70] sm:$0xff]   ;;  %v2420_v29 = vld [vmem:[%s3040_s1 + $0x78] sm:$0xff]   ;;  %v247_v33 = vld [vmem:[%s3039_s0] sm:$0xff] }
  0x1f   : > { %2179 = vmatprep.subr.bf16.mxu1 %v2401_v10  ;;  %v2417_v26 = vld [vmem:[%s3040_s1 + $0xf0] sm:$0xff]   ;;  %v2421_v30 = vld [vmem:[%s3040_s1 + $0xf8] sm:$0xff]   ;;  %v251_v34 = vld [vmem:[%s3039_s0 + $0x20] sm:$0xff] }
  0x20   : > { %v2418_v27 = vld [vmem:[%s3040_s1 + $0x30] sm:$0xff]   ;;  %v2422_v31 = vld [vmem:[%s3040_s1 + $0x38] sm:$0xff]   ;;  %v248_v35 = vld [vmem:[%s3039_s0 + $0x8] sm:$0xff]  ;;  %v1894_v36 = vcombine.low %v247_v33, %v251_v34  ;;  %v1895_v37 = vcombine.high %v247_v33, %v251_v34 }
  0x21   : > { %2116 = vmatpush3.bf16.msra.mxu0 %v2402_v11  ;;  %v2419_v28 = vld [vmem:[%s3040_s1 + $0xb0] sm:$0xff]   ;;  %v2423_v32 = vld [vmem:[%s3040_s1 + $0xb8] sm:$0xff]   ;;  %v252_v38 = vld [vmem:[%s3039_s0 + $0x28] sm:$0xff] }
  0x22   : > { %2180 = vmatpush3.bf16.msra.mxu1 %v2403_v12  ;;  %2117 = vmatprep.subr.bf16.mxu0 %v2404_v13  ;;  %v1896_v39 = vcombine.low %v248_v35, %v252_v38  ;;  %v1897_v40 = vcombine.high %v248_v35, %v252_v38  ;;  %v2424_v41 = vld [vmem:[%s3040_s1 + $0x140] sm:$0xff]   ;;  %v256_v48 = vld [vmem:[%s3039_s0 + $0x48] sm:$0xff]  ;;  %v2432_v63 = vld [vmem:[%s3040_s1 + $0x150] sm:$0xff]  }
  0x23   : > { %2181 = vmatprep.subr.bf16.mxu1 %v2405_v14  ;;  %1175 = vmatprep.mubr.bf16.mxu0 %v1895_v37  ;;  %v2425_v42 = vld [vmem:[%s3040_s1 + $0x100] sm:$0xff]   ;;  %v260_v49 = vld [vmem:[%s3039_s0 + $0x68] sm:$0xff]  ;;  %v2433_v0 = vld [vmem:[%s3040_s1 + $0x110] sm:$0xff]  }
  0x24   : > { %1272 = vmatprep.mubr.bf16.mxu1 %v1897_v40  ;;  %v2426_v43 = vld [vmem:[%s3040_s1 + $0x1c0] sm:$0xff]   ;;  %v1905_v50 = vcombine.high %v256_v48, %v260_v49  ;;  %v2428_v51 = vld [vmem:[%s3040_s1 + $0x148] sm:$0xff]   ;;  %v1904_v54 = vcombine.low %v256_v48, %v260_v49  ;;  %v2434_v1 = vld [vmem:[%s3040_s1 + $0x1d0] sm:$0xff]  }
  0x25   : > { %2118 = vmatpush3.bf16.msra.mxu0 %v2406_v15  ;;  %v2427_v44 = vld [vmem:[%s3040_s1 + $0x180] sm:$0xff]   ;;  %v2429_v53 = vld [vmem:[%s3040_s1 + $0x108] sm:$0xff]   ;;  %v2435_v2 = vld [vmem:[%s3040_s1 + $0x190] sm:$0xff]  }
  0x26   : > { %2182 = vmatpush3.bf16.msra.mxu1 %v2407_v16  ;;  %2119 = vmatprep.subr.bf16.mxu0 %v2408_v17  ;;  %v255_v45 = vld [vmem:[%s3039_s0 + $0x40] sm:$0xff]  ;;  %v2430_v55 = vld [vmem:[%s3040_s1 + $0x1c8] sm:$0xff]   ;;  %v2436_v11 = vld [vmem:[%s3040_s1 + $0x158] sm:$0xff]  }
  0x27   : > { %2183 = vmatprep.subr.bf16.mxu1 %v2409_v18  ;;  %v259_v46 = vld [vmem:[%s3039_s0 + $0x60] sm:$0xff]  ;;  %v2431_v56 = vld [vmem:[%s3040_s1 + $0x188] sm:$0xff]   ;;  %v2437_v12 = vld [vmem:[%s3040_s1 + $0x118] sm:$0xff]  }
  0x28   : > { %v1903_v47 = vcombine.high %v255_v45, %v259_v46  ;;  %v1902_v52 = vcombine.low %v255_v45, %v259_v46  ;;  %v263_v57 = vld [vmem:[%s3039_s0 + $0x80] sm:$0xff]  ;;  %v264_v59 = vld [vmem:[%s3039_s0 + $0x88] sm:$0xff]  ;;  %v2438_v13 = vld [vmem:[%s3040_s1 + $0x1d8] sm:$0xff]  }
  0x29   : > { %2120 = vmatpush3.bf16.msra.mxu0 %v2410_v19  ;;  %v267_v58 = vld [vmem:[%s3039_s0 + $0xa0] sm:$0xff]  ;;  %v268_v60 = vld [vmem:[%s3039_s0 + $0xa8] sm:$0xff]  ;;  %v2439_v14 = vld [vmem:[%s3040_s1 + $0x198] sm:$0xff]  }
  0x2a   : > { %2184 = vmatpush3.bf16.msra.mxu1 %v2411_v20  ;;  %2121 = vmatprep.subr.bf16.mxu0 %v2412_v21  ;;  %v1911_v61 = vcombine.high %v263_v57, %v267_v58  ;;  %v1913_v62 = vcombine.high %v264_v59, %v268_v60  ;;  %v1910_v3 = vcombine.low %v263_v57, %v267_v58  ;;  %v271_v4 = vld [vmem:[%s3039_s0 + $0xc0] sm:$0xff]  ;;  %v272_v6 = vld [vmem:[%s3039_s0 + $0xc8] sm:$0xff]  ;;  %v2449_v40 = vld [vmem:[%s3040_s1 + $0x130] sm:$0xff]  }
  0x2b   : > { %2185 = vmatprep.subr.bf16.mxu1 %v2413_v22  ;;  %v275_v5 = vld [vmem:[%s3039_s0 + $0xe0] sm:$0xff]  ;;  %v1912_v7 = vcombine.low %v264_v59, %v268_v60  ;;  %v276_v9 = vld [vmem:[%s3039_s0 + $0xe8] sm:$0xff]  ;;  %v2453_v49 = vld [vmem:[%s3040_s1 + $0x138] sm:$0xff]  }
  0x2c   : > { %v1919_v8 = vcombine.high %v271_v4, %v275_v5  ;;  %v1921_v10 = vcombine.high %v272_v6, %v276_v9  ;;  %v279_v15 = vld [vmem:[%s3039_s0 + $0x100] sm:$0xff]  ;;  %v280_v17 = vld [vmem:[%s3039_s0 + $0x108] sm:$0xff]  ;;  %v1918_v20 = vcombine.low %v271_v4, %v275_v5  ;;  %v1920_v22 = vcombine.low %v272_v6, %v276_v9  ;;  %v258_v9 = vld [vmem:[%s3039_s0 + $0x58] sm:$0xff] }
  0x2d   : > { %2122 = vmatpush3.bf16.msra.mxu0 %v2414_v23  ;;  %v283_v16 = vld [vmem:[%s3039_s0 + $0x120] sm:$0xff]  ;;  %v284_v18 = vld [vmem:[%s3039_s0 + $0x128] sm:$0xff] }
  0x2e   : > { %2186 = vmatpush3.bf16.msra.mxu1 %v2415_v24  ;;  %2123 = vmatprep.subr.bf16.mxu0 %v2416_v25  ;;  %v2440_v19 = vld [vmem:[%s3040_s1 + $0x160] sm:$0xff]   ;;  %v1927_v23 = vcombine.high %v279_v15, %v283_v16  ;;  %v1929_v25 = vcombine.high %v280_v17, %v284_v18  ;;  %v2446_v33 = vld [vmem:[%s3040_s1 + $0x1e8] sm:$0xff]   ;;  %v1926_v35 = vcombine.low %v279_v15, %v283_v16  ;;  %v265_v15 = vld [vmem:[%s3039_s0 + $0x90] sm:$0xff] }
  0x2f   : > { %2187 = vmatprep.subr.bf16.mxu1 %v2417_v26  ;;  %v2441_v21 = vld [vmem:[%s3040_s1 + $0x120] sm:$0xff]   ;;  %v2447_v34 = vld [vmem:[%s3040_s1 + $0x1a8] sm:$0xff]   ;;  %v269_v16 = vld [vmem:[%s3039_s0 + $0xb0] sm:$0xff] }
  0x30   : > { %v2442_v24 = vld [vmem:[%s3040_s1 + $0x1e0] sm:$0xff]   ;;  %v296_v45 = vld [vmem:[%s3039_s0 + $0x188] sm:$0xff] }
  0x31   : > { %2124 = vmatpush3.bf16.msra.mxu0 %v2418_v27  ;;  %v2443_v26 = vld [vmem:[%s3040_s1 + $0x1a0] sm:$0xff]   ;;  %v300_v46 = vld [vmem:[%s3039_s0 + $0x1a8] sm:$0xff] }
  0x32   : > { %2188 = vmatpush3.bf16.msra.mxu1 %v2419_v28  ;;  %2125 = vmatprep.subr.bf16.mxu0 %v2420_v29  ;;  %v287_v27 = vld [vmem:[%s3039_s0 + $0x140] sm:$0xff]  ;;  %v2444_v29 = vld [vmem:[%s3040_s1 + $0x168] sm:$0xff]   ;;  %v1944_v60 = vcombine.low %v296_v45, %v300_v46 }
  0x33   : > { %2189 = vmatprep.subr.bf16.mxu1 %v2421_v30  ;;  %v291_v28 = vld [vmem:[%s3039_s0 + $0x160] sm:$0xff]  ;;  %v288_v30 = vld [vmem:[%s3039_s0 + $0x148] sm:$0xff] }
  0x34   : > { %v1935_v37 = vcombine.high %v287_v27, %v291_v28  ;;  %v1934_v48 = vcombine.low %v287_v27, %v291_v28  ;;  %v304_v57 = vld [vmem:[%s3039_s0 + $0x1c8] sm:$0xff]  ;;  %v1914_v27 = vcombine.low %v265_v15, %v269_v16 }
  0x35   : > { %2126 = vmatpush3.bf16.msra.mxu0 %v2422_v31  ;;  %v292_v31 = vld [vmem:[%s3039_s0 + $0x168] sm:$0xff] }
  0x36   : > { %2190 = vmatpush3.bf16.msra.mxu1 %v2423_v32  ;;  %2239 = vmatprep.subr.bf16.mxu0 %v2424_v41  ;;  %v2445_v32 = vld [vmem:[%s3040_s1 + $0x128] sm:$0xff]   ;;  %v1937_v38 = vcombine.high %v288_v30, %v292_v31  ;;  %v2450_v41 = vld [vmem:[%s3040_s1 + $0x1f0] sm:$0xff]  }
  0x37   : > { %2303 = vmatprep.subr.bf16.mxu1 %v2426_v43  ;;  %v299_v43 = vld [vmem:[%s3039_s0 + $0x1a0] sm:$0xff]  ;;  %v308_v58 = vld [vmem:[%s3039_s0 + $0x1e8] sm:$0xff] }
  0x38   : > { %1176 = vmatmul.mubr.bf16.vlgmr.msra.gmra.mrb[0].mxu0 %v1894_v36  ;;  %v1928_v36 = vcombine.low %v280_v17, %v284_v18  ;;  %v1952_v4 = vcombine.low %v304_v57, %v308_v58  ;;  %v266_v17 = vld [vmem:[%s3039_s0 + $0x98] sm:$0xff] }
  0x39   : > { %1273 = vmatmul.mubr.bf16.vlgmr.msra.gmra.mrb[0].mxu1 %v1896_v39  ;;  %2240 = vmatpush3.bf16.msra.mxu0 %v2425_v42  ;;  %v2448_v39 = vld [vmem:[%s3040_s1 + $0x170] sm:$0xff]   ;;  %v295_v42 = vld [vmem:[%s3039_s0 + $0x180] sm:$0xff]  ;;  %v270_v18 = vld [vmem:[%s3039_s0 + $0xb8] sm:$0xff] }
  0x3a   : > { %2304 = vmatpush3.bf16.msra.mxu1 %v2427_v44  ;;  %1183 = vmatprep.mubr.bf16.mxu0 %v1903_v47  ;;  %v2451_v44 = vld [vmem:[%s3040_s1 + $0x1b0] sm:$0xff]   ;;  %v2452_v47 = vld [vmem:[%s3040_s1 + $0x178] sm:$0xff]   ;;  %v1942_v59 = vcombine.low %v295_v42, %v299_v43  ;;  %v1916_v28 = vcombine.low %v266_v17, %v270_v18 }
  0x3b   : > { %1280 = vmatprep.mubr.bf16.mxu1 %v1905_v50  ;;  %2241 = vmatprep.subr.bf16.mxu0 %v2428_v51  ;;  %v1936_v50 = vcombine.low %v288_v30, %v292_v31  ;;  %v1943_v51 = vcombine.high %v295_v42, %v299_v43  ;;  %v281_v31 = vld [vmem:[%s3039_s0 + $0x110] sm:$0xff]  ;;  %v294_v42 = vld [vmem:[%s3039_s0 + $0x178] sm:$0xff] }
  0x3c   : > { %2305 = vmatprep.subr.bf16.mxu1 %v2430_v55  ;;  %v303_v55 = vld [vmem:[%s3039_s0 + $0x1c0] sm:$0xff] }
  0x3d   : > { %2242 = vmatpush3.bf16.msra.mxu0 %v2429_v53  ;;  %v1945_v53 = vcombine.high %v296_v45, %v300_v46 }
  0x3e   : > { %2306 = vmatpush3.bf16.msra.mxu1 %v2431_v56  ;;  %2243 = vmatprep.subr.bf16.mxu0 %v2432_v63  ;;  %v307_v56 = vld [vmem:[%s3039_s0 + $0x1e0] sm:$0xff]  ;;  %v249_v63 = vld [vmem:[%s3039_s0 + $0x10] sm:$0xff] }
  0x3f   : > { %2307 = vmatprep.subr.bf16.mxu1 %v2434_v1  ;;  %v250_v1 = vld [vmem:[%s3039_s0 + $0x18] sm:$0xff] }
  0x40   : > { %1184 = vmatmul.mubr.bf16.gmra.mrb[4].mxu0 %v1902_v52  ;;  %v2454_v52 = vld [vmem:[%s3040_s1 + $0x1f8] sm:$0xff]  }
  0x41   : > { %1281 = vmatmul.mubr.bf16.gmra.mrb[4].mxu1 %v1904_v54  ;;  %1191 = vmatprep.mubr.bf16.mxu0 %v1911_v61  ;;  %v2455_v54 = vld [vmem:[%s3040_s1 + $0x1b8] sm:$0xff]   ;;  %v1951_v61 = vcombine.high %v303_v55, %v307_v56 }
  0x42   : > { %1288 = vmatprep.mubr.bf16.mxu1 %v1913_v62  ;;  %2244 = vmatpush3.bf16.msra.mxu0 %v2433_v0  ;;  %v1953_v62 = vcombine.high %v304_v57, %v308_v58  ;;  %v253_v0 = vld [vmem:[%s3039_s0 + $0x30] sm:$0xff]  ;;  %v306_v57 = vld [vmem:[%s3039_s0 + $0x1d8] sm:$0xff] }
  0x43   : > { %2308 = vmatpush3.bf16.msra.mxu1 %v2435_v2  ;;  %2245 = vmatprep.subr.bf16.mxu0 %v2436_v11  ;;  %v254_v2 = vld [vmem:[%s3039_s0 + $0x38] sm:$0xff]  ;;  %v1899_v5 = vcombine.high %v249_v63, %v253_v0  ;;  %v1898_v11 = vcombine.low %v249_v63, %v253_v0 }
  0x44   : > { %2309 = vmatprep.subr.bf16.mxu1 %v2438_v13  ;;  %v1901_v6 = vcombine.high %v250_v1, %v254_v2  ;;  %v310_v58 = vld [vmem:[%s3039_s0 + $0x1f8] sm:$0xff] }
  0x45   : > { %v1956_v0 = vcombine.low %v306_v57, %v310_v58 }
  0x46   : > { %2246 = vmatpush3.bf16.msra.mxu0 %v2437_v12  ;;  %v1900_v12 = vcombine.low %v250_v1, %v254_v2 }
  0x47   : > { %2310 = vmatpush3.bf16.msra.mxu1 %v2439_v14  ;;  %2247 = vmatprep.subr.bf16.mxu0 %v2440_v19 }
  0x48   : > { %1192 = vmatmul.mubr.bf16.gmra.mrb[8].mxu0 %v1910_v3  ;;  %2311 = vmatprep.subr.bf16.mxu1 %v2442_v24  ;;  %v1950_v3 = vcombine.low %v303_v55, %v307_v56  ;;  %v277_v24 = vld [vmem:[%s3039_s0 + $0xf0] sm:$0xff] }
  0x49   : > { %1289 = vmatmul.mubr.bf16.gmra.mrb[8].mxu1 %v1912_v7  ;;  %1199 = vmatprep.mubr.bf16.mxu0 %v1919_v8  ;;  %v257_v7 = vld [vmem:[%s3039_s0 + $0x50] sm:$0xff] }
  0x4a   : > { %1296 = vmatprep.mubr.bf16.mxu1 %v1921_v10  ;;  %2248 = vmatpush3.bf16.msra.mxu0 %v2441_v21  ;;  %v261_v8 = vld [vmem:[%s3039_s0 + $0x70] sm:$0xff]  ;;  %v262_v10 = vld [vmem:[%s3039_s0 + $0x78] sm:$0xff]  ;;  %v1915_v21 = vcombine.high %v265_v15, %v269_v16 }
  0x4b   : > { %2312 = vmatpush3.bf16.msra.mxu1 %v2443_v26  ;;  %2249 = vmatprep.subr.bf16.mxu0 %v2444_v29  ;;  %v1907_v13 = vcombine.high %v257_v7, %v261_v8  ;;  %v1909_v14 = vcombine.high %v258_v9, %v262_v10  ;;  %v1906_v19 = vcombine.low %v257_v7, %v261_v8  ;;  %v278_v26 = vld [vmem:[%s3039_s0 + $0xf8] sm:$0xff]  ;;  %v305_v55 = vld [vmem:[%s3039_s0 + $0x1d0] sm:$0xff] }
  0x4c   : > { %2313 = vmatprep.subr.bf16.mxu1 %v2446_v33  ;;  %v282_v33 = vld [vmem:[%s3039_s0 + $0x118] sm:$0xff]  ;;  %v309_v56 = vld [vmem:[%s3039_s0 + $0x1f0] sm:$0xff] }
  0x4d   : > { %v1954_v63 = vcombine.low %v305_v55, %v309_v56 }
  0x4e   : > { %2250 = vmatpush3.bf16.msra.mxu0 %v2445_v32  ;;  %v285_v32 = vld [vmem:[%s3039_s0 + $0x130] sm:$0xff] }
  0x4f   : > { %2314 = vmatpush3.bf16.msra.mxu1 %v2447_v34  ;;  %2251 = vmatprep.subr.bf16.mxu0 %v2448_v39  ;;  %v286_v34 = vld [vmem:[%s3039_s0 + $0x138] sm:$0xff]  ;;  %v289_v39 = vld [vmem:[%s3039_s0 + $0x150] sm:$0xff]  ;;  %v1930_v43 = vcombine.low %v281_v31, %v285_v32 }
  0x50   : > { %1200 = vmatmul.mubr.bf16.gmra.mrb[12].mxu0 %v1918_v20  ;;  %2315 = vmatprep.subr.bf16.mxu1 %v2450_v41  ;;  %v1908_v20 = vcombine.low %v258_v9, %v262_v10  ;;  %v290_v41 = vld [vmem:[%s3039_s0 + $0x158] sm:$0xff] }
  0x51   : > { %1297 = vmatmul.mubr.bf16.gmra.mrb[12].mxu1 %v1920_v22  ;;  %1207 = vmatprep.mubr.bf16.mxu0 %v1927_v23  ;;  %v1917_v22 = vcombine.high %v266_v17, %v270_v18  ;;  %v273_v23 = vld [vmem:[%s3039_s0 + $0xd0] sm:$0xff]  ;;  %v1941_v46 = vcombine.high %v290_v41, %v294_v42 }
  0x52   : > { %1304 = vmatprep.mubr.bf16.mxu1 %v1929_v25  ;;  %2252 = vmatpush3.bf16.msra.mxu0 %v2449_v40  ;;  %v274_v25 = vld [vmem:[%s3039_s0 + $0xd8] sm:$0xff]  ;;  %v1923_v29 = vcombine.high %v273_v23, %v277_v24  ;;  %v293_v40 = vld [vmem:[%s3039_s0 + $0x170] sm:$0xff] }
  0x53   : > { %2316 = vmatpush3.bf16.msra.mxu1 %v2451_v44  ;;  %2253 = vmatprep.subr.bf16.mxu0 %v2452_v47  ;;  %v1925_v30 = vcombine.high %v274_v25, %v278_v26  ;;  %v1932_v44 = vcombine.low %v282_v33, %v286_v34  ;;  %v1939_v45 = vcombine.high %v289_v39, %v293_v40  ;;  %v297_v47 = vld [vmem:[%s3039_s0 + $0x190] sm:$0xff] }
  0x54   : > { %2317 = vmatprep.subr.bf16.mxu1 %v2454_v52  ;;  %v1940_v52 = vcombine.low %v290_v41, %v294_v42 }
  0x56   : > { %2254 = vmatpush3.bf16.msra.mxu0 %v2453_v49  ;;  %v298_v49 = vld [vmem:[%s3039_s0 + $0x198] sm:$0xff] }
  0x57   : > { %2318 = vmatpush3.bf16.msra.mxu1 %v2455_v54 }
  0x58   : > { %1208 = vmatmul.mubr.bf16.gmra.mrb[16].mxu0 %v1926_v35  ;;  %v1922_v35 = vcombine.low %v273_v23, %v277_v24 }
  0x59   : > { %1305 = vmatmul.mubr.bf16.gmra.mrb[16].mxu1 %v1928_v36  ;;  %1215 = vmatprep.mubr.bf16.mxu0 %v1935_v37  ;;  %v1924_v36 = vcombine.low %v274_v25, %v278_v26  ;;  %v1931_v37 = vcombine.high %v281_v31, %v285_v32 }
  0x5a   : > { %1312 = vmatprep.mubr.bf16.mxu1 %v1937_v38  ;;  %v1933_v38 = vcombine.high %v282_v33, %v286_v34 }
  0x60   : > { %1216 = vmatmul.mubr.bf16.gmra.mrb[20].mxu0 %v1934_v48  ;;  %v301_v48 = vld [vmem:[%s3039_s0 + $0x1b0] sm:$0xff] }
  0x61   : > { %1313 = vmatmul.mubr.bf16.gmra.mrb[20].mxu1 %v1936_v50  ;;  %1223 = vmatprep.mubr.bf16.mxu0 %v1943_v51  ;;  %v302_v50 = vld [vmem:[%s3039_s0 + $0x1b8] sm:$0xff]  ;;  %v1938_v51 = vcombine.low %v289_v39, %v293_v40 }
  0x62   : > { %1320 = vmatprep.mubr.bf16.mxu1 %v1945_v53  ;;  %v1947_v53 = vcombine.high %v297_v47, %v301_v48  ;;  %v1949_v54 = vcombine.high %v298_v49, %v302_v50 }
  0x68   : > { %1224 = vmatmul.mubr.bf16.gmra.mrb[24].mxu0 %v1942_v59  ;;  %v1946_v59 = vcombine.low %v297_v47, %v301_v48 }
  0x69   : > { %1321 = vmatmul.mubr.bf16.gmra.mrb[24].mxu1 %v1944_v60  ;;  %1231 = vmatprep.mubr.bf16.mxu0 %v1951_v61  ;;  %v1948_v60 = vcombine.low %v298_v49, %v302_v50  ;;  %v1955_v61 = vcombine.high %v305_v55, %v309_v56 }
  0x6a   : > { %1328 = vmatprep.mubr.bf16.mxu1 %v1953_v62  ;;  %v1957_v62 = vcombine.high %v306_v57, %v310_v58 }
  0x70   : > { %1232 = vmatmul.mubr.bf16.gmra.mrb[28].mxu0 %v1950_v3 }
  0x71   : > { %1329 = vmatmul.mubr.bf16.gmra.mrb[28].mxu1 %v1952_v4  ;;  %1369 = vmatprep.mubr.bf16.mxu0 %v1899_v5 }
  0x72   : > { %1466 = vmatprep.mubr.bf16.mxu1 %v1901_v6 }
  0x78   : > { %1370 = vmatmul.mubr.bf16.vlgmr.msra.gmra.mrb[32].mxu0 %v1898_v11 }
  0x79   : > { %1467 = vmatmul.mubr.bf16.vlgmr.msra.gmra.mrb[32].mxu1 %v1900_v12  ;;  %1377 = vmatprep.mubr.bf16.mxu0 %v1907_v13 }
  0x7a   : > { %1474 = vmatprep.mubr.bf16.mxu1 %v1909_v14 }
  0x80   : > { %1378 = vmatmul.mubr.bf16.gmra.mrb[36].mxu0 %v1906_v19 }
  0x81   : > { %1475 = vmatmul.mubr.bf16.gmra.mrb[36].mxu1 %v1908_v20  ;;  %1385 = vmatprep.mubr.bf16.mxu0 %v1915_v21 }
  0x82   : > { %1482 = vmatprep.mubr.bf16.mxu1 %v1917_v22 }
  0x88   : > { %1386 = vmatmul.mubr.bf16.gmra.mrb[40].mxu0 %v1914_v27 }
  0x89   : > { %1483 = vmatmul.mubr.bf16.gmra.mrb[40].mxu1 %v1916_v28  ;;  %1393 = vmatprep.mubr.bf16.mxu0 %v1923_v29 }
  0x8a   : > { %1490 = vmatprep.mubr.bf16.mxu1 %v1925_v30 }
  0x90   : > { %1394 = vmatmul.mubr.bf16.gmra.mrb[44].mxu0 %v1922_v35 }
  0x91   : > { %1491 = vmatmul.mubr.bf16.gmra.mrb[44].mxu1 %v1924_v36  ;;  %1401 = vmatprep.mubr.bf16.mxu0 %v1931_v37 }
  0x92   : > { %1498 = vmatprep.mubr.bf16.mxu1 %v1933_v38 }
  0x98   : > { %1402 = vmatmul.mubr.bf16.gmra.mrb[48].mxu0 %v1930_v43 }
  0x99   : > { %1499 = vmatmul.mubr.bf16.gmra.mrb[48].mxu1 %v1932_v44  ;;  %1409 = vmatprep.mubr.bf16.mxu0 %v1939_v45 }
  0x9a   : > { %1506 = vmatprep.mubr.bf16.mxu1 %v1941_v46 }
  0xa0   : > { %1410 = vmatmul.mubr.bf16.gmra.mrb[52].mxu0 %v1938_v51 }
  0xa1   : > { %1507 = vmatmul.mubr.bf16.gmra.mrb[52].mxu1 %v1940_v52  ;;  %1417 = vmatprep.mubr.bf16.mxu0 %v1947_v53 }
  0xa2   : > { %1514 = vmatprep.mubr.bf16.mxu1 %v1949_v54 }
  0xa8   : > { %1418 = vmatmul.mubr.bf16.gmra.mrb[56].mxu0 %v1946_v59 }
  0xa9   : > { %1515 = vmatmul.mubr.bf16.gmra.mrb[56].mxu1 %v1948_v60  ;;  %1425 = vmatprep.mubr.bf16.mxu0 %v1955_v61 }
  0xaa   : > { %1522 = vmatprep.mubr.bf16.mxu1 %v1957_v62 }
  0xb0   : > { %1426 = vmatmul.mubr.bf16.gmra.mrb[60].mxu0 %v1954_v63 }
  0xb1   : > { %1523 = vmatmul.mubr.bf16.gmra.mrb[60].mxu1 %v1956_v0 }
 0x10b   : > { %v2127_v1 = vpop.f32.mrb[0].mxu0 }
 0x10c   : > { %v2191_v2 = vpop.f32.mrb[0].mxu1  ;;  %v2128_v3 = vpop.f32.mrb[1].mxu0 }
 0x10d   : > { %v2129_v4 = vadd.f32 %v2128_v3, %v2127_v1  ;;  %v2192_v5 = vpop.f32.mrb[1].mxu1  ;;  %v2130_v6 = vpop.f32.mrb[2].mxu0 }
 0x10e   : > { %v2193_v7 = vadd.f32 %v2192_v5, %v2191_v2  ;;  %v2194_v8 = vpop.f32.mrb[2].mxu1  ;;  %v2131_v9 = vpop.f32.mrb[3].mxu0 }
 0x10f   : > { %v2132_v10 = vadd.f32 %v2131_v9, %v2130_v6  ;;  %v2195_v11 = vpop.f32.mrb[3].mxu1 }
 0x110   : > { %v2914_v12 = vadd.f32 %v2193_v7, %v2129_v4  ;;  %v2196_v13 = vadd.f32 %v2195_v11, %v2194_v8 }
 0x112   : > { %v2916_v14 = vadd.f32 %v2196_v13, %v2132_v10 }
 0x113   : > { %v2133_v15 = vpop.f32.mrb[4].mxu0 }
 0x114   : > { %v2197_v16 = vpop.f32.mrb[4].mxu1  ;;  %v2134_v17 = vpop.f32.mrb[5].mxu0 }
 0x115   : > { %v2135_v18 = vadd.f32 %v2134_v17, %v2133_v15  ;;  %v2198_v19 = vpop.f32.mrb[5].mxu1  ;;  %v2136_v20 = vpop.f32.mrb[6].mxu0 }
 0x116   : > { %v2199_v21 = vadd.f32 %v2198_v19, %v2197_v16  ;;  %v2200_v22 = vpop.f32.mrb[6].mxu1  ;;  %v2137_v23 = vpop.f32.mrb[7].mxu0 }
 0x117   : > { %v2138_v24 = vadd.f32 %v2137_v23, %v2136_v20  ;;  %v2201_v25 = vpop.f32.mrb[7].mxu1 }
 0x118   : > { %v2918_v26 = vadd.f32 %v2199_v21, %v2135_v18  ;;  %v2202_v27 = vadd.f32 %v2201_v25, %v2200_v22 }
 0x11a   : > { %v2920_v28 = vadd.f32 %v2202_v27, %v2138_v24 }
 0x11b   : > { %v2139_v29 = vpop.f32.mrb[8].mxu0 }
 0x11c   : > { %v2203_v30 = vpop.f32.mrb[8].mxu1  ;;  %v2140_v31 = vpop.f32.mrb[9].mxu0 }
 0x11d   : > { %v2141_v32 = vadd.f32 %v2140_v31, %v2139_v29  ;;  %v2204_v33 = vpop.f32.mrb[9].mxu1  ;;  %v2142_v34 = vpop.f32.mrb[10].mxu0 }
 0x11e   : > { %v2205_v35 = vadd.f32 %v2204_v33, %v2203_v30  ;;  %v2206_v36 = vpop.f32.mrb[10].mxu1  ;;  %v2143_v37 = vpop.f32.mrb[11].mxu0 }
 0x11f   : > { %v2144_v38 = vadd.f32 %v2143_v37, %v2142_v34  ;;  %v2207_v39 = vpop.f32.mrb[11].mxu1 }
 0x120   : > { %v2922_v40 = vadd.f32 %v2205_v35, %v2141_v32  ;;  %v2208_v41 = vadd.f32 %v2207_v39, %v2206_v36 }
 0x122   : > { %v2924_v42 = vadd.f32 %v2208_v41, %v2144_v38 }
 0x123   : > { %v2145_v43 = vpop.f32.mrb[12].mxu0 }
 0x124   : > { %v2209_v44 = vpop.f32.mrb[12].mxu1  ;;  %v2146_v45 = vpop.f32.mrb[13].mxu0 }
 0x125   : > { %v2147_v46 = vadd.f32 %v2146_v45, %v2145_v43  ;;  %v2210_v47 = vpop.f32.mrb[13].mxu1  ;;  %v2148_v48 = vpop.f32.mrb[14].mxu0 }
 0x126   : > { %v2211_v49 = vadd.f32 %v2210_v47, %v2209_v44  ;;  %v2212_v50 = vpop.f32.mrb[14].mxu1  ;;  %v2149_v51 = vpop.f32.mrb[15].mxu0 }
 0x127   : > { %v2150_v52 = vadd.f32 %v2149_v51, %v2148_v48  ;;  %v2213_v53 = vpop.f32.mrb[15].mxu1 }
 0x128   : > { %v2926_v54 = vadd.f32 %v2211_v49, %v2147_v46  ;;  %v2214_v55 = vadd.f32 %v2213_v53, %v2212_v50 }
 0x12a   : > { %v2928_v56 = vadd.f32 %v2214_v55, %v2150_v52 }
 0x12b   : > { %v2151_v57 = vpop.f32.mrb[16].mxu0 }
 0x12c   : > { %v2215_v58 = vpop.f32.mrb[16].mxu1  ;;  %v2152_v59 = vpop.f32.mrb[17].mxu0 }
 0x12d   : > { %v2153_v60 = vadd.f32 %v2152_v59, %v2151_v57  ;;  %v2216_v61 = vpop.f32.mrb[17].mxu1  ;;  %v2154_v62 = vpop.f32.mrb[18].mxu0 }
 0x12e   : > { %v2217_v63 = vadd.f32 %v2216_v61, %v2215_v58  ;;  %v2218_v0 = vpop.f32.mrb[18].mxu1  ;;  %v2155_v1 = vpop.f32.mrb[19].mxu0 }
 0x12f   : > { %v2156_v2 = vadd.f32 %v2155_v1, %v2154_v62  ;;  %v2219_v3 = vpop.f32.mrb[19].mxu1 }
 0x130   : > { %v2930_v4 = vadd.f32 %v2217_v63, %v2153_v60  ;;  %v2220_v5 = vadd.f32 %v2219_v3, %v2218_v0 }
 0x132   : > { %v2932_v6 = vadd.f32 %v2220_v5, %v2156_v2 }
 0x133   : > { %v2157_v7 = vpop.f32.mrb[20].mxu0 }
 0x134   : > { %v2221_v8 = vpop.f32.mrb[20].mxu1  ;;  %v2158_v9 = vpop.f32.mrb[21].mxu0 }
 0x135   : > { %v2159_v10 = vadd.f32 %v2158_v9, %v2157_v7  ;;  %v2222_v11 = vpop.f32.mrb[21].mxu1  ;;  %v2160_v13 = vpop.f32.mrb[22].mxu0 }
 0x136   : > { %v2223_v15 = vadd.f32 %v2222_v11, %v2221_v8  ;;  %v2224_v16 = vpop.f32.mrb[22].mxu1  ;;  %v2161_v17 = vpop.f32.mrb[23].mxu0 }
 0x137   : > { %v2162_v18 = vadd.f32 %v2161_v17, %v2160_v13  ;;  %v2225_v19 = vpop.f32.mrb[23].mxu1 }
 0x138   : > { %v2934_v20 = vadd.f32 %v2223_v15, %v2159_v10  ;;  %v2226_v21 = vadd.f32 %v2225_v19, %v2224_v16 }
 0x13a   : > { %v2936_v22 = vadd.f32 %v2226_v21, %v2162_v18 }
 0x13b   : > { %v2163_v23 = vpop.f32.mrb[24].mxu0 }
 0x13c   : > { %v2227_v24 = vpop.f32.mrb[24].mxu1  ;;  %v2164_v25 = vpop.f32.mrb[25].mxu0 }
 0x13d   : > { %v2165_v27 = vadd.f32 %v2164_v25, %v2163_v23  ;;  %v2228_v29 = vpop.f32.mrb[25].mxu1  ;;  %v2166_v30 = vpop.f32.mrb[26].mxu0 }
 0x13e   : > { %v2229_v31 = vadd.f32 %v2228_v29, %v2227_v24  ;;  %v2230_v32 = vpop.f32.mrb[26].mxu1  ;;  %v2167_v33 = vpop.f32.mrb[27].mxu0 }
 0x13f   : > { %v2168_v34 = vadd.f32 %v2167_v33, %v2166_v30  ;;  %v2231_v35 = vpop.f32.mrb[27].mxu1 }
 0x140   : > { %v2938_v36 = vadd.f32 %v2229_v31, %v2165_v27  ;;  %v2232_v37 = vadd.f32 %v2231_v35, %v2230_v32 }
 0x142   : > { %v2940_v38 = vadd.f32 %v2232_v37, %v2168_v34 }
 0x143   : > { %v2169_v39 = vpop.f32.mrb[28].mxu0 }
 0x144   : > { %v2233_v41 = vpop.f32.mrb[28].mxu1  ;;  %v2170_v43 = vpop.f32.mrb[29].mxu0 }
 0x145   : > { %v2171_v44 = vadd.f32 %v2170_v43, %v2169_v39  ;;  %v2234_v45 = vpop.f32.mrb[29].mxu1  ;;  %v2172_v46 = vpop.f32.mrb[30].mxu0 }
 0x146   : > { %v2235_v47 = vadd.f32 %v2234_v45, %v2233_v41  ;;  %v2236_v48 = vpop.f32.mrb[30].mxu1  ;;  %v2173_v49 = vpop.f32.mrb[31].mxu0 }
 0x147   : > { %v2174_v50 = vadd.f32 %v2173_v49, %v2172_v46  ;;  %v2237_v51 = vpop.f32.mrb[31].mxu1 }
 0x148   : > { %v2942_v52 = vadd.f32 %v2235_v47, %v2171_v44  ;;  %v2238_v53 = vadd.f32 %v2237_v51, %v2236_v48 }
 0x14a   : > { %v2944_v55 = vadd.f32 %v2238_v53, %v2174_v50 }
 0x14b   : > { %v2255_v57 = vpop.f32.mrb[32].mxu0 }
 0x14c   : > { %v2319_v58 = vpop.f32.mrb[32].mxu1  ;;  %v2256_v59 = vpop.f32.mrb[33].mxu0 }
 0x14d   : > { %v2257_v60 = vadd.f32 %v2256_v59, %v2255_v57  ;;  %v2320_v61 = vpop.f32.mrb[33].mxu1  ;;  %v2258_v62 = vpop.f32.mrb[34].mxu0 }
 0x14e   : > { %v2321_v63 = vadd.f32 %v2320_v61, %v2319_v58  ;;  %v2322_v0 = vpop.f32.mrb[34].mxu1  ;;  %v2259_v1 = vpop.f32.mrb[35].mxu0 }
 0x14f   : > { %v1372_v2 = vadd.f32 %v2257_v60, %v2914_v12  ;;  %v2260_v3 = vadd.f32 %v2259_v1, %v2258_v62  ;;  %v2323_v5 = vpop.f32.mrb[35].mxu1 }
 0x150   : > { %v2324_v7 = vadd.f32 %v2323_v5, %v2322_v0 }
 0x151   : > { %v1469_v8 = vadd.f32 %v2321_v63, %v1372_v2  ;;  %v1375_v9 = vadd.f32 %v2260_v3, %v2916_v14 }
 0x153   : > { %1533 = vst [vmem:[#allocation2] sm:$0xff] %v1469_v8  ;;  %v1472_v10 = vadd.f32 %v2324_v7, %v1375_v9  ;;  %v2261_v11 = vpop.f32.mrb[36].mxu0  ;;  %v1574_v16 = vmul.f32 %v1469_v8, %v1469_v8 }
 0x154   : > { %v2325_v13 = vpop.f32.mrb[36].mxu1  ;;  %v2262_v15 = vpop.f32.mrb[37].mxu0 }
 0x155   : > { %1534 = vst [vmem:[#allocation2 + $0x8] sm:$0xff] %v1472_v10  ;;  %v1550_v17 = vadd.f32 %v1472_v10, %v1469_v8  ;;  %v1575_v18 = vmul.f32 %v1472_v10, %v1472_v10  ;;  %v2263_v19 = vadd.f32 %v2262_v15, %v2261_v11  ;;  %v2326_v21 = vpop.f32.mrb[37].mxu1  ;;  %v2264_v23 = vpop.f32.mrb[38].mxu0 }
 0x156   : > { %v2327_v24 = vadd.f32 %v2326_v21, %v2325_v13  ;;  %v2328_v12 = vpop.f32.mrb[38].mxu1  ;;  %v2265_v25 = vpop.f32.mrb[39].mxu0 }
 0x157   : > { %v1590_v27 = vadd.f32 %v1575_v18, %v1574_v16  ;;  %v1380_v29 = vadd.f32 %v2263_v19, %v2918_v26  ;;  %v2266_v30 = vadd.f32 %v2265_v25, %v2264_v23  ;;  %v2329_v14 = vpop.f32.mrb[39].mxu1 }
 0x158   : > { %v2330_v31 = vadd.f32 %v2329_v14, %v2328_v12 }
 0x159   : > { %v1477_v32 = vadd.f32 %v2327_v24, %v1380_v29  ;;  %v1383_v33 = vadd.f32 %v2266_v30, %v2920_v28 }
 0x15b   : > { %1535 = vst [vmem:[#allocation2 + $0x10] sm:$0xff] %v1477_v32  ;;  %v1551_v34 = vadd.f32 %v1550_v17, %v1477_v32  ;;  %v1576_v35 = vmul.f32 %v1477_v32, %v1477_v32  ;;  %v1480_v37 = vadd.f32 %v2330_v31, %v1383_v33  ;;  %v2267_v39 = vpop.f32.mrb[40].mxu0 }
 0x15c   : > { %v2331_v41 = vpop.f32.mrb[40].mxu1  ;;  %v2268_v43 = vpop.f32.mrb[41].mxu0 }
 0x15d   : > { %v1591_v44 = vadd.f32 %v1590_v27, %v1576_v35  ;;  %1536 = vst [vmem:[#allocation2 + $0x18] sm:$0xff] %v1480_v37  ;;  %v1552_v45 = vadd.f32 %v1551_v34, %v1480_v37  ;;  %v1577_v46 = vmul.f32 %v1480_v37, %v1480_v37  ;;  %v2269_v47 = vadd.f32 %v2268_v43, %v2267_v39  ;;  %v2332_v48 = vpop.f32.mrb[41].mxu1  ;;  %v2270_v26 = vpop.f32.mrb[42].mxu0 }
 0x15e   : > { %v2333_v49 = vadd.f32 %v2332_v48, %v2331_v41  ;;  %v2334_v50 = vpop.f32.mrb[42].mxu1  ;;  %v2271_v51 = vpop.f32.mrb[43].mxu0 }
 0x15f   : > { %v1592_v53 = vadd.f32 %v1591_v44, %v1577_v46  ;;  %v1388_v28 = vadd.f32 %v2269_v47, %v2922_v40  ;;  %v2272_v57 = vadd.f32 %v2271_v51, %v2270_v26  ;;  %v2335_v58 = vpop.f32.mrb[43].mxu1 }
 0x160   : > { %v2336_v59 = vadd.f32 %v2335_v58, %v2334_v50 }
 0x161   : > { %v1485_v60 = vadd.f32 %v2333_v49, %v1388_v28  ;;  %v1391_v61 = vadd.f32 %v2272_v57, %v2924_v42 }
 0x163   : > { %1537 = vst [vmem:[#allocation2 + $0x20] sm:$0xff] %v1485_v60  ;;  %v1553_v62 = vadd.f32 %v1552_v45, %v1485_v60  ;;  %v1578_v63 = vmul.f32 %v1485_v60, %v1485_v60  ;;  %v1488_v0 = vadd.f32 %v2336_v59, %v1391_v61  ;;  %v2273_v1 = vpop.f32.mrb[44].mxu0 }
 0x164   : > { %v2337_v2 = vpop.f32.mrb[44].mxu1  ;;  %v2274_v3 = vpop.f32.mrb[45].mxu0 }
 0x165   : > { %v1593_v5 = vadd.f32 %v1592_v53, %v1578_v63  ;;  %1538 = vst [vmem:[#allocation2 + $0x28] sm:$0xff] %v1488_v0  ;;  %v1554_v7 = vadd.f32 %v1553_v62, %v1488_v0  ;;  %v1579_v8 = vmul.f32 %v1488_v0, %v1488_v0  ;;  %v2275_v9 = vadd.f32 %v2274_v3, %v2273_v1  ;;  %v2338_v10 = vpop.f32.mrb[45].mxu1  ;;  %v2276_v40 = vpop.f32.mrb[46].mxu0 }
 0x166   : > { %v2339_v11 = vadd.f32 %v2338_v10, %v2337_v2  ;;  %v2340_v13 = vpop.f32.mrb[46].mxu1  ;;  %v2277_v15 = vpop.f32.mrb[47].mxu0 }
 0x167   : > { %v1594_v16 = vadd.f32 %v1593_v5, %v1579_v8  ;;  %v1396_v42 = vadd.f32 %v2275_v9, %v2926_v54  ;;  %v2278_v17 = vadd.f32 %v2277_v15, %v2276_v40  ;;  %v2341_v18 = vpop.f32.mrb[47].mxu1 }
 0x168   : > { %v2342_v19 = vadd.f32 %v2341_v18, %v2340_v13 }
 0x169   : > { %v1493_v21 = vadd.f32 %v2339_v11, %v1396_v42  ;;  %v1399_v23 = vadd.f32 %v2278_v17, %v2928_v56 }
 0x16b   : > { %1539 = vst [vmem:[#allocation2 + $0x30] sm:$0xff] %v1493_v21  ;;  %v1555_v24 = vadd.f32 %v1554_v7, %v1493_v21  ;;  %v1580_v12 = vmul.f32 %v1493_v21, %v1493_v21  ;;  %v1496_v25 = vadd.f32 %v2342_v19, %v1399_v23  ;;  %v2279_v27 = vpop.f32.mrb[48].mxu0 }
 0x16c   : > { %v2343_v29 = vpop.f32.mrb[48].mxu1  ;;  %v2280_v30 = vpop.f32.mrb[49].mxu0 }
 0x16d   : > { %v1595_v14 = vadd.f32 %v1594_v16, %v1580_v12  ;;  %1540 = vst [vmem:[#allocation2 + $0x38] sm:$0xff] %v1496_v25  ;;  %v1556_v31 = vadd.f32 %v1555_v24, %v1496_v25  ;;  %v1581_v32 = vmul.f32 %v1496_v25, %v1496_v25  ;;  %v2281_v33 = vadd.f32 %v2280_v30, %v2279_v27  ;;  %v2344_v34 = vpop.f32.mrb[49].mxu1  ;;  %v2282_v54 = vpop.f32.mrb[50].mxu0 }
 0x16e   : > { %v2345_v35 = vadd.f32 %v2344_v34, %v2343_v29  ;;  %v2346_v37 = vpop.f32.mrb[50].mxu1  ;;  %v2283_v39 = vpop.f32.mrb[51].mxu0 }
 0x16f   : > { %v1596_v41 = vadd.f32 %v1595_v14, %v1581_v32  ;;  %v1404_v56 = vadd.f32 %v2281_v33, %v2930_v4  ;;  %v2284_v43 = vadd.f32 %v2283_v39, %v2282_v54  ;;  %v2347_v44 = vpop.f32.mrb[51].mxu1 }
 0x170   : > { %v2348_v45 = vadd.f32 %v2347_v44, %v2346_v37 }
 0x171   : > { %v1501_v46 = vadd.f32 %v2345_v35, %v1404_v56  ;;  %v1407_v47 = vadd.f32 %v2284_v43, %v2932_v6 }
 0x173   : > { %1541 = vst [vmem:[#allocation2 + $0x40] sm:$0xff] %v1501_v46  ;;  %v1557_v48 = vadd.f32 %v1556_v31, %v1501_v46  ;;  %v1582_v26 = vmul.f32 %v1501_v46, %v1501_v46  ;;  %v1504_v49 = vadd.f32 %v2348_v45, %v1407_v47  ;;  %v2285_v50 = vpop.f32.mrb[52].mxu0 }
 0x174   : > { %v2349_v51 = vpop.f32.mrb[52].mxu1  ;;  %v2286_v53 = vpop.f32.mrb[53].mxu0 }
 0x175   : > { %v1597_v28 = vadd.f32 %v1596_v41, %v1582_v26  ;;  %1542 = vst [vmem:[#allocation2 + $0x48] sm:$0xff] %v1504_v49  ;;  %v1558_v57 = vadd.f32 %v1557_v48, %v1504_v49  ;;  %v1583_v58 = vmul.f32 %v1504_v49, %v1504_v49  ;;  %v2287_v59 = vadd.f32 %v2286_v53, %v2285_v50  ;;  %v2350_v60 = vpop.f32.mrb[53].mxu1  ;;  %v2288_v4 = vpop.f32.mrb[54].mxu0 }
 0x176   : > { %v2351_v61 = vadd.f32 %v2350_v60, %v2349_v51  ;;  %v2352_v62 = vpop.f32.mrb[54].mxu1  ;;  %v2289_v63 = vpop.f32.mrb[55].mxu0 }
 0x177   : > { %v1598_v0 = vadd.f32 %v1597_v28, %v1583_v58  ;;  %v1412_v6 = vadd.f32 %v2287_v59, %v2934_v20  ;;  %v2290_v1 = vadd.f32 %v2289_v63, %v2288_v4  ;;  %v2353_v2 = vpop.f32.mrb[55].mxu1 }
 0x178   : > { %v2354_v3 = vadd.f32 %v2353_v2, %v2352_v62 }
 0x179   : > { %v1509_v5 = vadd.f32 %v2351_v61, %v1412_v6  ;;  %v1415_v7 = vadd.f32 %v2290_v1, %v2936_v22 }
 0x17b   : > { %1543 = vst [vmem:[#allocation2 + $0x50] sm:$0xff] %v1509_v5  ;;  %v1559_v8 = vadd.f32 %v1558_v57, %v1509_v5  ;;  %v1584_v9 = vmul.f32 %v1509_v5, %v1509_v5  ;;  %v1512_v10 = vadd.f32 %v2354_v3, %v1415_v7  ;;  %v2291_v40 = vpop.f32.mrb[56].mxu0  ;;  %v1549_v3 = vld [vmem:[#allocation3] sm:$0x1]  ;;  %v1573_v7 = vld [vmem:[#allocation4] sm:$0x1] }
 0x17c   : > { %v2355_v11 = vpop.f32.mrb[56].mxu1  ;;  %v2292_v13 = vpop.f32.mrb[57].mxu0 }
 0x17d   : > { %v1599_v15 = vadd.f32 %v1598_v0, %v1584_v9  ;;  %1544 = vst [vmem:[#allocation2 + $0x58] sm:$0xff] %v1512_v10  ;;  %v1560_v16 = vadd.f32 %v1559_v8, %v1512_v10  ;;  %v1585_v42 = vmul.f32 %v1512_v10, %v1512_v10  ;;  %v2293_v17 = vadd.f32 %v2292_v13, %v2291_v40  ;;  %v2356_v18 = vpop.f32.mrb[57].mxu1  ;;  %v2294_v20 = vpop.f32.mrb[58].mxu0 }
 0x17e   : > { %v2357_v19 = vadd.f32 %v2356_v18, %v2355_v11  ;;  %v2358_v21 = vpop.f32.mrb[58].mxu1  ;;  %v2295_v23 = vpop.f32.mrb[59].mxu0 }
 0x17f   : > { %v1600_v24 = vadd.f32 %v1599_v15, %v1585_v42  ;;  %v1420_v22 = vadd.f32 %v2293_v17, %v2938_v36  ;;  %v2296_v12 = vadd.f32 %v2295_v23, %v2294_v20  ;;  %v2359_v25 = vpop.f32.mrb[59].mxu1 }
 0x180   : > { %v2360_v27 = vadd.f32 %v2359_v25, %v2358_v21 }
 0x181   : > { %v1517_v29 = vadd.f32 %v2357_v19, %v1420_v22  ;;  %v1423_v30 = vadd.f32 %v2296_v12, %v2940_v38 }
 0x183   : > { %1545 = vst [vmem:[#allocation2 + $0x60] sm:$0xff] %v1517_v29  ;;  %v1561_v14 = vadd.f32 %v1560_v16, %v1517_v29  ;;  %v1586_v31 = vmul.f32 %v1517_v29, %v1517_v29  ;;  %v1520_v32 = vadd.f32 %v2360_v27, %v1423_v30  ;;  %v2297_v33 = vpop.f32.mrb[60].mxu0 }
 0x184   : > { %v2361_v34 = vpop.f32.mrb[60].mxu1  ;;  %v2298_v54 = vpop.f32.mrb[61].mxu0 }
 0x185   : > { %v1601_v35 = vadd.f32 %v1600_v24, %v1586_v31  ;;  %1546 = vst [vmem:[#allocation2 + $0x68] sm:$0xff] %v1520_v32  ;;  %v1562_v37 = vadd.f32 %v1561_v14, %v1520_v32  ;;  %v1587_v39 = vmul.f32 %v1520_v32, %v1520_v32  ;;  %v2299_v41 = vadd.f32 %v2298_v54, %v2297_v33  ;;  %v2362_v56 = vpop.f32.mrb[61].mxu1  ;;  %v2300_v36 = vpop.f32.mrb[62].mxu0 }
 0x186   : > { %v2363_v43 = vadd.f32 %v2362_v56, %v2361_v34  ;;  %v2364_v44 = vpop.f32.mrb[62].mxu1  ;;  %v2301_v45 = vpop.f32.mrb[63].mxu0 }
 0x187   : > { %v1602_v46 = vadd.f32 %v1601_v35, %v1587_v39  ;;  %v1428_v38 = vadd.f32 %v2299_v41, %v2942_v52  ;;  %v2302_v47 = vadd.f32 %v2301_v45, %v2300_v36  ;;  %v2365_v48 = vpop.f32.mrb[63].mxu1 }
 0x188   : > { %v2366_v26 = vadd.f32 %v2365_v48, %v2364_v44 }
 0x189   : > { %v1525_v49 = vadd.f32 %v2363_v43, %v1428_v38  ;;  %v1431_v50 = vadd.f32 %v2302_v47, %v2944_v55 }
 0x18b   : > { %1547 = vst [vmem:[#allocation2 + $0x70] sm:$0xff] %v1525_v49  ;;  %v1563_v51 = vadd.f32 %v1562_v37, %v1525_v49  ;;  %v1588_v53 = vmul.f32 %v1525_v49, %v1525_v49  ;;  %v1528_v28 = vadd.f32 %v2366_v26, %v1431_v50 }
 0x18d   : > { %v1603_v57 = vadd.f32 %v1602_v46, %v1588_v53  ;;  %1548 = vst [vmem:[#allocation2 + $0x78] sm:$0xff] %v1528_v28  ;;  %v1564_v58 = vadd.f32 %v1563_v51, %v1528_v28  ;;  %v1589_v59 = vmul.f32 %v1528_v28, %v1528_v28 }
 0x18f   : > { %v1565_v60 = vrot.slane %v1564_v58, 4  ;;  %v1604_v4 = vadd.f32 %v1603_v57, %v1589_v59 }
 0x191   : > { %v1566_v61 = vadd.f32 %v1565_v60, %v1564_v58  ;;  %v1605_v62 = vrot.slane %v1604_v4, 4 }
 0x193   : > { %v1567_v63 = vrot.slane %v1566_v61, 2  ;;  %v1606_v52 = vadd.f32 %v1605_v62, %v1604_v4 }
 0x195   : > { %v1568_v0 = vadd.f32 %v1567_v63, %v1566_v61  ;;  %v1607_v6 = vrot.slane %v1606_v52, 2 }
 0x197   : > { %v1569_v1 = vrot.slane %v1568_v0, 1  ;;  %v1608_v2 = vadd.f32 %v1607_v6, %v1606_v52 }
 0x199   : > { %v1570_v55 = vadd.f32 %v1569_v1, %v1568_v0  ;;  %v1609_v5 = vrot.slane %v1608_v2, 1 }
 0x19b   : > { %v1571_v8 = vadd.f32 %v1570_v55, %v1549_v3  ;;  %v1610_v9 = vadd.f32 %v1609_v5, %v1608_v2 }
 0x19d   : > { %1572 = vst [vmem:[#allocation3] sm:$0x1] %v1571_v8  ;;  %v1611_v10 = vadd.f32 %v1610_v9, %v1573_v7 }
 0x19f   : > { %1612 = vst [vmem:[#allocation4] sm:$0x1] %v1611_v10 }
 0x1a0 PF: > { %p1613_p6 = scmp.eq.s32.totalorder %s2472_s15, 1 }
 0x1a1   : > { %v1625_v20 = vld [vmem:[%s3041_s2] sm:$0x1] (%p1613_p6) }
 0x1a2   : > { %1617 = sbr.rel (!%p1613_p6) target bundleno = 457 (0x1c9), region = 48  ;;  %v1630_v23 = vld [vmem:[%s3042_s3] sm:$0x1] (%p1613_p6) }
 0x1a4   : > { %v1618_v40 = vld [vmem:[#allocation3] sm:$0x1] (%p1613_p6) }
 0x1a5   : > { %v1619_v13 = vmul.f32 (%p1613_p6), 0.0078125, %v1618_v40 }
 0x1a6   : > { %v1620_v11 = vld [vmem:[#allocation4] sm:$0x1] (%p1613_p6) }
 0x1a7   : > { %v1621_v15 = vmul.f32 (%p1613_p6), 0.0078125, %v1620_v11  ;;  %v1622_v16 = vmul.f32 (%p1613_p6), %v1619_v13, %v1619_v13 }
 0x1a9   : > { %v1623_v42 = vsub.f32 %v1621_v15, %v1622_v16 }
 0x1ab   : > { %v1624_v17 = vmax.f32 %v1623_v42, 0.0 }
 0x1ad   : > { %v1626_v18 = vadd.f32 1e-05, %v1624_v17 }
 0x1af   : > { %2456 = vrsqrt.f32 %v1626_v18 }
 0x1b9   : > { %v2457_v19 = vpop.eup %2456 }
 0x1ba   : > { %v1628_v21 = vmul.f32 %v2457_v19, %v1625_v20 }
 0x1bc   : > { %1629 = vst [vmem:[#allocation5] sm:$0x1] %v1628_v21 }
 0x1c3   : > { %v1631_v24 = vld [vmem:[#allocation5] sm:$0x1] }
 0x1c4   : > { %v1632_v22 = vmul.f32 %v1631_v24, %v1619_v13 }
 0x1c6   : > { %v1633_v12 = vsub.f32 %v1630_v23, %v1632_v22 }
 0x1c8   : > { %1634 = vst [vmem:[#allocation6] sm:$0x1] %v1633_v12 }
 0x1c9 PF: > { %p2023_p7 = scmp.ne.s32.totalorder %s2472_s15, 1 }
 0x1ca   : > { %v1640_v25 = vld [vmem:[#allocation2] sm:$0xff] (!%p2023_p7)  ;;  %v1641_v27 = vld [vmem:[#allocation2 + $0x8] sm:$0xff] (!%p2023_p7)  ;;  %v1642_v32 = vld [vmem:[#allocation2 + $0x10] sm:$0xff] (!%p2023_p7) }
 0x1cb   : > { %1637 = sbr.rel (%p2023_p7) target bundleno = 484 (0x1e4), region = 52  ;;  %v2970_v29 = vld [vmem:[#allocation5] ss:$0 sm:$0xff] (!%p2023_p7)  ;;  %v1643_v33 = vld [vmem:[#allocation2 + $0x18] sm:$0xff] (!%p2023_p7)  ;;  %v1645_v37 = vld [vmem:[#allocation2 + $0x28] sm:$0xff] (!%p2023_p7) }
 0x1cc   : > { %v1663_v30 = vmul.f32 (!%p2023_p7), %v2970_v29, %v1640_v25  ;;  %v1664_v14 = vmul.f32 (!%p2023_p7), %v2970_v29, %v1641_v27  ;;  %v1665_v34 = vmul.f32 (!%p2023_p7), %v2970_v29, %v1642_v32  ;;  %v1666_v54 = vmul.f32 (!%p2023_p7), %v2970_v29, %v1643_v33  ;;  %v1644_v35 = vld [vmem:[#allocation2 + $0x20] sm:$0xff] (!%p2023_p7)  ;;  %v1646_v39 = vld [vmem:[#allocation2 + $0x30] sm:$0xff] (!%p2023_p7)  ;;  %v1647_v44 = vld [vmem:[#allocation2 + $0x38] sm:$0xff] (!%p2023_p7) }
 0x1cd   : > { %v1667_v36 = vmul.f32 (!%p2023_p7), %v2970_v29, %v1644_v35  ;;  %v1668_v43 = vmul.f32 (!%p2023_p7), %v2970_v29, %v1645_v37  ;;  %v1669_v38 = vmul.f32 (!%p2023_p7), %v2970_v29, %v1646_v39  ;;  %v1670_v47 = vmul.f32 (!%p2023_p7), %v2970_v29, %v1647_v44  ;;  %v1648_v58 = vld [vmem:[#allocation2 + $0x40] sm:$0xff] (!%p2023_p7)  ;;  %v1649_v62 = vld [vmem:[#allocation2 + $0x48] sm:$0xff] (!%p2023_p7)  ;;  %v1650_v1 = vld [vmem:[#allocation2 + $0x50] sm:$0xff] (!%p2023_p7) }
 0x1ce   : > { %v1651_v2 = vld [vmem:[#allocation2 + $0x58] sm:$0xff] (!%p2023_p7)  ;;  %v1671_v7 = vmul.f32 (!%p2023_p7), %v2970_v29, %v1648_v58  ;;  %v1652_v8 = vld [vmem:[#allocation2 + $0x60] sm:$0xff] (!%p2023_p7)  ;;  %v1653_v9 = vld [vmem:[#allocation2 + $0x68] sm:$0xff] (!%p2023_p7)  ;;  %v1672_v13 = vmul.f32 (!%p2023_p7), %v2970_v29, %v1649_v62  ;;  %v1673_v17 = vmul.f32 (!%p2023_p7), %v2970_v29, %v1650_v1 }
 0x1cf   : > { %v2974_v31 = vld [vmem:[#allocation6] ss:$0 sm:$0xff] (!%p2023_p7)  ;;  %v1654_v15 = vld [vmem:[#allocation2 + $0x70] sm:$0xff] (!%p2023_p7)  ;;  %v1674_v18 = vmul.f32 (!%p2023_p7), %v2970_v29, %v1651_v2  ;;  %v1655_v20 = vld [vmem:[#allocation2 + $0x78] sm:$0xff] (!%p2023_p7)  ;;  %v1675_v23 = vmul.f32 (!%p2023_p7), %v2970_v29, %v1652_v8  ;;  %v1676_v24 = vmul.f32 (!%p2023_p7), %v2970_v29, %v1653_v9 }
 0x1d0   : > { %v1686_v41 = vadd.f32 (!%p2023_p7), %v2974_v31, %v1663_v30  ;;  %v1687_v56 = vadd.f32 (!%p2023_p7), %v2974_v31, %v1664_v14  ;;  %v1688_v45 = vadd.f32 (!%p2023_p7), %v2974_v31, %v1665_v34  ;;  %v1689_v46 = vadd.f32 (!%p2023_p7), %v2974_v31, %v1666_v54 }
 0x1d1   : > { %v1690_v49 = vadd.f32 (!%p2023_p7), %v2974_v31, %v1667_v36  ;;  %v1691_v50 = vadd.f32 (!%p2023_p7), %v2974_v31, %v1668_v43  ;;  %v1692_v28 = vadd.f32 (!%p2023_p7), %v2974_v31, %v1669_v38  ;;  %v1693_v57 = vadd.f32 (!%p2023_p7), %v2974_v31, %v1670_v47 }
 0x1d2   : > { %v1702_v48 = vmul.f32 0.2, %v1686_v41  ;;  %v1703_v26 = vmul.f32 0.2, %v1687_v56  ;;  %v1704_v51 = vmul.f32 0.2, %v1688_v45  ;;  %v1694_v42 = vadd.f32 %v2974_v31, %v1671_v7 }
 0x1d3   : > { %v1705_v53 = vmul.f32 0.2, %v1689_v46  ;;  %v1706_v4 = vmul.f32 0.2, %v1690_v49  ;;  %v1707_v61 = vmul.f32 0.2, %v1691_v50  ;;  %v1695_v21 = vadd.f32 %v2974_v31, %v1672_v13 }
 0x1d4   : > { %v1718_v59 = vmax.f32 %v1686_v41, %v1702_v48  ;;  %v1719_v60 = vmax.f32 %v1687_v56, %v1703_v26  ;;  %v1720_v63 = vmax.f32 %v1688_v45, %v1704_v51  ;;  %v1708_v0 = vmul.f32 0.2, %v1692_v28 }
 0x1d5   : > { %v1721_v52 = vmax.f32 %v1689_v46, %v1705_v53  ;;  %v1709_v6 = vmul.f32 0.2, %v1693_v57  ;;  %v1722_v55 = vmax.f32 %v1690_v49, %v1706_v4  ;;  %v1723_v5 = vmax.f32 %v1691_v50, %v1707_v61 }
 0x1d6   : > { %v2067_v3 = vpack.c.bf16 %v1719_v60, %v1718_v59  ;;  %v1724_v40 = vmax.f32 %v1692_v28, %v1708_v0  ;;  %v1710_v22 = vmul.f32 0.2, %v1694_v42  ;;  %v1696_v12 = vadd.f32 %v2974_v31, %v1673_v17 }
 0x1d7   : > { %v2072_v10 = vpack.c.bf16 %v1721_v52, %v1720_v63  ;;  %v1725_v11 = vmax.f32 %v1693_v57, %v1709_v6  ;;  %v2077_v16 = vpack.c.bf16 %v1723_v5, %v1722_v55  ;;  %v1697_v25 = vadd.f32 %v2974_v31, %v1674_v18 }
 0x1d8   : > { %2068 = vst [vmem:[%s3043_s4] sm:$0xff] %v2067_v3   ;;  %v1677_v27 = vmul.f32 %v2970_v29, %v1654_v15  ;;  %v1711_v30 = vmul.f32 0.2, %v1695_v21  ;;  %v1698_v14 = vadd.f32 %v2974_v31, %v1675_v23  ;;  %v1699_v32 = vadd.f32 %v2974_v31, %v1676_v24 }
 0x1d9   : > { %2104 = vst [vmem:[%s3043_s4 + $0x8] sm:$0xff] %v2072_v10   ;;  %v2082_v19 = vpack.c.bf16 %v1725_v11, %v1724_v40  ;;  %2105 = vst [vmem:[%s3043_s4 + $0x10] sm:$0xff] %v2077_v16   ;;  %v1678_v33 = vmul.f32 %v2970_v29, %v1655_v20  ;;  %v1726_v34 = vmax.f32 %v1694_v42, %v1710_v22  ;;  %v1712_v54 = vmul.f32 0.2, %v1696_v12 }
 0x1da   : > { %v1713_v35 = vmul.f32 0.2, %v1697_v25  ;;  %v1700_v37 = vadd.f32 %v2974_v31, %v1677_v27  ;;  %v1727_v39 = vmax.f32 %v1695_v21, %v1711_v30  ;;  %v1714_v41 = vmul.f32 0.2, %v1698_v14 }
 0x1db   : > { %2106 = vst [vmem:[%s3043_s4 + $0x18] sm:$0xff] %v2082_v19   ;;  %v1715_v56 = vmul.f32 0.2, %v1699_v32  ;;  %v1701_v36 = vadd.f32 %v2974_v31, %v1678_v33  ;;  %v1728_v43 = vmax.f32 %v1696_v12, %v1712_v54 }
 0x1dc   : > { %v1729_v44 = vmax.f32 %v1697_v25, %v1713_v35  ;;  %v1716_v45 = vmul.f32 0.2, %v1700_v37  ;;  %v2087_v46 = vpack.c.bf16 %v1727_v39, %v1726_v34  ;;  %v1730_v38 = vmax.f32 %v1698_v14, %v1714_v41 }
 0x1dd   : > { %v1731_v47 = vmax.f32 %v1699_v32, %v1715_v56  ;;  %v1717_v48 = vmul.f32 0.2, %v1701_v36 }
 0x1de   : > { %v2092_v26 = vpack.c.bf16 %v1729_v44, %v1728_v43  ;;  %v1732_v49 = vmax.f32 %v1700_v37, %v1716_v45  ;;  %2107 = vst [vmem:[%s3043_s4 + $0x20] sm:$0xff] %v2087_v46  }
 0x1df   : > { %v2097_v29 = vpack.c.bf16 %v1731_v47, %v1730_v38  ;;  %v1733_v50 = vmax.f32 %v1701_v36, %v1717_v48 }
 0x1e0   : > { %2108 = vst [vmem:[%s3043_s4 + $0x28] sm:$0xff] %v2092_v26  }
 0x1e1   : > { %2109 = vst [vmem:[%s3043_s4 + $0x30] sm:$0xff] %v2097_v29   ;;  %v2102_v31 = vpack.c.bf16 %v1733_v50, %v1732_v49 }
 0x1e3   : > { %2110 = vst [vmem:[%s3043_s4 + $0x38] sm:$0xff] %v2102_v31  }
 0x1e4 PF: > { %s14_s17 = sadd.s32 1, %s2480_s17   ;;  %s3044_s15 = smov %s2476_s16 }
 0x1e5   : > { %p11_p8 = scmp.ge.s32.totalorder %s14_s17, 4   ;;  %s3045_s16 = smov %s3047_s18 }
 0x1e7   :  { %13 = sbr.rel (!%p11_p8) target bundleno = 2 (0x2), region = 84 }

// kernel: discriminator_forward.7
= control target key start
LH: loop header
LB: loop body
LE: loop exit
PB: predicated region body
PF: predicated region fallthrough
CT: control target
= control target key end

     0   :  { %s3540_s15 = smov 0   ;;  %s3542_s16 = smov 0   ;;  %s4503_s0 = inlined_call_operand.vmem [shape: bf16[32,2048], index: 0, kind: input, shape index: {}]   ;;  %s4504_s1 = inlined_call_operand.vmem [shape: bf16[2048,256], index: 1, kind: input, shape index: {}]   ;;  %s4505_s2 = inlined_call_operand.vmem [shape: f32[1,256], index: 2, kind: input, shape index: {}]   ;;  %s4506_s3 = inlined_call_operand.vmem [shape: f32[1,256], index: 3, kind: input, shape index: {}]   ;;  %s4507_s4 = inlined_call_operand.vmem [shape: bf16[32,256], index: 4, kind: output, shape index: {}]  }
   0x1   :  { %s3544_s17 = smov 0  }
   0x2 LB: > { %s26_s18 = sadd.s32 1, %s3507_s16  ;;  %p2714_p0 = scmp.ge.s32.totalorder %s3511_s17, 1  ;;  %s3511_s17 = sphi %s3544_s17, %s14_s17   ;;  %s3507_s16 = sphi %s3542_s16, %s4509_s16   ;;  %s3503_s15 = sphi %s3540_s15, %s4508_s15  }
   0x3   : > { %p28_p1 = scmp.ge.s32.totalorder %s26_s18, 2  ;;  %p186_p2 = scmp.lt.s32.totalorder %s3511_s17, 3 }
   0x5   : > { %s4511_s18 = smov (%p28_p1, %s26_s18), 0  ;;  %p187_p3 = pnand %p2714_p0, %p186_p2 }
   0x6   : > { %p237_p4 = scmp.eq.s32.totalorder (!%p187_p3), %s3503_s15, 0 }
   0x7   : > { %190 = sbr.rel (%p187_p3) target bundleno = 594 (0x252), region = 36 }
   0xe   : > { %242 = sbr.rel (!%p237_p4) target bundleno = 21 (0x15), region = 40  ;;  %v243_v0 = vlaneseq (%p237_p4)  ;;  %v3513_v1 = vmov (%p237_p4), 0.0  }
  0x10   : > { %vm245_vm0 = vcmp.lt.s32.totalorder (%p237_p4), %v243_v0, 256 }
  0x11   : > { %247 = vst.msk [vmem:[#allocation3] sm:$0x3] (%p237_p4), %vm245_vm0, %v3513_v1  ;;  %248 = vst.msk [vmem:[#allocation4] sm:$0x3] (%p237_p4), %vm245_vm0, %v3513_v1 }
  0x15 PF: > { %p2716_p5 = scmp.ne.s32.totalorder %s3503_s15, 0 }
  0x16   : > { %v3103_v2 = vld [vmem:[%s4504_s1 + $0x4] ss:$8 sps:$4 sm:$0xff] (!%p2716_p5)   ;;  %v3107_v4 = vld [vmem:[%s4504_s1] ss:$8 sps:$4 sm:$0xff] (!%p2716_p5)   ;;  %v3109_v6 = vld [vmem:[%s4504_s1 + $0x14] ss:$8 sps:$4 sm:$0xff] (!%p2716_p5)  }
  0x17   : > { %251 = sbr.rel (%p2716_p5) target bundleno = 530 (0x212), region = 44  ;;  %v3105_v3 = vld [vmem:[%s4504_s1 + $0x404] ss:$8 sps:$4 sm:$0xff] (!%p2716_p5)   ;;  %1980 = vmatprep.subr.bf16.mxu1 (!%p2716_p5), %v3103_v2  ;;  %v3108_v5 = vld [vmem:[%s4504_s1 + $0x400] ss:$8 sps:$4 sm:$0xff] (!%p2716_p5)  }
  0x18   : > { %2192 = vmatprep.subr.bf16.mxu0 (!%p2716_p5), %v3105_v3  ;;  %1981 = vmatpush1.bf16.msra.mxu1 (!%p2716_p5), %v3107_v4  ;;  %v3111_v7 = vld [vmem:[%s4504_s1 + $0x414] ss:$8 sps:$4 sm:$0xff] (!%p2716_p5)   ;;  %v3113_v8 = vld [vmem:[%s4504_s1 + $0x10] ss:$8 sps:$4 sm:$0xff] (!%p2716_p5)   ;;  %v3115_v10 = vld [vmem:[%s4504_s1 + $0x24] ss:$8 sps:$4 sm:$0xff] (!%p2716_p5)  }
  0x19   : > { %2193 = vmatpush1.bf16.msra.mxu0 (!%p2716_p5), %v3108_v5  ;;  %1982 = vmatprep.subr.bf16.mxu1 (!%p2716_p5), %v3109_v6  ;;  %v3114_v9 = vld [vmem:[%s4504_s1 + $0x410] ss:$8 sps:$4 sm:$0xff] (!%p2716_p5)   ;;  %v3117_v11 = vld [vmem:[%s4504_s1 + $0x424] ss:$8 sps:$4 sm:$0xff] (!%p2716_p5)   ;;  %v3119_v12 = vld [vmem:[%s4504_s1 + $0x20] ss:$8 sps:$4 sm:$0xff] (!%p2716_p5)  }
  0x1a   : > { %2194 = vmatprep.subr.bf16.mxu0 (!%p2716_p5), %v3111_v7  ;;  %v3120_v13 = vld [vmem:[%s4504_s1 + $0x420] ss:$8 sps:$4 sm:$0xff] (!%p2716_p5)   ;;  %v3121_v14 = vld [vmem:[%s4504_s1 + $0x34] ss:$8 sps:$4 sm:$0xff] (!%p2716_p5)   ;;  %v3125_v16 = vld [vmem:[%s4504_s1 + $0x30] ss:$8 sps:$4 sm:$0xff] (!%p2716_p5)  }
  0x1b   : > { %v3123_v15 = vld [vmem:[%s4504_s1 + $0x434] ss:$8 sps:$4 sm:$0xff] (!%p2716_p5)   ;;  %v3126_v17 = vld [vmem:[%s4504_s1 + $0x430] ss:$8 sps:$4 sm:$0xff] (!%p2716_p5)   ;;  %v3127_v18 = vld [vmem:[%s4504_s1 + $0x44] ss:$8 sps:$4 sm:$0xff] (!%p2716_p5)  }
  0x1c   : > { %1983 = vmatpush1.bf16.msra.mxu1 (!%p2716_p5), %v3113_v8  ;;  %v3129_v19 = vld [vmem:[%s4504_s1 + $0x444] ss:$8 sps:$4 sm:$0xff] (!%p2716_p5)   ;;  %v3131_v20 = vld [vmem:[%s4504_s1 + $0x40] ss:$8 sps:$4 sm:$0xff] (!%p2716_p5)   ;;  %v3133_v22 = vld [vmem:[%s4504_s1 + $0x54] ss:$8 sps:$4 sm:$0xff] (!%p2716_p5)  }
  0x1d   : > { %2195 = vmatpush1.bf16.msra.mxu0 (!%p2716_p5), %v3114_v9  ;;  %1984 = vmatprep.subr.bf16.mxu1 (!%p2716_p5), %v3115_v10  ;;  %v3132_v21 = vld [vmem:[%s4504_s1 + $0x440] ss:$8 sps:$4 sm:$0xff] (!%p2716_p5)   ;;  %v3135_v23 = vld [vmem:[%s4504_s1 + $0x454] ss:$8 sps:$4 sm:$0xff] (!%p2716_p5)   ;;  %v3137_v24 = vld [vmem:[%s4504_s1 + $0x50] ss:$8 sps:$4 sm:$0xff] (!%p2716_p5)  }
  0x1e   : > { %2196 = vmatprep.subr.bf16.mxu0 %v3117_v11  ;;  %v3138_v25 = vld [vmem:[%s4504_s1 + $0x450] ss:$8 sps:$4 sm:$0xff]   ;;  %v3139_v26 = vld [vmem:[%s4504_s1 + $0x64] ss:$8 sps:$4 sm:$0xff]   ;;  %v3143_v28 = vld [vmem:[%s4504_s1 + $0x60] ss:$8 sps:$4 sm:$0xff]  }
  0x1f   : > { %v3141_v27 = vld [vmem:[%s4504_s1 + $0x464] ss:$8 sps:$4 sm:$0xff]   ;;  %v3144_v29 = vld [vmem:[%s4504_s1 + $0x460] ss:$8 sps:$4 sm:$0xff]   ;;  %v3145_v30 = vld [vmem:[%s4504_s1 + $0x74] ss:$8 sps:$4 sm:$0xff]  }
  0x20   : > { %1985 = vmatpush1.bf16.msra.mxu1 %v3119_v12  ;;  %v3147_v31 = vld [vmem:[%s4504_s1 + $0x474] ss:$8 sps:$4 sm:$0xff]   ;;  %v3149_v32 = vld [vmem:[%s4504_s1 + $0x70] ss:$8 sps:$4 sm:$0xff]   ;;  %v3151_v34 = vld [vmem:[%s4504_s1 + $0x84] ss:$8 sps:$4 sm:$0xff]  }
  0x21   : > { %2197 = vmatpush1.bf16.msra.mxu0 %v3120_v13  ;;  %1986 = vmatprep.subr.bf16.mxu1 %v3121_v14  ;;  %v3150_v33 = vld [vmem:[%s4504_s1 + $0x470] ss:$8 sps:$4 sm:$0xff]   ;;  %v3153_v35 = vld [vmem:[%s4504_s1 + $0x484] ss:$8 sps:$4 sm:$0xff]   ;;  %v3155_v36 = vld [vmem:[%s4504_s1 + $0x80] ss:$8 sps:$4 sm:$0xff]  }
  0x22   : > { %2198 = vmatprep.subr.bf16.mxu0 %v3123_v15  ;;  %v3156_v37 = vld [vmem:[%s4504_s1 + $0x480] ss:$8 sps:$4 sm:$0xff]   ;;  %v3157_v38 = vld [vmem:[%s4504_s1 + $0x94] ss:$8 sps:$4 sm:$0xff]   ;;  %v3161_v40 = vld [vmem:[%s4504_s1 + $0x90] ss:$8 sps:$4 sm:$0xff]  }
  0x23   : > { %v3159_v39 = vld [vmem:[%s4504_s1 + $0x494] ss:$8 sps:$4 sm:$0xff]   ;;  %v3162_v41 = vld [vmem:[%s4504_s1 + $0x490] ss:$8 sps:$4 sm:$0xff]   ;;  %v3163_v42 = vld [vmem:[%s4504_s1 + $0xa4] ss:$8 sps:$4 sm:$0xff]  }
  0x24   : > { %1987 = vmatpush1.bf16.msra.mxu1 %v3125_v16  ;;  %v3165_v43 = vld [vmem:[%s4504_s1 + $0x4a4] ss:$8 sps:$4 sm:$0xff]   ;;  %v3167_v44 = vld [vmem:[%s4504_s1 + $0xa0] ss:$8 sps:$4 sm:$0xff]   ;;  %v3169_v46 = vld [vmem:[%s4504_s1 + $0xb4] ss:$8 sps:$4 sm:$0xff]  }
  0x25   : > { %2199 = vmatpush1.bf16.msra.mxu0 %v3126_v17  ;;  %1988 = vmatprep.subr.bf16.mxu1 %v3127_v18  ;;  %v3168_v45 = vld [vmem:[%s4504_s1 + $0x4a0] ss:$8 sps:$4 sm:$0xff]   ;;  %v3171_v47 = vld [vmem:[%s4504_s1 + $0x4b4] ss:$8 sps:$4 sm:$0xff]   ;;  %v3173_v48 = vld [vmem:[%s4504_s1 + $0xb0] ss:$8 sps:$4 sm:$0xff]  }
  0x26   : > { %2200 = vmatprep.subr.bf16.mxu0 %v3129_v19  ;;  %v3174_v49 = vld [vmem:[%s4504_s1 + $0x4b0] ss:$8 sps:$4 sm:$0xff]   ;;  %v252_v50 = vld [vmem:[%s4503_s0] sm:$0xff]  ;;  %v3181_v60 = vld [vmem:[%s4504_s1 + $0xd4] ss:$8 sps:$4 sm:$0xff]  }
  0x27   : > { %v260_v51 = vld [vmem:[%s4503_s0 + $0x40] sm:$0xff]  ;;  %v3183_v61 = vld [vmem:[%s4504_s1 + $0x4d4] ss:$8 sps:$4 sm:$0xff]   ;;  %v3185_v62 = vld [vmem:[%s4504_s1 + $0xd0] ss:$8 sps:$4 sm:$0xff]  }
  0x28   : > { %1989 = vmatpush1.bf16.msra.mxu1 %v3131_v20  ;;  %v3175_v52 = vld [vmem:[%s4504_s1 + $0xc4] ss:$8 sps:$4 sm:$0xff]   ;;  %v2718_v54 = vcombine.high %v252_v50, %v260_v51  ;;  %v3179_v58 = vld [vmem:[%s4504_s1 + $0xc0] ss:$8 sps:$4 sm:$0xff]   ;;  %v3186_v63 = vld [vmem:[%s4504_s1 + $0x4d0] ss:$8 sps:$4 sm:$0xff]   ;;  %v2717_v10 = vcombine.low %v252_v50, %v260_v51 }
  0x29   : > { %2201 = vmatpush1.bf16.msra.mxu0 %v3132_v21  ;;  %1990 = vmatprep.subr.bf16.mxu1 %v3133_v22  ;;  %v3177_v53 = vld [vmem:[%s4504_s1 + $0x4c4] ss:$8 sps:$4 sm:$0xff]   ;;  %v3180_v59 = vld [vmem:[%s4504_s1 + $0x4c0] ss:$8 sps:$4 sm:$0xff]   ;;  %v3193_v4 = vld [vmem:[%s4504_s1 + $0xf4] ss:$8 sps:$4 sm:$0xff]  }
  0x2a   : > { %2202 = vmatprep.subr.bf16.mxu0 %v3135_v23  ;;  %v256_v55 = vld [vmem:[%s4503_s0 + $0x20] sm:$0xff]  ;;  %2012 = vmatprep.mubr.bf16.mxu1 %v2718_v54  ;;  %v3195_v5 = vld [vmem:[%s4504_s1 + $0x4f4] ss:$8 sps:$4 sm:$0xff]   ;;  %v3197_v6 = vld [vmem:[%s4504_s1 + $0xf0] ss:$8 sps:$4 sm:$0xff]  }
  0x2b   : > { %v264_v56 = vld [vmem:[%s4503_s0 + $0x60] sm:$0xff]  ;;  %v3198_v7 = vld [vmem:[%s4504_s1 + $0x4f0] ss:$8 sps:$4 sm:$0xff]   ;;  %v3207_v14 = vld [vmem:[%s4504_s1 + $0x114] ss:$8 sps:$4 sm:$0xff]  }
  0x2c   : > { %1991 = vmatpush1.bf16.msra.mxu1 %v3137_v24  ;;  %v2726_v57 = vcombine.high %v256_v55, %v264_v56  ;;  %v3187_v0 = vld [vmem:[%s4504_s1 + $0xe4] ss:$8 sps:$4 sm:$0xff]   ;;  %v3191_v2 = vld [vmem:[%s4504_s1 + $0xe0] ss:$8 sps:$4 sm:$0xff]   ;;  %v2725_v12 = vcombine.low %v256_v55, %v264_v56  ;;  %v3210_v15 = vld [vmem:[%s4504_s1 + $0x514] ss:$8 sps:$4 sm:$0xff]  }
  0x2d   : > { %2203 = vmatpush1.bf16.msra.mxu0 %v3138_v25  ;;  %1992 = vmatprep.subr.bf16.mxu1 %v3139_v26  ;;  %v3189_v1 = vld [vmem:[%s4504_s1 + $0x4e4] ss:$8 sps:$4 sm:$0xff]   ;;  %v3192_v3 = vld [vmem:[%s4504_s1 + $0x4e0] ss:$8 sps:$4 sm:$0xff]   ;;  %v3205_v16 = vld [vmem:[%s4504_s1 + $0x110] ss:$8 sps:$4 sm:$0xff]  }
  0x2e   : > { %2204 = vmatprep.subr.bf16.mxu0 %v3141_v27  ;;  %2224 = vmatprep.mubr.bf16.mxu0 %v2726_v57  ;;  %v3201_v8 = vld [vmem:[%s4504_s1 + $0x104] ss:$8 sps:$4 sm:$0xff]   ;;  %v3199_v11 = vld [vmem:[%s4504_s1 + $0x100] ss:$8 sps:$4 sm:$0xff]   ;;  %v3208_v17 = vld [vmem:[%s4504_s1 + $0x510] ss:$8 sps:$4 sm:$0xff]  }
  0x2f   : > { %v3204_v9 = vld [vmem:[%s4504_s1 + $0x504] ss:$8 sps:$4 sm:$0xff]   ;;  %v3202_v13 = vld [vmem:[%s4504_s1 + $0x500] ss:$8 sps:$4 sm:$0xff]   ;;  %v3219_v22 = vld [vmem:[%s4504_s1 + $0x134] ss:$8 sps:$4 sm:$0xff]  }
  0x30   : > { %1993 = vmatpush1.bf16.msra.mxu1 %v3143_v28  ;;  %v3213_v18 = vld [vmem:[%s4504_s1 + $0x124] ss:$8 sps:$4 sm:$0xff]   ;;  %v3211_v20 = vld [vmem:[%s4504_s1 + $0x120] ss:$8 sps:$4 sm:$0xff]   ;;  %v3222_v23 = vld [vmem:[%s4504_s1 + $0x534] ss:$8 sps:$4 sm:$0xff]  }
  0x31   : > { %2205 = vmatpush1.bf16.msra.mxu0 %v3144_v29  ;;  %1994 = vmatprep.subr.bf16.mxu1 %v3145_v30  ;;  %v3216_v19 = vld [vmem:[%s4504_s1 + $0x524] ss:$8 sps:$4 sm:$0xff]   ;;  %v3214_v21 = vld [vmem:[%s4504_s1 + $0x520] ss:$8 sps:$4 sm:$0xff]   ;;  %v3217_v24 = vld [vmem:[%s4504_s1 + $0x130] ss:$8 sps:$4 sm:$0xff]  }
  0x32   : > { %2206 = vmatprep.subr.bf16.mxu0 %v3147_v31  ;;  %v3220_v25 = vld [vmem:[%s4504_s1 + $0x530] ss:$8 sps:$4 sm:$0xff]   ;;  %v3225_v26 = vld [vmem:[%s4504_s1 + $0x144] ss:$8 sps:$4 sm:$0xff]   ;;  %v3223_v28 = vld [vmem:[%s4504_s1 + $0x140] ss:$8 sps:$4 sm:$0xff]  }
  0x33   : > { %v3228_v27 = vld [vmem:[%s4504_s1 + $0x544] ss:$8 sps:$4 sm:$0xff]   ;;  %v3226_v29 = vld [vmem:[%s4504_s1 + $0x540] ss:$8 sps:$4 sm:$0xff]   ;;  %v3231_v30 = vld [vmem:[%s4504_s1 + $0x154] ss:$8 sps:$4 sm:$0xff]  }
  0x34   : > { %1995 = vmatpush1.bf16.msra.mxu1 %v3149_v32  ;;  %v3234_v31 = vld [vmem:[%s4504_s1 + $0x554] ss:$8 sps:$4 sm:$0xff]   ;;  %v268_v32 = vld [vmem:[%s4503_s0 + $0x80] sm:$0xff]  ;;  %v3883_v51 = vld [vmem:[%s4503_s0 + $0x28] sm:$0xff] }
  0x35   : > { %2207 = vmatpush1.bf16.msra.mxu0 %v3150_v33  ;;  %1996 = vmatprep.subr.bf16.mxu1 %v3151_v34  ;;  %v276_v33 = vld [vmem:[%s4503_s0 + $0xc0] sm:$0xff]  ;;  %v3229_v34 = vld [vmem:[%s4504_s1 + $0x150] ss:$8 sps:$4 sm:$0xff]  }
  0x36   : > { %2208 = vmatprep.subr.bf16.mxu0 %v3153_v35  ;;  %v2734_v35 = vcombine.high %v268_v32, %v276_v33  ;;  %v3244_v54 = vld [vmem:[%s4504_s1 + $0x570] ss:$8 sps:$4 sm:$0xff]   ;;  %v3249_v56 = vld [vmem:[%s4504_s1 + $0x184] ss:$8 sps:$4 sm:$0xff]  }
  0x37   : > { %v3252_v57 = vld [vmem:[%s4504_s1 + $0x584] ss:$8 sps:$4 sm:$0xff]  }
  0x38   : > { %1997 = vmatpush1.bf16.msra.mxu1 %v3155_v36  ;;  %v3232_v36 = vld [vmem:[%s4504_s1 + $0x550] ss:$8 sps:$4 sm:$0xff]  }
  0x39   : > { %2209 = vmatpush1.bf16.msra.mxu0 %v3156_v37  ;;  %1998 = vmatprep.subr.bf16.mxu1 %v3157_v38  ;;  %v272_v37 = vld [vmem:[%s4503_s0 + $0xa0] sm:$0xff] }
  0x3a   : > { %2210 = vmatprep.subr.bf16.mxu0 %v3159_v39  ;;  %v280_v38 = vld [vmem:[%s4503_s0 + $0xe0] sm:$0xff]  ;;  %v2733_v39 = vcombine.low %v268_v32, %v276_v33  ;;  %v3303_v32 = vld [vmem:[%s4504_s1 + $0x214] ss:$8 sps:$4 sm:$0xff]  }
  0x3b   : > { %v3306_v33 = vld [vmem:[%s4504_s1 + $0x614] ss:$8 sps:$4 sm:$0xff]  }
  0x3c   : > { %1999 = vmatpush1.bf16.msra.mxu1 %v3161_v40  ;;  %v3237_v40 = vld [vmem:[%s4504_s1 + $0x164] ss:$8 sps:$4 sm:$0xff]  }
  0x3d   : > { %2211 = vmatpush1.bf16.msra.mxu0 %v3162_v41  ;;  %2000 = vmatprep.subr.bf16.mxu1 %v3163_v42  ;;  %v2742_v41 = vcombine.high %v272_v37, %v280_v38  ;;  %v2741_v42 = vcombine.low %v272_v37, %v280_v38  ;;  %v3301_v38 = vld [vmem:[%s4504_s1 + $0x210] ss:$8 sps:$4 sm:$0xff]  }
  0x3e   : > { %2212 = vmatprep.subr.bf16.mxu0 %v3165_v43  ;;  %v3240_v43 = vld [vmem:[%s4504_s1 + $0x564] ss:$8 sps:$4 sm:$0xff]  }
  0x40   : > { %2001 = vmatpush1.bf16.msra.mxu1 %v3167_v44  ;;  %v3235_v44 = vld [vmem:[%s4504_s1 + $0x160] ss:$8 sps:$4 sm:$0xff]  }
  0x41   : > { %2213 = vmatpush1.bf16.msra.mxu0 %v3168_v45  ;;  %2002 = vmatprep.subr.bf16.mxu1 %v3169_v46  ;;  %v3238_v45 = vld [vmem:[%s4504_s1 + $0x560] ss:$8 sps:$4 sm:$0xff]  }
  0x42   : > { %2214 = vmatprep.subr.bf16.mxu0 %v3171_v47  ;;  %v3865_v46 = vld [vmem:[%s4503_s0 + $0x8] sm:$0xff] }
  0x43   : > { %v3870_v47 = vld [vmem:[%s4503_s0 + $0x48] sm:$0xff] }
  0x44   : > { %2003 = vmatpush1.bf16.msra.mxu1 %v3173_v48  ;;  %v3243_v48 = vld [vmem:[%s4504_s1 + $0x174] ss:$8 sps:$4 sm:$0xff]   ;;  %v2720_v50 = vcombine.high %v3865_v46, %v3870_v47 }
  0x45   : > { %2215 = vmatpush1.bf16.msra.mxu0 %v3174_v49  ;;  %2004 = vmatprep.subr.bf16.mxu1 %v3175_v52  ;;  %v3246_v49 = vld [vmem:[%s4504_s1 + $0x574] ss:$8 sps:$4 sm:$0xff]   ;;  %v3888_v52 = vld [vmem:[%s4503_s0 + $0x68] sm:$0xff] }
  0x46   : > { %2216 = vmatprep.subr.bf16.mxu0 %v3177_v53  ;;  %v3241_v53 = vld [vmem:[%s4504_s1 + $0x170] ss:$8 sps:$4 sm:$0xff]   ;;  %v2728_v55 = vcombine.high %v3883_v51, %v3888_v52 }
  0x48   : > { %2005 = vmatpush1.bf16.msra.mxu1 %v3179_v58  ;;  %v3247_v58 = vld [vmem:[%s4504_s1 + $0x180] ss:$8 sps:$4 sm:$0xff]  }
  0x49   : > { %2217 = vmatpush1.bf16.msra.mxu0 %v3180_v59  ;;  %2006 = vmatprep.subr.bf16.mxu1 %v3181_v60  ;;  %v3250_v59 = vld [vmem:[%s4504_s1 + $0x580] ss:$8 sps:$4 sm:$0xff]   ;;  %v3255_v60 = vld [vmem:[%s4504_s1 + $0x194] ss:$8 sps:$4 sm:$0xff]  }
  0x4a   : > { %2218 = vmatprep.subr.bf16.mxu0 %v3183_v61  ;;  %v3258_v61 = vld [vmem:[%s4504_s1 + $0x594] ss:$8 sps:$4 sm:$0xff]  }
  0x4c   : > { %2007 = vmatpush1.bf16.msra.mxu1 %v3185_v62  ;;  %v3253_v62 = vld [vmem:[%s4504_s1 + $0x190] ss:$8 sps:$4 sm:$0xff]  }
  0x4d   : > { %2219 = vmatpush1.bf16.msra.mxu0 %v3186_v63  ;;  %2008 = vmatprep.subr.bf16.mxu1 %v3187_v0  ;;  %v3256_v63 = vld [vmem:[%s4504_s1 + $0x590] ss:$8 sps:$4 sm:$0xff]   ;;  %v3261_v0 = vld [vmem:[%s4504_s1 + $0x1a4] ss:$8 sps:$4 sm:$0xff]  }
  0x4e   : > { %2220 = vmatprep.subr.bf16.mxu0 %v3189_v1  ;;  %v3264_v1 = vld [vmem:[%s4504_s1 + $0x5a4] ss:$8 sps:$4 sm:$0xff]  }
  0x50   : > { %2009 = vmatpush1.bf16.msra.mxu1 %v3191_v2  ;;  %v3259_v2 = vld [vmem:[%s4504_s1 + $0x1a0] ss:$8 sps:$4 sm:$0xff]  }
  0x51   : > { %2221 = vmatpush1.bf16.msra.mxu0 %v3192_v3  ;;  %2010 = vmatprep.subr.bf16.mxu1 %v3193_v4  ;;  %v3262_v3 = vld [vmem:[%s4504_s1 + $0x5a0] ss:$8 sps:$4 sm:$0xff]   ;;  %v3267_v4 = vld [vmem:[%s4504_s1 + $0x1b4] ss:$8 sps:$4 sm:$0xff]  }
  0x52   : > { %2222 = vmatprep.subr.bf16.mxu0 %v3195_v5  ;;  %v3270_v5 = vld [vmem:[%s4504_s1 + $0x5b4] ss:$8 sps:$4 sm:$0xff]  }
  0x54   : > { %2011 = vmatpush1.bf16.msra.mxu1 %v3197_v6  ;;  %v3265_v6 = vld [vmem:[%s4504_s1 + $0x1b0] ss:$8 sps:$4 sm:$0xff]  }
  0x55   : > { %2223 = vmatpush1.bf16.msra.mxu0 %v3198_v7  ;;  %2033 = vmatprep.subr.bf16.mxu1 %v3201_v8  ;;  %v3268_v7 = vld [vmem:[%s4504_s1 + $0x5b0] ss:$8 sps:$4 sm:$0xff]   ;;  %v3273_v8 = vld [vmem:[%s4504_s1 + $0x1c4] ss:$8 sps:$4 sm:$0xff]  }
  0x56   : > { %2245 = vmatprep.subr.bf16.mxu0 %v3204_v9  ;;  %v3276_v9 = vld [vmem:[%s4504_s1 + $0x5c4] ss:$8 sps:$4 sm:$0xff]  }
  0x57   : > { %2013 = vmatmul.mubr.bf16.vlgmr.msra.gmra.mrb[0].mxu1 %v2717_v10  ;;  %v3271_v10 = vld [vmem:[%s4504_s1 + $0x1c0] ss:$8 sps:$4 sm:$0xff]  }
  0x58   : > { %2225 = vmatmul.mubr.bf16.vlgmr.msra.gmra.mrb[0].mxu0 %v2725_v12  ;;  %2034 = vmatpush1.bf16.msra.mxu1 %v3199_v11  ;;  %v3274_v11 = vld [vmem:[%s4504_s1 + $0x5c0] ss:$8 sps:$4 sm:$0xff]   ;;  %v3279_v12 = vld [vmem:[%s4504_s1 + $0x1d4] ss:$8 sps:$4 sm:$0xff]  }
  0x59   : > { %2246 = vmatpush1.bf16.msra.mxu0 %v3202_v13  ;;  %2035 = vmatprep.subr.bf16.mxu1 %v3207_v14  ;;  %v3282_v13 = vld [vmem:[%s4504_s1 + $0x5d4] ss:$8 sps:$4 sm:$0xff]   ;;  %v3277_v14 = vld [vmem:[%s4504_s1 + $0x1d0] ss:$8 sps:$4 sm:$0xff]  }
  0x5a   : > { %2247 = vmatprep.subr.bf16.mxu0 %v3210_v15  ;;  %2022 = vmatprep.mubr.bf16.mxu1 %v2734_v35  ;;  %v3280_v15 = vld [vmem:[%s4504_s1 + $0x5d0] ss:$8 sps:$4 sm:$0xff]   ;;  %v281_v35 = vld [vmem:[%s4503_s0 + $0xe8] sm:$0xff] }
  0x5b   : > { %2234 = vmatprep.mubr.bf16.mxu0 %v2742_v41  ;;  %v3312_v41 = vld [vmem:[%s4504_s1 + $0x624] ss:$8 sps:$4 sm:$0xff]  }
  0x5c   : > { %2036 = vmatpush1.bf16.msra.mxu1 %v3205_v16  ;;  %v3285_v16 = vld [vmem:[%s4504_s1 + $0x1e4] ss:$8 sps:$4 sm:$0xff]  }
  0x5d   : > { %2248 = vmatpush1.bf16.msra.mxu0 %v3208_v17  ;;  %2037 = vmatprep.subr.bf16.mxu1 %v3213_v18  ;;  %v3288_v17 = vld [vmem:[%s4504_s1 + $0x5e4] ss:$8 sps:$4 sm:$0xff]   ;;  %v3283_v18 = vld [vmem:[%s4504_s1 + $0x1e0] ss:$8 sps:$4 sm:$0xff]  }
  0x5e   : > { %2249 = vmatprep.subr.bf16.mxu0 %v3216_v19  ;;  %v3286_v19 = vld [vmem:[%s4504_s1 + $0x5e0] ss:$8 sps:$4 sm:$0xff]  }
  0x5f   : > { %2023 = vmatmul.mubr.bf16.gmra.mrb[4].mxu1 %v2733_v39  ;;  %v3304_v39 = vld [vmem:[%s4504_s1 + $0x610] ss:$8 sps:$4 sm:$0xff]  }
  0x60   : > { %2038 = vmatpush1.bf16.msra.mxu1 %v3211_v20  ;;  %2235 = vmatmul.mubr.bf16.gmra.mrb[4].mxu0 %v2741_v42  ;;  %v3291_v20 = vld [vmem:[%s4504_s1 + $0x1f4] ss:$8 sps:$4 sm:$0xff]   ;;  %v3307_v42 = vld [vmem:[%s4504_s1 + $0x220] ss:$8 sps:$4 sm:$0xff]  }
  0x61   : > { %2250 = vmatpush1.bf16.msra.mxu0 %v3214_v21  ;;  %2039 = vmatprep.subr.bf16.mxu1 %v3219_v22  ;;  %v3294_v21 = vld [vmem:[%s4504_s1 + $0x5f4] ss:$8 sps:$4 sm:$0xff]   ;;  %v3289_v22 = vld [vmem:[%s4504_s1 + $0x1f0] ss:$8 sps:$4 sm:$0xff]  }
  0x62   : > { %2251 = vmatprep.subr.bf16.mxu0 %v3222_v23  ;;  %2065 = vmatprep.mubr.bf16.mxu1 %v2720_v50  ;;  %v3292_v23 = vld [vmem:[%s4504_s1 + $0x5f0] ss:$8 sps:$4 sm:$0xff]   ;;  %v3315_v50 = vld [vmem:[%s4504_s1 + $0x234] ss:$8 sps:$4 sm:$0xff]  }
  0x63   : > { %2277 = vmatprep.mubr.bf16.mxu0 %v2728_v55  ;;  %v3316_v55 = vld [vmem:[%s4504_s1 + $0x630] ss:$8 sps:$4 sm:$0xff]  }
  0x64   : > { %2040 = vmatpush1.bf16.msra.mxu1 %v3217_v24  ;;  %v3297_v24 = vld [vmem:[%s4504_s1 + $0x204] ss:$8 sps:$4 sm:$0xff]  }
  0x65   : > { %2252 = vmatpush1.bf16.msra.mxu0 %v3220_v25  ;;  %2041 = vmatprep.subr.bf16.mxu1 %v3225_v26  ;;  %v3300_v25 = vld [vmem:[%s4504_s1 + $0x604] ss:$8 sps:$4 sm:$0xff]   ;;  %v3295_v26 = vld [vmem:[%s4504_s1 + $0x200] ss:$8 sps:$4 sm:$0xff]  }
  0x66   : > { %2253 = vmatprep.subr.bf16.mxu0 %v3228_v27  ;;  %v3298_v27 = vld [vmem:[%s4504_s1 + $0x600] ss:$8 sps:$4 sm:$0xff]  }
  0x68   : > { %2042 = vmatpush1.bf16.msra.mxu1 %v3223_v28  ;;  %v269_v28 = vld [vmem:[%s4503_s0 + $0x88] sm:$0xff] }
  0x69   : > { %2254 = vmatpush1.bf16.msra.mxu0 %v3226_v29  ;;  %2043 = vmatprep.subr.bf16.mxu1 %v3231_v30  ;;  %v2719_v29 = vcombine.low %v3865_v46, %v3870_v47  ;;  %v2727_v30 = vcombine.low %v3883_v51, %v3888_v52  ;;  %v4054_v47 = vld [vmem:[%s4503_s0 + $0x50] sm:$0xff] }
  0x6a   : > { %2255 = vmatprep.subr.bf16.mxu0 %v3234_v31  ;;  %v277_v31 = vld [vmem:[%s4503_s0 + $0xc8] sm:$0xff]  ;;  %v3318_v51 = vld [vmem:[%s4504_s1 + $0x634] ss:$8 sps:$4 sm:$0xff]  }
  0x6c   : > { %2044 = vmatpush1.bf16.msra.mxu1 %v3229_v34  ;;  %v273_v34 = vld [vmem:[%s4503_s0 + $0xa8] sm:$0xff] }
  0x6d   : > { %2256 = vmatpush1.bf16.msra.mxu0 %v3232_v36  ;;  %2045 = vmatprep.subr.bf16.mxu1 %v3237_v40  ;;  %v2736_v36 = vcombine.high %v269_v28, %v277_v31  ;;  %v2744_v37 = vcombine.high %v273_v34, %v281_v35  ;;  %v3309_v40 = vld [vmem:[%s4504_s1 + $0x224] ss:$8 sps:$4 sm:$0xff]   ;;  %v2743_v46 = vcombine.low %v273_v34, %v281_v35  ;;  %v3379_v34 = vld [vmem:[%s4504_s1 + $0x2e0] ss:$8 sps:$4 sm:$0xff]  }
  0x6e   : > { %2257 = vmatprep.subr.bf16.mxu0 %v3240_v43  ;;  %v3310_v43 = vld [vmem:[%s4504_s1 + $0x620] ss:$8 sps:$4 sm:$0xff]  }
  0x6f   : > { %v3382_v35 = vld [vmem:[%s4504_s1 + $0x6e0] ss:$8 sps:$4 sm:$0xff]  }
  0x70   : > { %2046 = vmatpush1.bf16.msra.mxu1 %v3235_v44  ;;  %v4049_v44 = vld [vmem:[%s4503_s0 + $0x10] sm:$0xff] }
  0x71   : > { %2258 = vmatpush1.bf16.msra.mxu0 %v3238_v45  ;;  %2047 = vmatprep.subr.bf16.mxu1 %v3243_v48  ;;  %v2735_v45 = vcombine.low %v269_v28, %v277_v31  ;;  %v4059_v48 = vld [vmem:[%s4503_s0 + $0x30] sm:$0xff]  ;;  %v2722_v52 = vcombine.high %v4049_v44, %v4054_v47 }
  0x72   : > { %2259 = vmatprep.subr.bf16.mxu0 %v3246_v49  ;;  %v4064_v49 = vld [vmem:[%s4503_s0 + $0x70] sm:$0xff] }
  0x73   : > { %v3375_v28 = vld [vmem:[%s4504_s1 + $0x2d4] ss:$8 sps:$4 sm:$0xff]   ;;  %v3376_v31 = vld [vmem:[%s4504_s1 + $0x6d0] ss:$8 sps:$4 sm:$0xff]  }
  0x74   : > { %2048 = vmatpush1.bf16.msra.mxu1 %v3241_v53  ;;  %v2730_v53 = vcombine.high %v4059_v48, %v4064_v49 }
  0x75   : > { %2260 = vmatpush1.bf16.msra.mxu0 %v3244_v54  ;;  %2049 = vmatprep.subr.bf16.mxu1 %v3249_v56  ;;  %v3313_v54 = vld [vmem:[%s4504_s1 + $0x230] ss:$8 sps:$4 sm:$0xff]   ;;  %v3321_v56 = vld [vmem:[%s4504_s1 + $0x244] ss:$8 sps:$4 sm:$0xff]  }
  0x76   : > { %2261 = vmatprep.subr.bf16.mxu0 %v3252_v57  ;;  %v3324_v57 = vld [vmem:[%s4504_s1 + $0x644] ss:$8 sps:$4 sm:$0xff]  }
  0x78   : > { %2050 = vmatpush1.bf16.msra.mxu1 %v3247_v58  ;;  %v3319_v58 = vld [vmem:[%s4504_s1 + $0x240] ss:$8 sps:$4 sm:$0xff]  }
  0x79   : > { %2262 = vmatpush1.bf16.msra.mxu0 %v3250_v59  ;;  %2051 = vmatprep.subr.bf16.mxu1 %v3255_v60  ;;  %v3322_v59 = vld [vmem:[%s4504_s1 + $0x640] ss:$8 sps:$4 sm:$0xff]   ;;  %v3327_v60 = vld [vmem:[%s4504_s1 + $0x254] ss:$8 sps:$4 sm:$0xff]  }
  0x7a   : > { %2263 = vmatprep.subr.bf16.mxu0 %v3258_v61  ;;  %v3330_v61 = vld [vmem:[%s4504_s1 + $0x654] ss:$8 sps:$4 sm:$0xff]  }
  0x7c   : > { %2052 = vmatpush1.bf16.msra.mxu1 %v3253_v62  ;;  %v3325_v62 = vld [vmem:[%s4504_s1 + $0x250] ss:$8 sps:$4 sm:$0xff]  }
  0x7d   : > { %2264 = vmatpush1.bf16.msra.mxu0 %v3256_v63  ;;  %2053 = vmatprep.subr.bf16.mxu1 %v3261_v0  ;;  %v3328_v63 = vld [vmem:[%s4504_s1 + $0x650] ss:$8 sps:$4 sm:$0xff]   ;;  %v3333_v0 = vld [vmem:[%s4504_s1 + $0x264] ss:$8 sps:$4 sm:$0xff]  }
  0x7e   : > { %2265 = vmatprep.subr.bf16.mxu0 %v3264_v1  ;;  %v3336_v1 = vld [vmem:[%s4504_s1 + $0x664] ss:$8 sps:$4 sm:$0xff]  }
  0x80   : > { %2054 = vmatpush1.bf16.msra.mxu1 %v3259_v2  ;;  %v3331_v2 = vld [vmem:[%s4504_s1 + $0x260] ss:$8 sps:$4 sm:$0xff]  }
  0x81   : > { %2266 = vmatpush1.bf16.msra.mxu0 %v3262_v3  ;;  %2055 = vmatprep.subr.bf16.mxu1 %v3267_v4  ;;  %v3334_v3 = vld [vmem:[%s4504_s1 + $0x660] ss:$8 sps:$4 sm:$0xff]   ;;  %v3339_v4 = vld [vmem:[%s4504_s1 + $0x274] ss:$8 sps:$4 sm:$0xff]  }
  0x82   : > { %2267 = vmatprep.subr.bf16.mxu0 %v3270_v5  ;;  %v3342_v5 = vld [vmem:[%s4504_s1 + $0x674] ss:$8 sps:$4 sm:$0xff]  }
  0x84   : > { %2056 = vmatpush1.bf16.msra.mxu1 %v3265_v6  ;;  %v3337_v6 = vld [vmem:[%s4504_s1 + $0x270] ss:$8 sps:$4 sm:$0xff]  }
  0x85   : > { %2268 = vmatpush1.bf16.msra.mxu0 %v3268_v7  ;;  %2057 = vmatprep.subr.bf16.mxu1 %v3273_v8  ;;  %v3340_v7 = vld [vmem:[%s4504_s1 + $0x670] ss:$8 sps:$4 sm:$0xff]   ;;  %v3345_v8 = vld [vmem:[%s4504_s1 + $0x284] ss:$8 sps:$4 sm:$0xff]  }
  0x86   : > { %2269 = vmatprep.subr.bf16.mxu0 %v3276_v9  ;;  %v3348_v9 = vld [vmem:[%s4504_s1 + $0x684] ss:$8 sps:$4 sm:$0xff]  }
  0x88   : > { %2058 = vmatpush1.bf16.msra.mxu1 %v3271_v10  ;;  %v3343_v10 = vld [vmem:[%s4504_s1 + $0x280] ss:$8 sps:$4 sm:$0xff]  }
  0x89   : > { %2270 = vmatpush1.bf16.msra.mxu0 %v3274_v11  ;;  %2059 = vmatprep.subr.bf16.mxu1 %v3279_v12  ;;  %v3346_v11 = vld [vmem:[%s4504_s1 + $0x680] ss:$8 sps:$4 sm:$0xff]   ;;  %v3351_v12 = vld [vmem:[%s4504_s1 + $0x294] ss:$8 sps:$4 sm:$0xff]  }
  0x8a   : > { %2271 = vmatprep.subr.bf16.mxu0 %v3282_v13  ;;  %v3354_v13 = vld [vmem:[%s4504_s1 + $0x694] ss:$8 sps:$4 sm:$0xff]  }
  0x8c   : > { %2060 = vmatpush1.bf16.msra.mxu1 %v3277_v14  ;;  %v3349_v14 = vld [vmem:[%s4504_s1 + $0x290] ss:$8 sps:$4 sm:$0xff]  }
  0x8d   : > { %2272 = vmatpush1.bf16.msra.mxu0 %v3280_v15  ;;  %2061 = vmatprep.subr.bf16.mxu1 %v3285_v16  ;;  %v3352_v15 = vld [vmem:[%s4504_s1 + $0x690] ss:$8 sps:$4 sm:$0xff]   ;;  %v3357_v16 = vld [vmem:[%s4504_s1 + $0x2a4] ss:$8 sps:$4 sm:$0xff]  }
  0x8e   : > { %2273 = vmatprep.subr.bf16.mxu0 %v3288_v17  ;;  %v3360_v17 = vld [vmem:[%s4504_s1 + $0x6a4] ss:$8 sps:$4 sm:$0xff]  }
  0x90   : > { %2062 = vmatpush1.bf16.msra.mxu1 %v3283_v18  ;;  %v3355_v18 = vld [vmem:[%s4504_s1 + $0x2a0] ss:$8 sps:$4 sm:$0xff]  }
  0x91   : > { %2274 = vmatpush1.bf16.msra.mxu0 %v3286_v19  ;;  %2063 = vmatprep.subr.bf16.mxu1 %v3291_v20  ;;  %v3358_v19 = vld [vmem:[%s4504_s1 + $0x6a0] ss:$8 sps:$4 sm:$0xff]   ;;  %v3363_v20 = vld [vmem:[%s4504_s1 + $0x2b4] ss:$8 sps:$4 sm:$0xff]  }
  0x92   : > { %2275 = vmatprep.subr.bf16.mxu0 %v3294_v21  ;;  %v3366_v21 = vld [vmem:[%s4504_s1 + $0x6b4] ss:$8 sps:$4 sm:$0xff]  }
  0x94   : > { %2064 = vmatpush1.bf16.msra.mxu1 %v3289_v22  ;;  %v3361_v22 = vld [vmem:[%s4504_s1 + $0x2b0] ss:$8 sps:$4 sm:$0xff]  }
  0x95   : > { %2276 = vmatpush1.bf16.msra.mxu0 %v3292_v23  ;;  %2086 = vmatprep.subr.bf16.mxu1 %v3297_v24  ;;  %v3364_v23 = vld [vmem:[%s4504_s1 + $0x6b0] ss:$8 sps:$4 sm:$0xff]   ;;  %v3369_v24 = vld [vmem:[%s4504_s1 + $0x2c4] ss:$8 sps:$4 sm:$0xff]  }
  0x96   : > { %2298 = vmatprep.subr.bf16.mxu0 %v3300_v25  ;;  %v3372_v25 = vld [vmem:[%s4504_s1 + $0x6c4] ss:$8 sps:$4 sm:$0xff]  }
  0x97   : > { %2066 = vmatmul.mubr.bf16.vlgmr.msra.gmra.mrb[0].mxu1 %v2719_v29  ;;  %v3378_v29 = vld [vmem:[%s4504_s1 + $0x6d4] ss:$8 sps:$4 sm:$0xff]  }
  0x98   : > { %2278 = vmatmul.mubr.bf16.vlgmr.msra.gmra.mrb[0].mxu0 %v2727_v30  ;;  %2087 = vmatpush1.bf16.msra.mxu1 %v3295_v26  ;;  %v3367_v26 = vld [vmem:[%s4504_s1 + $0x2c0] ss:$8 sps:$4 sm:$0xff]   ;;  %v3373_v30 = vld [vmem:[%s4504_s1 + $0x2d0] ss:$8 sps:$4 sm:$0xff]  }
  0x99   : > { %2299 = vmatpush1.bf16.msra.mxu0 %v3298_v27  ;;  %2088 = vmatprep.subr.bf16.mxu1 %v3303_v32  ;;  %v3370_v27 = vld [vmem:[%s4504_s1 + $0x6c0] ss:$8 sps:$4 sm:$0xff]   ;;  %v3381_v32 = vld [vmem:[%s4504_s1 + $0x2e4] ss:$8 sps:$4 sm:$0xff]  }
  0x9a   : > { %2300 = vmatprep.subr.bf16.mxu0 %v3306_v33  ;;  %2075 = vmatprep.mubr.bf16.mxu1 %v2736_v36  ;;  %v3384_v33 = vld [vmem:[%s4504_s1 + $0x6e4] ss:$8 sps:$4 sm:$0xff]   ;;  %v3387_v36 = vld [vmem:[%s4504_s1 + $0x2f4] ss:$8 sps:$4 sm:$0xff]  }
  0x9b   : > { %2287 = vmatprep.mubr.bf16.mxu0 %v2744_v37  ;;  %v3390_v37 = vld [vmem:[%s4504_s1 + $0x6f4] ss:$8 sps:$4 sm:$0xff]  }
  0x9c   : > { %2089 = vmatpush1.bf16.msra.mxu1 %v3301_v38  ;;  %v3385_v38 = vld [vmem:[%s4504_s1 + $0x2f0] ss:$8 sps:$4 sm:$0xff]  }
  0x9d   : > { %2301 = vmatpush1.bf16.msra.mxu0 %v3304_v39  ;;  %2090 = vmatprep.subr.bf16.mxu1 %v3309_v40  ;;  %v3388_v39 = vld [vmem:[%s4504_s1 + $0x6f0] ss:$8 sps:$4 sm:$0xff]   ;;  %v3393_v40 = vld [vmem:[%s4504_s1 + $0x304] ss:$8 sps:$4 sm:$0xff]  }
  0x9e   : > { %2302 = vmatprep.subr.bf16.mxu0 %v3312_v41  ;;  %v3396_v41 = vld [vmem:[%s4504_s1 + $0x704] ss:$8 sps:$4 sm:$0xff]  }
  0x9f   : > { %2076 = vmatmul.mubr.bf16.gmra.mrb[4].mxu1 %v2735_v45  ;;  %v2729_v45 = vcombine.low %v4059_v48, %v4064_v49  ;;  %v3399_v48 = vld [vmem:[%s4504_s1 + $0x314] ss:$8 sps:$4 sm:$0xff]  }
  0xa0   : > { %2288 = vmatmul.mubr.bf16.gmra.mrb[4].mxu0 %v2743_v46  ;;  %2091 = vmatpush1.bf16.msra.mxu1 %v3307_v42  ;;  %v270_v42 = vld [vmem:[%s4503_s0 + $0x90] sm:$0xff] }
  0xa1   : > { %2303 = vmatpush1.bf16.msra.mxu0 %v3310_v43  ;;  %2092 = vmatprep.subr.bf16.mxu1 %v3315_v50  ;;  %v2721_v43 = vcombine.low %v4049_v44, %v4054_v47  ;;  %v278_v46 = vld [vmem:[%s4503_s0 + $0xd0] sm:$0xff]  ;;  %v3391_v44 = vld [vmem:[%s4504_s1 + $0x300] ss:$8 sps:$4 sm:$0xff]  }
  0xa2   : > { %2304 = vmatprep.subr.bf16.mxu0 %v3318_v51  ;;  %2118 = vmatprep.mubr.bf16.mxu1 %v2722_v52  ;;  %v274_v50 = vld [vmem:[%s4503_s0 + $0xb0] sm:$0xff]  ;;  %v3394_v47 = vld [vmem:[%s4504_s1 + $0x700] ss:$8 sps:$4 sm:$0xff]   ;;  %v2738_v52 = vcombine.high %v270_v42, %v278_v46 }
  0xa3   : > { %2330 = vmatprep.mubr.bf16.mxu0 %v2730_v53  ;;  %v282_v51 = vld [vmem:[%s4503_s0 + $0xf0] sm:$0xff] }
  0xa4   : > { %2093 = vmatpush1.bf16.msra.mxu1 %v3313_v54  ;;  %v3402_v49 = vld [vmem:[%s4504_s1 + $0x714] ss:$8 sps:$4 sm:$0xff]   ;;  %v2746_v53 = vcombine.high %v274_v50, %v282_v51  ;;  %v3397_v54 = vld [vmem:[%s4504_s1 + $0x310] ss:$8 sps:$4 sm:$0xff]  }
  0xa5   : > { %2305 = vmatpush1.bf16.msra.mxu0 %v3316_v55  ;;  %2094 = vmatprep.subr.bf16.mxu1 %v3321_v56  ;;  %v3400_v55 = vld [vmem:[%s4504_s1 + $0x710] ss:$8 sps:$4 sm:$0xff]   ;;  %v3405_v56 = vld [vmem:[%s4504_s1 + $0x324] ss:$8 sps:$4 sm:$0xff]  }
  0xa6   : > { %2306 = vmatprep.subr.bf16.mxu0 %v3324_v57  ;;  %v3408_v57 = vld [vmem:[%s4504_s1 + $0x724] ss:$8 sps:$4 sm:$0xff]  }
  0xa8   : > { %2095 = vmatpush1.bf16.msra.mxu1 %v3319_v58  ;;  %v4275_v58 = vld [vmem:[%s4503_s0 + $0x18] sm:$0xff] }
  0xa9   : > { %2307 = vmatpush1.bf16.msra.mxu0 %v3322_v59  ;;  %2096 = vmatprep.subr.bf16.mxu1 %v3327_v60  ;;  %v2737_v59 = vcombine.low %v270_v42, %v278_v46  ;;  %v2745_v60 = vcombine.low %v274_v50, %v282_v51  ;;  %v3463_v42 = vld [vmem:[%s4504_s1 + $0x3c0] ss:$8 sps:$4 sm:$0xff]   ;;  %v3474_v46 = vld [vmem:[%s4504_s1 + $0x7d4] ss:$8 sps:$4 sm:$0xff]   ;;  %v3469_v50 = vld [vmem:[%s4504_s1 + $0x3d0] ss:$8 sps:$4 sm:$0xff]  }
  0xaa   : > { %2308 = vmatprep.subr.bf16.mxu0 %v3330_v61  ;;  %v4280_v61 = vld [vmem:[%s4503_s0 + $0x58] sm:$0xff] }
  0xab   : > { %v3472_v51 = vld [vmem:[%s4504_s1 + $0x7d0] ss:$8 sps:$4 sm:$0xff]  }
  0xac   : > { %2097 = vmatpush1.bf16.msra.mxu1 %v3325_v62  ;;  %v4285_v62 = vld [vmem:[%s4503_s0 + $0x38] sm:$0xff] }
  0xad   : > { %2309 = vmatpush1.bf16.msra.mxu0 %v3328_v63  ;;  %2098 = vmatprep.subr.bf16.mxu1 %v3333_v0  ;;  %v4290_v63 = vld [vmem:[%s4503_s0 + $0x78] sm:$0xff]  ;;  %v3403_v0 = vld [vmem:[%s4504_s1 + $0x320] ss:$8 sps:$4 sm:$0xff]  }
  0xae   : > { %2310 = vmatprep.subr.bf16.mxu0 %v3336_v1  ;;  %v3406_v1 = vld [vmem:[%s4504_s1 + $0x720] ss:$8 sps:$4 sm:$0xff]  }
  0xb0   : > { %2099 = vmatpush1.bf16.msra.mxu1 %v3331_v2  ;;  %v3411_v2 = vld [vmem:[%s4504_s1 + $0x334] ss:$8 sps:$4 sm:$0xff]  }
  0xb1   : > { %2311 = vmatpush1.bf16.msra.mxu0 %v3334_v3  ;;  %2100 = vmatprep.subr.bf16.mxu1 %v3339_v4  ;;  %v3414_v3 = vld [vmem:[%s4504_s1 + $0x734] ss:$8 sps:$4 sm:$0xff]   ;;  %v2724_v4 = vcombine.high %v4275_v58, %v4280_v61 }
  0xb2   : > { %2312 = vmatprep.subr.bf16.mxu0 %v3342_v5  ;;  %v2732_v5 = vcombine.high %v4285_v62, %v4290_v63 }
  0xb4   : > { %2101 = vmatpush1.bf16.msra.mxu1 %v3337_v6  ;;  %v3409_v6 = vld [vmem:[%s4504_s1 + $0x330] ss:$8 sps:$4 sm:$0xff]  }
  0xb5   : > { %2313 = vmatpush1.bf16.msra.mxu0 %v3340_v7  ;;  %2102 = vmatprep.subr.bf16.mxu1 %v3345_v8  ;;  %v3412_v7 = vld [vmem:[%s4504_s1 + $0x730] ss:$8 sps:$4 sm:$0xff]   ;;  %v3417_v8 = vld [vmem:[%s4504_s1 + $0x344] ss:$8 sps:$4 sm:$0xff]  }
  0xb6   : > { %2314 = vmatprep.subr.bf16.mxu0 %v3348_v9  ;;  %v3420_v9 = vld [vmem:[%s4504_s1 + $0x744] ss:$8 sps:$4 sm:$0xff]  }
  0xb8   : > { %2103 = vmatpush1.bf16.msra.mxu1 %v3343_v10  ;;  %v3415_v10 = vld [vmem:[%s4504_s1 + $0x340] ss:$8 sps:$4 sm:$0xff]  }
  0xb9   : > { %2315 = vmatpush1.bf16.msra.mxu0 %v3346_v11  ;;  %2104 = vmatprep.subr.bf16.mxu1 %v3351_v12  ;;  %v3418_v11 = vld [vmem:[%s4504_s1 + $0x740] ss:$8 sps:$4 sm:$0xff]   ;;  %v3423_v12 = vld [vmem:[%s4504_s1 + $0x354] ss:$8 sps:$4 sm:$0xff]  }
  0xba   : > { %2316 = vmatprep.subr.bf16.mxu0 %v3354_v13  ;;  %v3426_v13 = vld [vmem:[%s4504_s1 + $0x754] ss:$8 sps:$4 sm:$0xff]  }
  0xbc   : > { %2105 = vmatpush1.bf16.msra.mxu1 %v3349_v14  ;;  %v3421_v14 = vld [vmem:[%s4504_s1 + $0x350] ss:$8 sps:$4 sm:$0xff]  }
  0xbd   : > { %2317 = vmatpush1.bf16.msra.mxu0 %v3352_v15  ;;  %2106 = vmatprep.subr.bf16.mxu1 %v3357_v16  ;;  %v3424_v15 = vld [vmem:[%s4504_s1 + $0x750] ss:$8 sps:$4 sm:$0xff]   ;;  %v3429_v16 = vld [vmem:[%s4504_s1 + $0x364] ss:$8 sps:$4 sm:$0xff]  }
  0xbe   : > { %2318 = vmatprep.subr.bf16.mxu0 %v3360_v17  ;;  %v3432_v17 = vld [vmem:[%s4504_s1 + $0x764] ss:$8 sps:$4 sm:$0xff]  }
  0xc0   : > { %2107 = vmatpush1.bf16.msra.mxu1 %v3355_v18  ;;  %v3427_v18 = vld [vmem:[%s4504_s1 + $0x360] ss:$8 sps:$4 sm:$0xff]  }
  0xc1   : > { %2319 = vmatpush1.bf16.msra.mxu0 %v3358_v19  ;;  %2108 = vmatprep.subr.bf16.mxu1 %v3363_v20  ;;  %v3430_v19 = vld [vmem:[%s4504_s1 + $0x760] ss:$8 sps:$4 sm:$0xff]   ;;  %v3435_v20 = vld [vmem:[%s4504_s1 + $0x374] ss:$8 sps:$4 sm:$0xff]  }
  0xc2   : > { %2320 = vmatprep.subr.bf16.mxu0 %v3366_v21  ;;  %v3438_v21 = vld [vmem:[%s4504_s1 + $0x774] ss:$8 sps:$4 sm:$0xff]  }
  0xc4   : > { %2109 = vmatpush1.bf16.msra.mxu1 %v3361_v22  ;;  %v3433_v22 = vld [vmem:[%s4504_s1 + $0x370] ss:$8 sps:$4 sm:$0xff]  }
  0xc5   : > { %2321 = vmatpush1.bf16.msra.mxu0 %v3364_v23  ;;  %2110 = vmatprep.subr.bf16.mxu1 %v3369_v24  ;;  %v3436_v23 = vld [vmem:[%s4504_s1 + $0x770] ss:$8 sps:$4 sm:$0xff]   ;;  %v3441_v24 = vld [vmem:[%s4504_s1 + $0x384] ss:$8 sps:$4 sm:$0xff]  }
  0xc6   : > { %2322 = vmatprep.subr.bf16.mxu0 %v3372_v25  ;;  %v3444_v25 = vld [vmem:[%s4504_s1 + $0x784] ss:$8 sps:$4 sm:$0xff]  }
  0xc8   : > { %2111 = vmatpush1.bf16.msra.mxu1 %v3367_v26  ;;  %v3439_v26 = vld [vmem:[%s4504_s1 + $0x380] ss:$8 sps:$4 sm:$0xff]  }
  0xc9   : > { %2323 = vmatpush1.bf16.msra.mxu0 %v3370_v27  ;;  %2112 = vmatprep.subr.bf16.mxu1 %v3375_v28  ;;  %v3442_v27 = vld [vmem:[%s4504_s1 + $0x780] ss:$8 sps:$4 sm:$0xff]   ;;  %v3447_v28 = vld [vmem:[%s4504_s1 + $0x394] ss:$8 sps:$4 sm:$0xff]  }
  0xca   : > { %2324 = vmatprep.subr.bf16.mxu0 %v3378_v29  ;;  %v3450_v29 = vld [vmem:[%s4504_s1 + $0x794] ss:$8 sps:$4 sm:$0xff]  }
  0xcc   : > { %2113 = vmatpush1.bf16.msra.mxu1 %v3373_v30  ;;  %v3445_v30 = vld [vmem:[%s4504_s1 + $0x390] ss:$8 sps:$4 sm:$0xff]  }
  0xcd   : > { %2325 = vmatpush1.bf16.msra.mxu0 %v3376_v31  ;;  %2114 = vmatprep.subr.bf16.mxu1 %v3381_v32  ;;  %v3448_v31 = vld [vmem:[%s4504_s1 + $0x790] ss:$8 sps:$4 sm:$0xff]   ;;  %v3453_v32 = vld [vmem:[%s4504_s1 + $0x3a4] ss:$8 sps:$4 sm:$0xff]  }
  0xce   : > { %2326 = vmatprep.subr.bf16.mxu0 %v3384_v33  ;;  %v3456_v33 = vld [vmem:[%s4504_s1 + $0x7a4] ss:$8 sps:$4 sm:$0xff]  }
  0xd0   : > { %2115 = vmatpush1.bf16.msra.mxu1 %v3379_v34  ;;  %v3451_v34 = vld [vmem:[%s4504_s1 + $0x3a0] ss:$8 sps:$4 sm:$0xff]  }
  0xd1   : > { %2327 = vmatpush1.bf16.msra.mxu0 %v3382_v35  ;;  %2116 = vmatprep.subr.bf16.mxu1 %v3387_v36  ;;  %v3454_v35 = vld [vmem:[%s4504_s1 + $0x7a0] ss:$8 sps:$4 sm:$0xff]   ;;  %v3459_v36 = vld [vmem:[%s4504_s1 + $0x3b4] ss:$8 sps:$4 sm:$0xff]  }
  0xd2   : > { %2328 = vmatprep.subr.bf16.mxu0 %v3390_v37  ;;  %v3462_v37 = vld [vmem:[%s4504_s1 + $0x7b4] ss:$8 sps:$4 sm:$0xff]  }
  0xd4   : > { %2117 = vmatpush1.bf16.msra.mxu1 %v3385_v38  ;;  %v3457_v38 = vld [vmem:[%s4504_s1 + $0x3b0] ss:$8 sps:$4 sm:$0xff]  }
  0xd5   : > { %2329 = vmatpush1.bf16.msra.mxu0 %v3388_v39  ;;  %2139 = vmatprep.subr.bf16.mxu1 %v3393_v40  ;;  %v3460_v39 = vld [vmem:[%s4504_s1 + $0x7b0] ss:$8 sps:$4 sm:$0xff]   ;;  %v3465_v40 = vld [vmem:[%s4504_s1 + $0x3c4] ss:$8 sps:$4 sm:$0xff]  }
  0xd6   : > { %2351 = vmatprep.subr.bf16.mxu0 %v3396_v41  ;;  %v3468_v41 = vld [vmem:[%s4504_s1 + $0x7c4] ss:$8 sps:$4 sm:$0xff]  }
  0xd7   : > { %2119 = vmatmul.mubr.bf16.vlgmr.msra.gmra.mrb[0].mxu1 %v2721_v43  ;;  %v3466_v43 = vld [vmem:[%s4504_s1 + $0x7c0] ss:$8 sps:$4 sm:$0xff]  }
  0xd8   : > { %2331 = vmatmul.mubr.bf16.vlgmr.msra.gmra.mrb[0].mxu0 %v2729_v45  ;;  %2140 = vmatpush1.bf16.msra.mxu1 %v3391_v44  ;;  %v3471_v45 = vld [vmem:[%s4504_s1 + $0x3d4] ss:$8 sps:$4 sm:$0xff]   ;;  %v3477_v44 = vld [vmem:[%s4504_s1 + $0x3e4] ss:$8 sps:$4 sm:$0xff]  }
  0xd9   : > { %2352 = vmatpush1.bf16.msra.mxu0 %v3394_v47  ;;  %2141 = vmatprep.subr.bf16.mxu1 %v3399_v48  ;;  %v3480_v47 = vld [vmem:[%s4504_s1 + $0x7e4] ss:$8 sps:$4 sm:$0xff]   ;;  %v3475_v48 = vld [vmem:[%s4504_s1 + $0x3e0] ss:$8 sps:$4 sm:$0xff]  }
  0xda   : > { %2353 = vmatprep.subr.bf16.mxu0 %v3402_v49  ;;  %2128 = vmatprep.mubr.bf16.mxu1 %v2738_v52  ;;  %v3478_v49 = vld [vmem:[%s4504_s1 + $0x7e0] ss:$8 sps:$4 sm:$0xff]   ;;  %v3483_v52 = vld [vmem:[%s4504_s1 + $0x3f4] ss:$8 sps:$4 sm:$0xff]  }
  0xdb   : > { %2340 = vmatprep.mubr.bf16.mxu0 %v2746_v53  ;;  %v3486_v53 = vld [vmem:[%s4504_s1 + $0x7f4] ss:$8 sps:$4 sm:$0xff]  }
  0xdc   : > { %2142 = vmatpush1.bf16.msra.mxu1 %v3397_v54  ;;  %v3481_v54 = vld [vmem:[%s4504_s1 + $0x3f0] ss:$8 sps:$4 sm:$0xff]  }
  0xdd   : > { %2354 = vmatpush1.bf16.msra.mxu0 %v3400_v55  ;;  %2143 = vmatprep.subr.bf16.mxu1 %v3405_v56  ;;  %v3484_v55 = vld [vmem:[%s4504_s1 + $0x7f0] ss:$8 sps:$4 sm:$0xff]  }
  0xde   : > { %2355 = vmatprep.subr.bf16.mxu0 %v3408_v57  ;;  %v271_v56 = vld [vmem:[%s4503_s0 + $0x98] sm:$0xff] }
  0xdf   : > { %2129 = vmatmul.mubr.bf16.gmra.mrb[4].mxu1 %v2737_v59  ;;  %v279_v57 = vld [vmem:[%s4503_s0 + $0xd8] sm:$0xff] }
  0xe0   : > { %2341 = vmatmul.mubr.bf16.gmra.mrb[4].mxu0 %v2745_v60  ;;  %2144 = vmatpush1.bf16.msra.mxu1 %v3403_v0  ;;  %v275_v59 = vld [vmem:[%s4503_s0 + $0xb8] sm:$0xff]  ;;  %v2723_v0 = vcombine.low %v4275_v58, %v4280_v61 }
  0xe1   : > { %2356 = vmatpush1.bf16.msra.mxu0 %v3406_v1  ;;  %2145 = vmatprep.subr.bf16.mxu1 %v3411_v2  ;;  %v283_v60 = vld [vmem:[%s4503_s0 + $0xf8] sm:$0xff]  ;;  %v2731_v1 = vcombine.low %v4285_v62, %v4290_v63  ;;  %v2740_v2 = vcombine.high %v271_v56, %v279_v57 }
  0xe2   : > { %2357 = vmatprep.subr.bf16.mxu0 %v3414_v3  ;;  %2171 = vmatprep.mubr.bf16.mxu1 %v2724_v4  ;;  %v2748_v3 = vcombine.high %v275_v59, %v283_v60  ;;  %v2739_v4 = vcombine.low %v271_v56, %v279_v57 }
  0xe3   : > { %2383 = vmatprep.mubr.bf16.mxu0 %v2732_v5  ;;  %v2747_v5 = vcombine.low %v275_v59, %v283_v60 }
  0xe4   : > { %2146 = vmatpush1.bf16.msra.mxu1 %v3409_v6 }
  0xe5   : > { %2358 = vmatpush1.bf16.msra.mxu0 %v3412_v7  ;;  %2147 = vmatprep.subr.bf16.mxu1 %v3417_v8 }
  0xe6   : > { %2359 = vmatprep.subr.bf16.mxu0 %v3420_v9 }
  0xe8   : > { %2148 = vmatpush1.bf16.msra.mxu1 %v3415_v10 }
  0xe9   : > { %2360 = vmatpush1.bf16.msra.mxu0 %v3418_v11  ;;  %2149 = vmatprep.subr.bf16.mxu1 %v3423_v12 }
  0xea   : > { %2361 = vmatprep.subr.bf16.mxu0 %v3426_v13 }
  0xec   : > { %2150 = vmatpush1.bf16.msra.mxu1 %v3421_v14 }
  0xed   : > { %2362 = vmatpush1.bf16.msra.mxu0 %v3424_v15  ;;  %2151 = vmatprep.subr.bf16.mxu1 %v3429_v16 }
  0xee   : > { %2363 = vmatprep.subr.bf16.mxu0 %v3432_v17 }
  0xf0   : > { %2152 = vmatpush1.bf16.msra.mxu1 %v3427_v18 }
  0xf1   : > { %2364 = vmatpush1.bf16.msra.mxu0 %v3430_v19  ;;  %2153 = vmatprep.subr.bf16.mxu1 %v3435_v20 }
  0xf2   : > { %2365 = vmatprep.subr.bf16.mxu0 %v3438_v21 }
  0xf4   : > { %2154 = vmatpush1.bf16.msra.mxu1 %v3433_v22 }
  0xf5   : > { %2366 = vmatpush1.bf16.msra.mxu0 %v3436_v23  ;;  %2155 = vmatprep.subr.bf16.mxu1 %v3441_v24 }
  0xf6   : > { %2367 = vmatprep.subr.bf16.mxu0 %v3444_v25 }
  0xf8   : > { %2156 = vmatpush1.bf16.msra.mxu1 %v3439_v26 }
  0xf9   : > { %2368 = vmatpush1.bf16.msra.mxu0 %v3442_v27  ;;  %2157 = vmatprep.subr.bf16.mxu1 %v3447_v28 }
  0xfa   : > { %2369 = vmatprep.subr.bf16.mxu0 %v3450_v29 }
  0xfc   : > { %2158 = vmatpush1.bf16.msra.mxu1 %v3445_v30 }
  0xfd   : > { %2370 = vmatpush1.bf16.msra.mxu0 %v3448_v31  ;;  %2159 = vmatprep.subr.bf16.mxu1 %v3453_v32 }
  0xfe   : > { %2371 = vmatprep.subr.bf16.mxu0 %v3456_v33 }
 0x100   : > { %2160 = vmatpush1.bf16.msra.mxu1 %v3451_v34 }
 0x101   : > { %2372 = vmatpush1.bf16.msra.mxu0 %v3454_v35  ;;  %2161 = vmatprep.subr.bf16.mxu1 %v3459_v36 }
 0x102   : > { %2373 = vmatprep.subr.bf16.mxu0 %v3462_v37 }
 0x104   : > { %2162 = vmatpush1.bf16.msra.mxu1 %v3457_v38 }
 0x105   : > { %2374 = vmatpush1.bf16.msra.mxu0 %v3460_v39  ;;  %2163 = vmatprep.subr.bf16.mxu1 %v3465_v40 }
 0x106   : > { %2375 = vmatprep.subr.bf16.mxu0 %v3468_v41 }
 0x108   : > { %2164 = vmatpush1.bf16.msra.mxu1 %v3463_v42 }
 0x109   : > { %2376 = vmatpush1.bf16.msra.mxu0 %v3466_v43  ;;  %2165 = vmatprep.subr.bf16.mxu1 %v3471_v45 }
 0x10a   : > { %2377 = vmatprep.subr.bf16.mxu0 %v3474_v46 }
 0x10c   : > { %2166 = vmatpush1.bf16.msra.mxu1 %v3469_v50 }
 0x10d   : > { %2378 = vmatpush1.bf16.msra.mxu0 %v3472_v51  ;;  %2167 = vmatprep.subr.bf16.mxu1 %v3477_v44 }
 0x10e   : > { %2379 = vmatprep.subr.bf16.mxu0 %v3480_v47 }
 0x110   : > { %2168 = vmatpush1.bf16.msra.mxu1 %v3475_v48 }
 0x111   : > { %2380 = vmatpush1.bf16.msra.mxu0 %v3478_v49  ;;  %2169 = vmatprep.subr.bf16.mxu1 %v3483_v52  ;;  %v3514_v49 = vmov 1966171168  }
 0x112   : > { %2381 = vmatprep.subr.bf16.mxu0 %v3486_v53  ;;  %v2441_v52 = vunpack.c.l.s4 %v3514_v49  ;;  %v2443_v53 = vlaneseq }
 0x114   : > { %2170 = vmatpush1.bf16.msra.mxu1 %v3481_v54  ;;  %vm2458_vm1 = vcmp.lt.s32.totalorder %v2443_v53, 256 }
 0x115   : > { %2382 = vmatpush1.bf16.msra.mxu0 %v3484_v55 }
 0x117   : > { %2172 = vmatmul.mubr.bf16.vlgmr.msra.gmra.mrb[0].mxu1 %v2723_v0 }
 0x118   : > { %2384 = vmatmul.mubr.bf16.vlgmr.msra.gmra.mrb[0].mxu0 %v2731_v1  ;;  %2181 = vmatprep.mubr.bf16.mxu1 %v2740_v2  ;;  %v2442_v2 = vunpack.c.0.s8 %v2441_v52 }
 0x119   : > { %2393 = vmatprep.mubr.bf16.mxu0 %v2748_v3  ;;  %v2444_v3 = vshrl.u32 %v2443_v53, 7 }
 0x11f   : > { %2182 = vmatmul.mubr.bf16.gmra.mrb[4].mxu1 %v2739_v4 }
 0x120   : > { %2394 = vmatmul.mubr.bf16.gmra.mrb[4].mxu0 %v2747_v5 }
 0x1ea   : > { %v2173_v6 = vpop.f32.mrb[0].mxu1 }
 0x1eb   : > { %v2385_v7 = vpop.f32.mrb[0].mxu0  ;;  %v2175_v9 = vpop.f32.mrb[1].mxu1 }
 0x1ec   : > { %v3021_v8 = vadd.f32 %v2385_v7, %v2173_v6  ;;  %v2387_v58 = vpop.f32.mrb[1].mxu0  ;;  %v2177_v10 = vpop.f32.mrb[2].mxu1 }
 0x1ed   : > { %v3022_v61 = vadd.f32 %v2387_v58, %v2175_v9  ;;  %v2389_v62 = vpop.f32.mrb[2].mxu0  ;;  %v2179_v11 = vpop.f32.mrb[3].mxu1 }
 0x1ee   : > { %2410 = vst [vmem:[#allocation2] sm:$0xff] %v3021_v8  ;;  %v3023_v63 = vadd.f32 %v2389_v62, %v2177_v10  ;;  %v2391_v12 = vpop.f32.mrb[3].mxu0  ;;  %v2462_v14 = vmul.f32 %v3021_v8, %v3021_v8  ;;  %v2445_v10 = vsub.s32 %v2442_v2, %v2444_v3 }
 0x1ef   : > { %2411 = vst [vmem:[#allocation2 + $0x8] sm:$0xff] %v3022_v61  ;;  %v3024_v13 = vadd.f32 %v2391_v12, %v2179_v11  ;;  %v2463_v17 = vmul.f32 %v3022_v61, %v3022_v61 }
 0x1f0   : > { %2412 = vst [vmem:[#allocation2 + $0x10] sm:$0xff] %v3023_v63  ;;  %v2419_v15 = vadd.f32 %v3023_v63, %v3021_v8  ;;  %v2464_v16 = vmul.f32 %v3023_v63, %v3023_v63 }
 0x1f1   : > { %2413 = vst [vmem:[#allocation2 + $0x18] sm:$0xff] %v3024_v13  ;;  %v2428_v18 = vadd.f32 %v3024_v13, %v3022_v61  ;;  %v2465_v19 = vmul.f32 %v3024_v13, %v3024_v13 }
 0x1f2   : > { %v2470_v20 = vadd.f32 %v2464_v16, %v2462_v14  ;;  %v2183_v22 = vpop.f32.mrb[4].mxu1 }
 0x1f3   : > { %v2479_v21 = vadd.f32 %v2465_v19, %v2463_v17  ;;  %v2395_v23 = vpop.f32.mrb[4].mxu0  ;;  %v2185_v25 = vpop.f32.mrb[5].mxu1 }
 0x1f4   : > { %v3025_v24 = vadd.f32 %v2395_v23, %v2183_v22  ;;  %v2397_v26 = vpop.f32.mrb[5].mxu0  ;;  %v2187_v28 = vpop.f32.mrb[6].mxu1 }
 0x1f5   : > { %v3026_v27 = vadd.f32 %v2397_v26, %v2185_v25  ;;  %v2399_v29 = vpop.f32.mrb[6].mxu0  ;;  %v2189_v33 = vpop.f32.mrb[7].mxu1 }
 0x1f6   : > { %2414 = vst [vmem:[#allocation2 + $0x20] sm:$0xff] %v3025_v24  ;;  %v2420_v30 = vadd.f32 %v3025_v24, %v2419_v15  ;;  %v2466_v31 = vmul.f32 %v3025_v24, %v3025_v24  ;;  %v3027_v32 = vadd.f32 %v2399_v29, %v2187_v28  ;;  %v2401_v34 = vpop.f32.mrb[7].mxu0  ;;  %v2418_v15 = vld [vmem:[#allocation3] sm:$0x3] }
 0x1f7   : > { %2415 = vst [vmem:[#allocation2 + $0x28] sm:$0xff] %v3026_v27  ;;  %v2429_v35 = vadd.f32 %v3026_v27, %v2428_v18  ;;  %v2467_v36 = vmul.f32 %v3026_v27, %v3026_v27  ;;  %v3028_v37 = vadd.f32 %v2401_v34, %v2189_v33  ;;  %v2461_v18 = vld [vmem:[#allocation4] sm:$0x3] }
 0x1f8   : > { %v2471_v38 = vadd.f32 %v2470_v20, %v2466_v31  ;;  %2416 = vst [vmem:[#allocation2 + $0x30] sm:$0xff] %v3027_v32  ;;  %v2421_v39 = vadd.f32 %v3027_v32, %v2420_v30  ;;  %v2468_v40 = vmul.f32 %v3027_v32, %v3027_v32 }
 0x1f9   : > { %v2480_v41 = vadd.f32 %v2479_v21, %v2467_v36  ;;  %2417 = vst [vmem:[#allocation2 + $0x38] sm:$0xff] %v3028_v37  ;;  %v2430_v42 = vadd.f32 %v3028_v37, %v2429_v35  ;;  %v2469_v43 = vmul.f32 %v3028_v37, %v3028_v37 }
 0x1fa   : > { %v2422_v45 = vrot.slane %v2421_v39, 4  ;;  %v2472_v46 = vadd.f32 %v2471_v38, %v2468_v40 }
 0x1fb   : > { %v2431_v50 = vrot.slane %v2430_v42, 4  ;;  %v2481_v51 = vadd.f32 %v2480_v41, %v2469_v43 }
 0x1fc   : > { %v2423_v44 = vadd.f32 %v2422_v45, %v2421_v39  ;;  %v2473_v47 = vrot.slane %v2472_v46, 4 }
 0x1fd   : > { %v2432_v48 = vadd.f32 %v2431_v50, %v2430_v42  ;;  %v2482_v54 = vrot.slane %v2481_v51, 4 }
 0x1fe   : > { %v2424_v55 = vrot.slane %v2423_v44, 2  ;;  %v2474_v56 = vadd.f32 %v2473_v47, %v2472_v46 }
 0x1ff   : > { %v2433_v57 = vrot.slane %v2432_v48, 2  ;;  %v2483_v59 = vadd.f32 %v2482_v54, %v2481_v51 }
 0x200   : > { %v2425_v60 = vadd.f32 %v2424_v55, %v2423_v44  ;;  %v2475_v0 = vrot.slane %v2474_v56, 2 }
 0x201   : > { %v2434_v1 = vadd.f32 %v2433_v57, %v2432_v48  ;;  %v2484_v4 = vrot.slane %v2483_v59, 2 }
 0x202   : > { %v2426_v5 = vrot.slane %v2425_v60, 1  ;;  %v2476_v6 = vadd.f32 %v2475_v0, %v2474_v56 }
 0x203   : > { %v2435_v7 = vrot.slane %v2434_v1, 1  ;;  %v2485_v8 = vadd.f32 %v2484_v4, %v2483_v59 }
 0x204   : > { %v2427_v9 = vadd.f32 %v2426_v5, %v2425_v60  ;;  %v2477_v58 = vrot.slane %v2476_v6, 1 }
 0x205   : > { %v2436_v61 = vadd.f32 %v2435_v7, %v2434_v1  ;;  %v2486_v62 = vrot.slane %v2485_v8, 1 }
 0x206   : > { %v2478_v63 = vadd.f32 %v2477_v58, %v2476_v6 }
 0x207   : > { %v2439_v11 = vcombine.low %v2427_v9, %v2436_v61  ;;  %v2487_v12 = vadd.f32 %v2486_v62, %v2485_v8 }
 0x209   : > { %v2446_v13 = vrot.slane %v2439_v11, %v2445_v10  ;;  %v2490_v14 = vcombine.low %v2478_v63, %v2487_v12 }
 0x20b   : > { %v2453_v16 = vrot.slane %v2446_v13, %v2445_v10  ;;  %v2497_v17 = vrot.slane %v2490_v14, %v2445_v10 }
 0x20d   : > { %v2455_v19 = vadd.f32 %v2453_v16, %v2418_v15  ;;  %v2504_v20 = vrot.slane %v2497_v17, %v2445_v10 }
 0x20f   : > { %2460 = vst.msk [vmem:[#allocation3] sm:$0x3] %vm2458_vm1, %v2455_v19  ;;  %v2506_v21 = vadd.f32 %v2504_v20, %v2461_v18 }
 0x211   : > { %2507 = vst.msk [vmem:[#allocation4] sm:$0x3] %vm2458_vm1, %v2506_v21 }
 0x212 PF: > { %p2508_p6 = scmp.eq.s32.totalorder %s3503_s15, 1 }
 0x213   : > { %v2524_v30 = vlaneseq (%p2508_p6)  ;;  %v2520_v31 = vld [vmem:[%s4505_s2] sm:$0x3] (%p2508_p6) }
 0x214   : > { %2512 = sbr.rel (!%p2508_p6) target bundleno = 571 (0x23b), region = 48  ;;  %v2529_v34 = vld [vmem:[%s4506_s3] sm:$0x3] (%p2508_p6) }
 0x215   : > { %vm2526_vm2 = vcmp.lt.s32.totalorder (%p2508_p6), %v2524_v30, 256 }
 0x216   : > { %v2513_v22 = vld [vmem:[#allocation3] sm:$0x3] (%p2508_p6) }
 0x217   : > { %v2514_v24 = vmul.f32 (%p2508_p6), 0.03125, %v2513_v22 }
 0x218   : > { %v2515_v23 = vld [vmem:[#allocation4] sm:$0x3] (%p2508_p6) }
 0x219   : > { %v2516_v25 = vmul.f32 (%p2508_p6), 0.03125, %v2515_v23  ;;  %v2517_v26 = vmul.f32 (%p2508_p6), %v2514_v24, %v2514_v24 }
 0x21b   : > { %v2518_v27 = vsub.f32 %v2516_v25, %v2517_v26 }
 0x21d   : > { %v2519_v28 = vmax.f32 %v2518_v27, 0.0 }
 0x21f   : > { %v2521_v29 = vadd.f32 1e-05, %v2519_v28 }
 0x221   : > { %3487 = vrsqrt.f32 %v2521_v29 }
 0x22b   : > { %v3488_v32 = vpop.eup %3487 }
 0x22c   : > { %v2523_v33 = vmul.f32 %v3488_v32, %v2520_v31 }
 0x22e   : > { %2528 = vst.msk [vmem:[#allocation5] sm:$0x3] %vm2526_vm2, %v2523_v33 }
 0x235   : > { %v2530_v35 = vld [vmem:[#allocation5] sm:$0x3] }
 0x236   : > { %v2531_v36 = vmul.f32 %v2530_v35, %v2514_v24 }
 0x238   : > { %v2532_v37 = vsub.f32 %v2529_v34, %v2531_v36 }
 0x23a   : > { %2533 = vst.msk [vmem:[#allocation6] sm:$0x3] %vm2526_vm2, %v2532_v37 }
 0x23b PF: > { %p3006_p7 = scmp.ne.s32.totalorder %s3503_s15, 1 }
 0x23c   : > { %v2553_v38 = vlaneseq (!%p3006_p7)  ;;  %v2551_v40 = vld [vmem:[#allocation5] sm:$0x3] (!%p3006_p7)  ;;  %v2544_v43 = vld [vmem:[#allocation2 + $0x8] sm:$0xff] (!%p3006_p7)  ;;  %v2545_v50 = vld [vmem:[#allocation2 + $0x10] sm:$0xff] (!%p3006_p7) }
 0x23d   : > { %2536 = sbr.rel (%p3006_p7) target bundleno = 594 (0x252), region = 52  ;;  %v2543_v42 = vld [vmem:[#allocation2] sm:$0xff] (!%p3006_p7)  ;;  %v2546_v51 = vld [vmem:[#allocation2 + $0x18] sm:$0xff] (!%p3006_p7)  ;;  %v2548_v53 = vld [vmem:[#allocation2 + $0x28] sm:$0xff] (!%p3006_p7) }
 0x23e   : > { %v2554_v39 = vshrl.u32 (!%p3006_p7), %v2553_v38, 7  ;;  %v2547_v44 = vld [vmem:[#allocation2 + $0x20] sm:$0xff] (!%p3006_p7)  ;;  %v2549_v54 = vld [vmem:[#allocation2 + $0x30] sm:$0xff] (!%p3006_p7)  ;;  %v2550_v55 = vld [vmem:[#allocation2 + $0x38] sm:$0xff] (!%p3006_p7) }
 0x240   : > { %v2555_v45 = vsub.s32 (!%p3006_p7), 0, %v2554_v39  ;;  %v2559_v46 = vsub.s32 (!%p3006_p7), 1, %v2554_v39 }
 0x241   : > { %v2571_v41 = vld [vmem:[#allocation6] sm:$0x3] (!%p3006_p7) }
 0x242   : > { %v2556_v47 = vrot.slane (!%p3006_p7), %v2551_v40, %v2555_v45  ;;  %v2560_v48 = vrot.slane (!%p3006_p7), %v2551_v40, %v2559_v46  ;;  %v2576_v49 = vrot.slane (!%p3006_p7), %v2571_v41, %v2555_v45  ;;  %v2580_v52 = vrot.slane (!%p3006_p7), %v2571_v41, %v2559_v46 }
 0x244   : > { %v2563_v56 = vmul.f32 %v2556_v47, %v2543_v42  ;;  %v2564_v57 = vmul.f32 %v2560_v48, %v2544_v43  ;;  %v2565_v59 = vmul.f32 %v2556_v47, %v2545_v50  ;;  %v2566_v60 = vmul.f32 %v2560_v48, %v2546_v51 }
 0x245   : > { %v2567_v0 = vmul.f32 %v2556_v47, %v2547_v44  ;;  %v2568_v1 = vmul.f32 %v2560_v48, %v2548_v53  ;;  %v2569_v2 = vmul.f32 %v2556_v47, %v2549_v54  ;;  %v2570_v3 = vmul.f32 %v2560_v48, %v2550_v55 }
 0x246   : > { %v2583_v4 = vadd.f32 %v2576_v49, %v2563_v56  ;;  %v2584_v5 = vadd.f32 %v2580_v52, %v2564_v57  ;;  %v2585_v6 = vadd.f32 %v2576_v49, %v2565_v59  ;;  %v2586_v7 = vadd.f32 %v2580_v52, %v2566_v60 }
 0x247   : > { %v2587_v8 = vadd.f32 %v2576_v49, %v2567_v0  ;;  %v2588_v9 = vadd.f32 %v2580_v52, %v2568_v1  ;;  %v2589_v58 = vadd.f32 %v2576_v49, %v2569_v2  ;;  %v2590_v61 = vadd.f32 %v2580_v52, %v2570_v3 }
 0x248   : > { %v2591_v10 = vmul.f32 0.2, %v2583_v4  ;;  %v2592_v62 = vmul.f32 0.2, %v2584_v5  ;;  %v2593_v63 = vmul.f32 0.2, %v2585_v6 }
 0x249   : > { %v2594_v11 = vmul.f32 0.2, %v2586_v7  ;;  %v2595_v12 = vmul.f32 0.2, %v2587_v8  ;;  %v2596_v13 = vmul.f32 0.2, %v2588_v9 }
 0x24a   : > { %v2599_v14 = vmax.f32 %v2583_v4, %v2591_v10  ;;  %v2600_v15 = vmax.f32 %v2584_v5, %v2592_v62  ;;  %v2601_v16 = vmax.f32 %v2585_v6, %v2593_v63  ;;  %v2597_v17 = vmul.f32 0.2, %v2589_v58 }
 0x24b   : > { %v2602_v18 = vmax.f32 %v2586_v7, %v2594_v11  ;;  %v2603_v19 = vmax.f32 %v2587_v8, %v2595_v12  ;;  %v2604_v20 = vmax.f32 %v2588_v9, %v2596_v13  ;;  %v2598_v21 = vmul.f32 0.2, %v2590_v61 }
 0x24c   : > { %v3017_v22 = vpack.c.bf16 %v2600_v15, %v2599_v14  ;;  %v2605_v23 = vmax.f32 %v2589_v58, %v2597_v17 }
 0x24d   : > { %v3018_v24 = vpack.c.bf16 %v2602_v18, %v2601_v16  ;;  %v3019_v25 = vpack.c.bf16 %v2604_v20, %v2603_v19  ;;  %v2606_v26 = vmax.f32 %v2590_v61, %v2598_v21 }
 0x24e   : > { %2631 = vst [vmem:[%s4507_s4] sm:$0xff] %v3017_v22 }
 0x24f   : > { %2632 = vst [vmem:[%s4507_s4 + $0x8] sm:$0xff] %v3018_v24  ;;  %2633 = vst [vmem:[%s4507_s4 + $0x10] sm:$0xff] %v3019_v25  ;;  %v3020_v27 = vpack.c.bf16 %v2606_v26, %v2605_v23 }
 0x251   : > { %2634 = vst [vmem:[%s4507_s4 + $0x18] sm:$0xff] %v3020_v27 }
 0x252 PF: > { %s14_s17 = sadd.s32 1, %s3511_s17   ;;  %s4508_s15 = smov %s3507_s16 }
 0x253   : > { %p11_p8 = scmp.ge.s32.totalorder %s14_s17, 4   ;;  %s4509_s16 = smov %s4511_s18 }
 0x255   :  { %13 = sbr.rel (!%p11_p8) target bundleno = 2 (0x2), region = 84 }

// kernel: discriminator_forward.8
= control target key start
LH: loop header
LB: loop body
LE: loop exit
PB: predicated region body
PF: predicated region fallthrough
CT: control target
= control target key end

     0   :  { %s10989_s15 = smov 0   ;;  %s10991_s16 = smov 0   ;;  %s14254_s0 = inlined_call_operand.vmem [shape: bf16[8,4096], index: 0, kind: input, shape index: {}]   ;;  %s14255_s1 = inlined_call_operand.vmem [shape: bf16[4096,512], index: 1, kind: input, shape index: {}]   ;;  %s14256_s2 = inlined_call_operand.vmem [shape: f32[1,512], index: 2, kind: input, shape index: {}]   ;;  %s14257_s3 = inlined_call_operand.vmem [shape: f32[1,512], index: 3, kind: input, shape index: {}]   ;;  %s14258_s4 = inlined_call_operand.vmem [shape: bf16[8,512], index: 4, kind: output, shape index: {}]  }
   0x1   :  { %s10993_s17 = smov 0  }
   0x2 LB: > { %s26_s18 = sadd.s32 1, %s10956_s16  ;;  %p8151_p0 = scmp.ge.s32.totalorder %s10960_s17, 1  ;;  %s10960_s17 = sphi %s10993_s17, %s14_s17   ;;  %s10956_s16 = sphi %s10991_s16, %s14260_s16   ;;  %s10952_s15 = sphi %s10989_s15, %s14259_s15  }
   0x3   : > { %p28_p1 = scmp.ge.s32.totalorder %s26_s18, 2  ;;  %p184_p2 = scmp.lt.s32.totalorder %s10960_s17, 3 }
   0x5   : > { %s14262_s18 = smov (%p28_p1, %s26_s18), 0  ;;  %p185_p3 = pnand %p8151_p0, %p184_p2 }
   0x6   : > { %p229_p4 = scmp.eq.s32.totalorder (!%p185_p3), %s10952_s15, 0 }
   0x7   : > { %188 = sbr.rel (%p185_p3) target bundleno = 1347 (0x543), region = 36 }
   0xe   : > { %234 = sbr.rel (!%p229_p4) target bundleno = 21 (0x15), region = 40  ;;  %v235_v0 = vlaneseq (%p229_p4)  ;;  %v10962_v1 = vmov (%p229_p4), 0.0  }
  0x10   : > { %vm237_vm0 = vcmp.lt.s32.totalorder (%p229_p4), %v235_v0, 512 }
  0x11   : > { %239 = vst.msk [vmem:[#allocation3] sm:$0xf] (%p229_p4), %vm237_vm0, %v10962_v1  ;;  %240 = vst.msk [vmem:[#allocation4] sm:$0xf] (%p229_p4), %vm237_vm0, %v10962_v1 }
  0x15 PF: > { %p8153_p5 = scmp.ne.s32.totalorder %s10952_s15, 0 }
  0x16   : > { %v9368_v2 = vld [vmem:[%s14255_s1 + $0x4] ss:$16 sps:$4 sm:$0xff] (!%p8153_p5)   ;;  %v9370_v3 = vld [vmem:[%s14255_s1 + $0xc] ss:$16 sps:$4 sm:$0xff] (!%p8153_p5)   ;;  %v9372_v4 = vld [vmem:[%s14255_s1] ss:$16 sps:$4 sm:$0xff] (!%p8153_p5)  }
  0x17   : > { %243 = sbr.rel (%p8153_p5) target bundleno = 1285 (0x505), region = 44  ;;  %6516 = vmatprep.subr.bf16.mxu0 (!%p8153_p5), %v9368_v2  ;;  %v9373_v5 = vld [vmem:[%s14255_s1 + $0x8] ss:$16 sps:$4 sm:$0xff] (!%p8153_p5)   ;;  %7172 = vmatprep.subr.bf16.mxu1 (!%p8153_p5), %v9370_v3  ;;  %v9374_v6 = vld [vmem:[%s14255_s1 + $0x24] ss:$16 sps:$4 sm:$0xff] (!%p8153_p5)  }
  0x18   : > { %6517 = vmatpush1.bf16.msra.mxu0 (!%p8153_p5), %v9372_v4  ;;  %7173 = vmatpush1.bf16.msra.mxu1 (!%p8153_p5), %v9373_v5  ;;  %v9376_v7 = vld [vmem:[%s14255_s1 + $0x2c] ss:$16 sps:$4 sm:$0xff] (!%p8153_p5)   ;;  %v9378_v8 = vld [vmem:[%s14255_s1 + $0x20] ss:$16 sps:$4 sm:$0xff] (!%p8153_p5)   ;;  %v9379_v9 = vld [vmem:[%s14255_s1 + $0x28] ss:$16 sps:$4 sm:$0xff] (!%p8153_p5)  }
  0x19   : > { %6518 = vmatprep.subr.bf16.mxu0 (!%p8153_p5), %v9374_v6  ;;  %7174 = vmatprep.subr.bf16.mxu1 (!%p8153_p5), %v9376_v7  ;;  %v9380_v10 = vld [vmem:[%s14255_s1 + $0x44] ss:$16 sps:$4 sm:$0xff] (!%p8153_p5)   ;;  %v9382_v11 = vld [vmem:[%s14255_s1 + $0x4c] ss:$16 sps:$4 sm:$0xff] (!%p8153_p5)   ;;  %v9384_v12 = vld [vmem:[%s14255_s1 + $0x40] ss:$16 sps:$4 sm:$0xff] (!%p8153_p5)  }
  0x1a   : > { %v9385_v13 = vld [vmem:[%s14255_s1 + $0x48] ss:$16 sps:$4 sm:$0xff] (!%p8153_p5)   ;;  %v9386_v14 = vld [vmem:[%s14255_s1 + $0x64] ss:$16 sps:$4 sm:$0xff] (!%p8153_p5)   ;;  %v9388_v15 = vld [vmem:[%s14255_s1 + $0x6c] ss:$16 sps:$4 sm:$0xff] (!%p8153_p5)  }
  0x1b   : > { %v9390_v16 = vld [vmem:[%s14255_s1 + $0x60] ss:$16 sps:$4 sm:$0xff] (!%p8153_p5)   ;;  %v9391_v17 = vld [vmem:[%s14255_s1 + $0x68] ss:$16 sps:$4 sm:$0xff] (!%p8153_p5)   ;;  %v9392_v18 = vld [vmem:[%s14255_s1 + $0x84] ss:$16 sps:$4 sm:$0xff] (!%p8153_p5)  }
  0x1c   : > { %6519 = vmatpush1.bf16.msra.mxu0 (!%p8153_p5), %v9378_v8  ;;  %7175 = vmatpush1.bf16.msra.mxu1 (!%p8153_p5), %v9379_v9  ;;  %v9394_v19 = vld [vmem:[%s14255_s1 + $0x8c] ss:$16 sps:$4 sm:$0xff] (!%p8153_p5)   ;;  %v9396_v20 = vld [vmem:[%s14255_s1 + $0x80] ss:$16 sps:$4 sm:$0xff] (!%p8153_p5)   ;;  %v9397_v21 = vld [vmem:[%s14255_s1 + $0x88] ss:$16 sps:$4 sm:$0xff] (!%p8153_p5)  }
  0x1d   : > { %6520 = vmatprep.subr.bf16.mxu0 (!%p8153_p5), %v9380_v10  ;;  %7176 = vmatprep.subr.bf16.mxu1 (!%p8153_p5), %v9382_v11  ;;  %v9398_v22 = vld [vmem:[%s14255_s1 + $0xa4] ss:$16 sps:$4 sm:$0xff] (!%p8153_p5)   ;;  %v9400_v23 = vld [vmem:[%s14255_s1 + $0xac] ss:$16 sps:$4 sm:$0xff] (!%p8153_p5)   ;;  %v9402_v24 = vld [vmem:[%s14255_s1 + $0xa0] ss:$16 sps:$4 sm:$0xff] (!%p8153_p5)  }
  0x1e   : > { %v9403_v25 = vld [vmem:[%s14255_s1 + $0xa8] ss:$16 sps:$4 sm:$0xff]   ;;  %v9404_v26 = vld [vmem:[%s14255_s1 + $0xc4] ss:$16 sps:$4 sm:$0xff]   ;;  %v9406_v27 = vld [vmem:[%s14255_s1 + $0xcc] ss:$16 sps:$4 sm:$0xff]  }
  0x1f   : > { %v9408_v28 = vld [vmem:[%s14255_s1 + $0xc0] ss:$16 sps:$4 sm:$0xff]   ;;  %v9409_v29 = vld [vmem:[%s14255_s1 + $0xc8] ss:$16 sps:$4 sm:$0xff]   ;;  %v9410_v30 = vld [vmem:[%s14255_s1 + $0xe4] ss:$16 sps:$4 sm:$0xff]  }
  0x20   : > { %6521 = vmatpush1.bf16.msra.mxu0 %v9384_v12  ;;  %7177 = vmatpush1.bf16.msra.mxu1 %v9385_v13  ;;  %v9412_v31 = vld [vmem:[%s14255_s1 + $0xec] ss:$16 sps:$4 sm:$0xff]   ;;  %v9414_v32 = vld [vmem:[%s14255_s1 + $0xe0] ss:$16 sps:$4 sm:$0xff]   ;;  %v9415_v33 = vld [vmem:[%s14255_s1 + $0xe8] ss:$16 sps:$4 sm:$0xff]  }
  0x21   : > { %6522 = vmatprep.subr.bf16.mxu0 %v9386_v14  ;;  %7178 = vmatprep.subr.bf16.mxu1 %v9388_v15  ;;  %v9416_v34 = vld [vmem:[%s14255_s1 + $0x104] ss:$16 sps:$4 sm:$0xff]   ;;  %v9418_v35 = vld [vmem:[%s14255_s1 + $0x10c] ss:$16 sps:$4 sm:$0xff]   ;;  %v9420_v36 = vld [vmem:[%s14255_s1 + $0x100] ss:$16 sps:$4 sm:$0xff]  }
  0x22   : > { %v9421_v37 = vld [vmem:[%s14255_s1 + $0x108] ss:$16 sps:$4 sm:$0xff]   ;;  %v9422_v38 = vld [vmem:[%s14255_s1 + $0x124] ss:$16 sps:$4 sm:$0xff]   ;;  %v9424_v39 = vld [vmem:[%s14255_s1 + $0x12c] ss:$16 sps:$4 sm:$0xff]  }
  0x23   : > { %v9426_v40 = vld [vmem:[%s14255_s1 + $0x120] ss:$16 sps:$4 sm:$0xff]   ;;  %v9427_v41 = vld [vmem:[%s14255_s1 + $0x128] ss:$16 sps:$4 sm:$0xff]   ;;  %v9428_v42 = vld [vmem:[%s14255_s1 + $0x144] ss:$16 sps:$4 sm:$0xff]  }
  0x24   : > { %6523 = vmatpush1.bf16.msra.mxu0 %v9390_v16  ;;  %7179 = vmatpush1.bf16.msra.mxu1 %v9391_v17  ;;  %v9430_v43 = vld [vmem:[%s14255_s1 + $0x14c] ss:$16 sps:$4 sm:$0xff]   ;;  %v9432_v44 = vld [vmem:[%s14255_s1 + $0x140] ss:$16 sps:$4 sm:$0xff]   ;;  %v9433_v45 = vld [vmem:[%s14255_s1 + $0x148] ss:$16 sps:$4 sm:$0xff]  }
  0x25   : > { %6524 = vmatprep.subr.bf16.mxu0 %v9392_v18  ;;  %7180 = vmatprep.subr.bf16.mxu1 %v9394_v19  ;;  %v9434_v46 = vld [vmem:[%s14255_s1 + $0x164] ss:$16 sps:$4 sm:$0xff]   ;;  %v9436_v47 = vld [vmem:[%s14255_s1 + $0x16c] ss:$16 sps:$4 sm:$0xff]   ;;  %v9438_v49 = vld [vmem:[%s14255_s1 + $0x160] ss:$16 sps:$4 sm:$0xff]  }
  0x26   : > { %v244_v48 = vld [vmem:[%s14254_s0] sm:$0xff]  ;;  %v9439_v51 = vld [vmem:[%s14255_s1 + $0x168] ss:$16 sps:$4 sm:$0xff]   ;;  %v9442_v53 = vld [vmem:[%s14255_s1 + $0x18c] ss:$16 sps:$4 sm:$0xff]  }
  0x27   : > { %v8155_v50 = vcombine.high %v244_v48, %v244_v48  ;;  %v9440_v52 = vld [vmem:[%s14255_s1 + $0x184] ss:$16 sps:$4 sm:$0xff]   ;;  %v9444_v54 = vld [vmem:[%s14255_s1 + $0x180] ss:$16 sps:$4 sm:$0xff]   ;;  %v9445_v55 = vld [vmem:[%s14255_s1 + $0x188] ss:$16 sps:$4 sm:$0xff]   ;;  %v8154_v6 = vcombine.low %v244_v48, %v244_v48 }
  0x28   : > { %6525 = vmatpush1.bf16.msra.mxu0 %v9396_v20  ;;  %7181 = vmatpush1.bf16.msra.mxu1 %v9397_v21  ;;  %v9446_v56 = vld [vmem:[%s14255_s1 + $0x1a4] ss:$16 sps:$4 sm:$0xff]   ;;  %v9448_v57 = vld [vmem:[%s14255_s1 + $0x1ac] ss:$16 sps:$4 sm:$0xff]   ;;  %v9450_v58 = vld [vmem:[%s14255_s1 + $0x1a0] ss:$16 sps:$4 sm:$0xff]  }
  0x29   : > { %6526 = vmatprep.subr.bf16.mxu0 %v9398_v22  ;;  %7182 = vmatprep.subr.bf16.mxu1 %v9400_v23  ;;  %v9451_v59 = vld [vmem:[%s14255_s1 + $0x1a8] ss:$16 sps:$4 sm:$0xff]   ;;  %v9452_v60 = vld [vmem:[%s14255_s1 + $0x1c4] ss:$16 sps:$4 sm:$0xff]   ;;  %v9454_v61 = vld [vmem:[%s14255_s1 + $0x1cc] ss:$16 sps:$4 sm:$0xff]  }
  0x2a   : > { %6548 = vmatprep.mubr.bf16.mxu0 %v8155_v50  ;;  %7204 = vmatprep.mubr.bf16.mxu1 %v8155_v50  ;;  %v9456_v62 = vld [vmem:[%s14255_s1 + $0x1c0] ss:$16 sps:$4 sm:$0xff]   ;;  %v9457_v63 = vld [vmem:[%s14255_s1 + $0x1c8] ss:$16 sps:$4 sm:$0xff]   ;;  %v9458_v0 = vld [vmem:[%s14255_s1 + $0x1e4] ss:$16 sps:$4 sm:$0xff]  }
  0x2b   : > { %v9460_v1 = vld [vmem:[%s14255_s1 + $0x1ec] ss:$16 sps:$4 sm:$0xff]   ;;  %v9462_v2 = vld [vmem:[%s14255_s1 + $0x1e0] ss:$16 sps:$4 sm:$0xff]   ;;  %v9463_v3 = vld [vmem:[%s14255_s1 + $0x1e8] ss:$16 sps:$4 sm:$0xff]  }
  0x2c   : > { %6527 = vmatpush1.bf16.msra.mxu0 %v9402_v24  ;;  %7183 = vmatpush1.bf16.msra.mxu1 %v9403_v25  ;;  %v9468_v4 = vld [vmem:[%s14255_s1 + $0x204] ss:$16 sps:$4 sm:$0xff]   ;;  %v9471_v5 = vld [vmem:[%s14255_s1 + $0x20c] ss:$16 sps:$4 sm:$0xff]   ;;  %v9466_v7 = vld [vmem:[%s14255_s1 + $0x200] ss:$16 sps:$4 sm:$0xff]  }
  0x2d   : > { %6528 = vmatprep.subr.bf16.mxu0 %v9404_v26  ;;  %7184 = vmatprep.subr.bf16.mxu1 %v9406_v27  ;;  %v9469_v8 = vld [vmem:[%s14255_s1 + $0x208] ss:$16 sps:$4 sm:$0xff]   ;;  %v9474_v9 = vld [vmem:[%s14255_s1 + $0x224] ss:$16 sps:$4 sm:$0xff]   ;;  %v9477_v10 = vld [vmem:[%s14255_s1 + $0x22c] ss:$16 sps:$4 sm:$0xff]  }
  0x2e   : > { %v9472_v11 = vld [vmem:[%s14255_s1 + $0x220] ss:$16 sps:$4 sm:$0xff]   ;;  %v9475_v12 = vld [vmem:[%s14255_s1 + $0x228] ss:$16 sps:$4 sm:$0xff]   ;;  %v9480_v13 = vld [vmem:[%s14255_s1 + $0x244] ss:$16 sps:$4 sm:$0xff]  }
  0x2f   : > { %v9483_v14 = vld [vmem:[%s14255_s1 + $0x24c] ss:$16 sps:$4 sm:$0xff]   ;;  %v9478_v15 = vld [vmem:[%s14255_s1 + $0x240] ss:$16 sps:$4 sm:$0xff]   ;;  %v9481_v16 = vld [vmem:[%s14255_s1 + $0x248] ss:$16 sps:$4 sm:$0xff]  }
  0x30   : > { %6529 = vmatpush1.bf16.msra.mxu0 %v9408_v28  ;;  %7185 = vmatpush1.bf16.msra.mxu1 %v9409_v29  ;;  %v9486_v17 = vld [vmem:[%s14255_s1 + $0x264] ss:$16 sps:$4 sm:$0xff]   ;;  %v9489_v18 = vld [vmem:[%s14255_s1 + $0x26c] ss:$16 sps:$4 sm:$0xff]   ;;  %v9484_v19 = vld [vmem:[%s14255_s1 + $0x260] ss:$16 sps:$4 sm:$0xff]  }
  0x31   : > { %6530 = vmatprep.subr.bf16.mxu0 %v9410_v30  ;;  %7186 = vmatprep.subr.bf16.mxu1 %v9412_v31  ;;  %v9487_v20 = vld [vmem:[%s14255_s1 + $0x268] ss:$16 sps:$4 sm:$0xff]   ;;  %v9492_v21 = vld [vmem:[%s14255_s1 + $0x284] ss:$16 sps:$4 sm:$0xff]   ;;  %v9495_v22 = vld [vmem:[%s14255_s1 + $0x28c] ss:$16 sps:$4 sm:$0xff]  }
  0x32   : > { %v9490_v23 = vld [vmem:[%s14255_s1 + $0x280] ss:$16 sps:$4 sm:$0xff]   ;;  %v9493_v24 = vld [vmem:[%s14255_s1 + $0x288] ss:$16 sps:$4 sm:$0xff]   ;;  %v9498_v25 = vld [vmem:[%s14255_s1 + $0x2a4] ss:$16 sps:$4 sm:$0xff]  }
  0x33   : > { %v9501_v26 = vld [vmem:[%s14255_s1 + $0x2ac] ss:$16 sps:$4 sm:$0xff]   ;;  %v9496_v27 = vld [vmem:[%s14255_s1 + $0x2a0] ss:$16 sps:$4 sm:$0xff]   ;;  %v9499_v28 = vld [vmem:[%s14255_s1 + $0x2a8] ss:$16 sps:$4 sm:$0xff]  }
  0x34   : > { %6531 = vmatpush1.bf16.msra.mxu0 %v9414_v32  ;;  %7187 = vmatpush1.bf16.msra.mxu1 %v9415_v33  ;;  %v9504_v29 = vld [vmem:[%s14255_s1 + $0x2c4] ss:$16 sps:$4 sm:$0xff]   ;;  %v9507_v30 = vld [vmem:[%s14255_s1 + $0x2cc] ss:$16 sps:$4 sm:$0xff]   ;;  %v9502_v33 = vld [vmem:[%s14255_s1 + $0x2c0] ss:$16 sps:$4 sm:$0xff]  }
  0x35   : > { %6532 = vmatprep.subr.bf16.mxu0 %v9416_v34  ;;  %7188 = vmatprep.subr.bf16.mxu1 %v9418_v35  ;;  %v11287_v31 = vld [vmem:[%s14254_s0 + $0x8] sm:$0xff]  ;;  %v9510_v35 = vld [vmem:[%s14255_s1 + $0x2e4] ss:$16 sps:$4 sm:$0xff]  }
  0x36   : > { %v8157_v32 = vcombine.high %v11287_v31, %v11287_v31  ;;  %v9505_v34 = vld [vmem:[%s14255_s1 + $0x2c8] ss:$16 sps:$4 sm:$0xff]   ;;  %v9531_v48 = vld [vmem:[%s14255_s1 + $0x34c] ss:$16 sps:$4 sm:$0xff]  }
  0x37   : > { %v9529_v50 = vld [vmem:[%s14255_s1 + $0x348] ss:$16 sps:$4 sm:$0xff]  }
  0x38   : > { %6533 = vmatpush1.bf16.msra.mxu0 %v9420_v36  ;;  %7189 = vmatpush1.bf16.msra.mxu1 %v9421_v37  ;;  %v9513_v36 = vld [vmem:[%s14255_s1 + $0x2ec] ss:$16 sps:$4 sm:$0xff]   ;;  %v9508_v37 = vld [vmem:[%s14255_s1 + $0x2e0] ss:$16 sps:$4 sm:$0xff]  }
  0x39   : > { %6534 = vmatprep.subr.bf16.mxu0 %v9422_v38  ;;  %7190 = vmatprep.subr.bf16.mxu1 %v9424_v39  ;;  %v9511_v38 = vld [vmem:[%s14255_s1 + $0x2e8] ss:$16 sps:$4 sm:$0xff]   ;;  %v9516_v39 = vld [vmem:[%s14255_s1 + $0x304] ss:$16 sps:$4 sm:$0xff]  }
  0x3c   : > { %6535 = vmatpush1.bf16.msra.mxu0 %v9426_v40  ;;  %7191 = vmatpush1.bf16.msra.mxu1 %v9427_v41  ;;  %v9519_v40 = vld [vmem:[%s14255_s1 + $0x30c] ss:$16 sps:$4 sm:$0xff]   ;;  %v9514_v41 = vld [vmem:[%s14255_s1 + $0x300] ss:$16 sps:$4 sm:$0xff]  }
  0x3d   : > { %6536 = vmatprep.subr.bf16.mxu0 %v9428_v42  ;;  %7192 = vmatprep.subr.bf16.mxu1 %v9430_v43  ;;  %v9517_v42 = vld [vmem:[%s14255_s1 + $0x308] ss:$16 sps:$4 sm:$0xff]   ;;  %v9522_v43 = vld [vmem:[%s14255_s1 + $0x324] ss:$16 sps:$4 sm:$0xff]  }
  0x40   : > { %6537 = vmatpush1.bf16.msra.mxu0 %v9432_v44  ;;  %7193 = vmatpush1.bf16.msra.mxu1 %v9433_v45  ;;  %v9525_v44 = vld [vmem:[%s14255_s1 + $0x32c] ss:$16 sps:$4 sm:$0xff]   ;;  %v9520_v45 = vld [vmem:[%s14255_s1 + $0x320] ss:$16 sps:$4 sm:$0xff]  }
  0x41   : > { %6538 = vmatprep.subr.bf16.mxu0 %v9434_v46  ;;  %7194 = vmatprep.subr.bf16.mxu1 %v9436_v47  ;;  %v9523_v46 = vld [vmem:[%s14255_s1 + $0x328] ss:$16 sps:$4 sm:$0xff]   ;;  %v9528_v47 = vld [vmem:[%s14255_s1 + $0x344] ss:$16 sps:$4 sm:$0xff]  }
  0x44   : > { %6539 = vmatpush1.bf16.msra.mxu0 %v9438_v49  ;;  %7195 = vmatpush1.bf16.msra.mxu1 %v9439_v51  ;;  %v9526_v49 = vld [vmem:[%s14255_s1 + $0x340] ss:$16 sps:$4 sm:$0xff]   ;;  %v9534_v51 = vld [vmem:[%s14255_s1 + $0x364] ss:$16 sps:$4 sm:$0xff]  }
  0x45   : > { %6540 = vmatprep.subr.bf16.mxu0 %v9440_v52  ;;  %7196 = vmatprep.subr.bf16.mxu1 %v9442_v53  ;;  %v9537_v52 = vld [vmem:[%s14255_s1 + $0x36c] ss:$16 sps:$4 sm:$0xff]   ;;  %v9532_v53 = vld [vmem:[%s14255_s1 + $0x360] ss:$16 sps:$4 sm:$0xff]  }
  0x48   : > { %6541 = vmatpush1.bf16.msra.mxu0 %v9444_v54  ;;  %7197 = vmatpush1.bf16.msra.mxu1 %v9445_v55  ;;  %v9535_v54 = vld [vmem:[%s14255_s1 + $0x368] ss:$16 sps:$4 sm:$0xff]   ;;  %v9540_v55 = vld [vmem:[%s14255_s1 + $0x384] ss:$16 sps:$4 sm:$0xff]  }
  0x49   : > { %6542 = vmatprep.subr.bf16.mxu0 %v9446_v56  ;;  %7198 = vmatprep.subr.bf16.mxu1 %v9448_v57  ;;  %v9543_v56 = vld [vmem:[%s14255_s1 + $0x38c] ss:$16 sps:$4 sm:$0xff]   ;;  %v9538_v57 = vld [vmem:[%s14255_s1 + $0x380] ss:$16 sps:$4 sm:$0xff]  }
  0x4c   : > { %6543 = vmatpush1.bf16.msra.mxu0 %v9450_v58  ;;  %7199 = vmatpush1.bf16.msra.mxu1 %v9451_v59  ;;  %v9541_v58 = vld [vmem:[%s14255_s1 + $0x388] ss:$16 sps:$4 sm:$0xff]   ;;  %v9546_v59 = vld [vmem:[%s14255_s1 + $0x3a4] ss:$16 sps:$4 sm:$0xff]  }
  0x4d   : > { %6544 = vmatprep.subr.bf16.mxu0 %v9452_v60  ;;  %7200 = vmatprep.subr.bf16.mxu1 %v9454_v61  ;;  %v9549_v60 = vld [vmem:[%s14255_s1 + $0x3ac] ss:$16 sps:$4 sm:$0xff]   ;;  %v9544_v61 = vld [vmem:[%s14255_s1 + $0x3a0] ss:$16 sps:$4 sm:$0xff]  }
  0x50   : > { %6545 = vmatpush1.bf16.msra.mxu0 %v9456_v62  ;;  %7201 = vmatpush1.bf16.msra.mxu1 %v9457_v63  ;;  %v9547_v62 = vld [vmem:[%s14255_s1 + $0x3a8] ss:$16 sps:$4 sm:$0xff]   ;;  %v9552_v63 = vld [vmem:[%s14255_s1 + $0x3c4] ss:$16 sps:$4 sm:$0xff]  }
  0x51   : > { %6546 = vmatprep.subr.bf16.mxu0 %v9458_v0  ;;  %7202 = vmatprep.subr.bf16.mxu1 %v9460_v1  ;;  %v9555_v0 = vld [vmem:[%s14255_s1 + $0x3cc] ss:$16 sps:$4 sm:$0xff]   ;;  %v9550_v1 = vld [vmem:[%s14255_s1 + $0x3c0] ss:$16 sps:$4 sm:$0xff]  }
  0x54   : > { %6547 = vmatpush1.bf16.msra.mxu0 %v9462_v2  ;;  %7203 = vmatpush1.bf16.msra.mxu1 %v9463_v3  ;;  %v9553_v2 = vld [vmem:[%s14255_s1 + $0x3c8] ss:$16 sps:$4 sm:$0xff]   ;;  %v9558_v3 = vld [vmem:[%s14255_s1 + $0x3e4] ss:$16 sps:$4 sm:$0xff]  }
  0x55   : > { %6557 = vmatprep.subr.bf16.mxu0 %v9468_v4  ;;  %7213 = vmatprep.subr.bf16.mxu1 %v9471_v5  ;;  %v9561_v4 = vld [vmem:[%s14255_s1 + $0x3ec] ss:$16 sps:$4 sm:$0xff]   ;;  %v9556_v5 = vld [vmem:[%s14255_s1 + $0x3e0] ss:$16 sps:$4 sm:$0xff]  }
  0x57   : > { %6549 = vmatmul.mubr.bf16.vlgmr.msra.gmra.mrb[0].mxu0 %v8154_v6  ;;  %7205 = vmatmul.mubr.bf16.vlgmr.msra.gmra.mrb[0].mxu1 %v8154_v6  ;;  %v9559_v6 = vld [vmem:[%s14255_s1 + $0x3e8] ss:$16 sps:$4 sm:$0xff]  }
  0x58   : > { %6558 = vmatpush1.bf16.msra.mxu0 %v9466_v7  ;;  %7214 = vmatpush1.bf16.msra.mxu1 %v9469_v8  ;;  %v9566_v7 = vld [vmem:[%s14255_s1 + $0x404] ss:$16 sps:$4 sm:$0xff]   ;;  %v9569_v8 = vld [vmem:[%s14255_s1 + $0x40c] ss:$16 sps:$4 sm:$0xff]  }
  0x59   : > { %6559 = vmatprep.subr.bf16.mxu0 %v9474_v9  ;;  %7215 = vmatprep.subr.bf16.mxu1 %v9477_v10  ;;  %v8156_v9 = vcombine.low %v11287_v31, %v11287_v31  ;;  %v9564_v10 = vld [vmem:[%s14255_s1 + $0x400] ss:$16 sps:$4 sm:$0xff]   ;;  %v9599_v31 = vld [vmem:[%s14255_s1 + $0x4ac] ss:$16 sps:$4 sm:$0xff]  }
  0x5a   : > { %6589 = vmatprep.mubr.bf16.mxu0 %v8157_v32  ;;  %7245 = vmatprep.mubr.bf16.mxu1 %v8157_v32  ;;  %v9594_v32 = vld [vmem:[%s14255_s1 + $0x4a0] ss:$16 sps:$4 sm:$0xff]  }
  0x5c   : > { %6560 = vmatpush1.bf16.msra.mxu0 %v9472_v11  ;;  %7216 = vmatpush1.bf16.msra.mxu1 %v9475_v12  ;;  %v9567_v11 = vld [vmem:[%s14255_s1 + $0x408] ss:$16 sps:$4 sm:$0xff]   ;;  %v9572_v12 = vld [vmem:[%s14255_s1 + $0x424] ss:$16 sps:$4 sm:$0xff]  }
  0x5d   : > { %6561 = vmatprep.subr.bf16.mxu0 %v9480_v13  ;;  %7217 = vmatprep.subr.bf16.mxu1 %v9483_v14  ;;  %v11425_v13 = vld [vmem:[%s14254_s0 + $0x10] sm:$0xff]  ;;  %v9575_v14 = vld [vmem:[%s14255_s1 + $0x42c] ss:$16 sps:$4 sm:$0xff]  }
  0x60   : > { %6562 = vmatpush1.bf16.msra.mxu0 %v9478_v15  ;;  %7218 = vmatpush1.bf16.msra.mxu1 %v9481_v16  ;;  %v8159_v15 = vcombine.high %v11425_v13, %v11425_v13  ;;  %v9570_v16 = vld [vmem:[%s14255_s1 + $0x420] ss:$16 sps:$4 sm:$0xff]  }
  0x61   : > { %6563 = vmatprep.subr.bf16.mxu0 %v9486_v17  ;;  %7219 = vmatprep.subr.bf16.mxu1 %v9489_v18  ;;  %v9573_v17 = vld [vmem:[%s14255_s1 + $0x428] ss:$16 sps:$4 sm:$0xff]   ;;  %v9578_v18 = vld [vmem:[%s14255_s1 + $0x444] ss:$16 sps:$4 sm:$0xff]  }
  0x64   : > { %6564 = vmatpush1.bf16.msra.mxu0 %v9484_v19  ;;  %7220 = vmatpush1.bf16.msra.mxu1 %v9487_v20  ;;  %v9581_v19 = vld [vmem:[%s14255_s1 + $0x44c] ss:$16 sps:$4 sm:$0xff]   ;;  %v9576_v20 = vld [vmem:[%s14255_s1 + $0x440] ss:$16 sps:$4 sm:$0xff]  }
  0x65   : > { %6565 = vmatprep.subr.bf16.mxu0 %v9492_v21  ;;  %7221 = vmatprep.subr.bf16.mxu1 %v9495_v22  ;;  %v9579_v21 = vld [vmem:[%s14255_s1 + $0x448] ss:$16 sps:$4 sm:$0xff]   ;;  %v9584_v22 = vld [vmem:[%s14255_s1 + $0x464] ss:$16 sps:$4 sm:$0xff]  }
  0x68   : > { %6566 = vmatpush1.bf16.msra.mxu0 %v9490_v23  ;;  %7222 = vmatpush1.bf16.msra.mxu1 %v9493_v24  ;;  %v9587_v23 = vld [vmem:[%s14255_s1 + $0x46c] ss:$16 sps:$4 sm:$0xff]   ;;  %v9582_v24 = vld [vmem:[%s14255_s1 + $0x460] ss:$16 sps:$4 sm:$0xff]  }
  0x69   : > { %6567 = vmatprep.subr.bf16.mxu0 %v9498_v25  ;;  %7223 = vmatprep.subr.bf16.mxu1 %v9501_v26  ;;  %v9585_v25 = vld [vmem:[%s14255_s1 + $0x468] ss:$16 sps:$4 sm:$0xff]   ;;  %v9590_v26 = vld [vmem:[%s14255_s1 + $0x484] ss:$16 sps:$4 sm:$0xff]  }
  0x6c   : > { %6568 = vmatpush1.bf16.msra.mxu0 %v9496_v27  ;;  %7224 = vmatpush1.bf16.msra.mxu1 %v9499_v28  ;;  %v9593_v27 = vld [vmem:[%s14255_s1 + $0x48c] ss:$16 sps:$4 sm:$0xff]   ;;  %v9588_v28 = vld [vmem:[%s14255_s1 + $0x480] ss:$16 sps:$4 sm:$0xff]  }
  0x6d   : > { %6569 = vmatprep.subr.bf16.mxu0 %v9504_v29  ;;  %7225 = vmatprep.subr.bf16.mxu1 %v9507_v30  ;;  %v9591_v29 = vld [vmem:[%s14255_s1 + $0x488] ss:$16 sps:$4 sm:$0xff]   ;;  %v9596_v30 = vld [vmem:[%s14255_s1 + $0x4a4] ss:$16 sps:$4 sm:$0xff]  }
  0x70   : > { %6570 = vmatpush1.bf16.msra.mxu0 %v9502_v33  ;;  %7226 = vmatpush1.bf16.msra.mxu1 %v9505_v34  ;;  %v9597_v33 = vld [vmem:[%s14255_s1 + $0x4a8] ss:$16 sps:$4 sm:$0xff]   ;;  %v9602_v34 = vld [vmem:[%s14255_s1 + $0x4c4] ss:$16 sps:$4 sm:$0xff]  }
  0x71   : > { %6571 = vmatprep.subr.bf16.mxu0 %v9510_v35  ;;  %7227 = vmatprep.subr.bf16.mxu1 %v9513_v36  ;;  %v9605_v35 = vld [vmem:[%s14255_s1 + $0x4cc] ss:$16 sps:$4 sm:$0xff]   ;;  %v9600_v36 = vld [vmem:[%s14255_s1 + $0x4c0] ss:$16 sps:$4 sm:$0xff]  }
  0x74   : > { %6572 = vmatpush1.bf16.msra.mxu0 %v9508_v37  ;;  %7228 = vmatpush1.bf16.msra.mxu1 %v9511_v38  ;;  %v9603_v37 = vld [vmem:[%s14255_s1 + $0x4c8] ss:$16 sps:$4 sm:$0xff]   ;;  %v9608_v38 = vld [vmem:[%s14255_s1 + $0x4e4] ss:$16 sps:$4 sm:$0xff]  }
  0x75   : > { %6573 = vmatprep.subr.bf16.mxu0 %v9516_v39  ;;  %7229 = vmatprep.subr.bf16.mxu1 %v9519_v40  ;;  %v9611_v39 = vld [vmem:[%s14255_s1 + $0x4ec] ss:$16 sps:$4 sm:$0xff]   ;;  %v9606_v40 = vld [vmem:[%s14255_s1 + $0x4e0] ss:$16 sps:$4 sm:$0xff]  }
  0x78   : > { %6574 = vmatpush1.bf16.msra.mxu0 %v9514_v41  ;;  %7230 = vmatpush1.bf16.msra.mxu1 %v9517_v42  ;;  %v9609_v41 = vld [vmem:[%s14255_s1 + $0x4e8] ss:$16 sps:$4 sm:$0xff]   ;;  %v9614_v42 = vld [vmem:[%s14255_s1 + $0x504] ss:$16 sps:$4 sm:$0xff]  }
  0x79   : > { %6575 = vmatprep.subr.bf16.mxu0 %v9522_v43  ;;  %7231 = vmatprep.subr.bf16.mxu1 %v9525_v44  ;;  %v9617_v43 = vld [vmem:[%s14255_s1 + $0x50c] ss:$16 sps:$4 sm:$0xff]   ;;  %v9612_v44 = vld [vmem:[%s14255_s1 + $0x500] ss:$16 sps:$4 sm:$0xff]  }
  0x7c   : > { %6576 = vmatpush1.bf16.msra.mxu0 %v9520_v45  ;;  %7232 = vmatpush1.bf16.msra.mxu1 %v9523_v46  ;;  %v9615_v45 = vld [vmem:[%s14255_s1 + $0x508] ss:$16 sps:$4 sm:$0xff]   ;;  %v9620_v46 = vld [vmem:[%s14255_s1 + $0x524] ss:$16 sps:$4 sm:$0xff]  }
  0x7d   : > { %6577 = vmatprep.subr.bf16.mxu0 %v9528_v47  ;;  %7233 = vmatprep.subr.bf16.mxu1 %v9531_v48  ;;  %v9623_v47 = vld [vmem:[%s14255_s1 + $0x52c] ss:$16 sps:$4 sm:$0xff]   ;;  %v9618_v48 = vld [vmem:[%s14255_s1 + $0x520] ss:$16 sps:$4 sm:$0xff]  }
  0x80   : > { %6578 = vmatpush1.bf16.msra.mxu0 %v9526_v49  ;;  %7234 = vmatpush1.bf16.msra.mxu1 %v9529_v50  ;;  %v9621_v49 = vld [vmem:[%s14255_s1 + $0x528] ss:$16 sps:$4 sm:$0xff]   ;;  %v9626_v50 = vld [vmem:[%s14255_s1 + $0x544] ss:$16 sps:$4 sm:$0xff]  }
  0x81   : > { %6579 = vmatprep.subr.bf16.mxu0 %v9534_v51  ;;  %7235 = vmatprep.subr.bf16.mxu1 %v9537_v52  ;;  %v9629_v51 = vld [vmem:[%s14255_s1 + $0x54c] ss:$16 sps:$4 sm:$0xff]   ;;  %v9624_v52 = vld [vmem:[%s14255_s1 + $0x540] ss:$16 sps:$4 sm:$0xff]  }
  0x84   : > { %6580 = vmatpush1.bf16.msra.mxu0 %v9532_v53  ;;  %7236 = vmatpush1.bf16.msra.mxu1 %v9535_v54  ;;  %v9627_v53 = vld [vmem:[%s14255_s1 + $0x548] ss:$16 sps:$4 sm:$0xff]   ;;  %v9632_v54 = vld [vmem:[%s14255_s1 + $0x564] ss:$16 sps:$4 sm:$0xff]  }
  0x85   : > { %6581 = vmatprep.subr.bf16.mxu0 %v9540_v55  ;;  %7237 = vmatprep.subr.bf16.mxu1 %v9543_v56  ;;  %v9635_v55 = vld [vmem:[%s14255_s1 + $0x56c] ss:$16 sps:$4 sm:$0xff]   ;;  %v9630_v56 = vld [vmem:[%s14255_s1 + $0x560] ss:$16 sps:$4 sm:$0xff]  }
  0x88   : > { %6582 = vmatpush1.bf16.msra.mxu0 %v9538_v57  ;;  %7238 = vmatpush1.bf16.msra.mxu1 %v9541_v58  ;;  %v9633_v57 = vld [vmem:[%s14255_s1 + $0x568] ss:$16 sps:$4 sm:$0xff]   ;;  %v9638_v58 = vld [vmem:[%s14255_s1 + $0x584] ss:$16 sps:$4 sm:$0xff]  }
  0x89   : > { %6583 = vmatprep.subr.bf16.mxu0 %v9546_v59  ;;  %7239 = vmatprep.subr.bf16.mxu1 %v9549_v60  ;;  %v9641_v59 = vld [vmem:[%s14255_s1 + $0x58c] ss:$16 sps:$4 sm:$0xff]   ;;  %v9636_v60 = vld [vmem:[%s14255_s1 + $0x580] ss:$16 sps:$4 sm:$0xff]  }
  0x8c   : > { %6584 = vmatpush1.bf16.msra.mxu0 %v9544_v61  ;;  %7240 = vmatpush1.bf16.msra.mxu1 %v9547_v62  ;;  %v9639_v61 = vld [vmem:[%s14255_s1 + $0x588] ss:$16 sps:$4 sm:$0xff]   ;;  %v9644_v62 = vld [vmem:[%s14255_s1 + $0x5a4] ss:$16 sps:$4 sm:$0xff]  }
  0x8d   : > { %6585 = vmatprep.subr.bf16.mxu0 %v9552_v63  ;;  %7241 = vmatprep.subr.bf16.mxu1 %v9555_v0  ;;  %v9647_v63 = vld [vmem:[%s14255_s1 + $0x5ac] ss:$16 sps:$4 sm:$0xff]   ;;  %v9642_v0 = vld [vmem:[%s14255_s1 + $0x5a0] ss:$16 sps:$4 sm:$0xff]  }
  0x90   : > { %6586 = vmatpush1.bf16.msra.mxu0 %v9550_v1  ;;  %7242 = vmatpush1.bf16.msra.mxu1 %v9553_v2  ;;  %v9645_v1 = vld [vmem:[%s14255_s1 + $0x5a8] ss:$16 sps:$4 sm:$0xff]   ;;  %v9650_v2 = vld [vmem:[%s14255_s1 + $0x5c4] ss:$16 sps:$4 sm:$0xff]  }
  0x91   : > { %6587 = vmatprep.subr.bf16.mxu0 %v9558_v3  ;;  %7243 = vmatprep.subr.bf16.mxu1 %v9561_v4  ;;  %v9653_v3 = vld [vmem:[%s14255_s1 + $0x5cc] ss:$16 sps:$4 sm:$0xff]   ;;  %v9648_v4 = vld [vmem:[%s14255_s1 + $0x5c0] ss:$16 sps:$4 sm:$0xff]  }
  0x94   : > { %6588 = vmatpush1.bf16.msra.mxu0 %v9556_v5  ;;  %7244 = vmatpush1.bf16.msra.mxu1 %v9559_v6  ;;  %v9651_v5 = vld [vmem:[%s14255_s1 + $0x5c8] ss:$16 sps:$4 sm:$0xff]   ;;  %v9656_v6 = vld [vmem:[%s14255_s1 + $0x5e4] ss:$16 sps:$4 sm:$0xff]  }
  0x95   : > { %6598 = vmatprep.subr.bf16.mxu0 %v9566_v7  ;;  %7254 = vmatprep.subr.bf16.mxu1 %v9569_v8  ;;  %v9659_v7 = vld [vmem:[%s14255_s1 + $0x5ec] ss:$16 sps:$4 sm:$0xff]   ;;  %v9654_v8 = vld [vmem:[%s14255_s1 + $0x5e0] ss:$16 sps:$4 sm:$0xff]  }
  0x97   : > { %6590 = vmatmul.mubr.bf16.vlgmr.msra.gmra.mrb[0].mxu0 %v8156_v9  ;;  %7246 = vmatmul.mubr.bf16.vlgmr.msra.gmra.mrb[0].mxu1 %v8156_v9  ;;  %v9657_v9 = vld [vmem:[%s14255_s1 + $0x5e8] ss:$16 sps:$4 sm:$0xff]  }
  0x98   : > { %6599 = vmatpush1.bf16.msra.mxu0 %v9564_v10  ;;  %7255 = vmatpush1.bf16.msra.mxu1 %v9567_v11  ;;  %v9664_v10 = vld [vmem:[%s14255_s1 + $0x604] ss:$16 sps:$4 sm:$0xff]   ;;  %v9667_v11 = vld [vmem:[%s14255_s1 + $0x60c] ss:$16 sps:$4 sm:$0xff]  }
  0x99   : > { %6600 = vmatprep.subr.bf16.mxu0 %v9572_v12  ;;  %7256 = vmatprep.subr.bf16.mxu1 %v9575_v14  ;;  %v9662_v12 = vld [vmem:[%s14255_s1 + $0x600] ss:$16 sps:$4 sm:$0xff]   ;;  %v8158_v14 = vcombine.low %v11425_v13, %v11425_v13  ;;  %v9673_v13 = vld [vmem:[%s14255_s1 + $0x62c] ss:$16 sps:$4 sm:$0xff]  }
  0x9a   : > { %6630 = vmatprep.mubr.bf16.mxu0 %v8159_v15  ;;  %7286 = vmatprep.mubr.bf16.mxu1 %v8159_v15  ;;  %v9665_v15 = vld [vmem:[%s14255_s1 + $0x608] ss:$16 sps:$4 sm:$0xff]  }
  0x9c   : > { %6601 = vmatpush1.bf16.msra.mxu0 %v9570_v16  ;;  %7257 = vmatpush1.bf16.msra.mxu1 %v9573_v17  ;;  %v11623_v16 = vld [vmem:[%s14254_s0 + $0x18] sm:$0xff]  ;;  %v9670_v17 = vld [vmem:[%s14255_s1 + $0x624] ss:$16 sps:$4 sm:$0xff]  }
  0x9d   : > { %6602 = vmatprep.subr.bf16.mxu0 %v9578_v18  ;;  %7258 = vmatprep.subr.bf16.mxu1 %v9581_v19  ;;  %v8161_v18 = vcombine.high %v11623_v16, %v11623_v16  ;;  %v9668_v19 = vld [vmem:[%s14255_s1 + $0x620] ss:$16 sps:$4 sm:$0xff]  }
  0xa0   : > { %6603 = vmatpush1.bf16.msra.mxu0 %v9576_v20  ;;  %7259 = vmatpush1.bf16.msra.mxu1 %v9579_v21  ;;  %v9671_v20 = vld [vmem:[%s14255_s1 + $0x628] ss:$16 sps:$4 sm:$0xff]   ;;  %v9676_v21 = vld [vmem:[%s14255_s1 + $0x644] ss:$16 sps:$4 sm:$0xff]  }
  0xa1   : > { %6604 = vmatprep.subr.bf16.mxu0 %v9584_v22  ;;  %7260 = vmatprep.subr.bf16.mxu1 %v9587_v23  ;;  %v9679_v22 = vld [vmem:[%s14255_s1 + $0x64c] ss:$16 sps:$4 sm:$0xff]   ;;  %v9674_v23 = vld [vmem:[%s14255_s1 + $0x640] ss:$16 sps:$4 sm:$0xff]  }
  0xa4   : > { %6605 = vmatpush1.bf16.msra.mxu0 %v9582_v24  ;;  %7261 = vmatpush1.bf16.msra.mxu1 %v9585_v25  ;;  %v9677_v24 = vld [vmem:[%s14255_s1 + $0x648] ss:$16 sps:$4 sm:$0xff]   ;;  %v9682_v25 = vld [vmem:[%s14255_s1 + $0x664] ss:$16 sps:$4 sm:$0xff]  }
  0xa5   : > { %6606 = vmatprep.subr.bf16.mxu0 %v9590_v26  ;;  %7262 = vmatprep.subr.bf16.mxu1 %v9593_v27  ;;  %v9685_v26 = vld [vmem:[%s14255_s1 + $0x66c] ss:$16 sps:$4 sm:$0xff]   ;;  %v9680_v27 = vld [vmem:[%s14255_s1 + $0x660] ss:$16 sps:$4 sm:$0xff]  }
  0xa8   : > { %6607 = vmatpush1.bf16.msra.mxu0 %v9588_v28  ;;  %7263 = vmatpush1.bf16.msra.mxu1 %v9591_v29  ;;  %v9683_v28 = vld [vmem:[%s14255_s1 + $0x668] ss:$16 sps:$4 sm:$0xff]   ;;  %v9688_v29 = vld [vmem:[%s14255_s1 + $0x684] ss:$16 sps:$4 sm:$0xff]  }
  0xa9   : > { %6608 = vmatprep.subr.bf16.mxu0 %v9596_v30  ;;  %7264 = vmatprep.subr.bf16.mxu1 %v9599_v31  ;;  %v9691_v30 = vld [vmem:[%s14255_s1 + $0x68c] ss:$16 sps:$4 sm:$0xff]   ;;  %v9686_v31 = vld [vmem:[%s14255_s1 + $0x680] ss:$16 sps:$4 sm:$0xff]  }
  0xac   : > { %6609 = vmatpush1.bf16.msra.mxu0 %v9594_v32  ;;  %7265 = vmatpush1.bf16.msra.mxu1 %v9597_v33  ;;  %v9689_v32 = vld [vmem:[%s14255_s1 + $0x688] ss:$16 sps:$4 sm:$0xff]   ;;  %v9694_v33 = vld [vmem:[%s14255_s1 + $0x6a4] ss:$16 sps:$4 sm:$0xff]  }
  0xad   : > { %6610 = vmatprep.subr.bf16.mxu0 %v9602_v34  ;;  %7266 = vmatprep.subr.bf16.mxu1 %v9605_v35  ;;  %v9697_v34 = vld [vmem:[%s14255_s1 + $0x6ac] ss:$16 sps:$4 sm:$0xff]   ;;  %v9692_v35 = vld [vmem:[%s14255_s1 + $0x6a0] ss:$16 sps:$4 sm:$0xff]  }
  0xb0   : > { %6611 = vmatpush1.bf16.msra.mxu0 %v9600_v36  ;;  %7267 = vmatpush1.bf16.msra.mxu1 %v9603_v37  ;;  %v9695_v36 = vld [vmem:[%s14255_s1 + $0x6a8] ss:$16 sps:$4 sm:$0xff]   ;;  %v9700_v37 = vld [vmem:[%s14255_s1 + $0x6c4] ss:$16 sps:$4 sm:$0xff]  }
  0xb1   : > { %6612 = vmatprep.subr.bf16.mxu0 %v9608_v38  ;;  %7268 = vmatprep.subr.bf16.mxu1 %v9611_v39  ;;  %v9703_v38 = vld [vmem:[%s14255_s1 + $0x6cc] ss:$16 sps:$4 sm:$0xff]   ;;  %v9698_v39 = vld [vmem:[%s14255_s1 + $0x6c0] ss:$16 sps:$4 sm:$0xff]  }
  0xb4   : > { %6613 = vmatpush1.bf16.msra.mxu0 %v9606_v40  ;;  %7269 = vmatpush1.bf16.msra.mxu1 %v9609_v41  ;;  %v9701_v40 = vld [vmem:[%s14255_s1 + $0x6c8] ss:$16 sps:$4 sm:$0xff]   ;;  %v9706_v41 = vld [vmem:[%s14255_s1 + $0x6e4] ss:$16 sps:$4 sm:$0xff]  }
  0xb5   : > { %6614 = vmatprep.subr.bf16.mxu0 %v9614_v42  ;;  %7270 = vmatprep.subr.bf16.mxu1 %v9617_v43  ;;  %v9709_v42 = vld [vmem:[%s14255_s1 + $0x6ec] ss:$16 sps:$4 sm:$0xff]   ;;  %v9704_v43 = vld [vmem:[%s14255_s1 + $0x6e0] ss:$16 sps:$4 sm:$0xff]  }
  0xb8   : > { %6615 = vmatpush1.bf16.msra.mxu0 %v9612_v44  ;;  %7271 = vmatpush1.bf16.msra.mxu1 %v9615_v45  ;;  %v9707_v44 = vld [vmem:[%s14255_s1 + $0x6e8] ss:$16 sps:$4 sm:$0xff]   ;;  %v9712_v45 = vld [vmem:[%s14255_s1 + $0x704] ss:$16 sps:$4 sm:$0xff]  }
  0xb9   : > { %6616 = vmatprep.subr.bf16.mxu0 %v9620_v46  ;;  %7272 = vmatprep.subr.bf16.mxu1 %v9623_v47  ;;  %v9715_v46 = vld [vmem:[%s14255_s1 + $0x70c] ss:$16 sps:$4 sm:$0xff]   ;;  %v9710_v47 = vld [vmem:[%s14255_s1 + $0x700] ss:$16 sps:$4 sm:$0xff]  }
  0xbc   : > { %6617 = vmatpush1.bf16.msra.mxu0 %v9618_v48  ;;  %7273 = vmatpush1.bf16.msra.mxu1 %v9621_v49  ;;  %v9713_v48 = vld [vmem:[%s14255_s1 + $0x708] ss:$16 sps:$4 sm:$0xff]   ;;  %v9718_v49 = vld [vmem:[%s14255_s1 + $0x724] ss:$16 sps:$4 sm:$0xff]  }
  0xbd   : > { %6618 = vmatprep.subr.bf16.mxu0 %v9626_v50  ;;  %7274 = vmatprep.subr.bf16.mxu1 %v9629_v51  ;;  %v9721_v50 = vld [vmem:[%s14255_s1 + $0x72c] ss:$16 sps:$4 sm:$0xff]   ;;  %v9716_v51 = vld [vmem:[%s14255_s1 + $0x720] ss:$16 sps:$4 sm:$0xff]  }
  0xc0   : > { %6619 = vmatpush1.bf16.msra.mxu0 %v9624_v52  ;;  %7275 = vmatpush1.bf16.msra.mxu1 %v9627_v53  ;;  %v9719_v52 = vld [vmem:[%s14255_s1 + $0x728] ss:$16 sps:$4 sm:$0xff]   ;;  %v9724_v53 = vld [vmem:[%s14255_s1 + $0x744] ss:$16 sps:$4 sm:$0xff]  }
  0xc1   : > { %6620 = vmatprep.subr.bf16.mxu0 %v9632_v54  ;;  %7276 = vmatprep.subr.bf16.mxu1 %v9635_v55  ;;  %v9727_v54 = vld [vmem:[%s14255_s1 + $0x74c] ss:$16 sps:$4 sm:$0xff]   ;;  %v9722_v55 = vld [vmem:[%s14255_s1 + $0x740] ss:$16 sps:$4 sm:$0xff]  }
  0xc4   : > { %6621 = vmatpush1.bf16.msra.mxu0 %v9630_v56  ;;  %7277 = vmatpush1.bf16.msra.mxu1 %v9633_v57  ;;  %v9725_v56 = vld [vmem:[%s14255_s1 + $0x748] ss:$16 sps:$4 sm:$0xff]   ;;  %v9730_v57 = vld [vmem:[%s14255_s1 + $0x764] ss:$16 sps:$4 sm:$0xff]  }
  0xc5   : > { %6622 = vmatprep.subr.bf16.mxu0 %v9638_v58  ;;  %7278 = vmatprep.subr.bf16.mxu1 %v9641_v59  ;;  %v9733_v58 = vld [vmem:[%s14255_s1 + $0x76c] ss:$16 sps:$4 sm:$0xff]   ;;  %v9728_v59 = vld [vmem:[%s14255_s1 + $0x760] ss:$16 sps:$4 sm:$0xff]  }
  0xc8   : > { %6623 = vmatpush1.bf16.msra.mxu0 %v9636_v60  ;;  %7279 = vmatpush1.bf16.msra.mxu1 %v9639_v61  ;;  %v9731_v60 = vld [vmem:[%s14255_s1 + $0x768] ss:$16 sps:$4 sm:$0xff]   ;;  %v9736_v61 = vld [vmem:[%s14255_s1 + $0x784] ss:$16 sps:$4 sm:$0xff]  }
  0xc9   : > { %6624 = vmatprep.subr.bf16.mxu0 %v9644_v62  ;;  %7280 = vmatprep.subr.bf16.mxu1 %v9647_v63  ;;  %v9739_v62 = vld [vmem:[%s14255_s1 + $0x78c] ss:$16 sps:$4 sm:$0xff]   ;;  %v9734_v63 = vld [vmem:[%s14255_s1 + $0x780] ss:$16 sps:$4 sm:$0xff]  }
  0xcc   : > { %6625 = vmatpush1.bf16.msra.mxu0 %v9642_v0  ;;  %7281 = vmatpush1.bf16.msra.mxu1 %v9645_v1  ;;  %v9737_v0 = vld [vmem:[%s14255_s1 + $0x788] ss:$16 sps:$4 sm:$0xff]   ;;  %v9742_v1 = vld [vmem:[%s14255_s1 + $0x7a4] ss:$16 sps:$4 sm:$0xff]  }
  0xcd   : > { %6626 = vmatprep.subr.bf16.mxu0 %v9650_v2  ;;  %7282 = vmatprep.subr.bf16.mxu1 %v9653_v3  ;;  %v9745_v2 = vld [vmem:[%s14255_s1 + $0x7ac] ss:$16 sps:$4 sm:$0xff]   ;;  %v9740_v3 = vld [vmem:[%s14255_s1 + $0x7a0] ss:$16 sps:$4 sm:$0xff]  }
  0xd0   : > { %6627 = vmatpush1.bf16.msra.mxu0 %v9648_v4  ;;  %7283 = vmatpush1.bf16.msra.mxu1 %v9651_v5  ;;  %v9743_v4 = vld [vmem:[%s14255_s1 + $0x7a8] ss:$16 sps:$4 sm:$0xff]   ;;  %v9748_v5 = vld [vmem:[%s14255_s1 + $0x7c4] ss:$16 sps:$4 sm:$0xff]  }
  0xd1   : > { %6628 = vmatprep.subr.bf16.mxu0 %v9656_v6  ;;  %7284 = vmatprep.subr.bf16.mxu1 %v9659_v7  ;;  %v9751_v6 = vld [vmem:[%s14255_s1 + $0x7cc] ss:$16 sps:$4 sm:$0xff]   ;;  %v9746_v7 = vld [vmem:[%s14255_s1 + $0x7c0] ss:$16 sps:$4 sm:$0xff]  }
  0xd4   : > { %6629 = vmatpush1.bf16.msra.mxu0 %v9654_v8  ;;  %7285 = vmatpush1.bf16.msra.mxu1 %v9657_v9  ;;  %v9749_v8 = vld [vmem:[%s14255_s1 + $0x7c8] ss:$16 sps:$4 sm:$0xff]   ;;  %v9754_v9 = vld [vmem:[%s14255_s1 + $0x7e4] ss:$16 sps:$4 sm:$0xff]  }
  0xd5   : > { %6639 = vmatprep.subr.bf16.mxu0 %v9664_v10  ;;  %7295 = vmatprep.subr.bf16.mxu1 %v9667_v11  ;;  %v9757_v10 = vld [vmem:[%s14255_s1 + $0x7ec] ss:$16 sps:$4 sm:$0xff]   ;;  %v9752_v11 = vld [vmem:[%s14255_s1 + $0x7e0] ss:$16 sps:$4 sm:$0xff]  }
  0xd7   : > { %6631 = vmatmul.mubr.bf16.vlgmr.msra.gmra.mrb[0].mxu0 %v8158_v14  ;;  %7287 = vmatmul.mubr.bf16.vlgmr.msra.gmra.mrb[0].mxu1 %v8158_v14  ;;  %v9762_v14 = vld [vmem:[%s14255_s1 + $0x804] ss:$16 sps:$4 sm:$0xff]  }
  0xd8   : > { %6640 = vmatpush1.bf16.msra.mxu0 %v9662_v12  ;;  %7296 = vmatpush1.bf16.msra.mxu1 %v9665_v15  ;;  %v9755_v12 = vld [vmem:[%s14255_s1 + $0x7e8] ss:$16 sps:$4 sm:$0xff]   ;;  %v9765_v15 = vld [vmem:[%s14255_s1 + $0x80c] ss:$16 sps:$4 sm:$0xff]  }
  0xd9   : > { %6641 = vmatprep.subr.bf16.mxu0 %v9670_v17  ;;  %7297 = vmatprep.subr.bf16.mxu1 %v9673_v13  ;;  %v9760_v17 = vld [vmem:[%s14255_s1 + $0x800] ss:$16 sps:$4 sm:$0xff]   ;;  %v8160_v13 = vcombine.low %v11623_v16, %v11623_v16  ;;  %v9771_v16 = vld [vmem:[%s14255_s1 + $0x82c] ss:$16 sps:$4 sm:$0xff]  }
  0xda   : > { %6671 = vmatprep.mubr.bf16.mxu0 %v8161_v18  ;;  %7327 = vmatprep.mubr.bf16.mxu1 %v8161_v18  ;;  %v11821_v18 = vld [vmem:[%s14254_s0 + $0x20] sm:$0xff] }
  0xdc   : > { %6642 = vmatpush1.bf16.msra.mxu0 %v9668_v19  ;;  %7298 = vmatpush1.bf16.msra.mxu1 %v9671_v20  ;;  %v9763_v19 = vld [vmem:[%s14255_s1 + $0x808] ss:$16 sps:$4 sm:$0xff]   ;;  %v9768_v20 = vld [vmem:[%s14255_s1 + $0x824] ss:$16 sps:$4 sm:$0xff]  }
  0xdd   : > { %6643 = vmatprep.subr.bf16.mxu0 %v9676_v21  ;;  %7299 = vmatprep.subr.bf16.mxu1 %v9679_v22  ;;  %v8163_v21 = vcombine.high %v11821_v18, %v11821_v18  ;;  %v9766_v22 = vld [vmem:[%s14255_s1 + $0x820] ss:$16 sps:$4 sm:$0xff]  }
  0xe0   : > { %6644 = vmatpush1.bf16.msra.mxu0 %v9674_v23  ;;  %7300 = vmatpush1.bf16.msra.mxu1 %v9677_v24  ;;  %v9769_v23 = vld [vmem:[%s14255_s1 + $0x828] ss:$16 sps:$4 sm:$0xff]   ;;  %v9774_v24 = vld [vmem:[%s14255_s1 + $0x844] ss:$16 sps:$4 sm:$0xff]  }
  0xe1   : > { %6645 = vmatprep.subr.bf16.mxu0 %v9682_v25  ;;  %7301 = vmatprep.subr.bf16.mxu1 %v9685_v26  ;;  %v9777_v25 = vld [vmem:[%s14255_s1 + $0x84c] ss:$16 sps:$4 sm:$0xff]   ;;  %v9772_v26 = vld [vmem:[%s14255_s1 + $0x840] ss:$16 sps:$4 sm:$0xff]  }
  0xe4   : > { %6646 = vmatpush1.bf16.msra.mxu0 %v9680_v27  ;;  %7302 = vmatpush1.bf16.msra.mxu1 %v9683_v28  ;;  %v9775_v27 = vld [vmem:[%s14255_s1 + $0x848] ss:$16 sps:$4 sm:$0xff]   ;;  %v9780_v28 = vld [vmem:[%s14255_s1 + $0x864] ss:$16 sps:$4 sm:$0xff]  }
  0xe5   : > { %6647 = vmatprep.subr.bf16.mxu0 %v9688_v29  ;;  %7303 = vmatprep.subr.bf16.mxu1 %v9691_v30  ;;  %v9783_v29 = vld [vmem:[%s14255_s1 + $0x86c] ss:$16 sps:$4 sm:$0xff]   ;;  %v9778_v30 = vld [vmem:[%s14255_s1 + $0x860] ss:$16 sps:$4 sm:$0xff]  }
  0xe8   : > { %6648 = vmatpush1.bf16.msra.mxu0 %v9686_v31  ;;  %7304 = vmatpush1.bf16.msra.mxu1 %v9689_v32  ;;  %v9781_v31 = vld [vmem:[%s14255_s1 + $0x868] ss:$16 sps:$4 sm:$0xff]   ;;  %v9786_v32 = vld [vmem:[%s14255_s1 + $0x884] ss:$16 sps:$4 sm:$0xff]  }
  0xe9   : > { %6649 = vmatprep.subr.bf16.mxu0 %v9694_v33  ;;  %7305 = vmatprep.subr.bf16.mxu1 %v9697_v34  ;;  %v9789_v33 = vld [vmem:[%s14255_s1 + $0x88c] ss:$16 sps:$4 sm:$0xff]   ;;  %v9784_v34 = vld [vmem:[%s14255_s1 + $0x880] ss:$16 sps:$4 sm:$0xff]  }
  0xec   : > { %6650 = vmatpush1.bf16.msra.mxu0 %v9692_v35  ;;  %7306 = vmatpush1.bf16.msra.mxu1 %v9695_v36  ;;  %v9787_v35 = vld [vmem:[%s14255_s1 + $0x888] ss:$16 sps:$4 sm:$0xff]   ;;  %v9792_v36 = vld [vmem:[%s14255_s1 + $0x8a4] ss:$16 sps:$4 sm:$0xff]  }
  0xed   : > { %6651 = vmatprep.subr.bf16.mxu0 %v9700_v37  ;;  %7307 = vmatprep.subr.bf16.mxu1 %v9703_v38  ;;  %v9795_v37 = vld [vmem:[%s14255_s1 + $0x8ac] ss:$16 sps:$4 sm:$0xff]   ;;  %v9790_v38 = vld [vmem:[%s14255_s1 + $0x8a0] ss:$16 sps:$4 sm:$0xff]  }
  0xf0   : > { %6652 = vmatpush1.bf16.msra.mxu0 %v9698_v39  ;;  %7308 = vmatpush1.bf16.msra.mxu1 %v9701_v40  ;;  %v9793_v39 = vld [vmem:[%s14255_s1 + $0x8a8] ss:$16 sps:$4 sm:$0xff]   ;;  %v9798_v40 = vld [vmem:[%s14255_s1 + $0x8c4] ss:$16 sps:$4 sm:$0xff]  }
  0xf1   : > { %6653 = vmatprep.subr.bf16.mxu0 %v9706_v41  ;;  %7309 = vmatprep.subr.bf16.mxu1 %v9709_v42  ;;  %v9801_v41 = vld [vmem:[%s14255_s1 + $0x8cc] ss:$16 sps:$4 sm:$0xff]   ;;  %v9796_v42 = vld [vmem:[%s14255_s1 + $0x8c0] ss:$16 sps:$4 sm:$0xff]  }
  0xf4   : > { %6654 = vmatpush1.bf16.msra.mxu0 %v9704_v43  ;;  %7310 = vmatpush1.bf16.msra.mxu1 %v9707_v44  ;;  %v9799_v43 = vld [vmem:[%s14255_s1 + $0x8c8] ss:$16 sps:$4 sm:$0xff]   ;;  %v9804_v44 = vld [vmem:[%s14255_s1 + $0x8e4] ss:$16 sps:$4 sm:$0xff]  }
  0xf5   : > { %6655 = vmatprep.subr.bf16.mxu0 %v9712_v45  ;;  %7311 = vmatprep.subr.bf16.mxu1 %v9715_v46  ;;  %v9807_v45 = vld [vmem:[%s14255_s1 + $0x8ec] ss:$16 sps:$4 sm:$0xff]   ;;  %v9802_v46 = vld [vmem:[%s14255_s1 + $0x8e0] ss:$16 sps:$4 sm:$0xff]  }
  0xf8   : > { %6656 = vmatpush1.bf16.msra.mxu0 %v9710_v47  ;;  %7312 = vmatpush1.bf16.msra.mxu1 %v9713_v48  ;;  %v9805_v47 = vld [vmem:[%s14255_s1 + $0x8e8] ss:$16 sps:$4 sm:$0xff]   ;;  %v9810_v48 = vld [vmem:[%s14255_s1 + $0x904] ss:$16 sps:$4 sm:$0xff]  }
  0xf9   : > { %6657 = vmatprep.subr.bf16.mxu0 %v9718_v49  ;;  %7313 = vmatprep.subr.bf16.mxu1 %v9721_v50  ;;  %v9813_v49 = vld [vmem:[%s14255_s1 + $0x90c] ss:$16 sps:$4 sm:$0xff]   ;;  %v9808_v50 = vld [vmem:[%s14255_s1 + $0x900] ss:$16 sps:$4 sm:$0xff]  }
  0xfc   : > { %6658 = vmatpush1.bf16.msra.mxu0 %v9716_v51  ;;  %7314 = vmatpush1.bf16.msra.mxu1 %v9719_v52  ;;  %v9811_v51 = vld [vmem:[%s14255_s1 + $0x908] ss:$16 sps:$4 sm:$0xff]   ;;  %v9816_v52 = vld [vmem:[%s14255_s1 + $0x924] ss:$16 sps:$4 sm:$0xff]  }
  0xfd   : > { %6659 = vmatprep.subr.bf16.mxu0 %v9724_v53  ;;  %7315 = vmatprep.subr.bf16.mxu1 %v9727_v54  ;;  %v9819_v53 = vld [vmem:[%s14255_s1 + $0x92c] ss:$16 sps:$4 sm:$0xff]   ;;  %v9814_v54 = vld [vmem:[%s14255_s1 + $0x920] ss:$16 sps:$4 sm:$0xff]  }
 0x100   : > { %6660 = vmatpush1.bf16.msra.mxu0 %v9722_v55  ;;  %7316 = vmatpush1.bf16.msra.mxu1 %v9725_v56  ;;  %v9817_v55 = vld [vmem:[%s14255_s1 + $0x928] ss:$16 sps:$4 sm:$0xff]   ;;  %v9822_v56 = vld [vmem:[%s14255_s1 + $0x944] ss:$16 sps:$4 sm:$0xff]  }
 0x101   : > { %6661 = vmatprep.subr.bf16.mxu0 %v9730_v57  ;;  %7317 = vmatprep.subr.bf16.mxu1 %v9733_v58  ;;  %v9825_v57 = vld [vmem:[%s14255_s1 + $0x94c] ss:$16 sps:$4 sm:$0xff]   ;;  %v9820_v58 = vld [vmem:[%s14255_s1 + $0x940] ss:$16 sps:$4 sm:$0xff]  }
 0x104   : > { %6662 = vmatpush1.bf16.msra.mxu0 %v9728_v59  ;;  %7318 = vmatpush1.bf16.msra.mxu1 %v9731_v60  ;;  %v9823_v59 = vld [vmem:[%s14255_s1 + $0x948] ss:$16 sps:$4 sm:$0xff]   ;;  %v9828_v60 = vld [vmem:[%s14255_s1 + $0x964] ss:$16 sps:$4 sm:$0xff]  }
 0x105   : > { %6663 = vmatprep.subr.bf16.mxu0 %v9736_v61  ;;  %7319 = vmatprep.subr.bf16.mxu1 %v9739_v62  ;;  %v9831_v61 = vld [vmem:[%s14255_s1 + $0x96c] ss:$16 sps:$4 sm:$0xff]   ;;  %v9826_v62 = vld [vmem:[%s14255_s1 + $0x960] ss:$16 sps:$4 sm:$0xff]  }
 0x108   : > { %6664 = vmatpush1.bf16.msra.mxu0 %v9734_v63  ;;  %7320 = vmatpush1.bf16.msra.mxu1 %v9737_v0  ;;  %v9829_v63 = vld [vmem:[%s14255_s1 + $0x968] ss:$16 sps:$4 sm:$0xff]   ;;  %v9834_v0 = vld [vmem:[%s14255_s1 + $0x984] ss:$16 sps:$4 sm:$0xff]  }
 0x109   : > { %6665 = vmatprep.subr.bf16.mxu0 %v9742_v1  ;;  %7321 = vmatprep.subr.bf16.mxu1 %v9745_v2  ;;  %v9837_v1 = vld [vmem:[%s14255_s1 + $0x98c] ss:$16 sps:$4 sm:$0xff]   ;;  %v9832_v2 = vld [vmem:[%s14255_s1 + $0x980] ss:$16 sps:$4 sm:$0xff]  }
 0x10c   : > { %6666 = vmatpush1.bf16.msra.mxu0 %v9740_v3  ;;  %7322 = vmatpush1.bf16.msra.mxu1 %v9743_v4  ;;  %v9835_v3 = vld [vmem:[%s14255_s1 + $0x988] ss:$16 sps:$4 sm:$0xff]   ;;  %v9840_v4 = vld [vmem:[%s14255_s1 + $0x9a4] ss:$16 sps:$4 sm:$0xff]  }
 0x10d   : > { %6667 = vmatprep.subr.bf16.mxu0 %v9748_v5  ;;  %7323 = vmatprep.subr.bf16.mxu1 %v9751_v6  ;;  %v9843_v5 = vld [vmem:[%s14255_s1 + $0x9ac] ss:$16 sps:$4 sm:$0xff]   ;;  %v9838_v6 = vld [vmem:[%s14255_s1 + $0x9a0] ss:$16 sps:$4 sm:$0xff]  }
 0x110   : > { %6668 = vmatpush1.bf16.msra.mxu0 %v9746_v7  ;;  %7324 = vmatpush1.bf16.msra.mxu1 %v9749_v8  ;;  %v9841_v7 = vld [vmem:[%s14255_s1 + $0x9a8] ss:$16 sps:$4 sm:$0xff]   ;;  %v9846_v8 = vld [vmem:[%s14255_s1 + $0x9c4] ss:$16 sps:$4 sm:$0xff]  }
 0x111   : > { %6669 = vmatprep.subr.bf16.mxu0 %v9754_v9  ;;  %7325 = vmatprep.subr.bf16.mxu1 %v9757_v10  ;;  %v9849_v9 = vld [vmem:[%s14255_s1 + $0x9cc] ss:$16 sps:$4 sm:$0xff]   ;;  %v9844_v10 = vld [vmem:[%s14255_s1 + $0x9c0] ss:$16 sps:$4 sm:$0xff]  }
 0x114   : > { %6670 = vmatpush1.bf16.msra.mxu0 %v9752_v11  ;;  %7326 = vmatpush1.bf16.msra.mxu1 %v9755_v12  ;;  %v9847_v11 = vld [vmem:[%s14255_s1 + $0x9c8] ss:$16 sps:$4 sm:$0xff]   ;;  %v9852_v12 = vld [vmem:[%s14255_s1 + $0x9e4] ss:$16 sps:$4 sm:$0xff]  }
 0x115   : > { %6680 = vmatprep.subr.bf16.mxu0 %v9762_v14  ;;  %7336 = vmatprep.subr.bf16.mxu1 %v9765_v15  ;;  %v9855_v14 = vld [vmem:[%s14255_s1 + $0x9ec] ss:$16 sps:$4 sm:$0xff]   ;;  %v9850_v15 = vld [vmem:[%s14255_s1 + $0x9e0] ss:$16 sps:$4 sm:$0xff]  }
 0x117   : > { %6672 = vmatmul.mubr.bf16.vlgmr.msra.gmra.mrb[0].mxu0 %v8160_v13  ;;  %7328 = vmatmul.mubr.bf16.vlgmr.msra.gmra.mrb[0].mxu1 %v8160_v13  ;;  %v9860_v13 = vld [vmem:[%s14255_s1 + $0xa04] ss:$16 sps:$4 sm:$0xff]  }
 0x118   : > { %6681 = vmatpush1.bf16.msra.mxu0 %v9760_v17  ;;  %7337 = vmatpush1.bf16.msra.mxu1 %v9763_v19  ;;  %v9853_v17 = vld [vmem:[%s14255_s1 + $0x9e8] ss:$16 sps:$4 sm:$0xff]   ;;  %v9863_v19 = vld [vmem:[%s14255_s1 + $0xa0c] ss:$16 sps:$4 sm:$0xff]  }
 0x119   : > { %6682 = vmatprep.subr.bf16.mxu0 %v9768_v20  ;;  %7338 = vmatprep.subr.bf16.mxu1 %v9771_v16  ;;  %v12017_v20 = vld [vmem:[%s14254_s0 + $0x28] sm:$0xff]  ;;  %v8162_v16 = vcombine.low %v11821_v18, %v11821_v18 }
 0x11a   : > { %6712 = vmatprep.mubr.bf16.mxu0 %v8163_v21  ;;  %7368 = vmatprep.mubr.bf16.mxu1 %v8163_v21  ;;  %v9858_v21 = vld [vmem:[%s14255_s1 + $0xa00] ss:$16 sps:$4 sm:$0xff]   ;;  %v9869_v18 = vld [vmem:[%s14255_s1 + $0xa2c] ss:$16 sps:$4 sm:$0xff]  }
 0x11c   : > { %6683 = vmatpush1.bf16.msra.mxu0 %v9766_v22  ;;  %7339 = vmatpush1.bf16.msra.mxu1 %v9769_v23  ;;  %v9861_v22 = vld [vmem:[%s14255_s1 + $0xa08] ss:$16 sps:$4 sm:$0xff]   ;;  %v9866_v23 = vld [vmem:[%s14255_s1 + $0xa24] ss:$16 sps:$4 sm:$0xff]  }
 0x11d   : > { %6684 = vmatprep.subr.bf16.mxu0 %v9774_v24  ;;  %7340 = vmatprep.subr.bf16.mxu1 %v9777_v25  ;;  %v8165_v24 = vcombine.high %v12017_v20, %v12017_v20  ;;  %v9864_v25 = vld [vmem:[%s14255_s1 + $0xa20] ss:$16 sps:$4 sm:$0xff]  }
 0x120   : > { %6685 = vmatpush1.bf16.msra.mxu0 %v9772_v26  ;;  %7341 = vmatpush1.bf16.msra.mxu1 %v9775_v27  ;;  %v9867_v26 = vld [vmem:[%s14255_s1 + $0xa28] ss:$16 sps:$4 sm:$0xff]   ;;  %v9872_v27 = vld [vmem:[%s14255_s1 + $0xa44] ss:$16 sps:$4 sm:$0xff]  }
 0x121   : > { %6686 = vmatprep.subr.bf16.mxu0 %v9780_v28  ;;  %7342 = vmatprep.subr.bf16.mxu1 %v9783_v29  ;;  %v9875_v28 = vld [vmem:[%s14255_s1 + $0xa4c] ss:$16 sps:$4 sm:$0xff]   ;;  %v9870_v29 = vld [vmem:[%s14255_s1 + $0xa40] ss:$16 sps:$4 sm:$0xff]  }
 0x124   : > { %6687 = vmatpush1.bf16.msra.mxu0 %v9778_v30  ;;  %7343 = vmatpush1.bf16.msra.mxu1 %v9781_v31  ;;  %v9873_v30 = vld [vmem:[%s14255_s1 + $0xa48] ss:$16 sps:$4 sm:$0xff]   ;;  %v9878_v31 = vld [vmem:[%s14255_s1 + $0xa64] ss:$16 sps:$4 sm:$0xff]  }
 0x125   : > { %6688 = vmatprep.subr.bf16.mxu0 %v9786_v32  ;;  %7344 = vmatprep.subr.bf16.mxu1 %v9789_v33  ;;  %v9881_v32 = vld [vmem:[%s14255_s1 + $0xa6c] ss:$16 sps:$4 sm:$0xff]   ;;  %v9876_v33 = vld [vmem:[%s14255_s1 + $0xa60] ss:$16 sps:$4 sm:$0xff]  }
 0x128   : > { %6689 = vmatpush1.bf16.msra.mxu0 %v9784_v34  ;;  %7345 = vmatpush1.bf16.msra.mxu1 %v9787_v35  ;;  %v9879_v34 = vld [vmem:[%s14255_s1 + $0xa68] ss:$16 sps:$4 sm:$0xff]   ;;  %v9884_v35 = vld [vmem:[%s14255_s1 + $0xa84] ss:$16 sps:$4 sm:$0xff]  }
 0x129   : > { %6690 = vmatprep.subr.bf16.mxu0 %v9792_v36  ;;  %7346 = vmatprep.subr.bf16.mxu1 %v9795_v37  ;;  %v9887_v36 = vld [vmem:[%s14255_s1 + $0xa8c] ss:$16 sps:$4 sm:$0xff]   ;;  %v9882_v37 = vld [vmem:[%s14255_s1 + $0xa80] ss:$16 sps:$4 sm:$0xff]  }
 0x12c   : > { %6691 = vmatpush1.bf16.msra.mxu0 %v9790_v38  ;;  %7347 = vmatpush1.bf16.msra.mxu1 %v9793_v39  ;;  %v9885_v38 = vld [vmem:[%s14255_s1 + $0xa88] ss:$16 sps:$4 sm:$0xff]   ;;  %v9890_v39 = vld [vmem:[%s14255_s1 + $0xaa4] ss:$16 sps:$4 sm:$0xff]  }
 0x12d   : > { %6692 = vmatprep.subr.bf16.mxu0 %v9798_v40  ;;  %7348 = vmatprep.subr.bf16.mxu1 %v9801_v41  ;;  %v9893_v40 = vld [vmem:[%s14255_s1 + $0xaac] ss:$16 sps:$4 sm:$0xff]   ;;  %v9888_v41 = vld [vmem:[%s14255_s1 + $0xaa0] ss:$16 sps:$4 sm:$0xff]  }
 0x130   : > { %6693 = vmatpush1.bf16.msra.mxu0 %v9796_v42  ;;  %7349 = vmatpush1.bf16.msra.mxu1 %v9799_v43  ;;  %v9891_v42 = vld [vmem:[%s14255_s1 + $0xaa8] ss:$16 sps:$4 sm:$0xff]   ;;  %v9896_v43 = vld [vmem:[%s14255_s1 + $0xac4] ss:$16 sps:$4 sm:$0xff]  }
 0x131   : > { %6694 = vmatprep.subr.bf16.mxu0 %v9804_v44  ;;  %7350 = vmatprep.subr.bf16.mxu1 %v9807_v45  ;;  %v9899_v44 = vld [vmem:[%s14255_s1 + $0xacc] ss:$16 sps:$4 sm:$0xff]   ;;  %v9894_v45 = vld [vmem:[%s14255_s1 + $0xac0] ss:$16 sps:$4 sm:$0xff]  }
 0x134   : > { %6695 = vmatpush1.bf16.msra.mxu0 %v9802_v46  ;;  %7351 = vmatpush1.bf16.msra.mxu1 %v9805_v47  ;;  %v9897_v46 = vld [vmem:[%s14255_s1 + $0xac8] ss:$16 sps:$4 sm:$0xff]   ;;  %v9902_v47 = vld [vmem:[%s14255_s1 + $0xae4] ss:$16 sps:$4 sm:$0xff]  }
 0x135   : > { %6696 = vmatprep.subr.bf16.mxu0 %v9810_v48  ;;  %7352 = vmatprep.subr.bf16.mxu1 %v9813_v49  ;;  %v9905_v48 = vld [vmem:[%s14255_s1 + $0xaec] ss:$16 sps:$4 sm:$0xff]   ;;  %v9900_v49 = vld [vmem:[%s14255_s1 + $0xae0] ss:$16 sps:$4 sm:$0xff]  }
 0x138   : > { %6697 = vmatpush1.bf16.msra.mxu0 %v9808_v50  ;;  %7353 = vmatpush1.bf16.msra.mxu1 %v9811_v51  ;;  %v9903_v50 = vld [vmem:[%s14255_s1 + $0xae8] ss:$16 sps:$4 sm:$0xff]   ;;  %v9908_v51 = vld [vmem:[%s14255_s1 + $0xb04] ss:$16 sps:$4 sm:$0xff]  }
 0x139   : > { %6698 = vmatprep.subr.bf16.mxu0 %v9816_v52  ;;  %7354 = vmatprep.subr.bf16.mxu1 %v9819_v53  ;;  %v9911_v52 = vld [vmem:[%s14255_s1 + $0xb0c] ss:$16 sps:$4 sm:$0xff]   ;;  %v9906_v53 = vld [vmem:[%s14255_s1 + $0xb00] ss:$16 sps:$4 sm:$0xff]  }
 0x13c   : > { %6699 = vmatpush1.bf16.msra.mxu0 %v9814_v54  ;;  %7355 = vmatpush1.bf16.msra.mxu1 %v9817_v55  ;;  %v9909_v54 = vld [vmem:[%s14255_s1 + $0xb08] ss:$16 sps:$4 sm:$0xff]   ;;  %v9914_v55 = vld [vmem:[%s14255_s1 + $0xb24] ss:$16 sps:$4 sm:$0xff]  }
 0x13d   : > { %6700 = vmatprep.subr.bf16.mxu0 %v9822_v56  ;;  %7356 = vmatprep.subr.bf16.mxu1 %v9825_v57  ;;  %v9917_v56 = vld [vmem:[%s14255_s1 + $0xb2c] ss:$16 sps:$4 sm:$0xff]   ;;  %v9912_v57 = vld [vmem:[%s14255_s1 + $0xb20] ss:$16 sps:$4 sm:$0xff]  }
 0x140   : > { %6701 = vmatpush1.bf16.msra.mxu0 %v9820_v58  ;;  %7357 = vmatpush1.bf16.msra.mxu1 %v9823_v59  ;;  %v9915_v58 = vld [vmem:[%s14255_s1 + $0xb28] ss:$16 sps:$4 sm:$0xff]   ;;  %v9920_v59 = vld [vmem:[%s14255_s1 + $0xb44] ss:$16 sps:$4 sm:$0xff]  }
 0x141   : > { %6702 = vmatprep.subr.bf16.mxu0 %v9828_v60  ;;  %7358 = vmatprep.subr.bf16.mxu1 %v9831_v61  ;;  %v9923_v60 = vld [vmem:[%s14255_s1 + $0xb4c] ss:$16 sps:$4 sm:$0xff]   ;;  %v9918_v61 = vld [vmem:[%s14255_s1 + $0xb40] ss:$16 sps:$4 sm:$0xff]  }
 0x144   : > { %6703 = vmatpush1.bf16.msra.mxu0 %v9826_v62  ;;  %7359 = vmatpush1.bf16.msra.mxu1 %v9829_v63  ;;  %v9921_v62 = vld [vmem:[%s14255_s1 + $0xb48] ss:$16 sps:$4 sm:$0xff]   ;;  %v9926_v63 = vld [vmem:[%s14255_s1 + $0xb64] ss:$16 sps:$4 sm:$0xff]  }
 0x145   : > { %6704 = vmatprep.subr.bf16.mxu0 %v9834_v0  ;;  %7360 = vmatprep.subr.bf16.mxu1 %v9837_v1  ;;  %v9929_v0 = vld [vmem:[%s14255_s1 + $0xb6c] ss:$16 sps:$4 sm:$0xff]   ;;  %v9924_v1 = vld [vmem:[%s14255_s1 + $0xb60] ss:$16 sps:$4 sm:$0xff]  }
 0x148   : > { %6705 = vmatpush1.bf16.msra.mxu0 %v9832_v2  ;;  %7361 = vmatpush1.bf16.msra.mxu1 %v9835_v3  ;;  %v9927_v2 = vld [vmem:[%s14255_s1 + $0xb68] ss:$16 sps:$4 sm:$0xff]   ;;  %v9932_v3 = vld [vmem:[%s14255_s1 + $0xb84] ss:$16 sps:$4 sm:$0xff]  }
 0x149   : > { %6706 = vmatprep.subr.bf16.mxu0 %v9840_v4  ;;  %7362 = vmatprep.subr.bf16.mxu1 %v9843_v5  ;;  %v9935_v4 = vld [vmem:[%s14255_s1 + $0xb8c] ss:$16 sps:$4 sm:$0xff]   ;;  %v9930_v5 = vld [vmem:[%s14255_s1 + $0xb80] ss:$16 sps:$4 sm:$0xff]  }
 0x14c   : > { %6707 = vmatpush1.bf16.msra.mxu0 %v9838_v6  ;;  %7363 = vmatpush1.bf16.msra.mxu1 %v9841_v7  ;;  %v9933_v6 = vld [vmem:[%s14255_s1 + $0xb88] ss:$16 sps:$4 sm:$0xff]   ;;  %v9938_v7 = vld [vmem:[%s14255_s1 + $0xba4] ss:$16 sps:$4 sm:$0xff]  }
 0x14d   : > { %6708 = vmatprep.subr.bf16.mxu0 %v9846_v8  ;;  %7364 = vmatprep.subr.bf16.mxu1 %v9849_v9  ;;  %v9941_v8 = vld [vmem:[%s14255_s1 + $0xbac] ss:$16 sps:$4 sm:$0xff]   ;;  %v9936_v9 = vld [vmem:[%s14255_s1 + $0xba0] ss:$16 sps:$4 sm:$0xff]  }
 0x150   : > { %6709 = vmatpush1.bf16.msra.mxu0 %v9844_v10  ;;  %7365 = vmatpush1.bf16.msra.mxu1 %v9847_v11  ;;  %v9939_v10 = vld [vmem:[%s14255_s1 + $0xba8] ss:$16 sps:$4 sm:$0xff]   ;;  %v9944_v11 = vld [vmem:[%s14255_s1 + $0xbc4] ss:$16 sps:$4 sm:$0xff]  }
 0x151   : > { %6710 = vmatprep.subr.bf16.mxu0 %v9852_v12  ;;  %7366 = vmatprep.subr.bf16.mxu1 %v9855_v14  ;;  %v9947_v12 = vld [vmem:[%s14255_s1 + $0xbcc] ss:$16 sps:$4 sm:$0xff]   ;;  %v9942_v14 = vld [vmem:[%s14255_s1 + $0xbc0] ss:$16 sps:$4 sm:$0xff]  }
 0x154   : > { %6711 = vmatpush1.bf16.msra.mxu0 %v9850_v15  ;;  %7367 = vmatpush1.bf16.msra.mxu1 %v9853_v17  ;;  %v9945_v15 = vld [vmem:[%s14255_s1 + $0xbc8] ss:$16 sps:$4 sm:$0xff]   ;;  %v9950_v17 = vld [vmem:[%s14255_s1 + $0xbe4] ss:$16 sps:$4 sm:$0xff]  }
 0x155   : > { %6721 = vmatprep.subr.bf16.mxu0 %v9860_v13  ;;  %7377 = vmatprep.subr.bf16.mxu1 %v9863_v19  ;;  %v9953_v13 = vld [vmem:[%s14255_s1 + $0xbec] ss:$16 sps:$4 sm:$0xff]   ;;  %v9948_v19 = vld [vmem:[%s14255_s1 + $0xbe0] ss:$16 sps:$4 sm:$0xff]  }
 0x157   : > { %6713 = vmatmul.mubr.bf16.vlgmr.msra.gmra.mrb[0].mxu0 %v8162_v16  ;;  %7369 = vmatmul.mubr.bf16.vlgmr.msra.gmra.mrb[0].mxu1 %v8162_v16  ;;  %v9951_v16 = vld [vmem:[%s14255_s1 + $0xbe8] ss:$16 sps:$4 sm:$0xff]  }
 0x158   : > { %6722 = vmatpush1.bf16.msra.mxu0 %v9858_v21  ;;  %7378 = vmatpush1.bf16.msra.mxu1 %v9861_v22  ;;  %v9958_v21 = vld [vmem:[%s14255_s1 + $0xc04] ss:$16 sps:$4 sm:$0xff]   ;;  %v9961_v22 = vld [vmem:[%s14255_s1 + $0xc0c] ss:$16 sps:$4 sm:$0xff]  }
 0x159   : > { %6723 = vmatprep.subr.bf16.mxu0 %v9866_v23  ;;  %7379 = vmatprep.subr.bf16.mxu1 %v9869_v18  ;;  %v12218_v23 = vld [vmem:[%s14254_s0 + $0x30] sm:$0xff]  ;;  %v8164_v18 = vcombine.low %v12017_v20, %v12017_v20  ;;  %v9967_v20 = vld [vmem:[%s14255_s1 + $0xc2c] ss:$16 sps:$4 sm:$0xff]  }
 0x15a   : > { %6753 = vmatprep.mubr.bf16.mxu0 %v8165_v24  ;;  %7409 = vmatprep.mubr.bf16.mxu1 %v8165_v24  ;;  %v9956_v24 = vld [vmem:[%s14255_s1 + $0xc00] ss:$16 sps:$4 sm:$0xff]  }
 0x15c   : > { %6724 = vmatpush1.bf16.msra.mxu0 %v9864_v25  ;;  %7380 = vmatpush1.bf16.msra.mxu1 %v9867_v26  ;;  %v9959_v25 = vld [vmem:[%s14255_s1 + $0xc08] ss:$16 sps:$4 sm:$0xff]   ;;  %v9964_v26 = vld [vmem:[%s14255_s1 + $0xc24] ss:$16 sps:$4 sm:$0xff]  }
 0x15d   : > { %6725 = vmatprep.subr.bf16.mxu0 %v9872_v27  ;;  %7381 = vmatprep.subr.bf16.mxu1 %v9875_v28  ;;  %v8167_v27 = vcombine.high %v12218_v23, %v12218_v23  ;;  %v9962_v28 = vld [vmem:[%s14255_s1 + $0xc20] ss:$16 sps:$4 sm:$0xff]  }
 0x160   : > { %6726 = vmatpush1.bf16.msra.mxu0 %v9870_v29  ;;  %7382 = vmatpush1.bf16.msra.mxu1 %v9873_v30  ;;  %v9965_v29 = vld [vmem:[%s14255_s1 + $0xc28] ss:$16 sps:$4 sm:$0xff]   ;;  %v9970_v30 = vld [vmem:[%s14255_s1 + $0xc44] ss:$16 sps:$4 sm:$0xff]  }
 0x161   : > { %6727 = vmatprep.subr.bf16.mxu0 %v9878_v31  ;;  %7383 = vmatprep.subr.bf16.mxu1 %v9881_v32  ;;  %v9973_v31 = vld [vmem:[%s14255_s1 + $0xc4c] ss:$16 sps:$4 sm:$0xff]   ;;  %v9968_v32 = vld [vmem:[%s14255_s1 + $0xc40] ss:$16 sps:$4 sm:$0xff]  }
 0x164   : > { %6728 = vmatpush1.bf16.msra.mxu0 %v9876_v33  ;;  %7384 = vmatpush1.bf16.msra.mxu1 %v9879_v34  ;;  %v9971_v33 = vld [vmem:[%s14255_s1 + $0xc48] ss:$16 sps:$4 sm:$0xff]   ;;  %v9976_v34 = vld [vmem:[%s14255_s1 + $0xc64] ss:$16 sps:$4 sm:$0xff]  }
 0x165   : > { %6729 = vmatprep.subr.bf16.mxu0 %v9884_v35  ;;  %7385 = vmatprep.subr.bf16.mxu1 %v9887_v36  ;;  %v9979_v35 = vld [vmem:[%s14255_s1 + $0xc6c] ss:$16 sps:$4 sm:$0xff]   ;;  %v9974_v36 = vld [vmem:[%s14255_s1 + $0xc60] ss:$16 sps:$4 sm:$0xff]  }
 0x168   : > { %6730 = vmatpush1.bf16.msra.mxu0 %v9882_v37  ;;  %7386 = vmatpush1.bf16.msra.mxu1 %v9885_v38  ;;  %v9977_v37 = vld [vmem:[%s14255_s1 + $0xc68] ss:$16 sps:$4 sm:$0xff]   ;;  %v9982_v38 = vld [vmem:[%s14255_s1 + $0xc84] ss:$16 sps:$4 sm:$0xff]  }
 0x169   : > { %6731 = vmatprep.subr.bf16.mxu0 %v9890_v39  ;;  %7387 = vmatprep.subr.bf16.mxu1 %v9893_v40  ;;  %v9985_v39 = vld [vmem:[%s14255_s1 + $0xc8c] ss:$16 sps:$4 sm:$0xff]   ;;  %v9980_v40 = vld [vmem:[%s14255_s1 + $0xc80] ss:$16 sps:$4 sm:$0xff]  }
 0x16c   : > { %6732 = vmatpush1.bf16.msra.mxu0 %v9888_v41  ;;  %7388 = vmatpush1.bf16.msra.mxu1 %v9891_v42  ;;  %v9983_v41 = vld [vmem:[%s14255_s1 + $0xc88] ss:$16 sps:$4 sm:$0xff]   ;;  %v9988_v42 = vld [vmem:[%s14255_s1 + $0xca4] ss:$16 sps:$4 sm:$0xff]  }
 0x16d   : > { %6733 = vmatprep.subr.bf16.mxu0 %v9896_v43  ;;  %7389 = vmatprep.subr.bf16.mxu1 %v9899_v44  ;;  %v9991_v43 = vld [vmem:[%s14255_s1 + $0xcac] ss:$16 sps:$4 sm:$0xff]   ;;  %v9986_v44 = vld [vmem:[%s14255_s1 + $0xca0] ss:$16 sps:$4 sm:$0xff]  }
 0x170   : > { %6734 = vmatpush1.bf16.msra.mxu0 %v9894_v45  ;;  %7390 = vmatpush1.bf16.msra.mxu1 %v9897_v46  ;;  %v9989_v45 = vld [vmem:[%s14255_s1 + $0xca8] ss:$16 sps:$4 sm:$0xff]   ;;  %v9994_v46 = vld [vmem:[%s14255_s1 + $0xcc4] ss:$16 sps:$4 sm:$0xff]  }
 0x171   : > { %6735 = vmatprep.subr.bf16.mxu0 %v9902_v47  ;;  %7391 = vmatprep.subr.bf16.mxu1 %v9905_v48  ;;  %v9997_v47 = vld [vmem:[%s14255_s1 + $0xccc] ss:$16 sps:$4 sm:$0xff]   ;;  %v9992_v48 = vld [vmem:[%s14255_s1 + $0xcc0] ss:$16 sps:$4 sm:$0xff]  }
 0x174   : > { %6736 = vmatpush1.bf16.msra.mxu0 %v9900_v49  ;;  %7392 = vmatpush1.bf16.msra.mxu1 %v9903_v50  ;;  %v9995_v49 = vld [vmem:[%s14255_s1 + $0xcc8] ss:$16 sps:$4 sm:$0xff]   ;;  %v10000_v50 = vld [vmem:[%s14255_s1 + $0xce4] ss:$16 sps:$4 sm:$0xff]  }
 0x175   : > { %6737 = vmatprep.subr.bf16.mxu0 %v9908_v51  ;;  %7393 = vmatprep.subr.bf16.mxu1 %v9911_v52  ;;  %v10003_v51 = vld [vmem:[%s14255_s1 + $0xcec] ss:$16 sps:$4 sm:$0xff]   ;;  %v9998_v52 = vld [vmem:[%s14255_s1 + $0xce0] ss:$16 sps:$4 sm:$0xff]  }
 0x178   : > { %6738 = vmatpush1.bf16.msra.mxu0 %v9906_v53  ;;  %7394 = vmatpush1.bf16.msra.mxu1 %v9909_v54  ;;  %v10001_v53 = vld [vmem:[%s14255_s1 + $0xce8] ss:$16 sps:$4 sm:$0xff]   ;;  %v10006_v54 = vld [vmem:[%s14255_s1 + $0xd04] ss:$16 sps:$4 sm:$0xff]  }
 0x179   : > { %6739 = vmatprep.subr.bf16.mxu0 %v9914_v55  ;;  %7395 = vmatprep.subr.bf16.mxu1 %v9917_v56  ;;  %v10009_v55 = vld [vmem:[%s14255_s1 + $0xd0c] ss:$16 sps:$4 sm:$0xff]   ;;  %v10004_v56 = vld [vmem:[%s14255_s1 + $0xd00] ss:$16 sps:$4 sm:$0xff]  }
 0x17c   : > { %6740 = vmatpush1.bf16.msra.mxu0 %v9912_v57  ;;  %7396 = vmatpush1.bf16.msra.mxu1 %v9915_v58  ;;  %v10007_v57 = vld [vmem:[%s14255_s1 + $0xd08] ss:$16 sps:$4 sm:$0xff]   ;;  %v10012_v58 = vld [vmem:[%s14255_s1 + $0xd24] ss:$16 sps:$4 sm:$0xff]  }
 0x17d   : > { %6741 = vmatprep.subr.bf16.mxu0 %v9920_v59  ;;  %7397 = vmatprep.subr.bf16.mxu1 %v9923_v60  ;;  %v10015_v59 = vld [vmem:[%s14255_s1 + $0xd2c] ss:$16 sps:$4 sm:$0xff]   ;;  %v10010_v60 = vld [vmem:[%s14255_s1 + $0xd20] ss:$16 sps:$4 sm:$0xff]  }
 0x180   : > { %6742 = vmatpush1.bf16.msra.mxu0 %v9918_v61  ;;  %7398 = vmatpush1.bf16.msra.mxu1 %v9921_v62  ;;  %v10013_v61 = vld [vmem:[%s14255_s1 + $0xd28] ss:$16 sps:$4 sm:$0xff]   ;;  %v10018_v62 = vld [vmem:[%s14255_s1 + $0xd44] ss:$16 sps:$4 sm:$0xff]  }
 0x181   : > { %6743 = vmatprep.subr.bf16.mxu0 %v9926_v63  ;;  %7399 = vmatprep.subr.bf16.mxu1 %v9929_v0  ;;  %v10021_v63 = vld [vmem:[%s14255_s1 + $0xd4c] ss:$16 sps:$4 sm:$0xff]   ;;  %v10016_v0 = vld [vmem:[%s14255_s1 + $0xd40] ss:$16 sps:$4 sm:$0xff]  }
 0x184   : > { %6744 = vmatpush1.bf16.msra.mxu0 %v9924_v1  ;;  %7400 = vmatpush1.bf16.msra.mxu1 %v9927_v2  ;;  %v10019_v1 = vld [vmem:[%s14255_s1 + $0xd48] ss:$16 sps:$4 sm:$0xff]   ;;  %v10024_v2 = vld [vmem:[%s14255_s1 + $0xd64] ss:$16 sps:$4 sm:$0xff]  }
 0x185   : > { %6745 = vmatprep.subr.bf16.mxu0 %v9932_v3  ;;  %7401 = vmatprep.subr.bf16.mxu1 %v9935_v4  ;;  %v10027_v3 = vld [vmem:[%s14255_s1 + $0xd6c] ss:$16 sps:$4 sm:$0xff]   ;;  %v10022_v4 = vld [vmem:[%s14255_s1 + $0xd60] ss:$16 sps:$4 sm:$0xff]  }
 0x188   : > { %6746 = vmatpush1.bf16.msra.mxu0 %v9930_v5  ;;  %7402 = vmatpush1.bf16.msra.mxu1 %v9933_v6  ;;  %v10025_v5 = vld [vmem:[%s14255_s1 + $0xd68] ss:$16 sps:$4 sm:$0xff]   ;;  %v10030_v6 = vld [vmem:[%s14255_s1 + $0xd84] ss:$16 sps:$4 sm:$0xff]  }
 0x189   : > { %6747 = vmatprep.subr.bf16.mxu0 %v9938_v7  ;;  %7403 = vmatprep.subr.bf16.mxu1 %v9941_v8  ;;  %v10033_v7 = vld [vmem:[%s14255_s1 + $0xd8c] ss:$16 sps:$4 sm:$0xff]   ;;  %v10028_v8 = vld [vmem:[%s14255_s1 + $0xd80] ss:$16 sps:$4 sm:$0xff]  }
 0x18c   : > { %6748 = vmatpush1.bf16.msra.mxu0 %v9936_v9  ;;  %7404 = vmatpush1.bf16.msra.mxu1 %v9939_v10  ;;  %v10031_v9 = vld [vmem:[%s14255_s1 + $0xd88] ss:$16 sps:$4 sm:$0xff]   ;;  %v10036_v10 = vld [vmem:[%s14255_s1 + $0xda4] ss:$16 sps:$4 sm:$0xff]  }
 0x18d   : > { %6749 = vmatprep.subr.bf16.mxu0 %v9944_v11  ;;  %7405 = vmatprep.subr.bf16.mxu1 %v9947_v12  ;;  %v10039_v11 = vld [vmem:[%s14255_s1 + $0xdac] ss:$16 sps:$4 sm:$0xff]   ;;  %v10034_v12 = vld [vmem:[%s14255_s1 + $0xda0] ss:$16 sps:$4 sm:$0xff]  }
 0x190   : > { %6750 = vmatpush1.bf16.msra.mxu0 %v9942_v14  ;;  %7406 = vmatpush1.bf16.msra.mxu1 %v9945_v15  ;;  %v10037_v14 = vld [vmem:[%s14255_s1 + $0xda8] ss:$16 sps:$4 sm:$0xff]   ;;  %v10042_v15 = vld [vmem:[%s14255_s1 + $0xdc4] ss:$16 sps:$4 sm:$0xff]  }
 0x191   : > { %6751 = vmatprep.subr.bf16.mxu0 %v9950_v17  ;;  %7407 = vmatprep.subr.bf16.mxu1 %v9953_v13  ;;  %v10045_v17 = vld [vmem:[%s14255_s1 + $0xdcc] ss:$16 sps:$4 sm:$0xff]   ;;  %v10040_v13 = vld [vmem:[%s14255_s1 + $0xdc0] ss:$16 sps:$4 sm:$0xff]  }
 0x194   : > { %6752 = vmatpush1.bf16.msra.mxu0 %v9948_v19  ;;  %7408 = vmatpush1.bf16.msra.mxu1 %v9951_v16  ;;  %v10043_v19 = vld [vmem:[%s14255_s1 + $0xdc8] ss:$16 sps:$4 sm:$0xff]   ;;  %v10048_v16 = vld [vmem:[%s14255_s1 + $0xde4] ss:$16 sps:$4 sm:$0xff]  }
 0x195   : > { %6762 = vmatprep.subr.bf16.mxu0 %v9958_v21  ;;  %7418 = vmatprep.subr.bf16.mxu1 %v9961_v22  ;;  %v10051_v21 = vld [vmem:[%s14255_s1 + $0xdec] ss:$16 sps:$4 sm:$0xff]   ;;  %v10046_v22 = vld [vmem:[%s14255_s1 + $0xde0] ss:$16 sps:$4 sm:$0xff]  }
 0x197   : > { %6754 = vmatmul.mubr.bf16.vlgmr.msra.gmra.mrb[0].mxu0 %v8164_v18  ;;  %7410 = vmatmul.mubr.bf16.vlgmr.msra.gmra.mrb[0].mxu1 %v8164_v18  ;;  %v10049_v18 = vld [vmem:[%s14255_s1 + $0xde8] ss:$16 sps:$4 sm:$0xff]  }
 0x198   : > { %6763 = vmatpush1.bf16.msra.mxu0 %v9956_v24  ;;  %7419 = vmatpush1.bf16.msra.mxu1 %v9959_v25  ;;  %v10056_v24 = vld [vmem:[%s14255_s1 + $0xe04] ss:$16 sps:$4 sm:$0xff]   ;;  %v10059_v25 = vld [vmem:[%s14255_s1 + $0xe0c] ss:$16 sps:$4 sm:$0xff]  }
 0x199   : > { %6764 = vmatprep.subr.bf16.mxu0 %v9964_v26  ;;  %7420 = vmatprep.subr.bf16.mxu1 %v9967_v20  ;;  %v12419_v26 = vld [vmem:[%s14254_s0 + $0x38] sm:$0xff]  ;;  %v8166_v20 = vcombine.low %v12218_v23, %v12218_v23 }
 0x19a   : > { %6794 = vmatprep.mubr.bf16.mxu0 %v8167_v27  ;;  %7450 = vmatprep.mubr.bf16.mxu1 %v8167_v27  ;;  %v10054_v27 = vld [vmem:[%s14255_s1 + $0xe00] ss:$16 sps:$4 sm:$0xff]   ;;  %v10065_v23 = vld [vmem:[%s14255_s1 + $0xe2c] ss:$16 sps:$4 sm:$0xff]  }
 0x19c   : > { %6765 = vmatpush1.bf16.msra.mxu0 %v9962_v28  ;;  %7421 = vmatpush1.bf16.msra.mxu1 %v9965_v29  ;;  %v10057_v28 = vld [vmem:[%s14255_s1 + $0xe08] ss:$16 sps:$4 sm:$0xff]   ;;  %v10062_v29 = vld [vmem:[%s14255_s1 + $0xe24] ss:$16 sps:$4 sm:$0xff]  }
 0x19d   : > { %6766 = vmatprep.subr.bf16.mxu0 %v9970_v30  ;;  %7422 = vmatprep.subr.bf16.mxu1 %v9973_v31  ;;  %v8169_v30 = vcombine.high %v12419_v26, %v12419_v26  ;;  %v10060_v31 = vld [vmem:[%s14255_s1 + $0xe20] ss:$16 sps:$4 sm:$0xff]  }
 0x1a0   : > { %6767 = vmatpush1.bf16.msra.mxu0 %v9968_v32  ;;  %7423 = vmatpush1.bf16.msra.mxu1 %v9971_v33  ;;  %v10063_v32 = vld [vmem:[%s14255_s1 + $0xe28] ss:$16 sps:$4 sm:$0xff]   ;;  %v10068_v33 = vld [vmem:[%s14255_s1 + $0xe44] ss:$16 sps:$4 sm:$0xff]  }
 0x1a1   : > { %6768 = vmatprep.subr.bf16.mxu0 %v9976_v34  ;;  %7424 = vmatprep.subr.bf16.mxu1 %v9979_v35  ;;  %v10071_v34 = vld [vmem:[%s14255_s1 + $0xe4c] ss:$16 sps:$4 sm:$0xff]   ;;  %v10066_v35 = vld [vmem:[%s14255_s1 + $0xe40] ss:$16 sps:$4 sm:$0xff]  }
 0x1a4   : > { %6769 = vmatpush1.bf16.msra.mxu0 %v9974_v36  ;;  %7425 = vmatpush1.bf16.msra.mxu1 %v9977_v37  ;;  %v10069_v36 = vld [vmem:[%s14255_s1 + $0xe48] ss:$16 sps:$4 sm:$0xff]   ;;  %v10074_v37 = vld [vmem:[%s14255_s1 + $0xe64] ss:$16 sps:$4 sm:$0xff]  }
 0x1a5   : > { %6770 = vmatprep.subr.bf16.mxu0 %v9982_v38  ;;  %7426 = vmatprep.subr.bf16.mxu1 %v9985_v39  ;;  %v10077_v38 = vld [vmem:[%s14255_s1 + $0xe6c] ss:$16 sps:$4 sm:$0xff]   ;;  %v10072_v39 = vld [vmem:[%s14255_s1 + $0xe60] ss:$16 sps:$4 sm:$0xff]  }
 0x1a8   : > { %6771 = vmatpush1.bf16.msra.mxu0 %v9980_v40  ;;  %7427 = vmatpush1.bf16.msra.mxu1 %v9983_v41  ;;  %v10075_v40 = vld [vmem:[%s14255_s1 + $0xe68] ss:$16 sps:$4 sm:$0xff]   ;;  %v10080_v41 = vld [vmem:[%s14255_s1 + $0xe84] ss:$16 sps:$4 sm:$0xff]  }
 0x1a9   : > { %6772 = vmatprep.subr.bf16.mxu0 %v9988_v42  ;;  %7428 = vmatprep.subr.bf16.mxu1 %v9991_v43  ;;  %v10083_v42 = vld [vmem:[%s14255_s1 + $0xe8c] ss:$16 sps:$4 sm:$0xff]   ;;  %v10078_v43 = vld [vmem:[%s14255_s1 + $0xe80] ss:$16 sps:$4 sm:$0xff]  }
 0x1ac   : > { %6773 = vmatpush1.bf16.msra.mxu0 %v9986_v44  ;;  %7429 = vmatpush1.bf16.msra.mxu1 %v9989_v45  ;;  %v10081_v44 = vld [vmem:[%s14255_s1 + $0xe88] ss:$16 sps:$4 sm:$0xff]   ;;  %v10086_v45 = vld [vmem:[%s14255_s1 + $0xea4] ss:$16 sps:$4 sm:$0xff]  }
 0x1ad   : > { %6774 = vmatprep.subr.bf16.mxu0 %v9994_v46  ;;  %7430 = vmatprep.subr.bf16.mxu1 %v9997_v47  ;;  %v10089_v46 = vld [vmem:[%s14255_s1 + $0xeac] ss:$16 sps:$4 sm:$0xff]   ;;  %v10084_v47 = vld [vmem:[%s14255_s1 + $0xea0] ss:$16 sps:$4 sm:$0xff]  }
 0x1b0   : > { %6775 = vmatpush1.bf16.msra.mxu0 %v9992_v48  ;;  %7431 = vmatpush1.bf16.msra.mxu1 %v9995_v49  ;;  %v10087_v48 = vld [vmem:[%s14255_s1 + $0xea8] ss:$16 sps:$4 sm:$0xff]   ;;  %v10092_v49 = vld [vmem:[%s14255_s1 + $0xec4] ss:$16 sps:$4 sm:$0xff]  }
 0x1b1   : > { %6776 = vmatprep.subr.bf16.mxu0 %v10000_v50  ;;  %7432 = vmatprep.subr.bf16.mxu1 %v10003_v51  ;;  %v10095_v50 = vld [vmem:[%s14255_s1 + $0xecc] ss:$16 sps:$4 sm:$0xff]   ;;  %v10090_v51 = vld [vmem:[%s14255_s1 + $0xec0] ss:$16 sps:$4 sm:$0xff]  }
 0x1b4   : > { %6777 = vmatpush1.bf16.msra.mxu0 %v9998_v52  ;;  %7433 = vmatpush1.bf16.msra.mxu1 %v10001_v53  ;;  %v10093_v52 = vld [vmem:[%s14255_s1 + $0xec8] ss:$16 sps:$4 sm:$0xff]   ;;  %v10098_v53 = vld [vmem:[%s14255_s1 + $0xee4] ss:$16 sps:$4 sm:$0xff]  }
 0x1b5   : > { %6778 = vmatprep.subr.bf16.mxu0 %v10006_v54  ;;  %7434 = vmatprep.subr.bf16.mxu1 %v10009_v55  ;;  %v10101_v54 = vld [vmem:[%s14255_s1 + $0xeec] ss:$16 sps:$4 sm:$0xff]   ;;  %v10096_v55 = vld [vmem:[%s14255_s1 + $0xee0] ss:$16 sps:$4 sm:$0xff]  }
 0x1b8   : > { %6779 = vmatpush1.bf16.msra.mxu0 %v10004_v56  ;;  %7435 = vmatpush1.bf16.msra.mxu1 %v10007_v57  ;;  %v10099_v56 = vld [vmem:[%s14255_s1 + $0xee8] ss:$16 sps:$4 sm:$0xff]   ;;  %v10104_v57 = vld [vmem:[%s14255_s1 + $0xf04] ss:$16 sps:$4 sm:$0xff]  }
 0x1b9   : > { %6780 = vmatprep.subr.bf16.mxu0 %v10012_v58  ;;  %7436 = vmatprep.subr.bf16.mxu1 %v10015_v59  ;;  %v10107_v58 = vld [vmem:[%s14255_s1 + $0xf0c] ss:$16 sps:$4 sm:$0xff]   ;;  %v10102_v59 = vld [vmem:[%s14255_s1 + $0xf00] ss:$16 sps:$4 sm:$0xff]  }
 0x1bc   : > { %6781 = vmatpush1.bf16.msra.mxu0 %v10010_v60  ;;  %7437 = vmatpush1.bf16.msra.mxu1 %v10013_v61  ;;  %v10105_v60 = vld [vmem:[%s14255_s1 + $0xf08] ss:$16 sps:$4 sm:$0xff]   ;;  %v10110_v61 = vld [vmem:[%s14255_s1 + $0xf24] ss:$16 sps:$4 sm:$0xff]  }
 0x1bd   : > { %6782 = vmatprep.subr.bf16.mxu0 %v10018_v62  ;;  %7438 = vmatprep.subr.bf16.mxu1 %v10021_v63  ;;  %v10113_v62 = vld [vmem:[%s14255_s1 + $0xf2c] ss:$16 sps:$4 sm:$0xff]   ;;  %v10108_v63 = vld [vmem:[%s14255_s1 + $0xf20] ss:$16 sps:$4 sm:$0xff]  }
 0x1c0   : > { %6783 = vmatpush1.bf16.msra.mxu0 %v10016_v0  ;;  %7439 = vmatpush1.bf16.msra.mxu1 %v10019_v1  ;;  %v10111_v0 = vld [vmem:[%s14255_s1 + $0xf28] ss:$16 sps:$4 sm:$0xff]   ;;  %v10116_v1 = vld [vmem:[%s14255_s1 + $0xf44] ss:$16 sps:$4 sm:$0xff]  }
 0x1c1   : > { %6784 = vmatprep.subr.bf16.mxu0 %v10024_v2  ;;  %7440 = vmatprep.subr.bf16.mxu1 %v10027_v3  ;;  %v10119_v2 = vld [vmem:[%s14255_s1 + $0xf4c] ss:$16 sps:$4 sm:$0xff]   ;;  %v10114_v3 = vld [vmem:[%s14255_s1 + $0xf40] ss:$16 sps:$4 sm:$0xff]  }
 0x1c4   : > { %6785 = vmatpush1.bf16.msra.mxu0 %v10022_v4  ;;  %7441 = vmatpush1.bf16.msra.mxu1 %v10025_v5  ;;  %v10117_v4 = vld [vmem:[%s14255_s1 + $0xf48] ss:$16 sps:$4 sm:$0xff]   ;;  %v10122_v5 = vld [vmem:[%s14255_s1 + $0xf64] ss:$16 sps:$4 sm:$0xff]  }
 0x1c5   : > { %6786 = vmatprep.subr.bf16.mxu0 %v10030_v6  ;;  %7442 = vmatprep.subr.bf16.mxu1 %v10033_v7  ;;  %v10125_v6 = vld [vmem:[%s14255_s1 + $0xf6c] ss:$16 sps:$4 sm:$0xff]   ;;  %v10120_v7 = vld [vmem:[%s14255_s1 + $0xf60] ss:$16 sps:$4 sm:$0xff]  }
 0x1c8   : > { %6787 = vmatpush1.bf16.msra.mxu0 %v10028_v8  ;;  %7443 = vmatpush1.bf16.msra.mxu1 %v10031_v9  ;;  %v10123_v8 = vld [vmem:[%s14255_s1 + $0xf68] ss:$16 sps:$4 sm:$0xff]   ;;  %v10128_v9 = vld [vmem:[%s14255_s1 + $0xf84] ss:$16 sps:$4 sm:$0xff]  }
 0x1c9   : > { %6788 = vmatprep.subr.bf16.mxu0 %v10036_v10  ;;  %7444 = vmatprep.subr.bf16.mxu1 %v10039_v11  ;;  %v10131_v10 = vld [vmem:[%s14255_s1 + $0xf8c] ss:$16 sps:$4 sm:$0xff]   ;;  %v10126_v11 = vld [vmem:[%s14255_s1 + $0xf80] ss:$16 sps:$4 sm:$0xff]  }
 0x1cc   : > { %6789 = vmatpush1.bf16.msra.mxu0 %v10034_v12  ;;  %7445 = vmatpush1.bf16.msra.mxu1 %v10037_v14  ;;  %v10129_v12 = vld [vmem:[%s14255_s1 + $0xf88] ss:$16 sps:$4 sm:$0xff]   ;;  %v10134_v14 = vld [vmem:[%s14255_s1 + $0xfa4] ss:$16 sps:$4 sm:$0xff]  }
 0x1cd   : > { %6790 = vmatprep.subr.bf16.mxu0 %v10042_v15  ;;  %7446 = vmatprep.subr.bf16.mxu1 %v10045_v17  ;;  %v10137_v15 = vld [vmem:[%s14255_s1 + $0xfac] ss:$16 sps:$4 sm:$0xff]   ;;  %v10132_v17 = vld [vmem:[%s14255_s1 + $0xfa0] ss:$16 sps:$4 sm:$0xff]  }
 0x1d0   : > { %6791 = vmatpush1.bf16.msra.mxu0 %v10040_v13  ;;  %7447 = vmatpush1.bf16.msra.mxu1 %v10043_v19  ;;  %v10135_v13 = vld [vmem:[%s14255_s1 + $0xfa8] ss:$16 sps:$4 sm:$0xff]   ;;  %v10140_v19 = vld [vmem:[%s14255_s1 + $0xfc4] ss:$16 sps:$4 sm:$0xff]  }
 0x1d1   : > { %6792 = vmatprep.subr.bf16.mxu0 %v10048_v16  ;;  %7448 = vmatprep.subr.bf16.mxu1 %v10051_v21  ;;  %v10143_v16 = vld [vmem:[%s14255_s1 + $0xfcc] ss:$16 sps:$4 sm:$0xff]   ;;  %v10138_v21 = vld [vmem:[%s14255_s1 + $0xfc0] ss:$16 sps:$4 sm:$0xff]  }
 0x1d4   : > { %6793 = vmatpush1.bf16.msra.mxu0 %v10046_v22  ;;  %7449 = vmatpush1.bf16.msra.mxu1 %v10049_v18  ;;  %v10141_v22 = vld [vmem:[%s14255_s1 + $0xfc8] ss:$16 sps:$4 sm:$0xff]   ;;  %v10146_v18 = vld [vmem:[%s14255_s1 + $0xfe4] ss:$16 sps:$4 sm:$0xff]  }
 0x1d5   : > { %6803 = vmatprep.subr.bf16.mxu0 %v10056_v24  ;;  %7459 = vmatprep.subr.bf16.mxu1 %v10059_v25  ;;  %v10149_v24 = vld [vmem:[%s14255_s1 + $0xfec] ss:$16 sps:$4 sm:$0xff]   ;;  %v10144_v25 = vld [vmem:[%s14255_s1 + $0xfe0] ss:$16 sps:$4 sm:$0xff]  }
 0x1d7   : > { %6795 = vmatmul.mubr.bf16.vlgmr.msra.gmra.mrb[0].mxu0 %v8166_v20  ;;  %7451 = vmatmul.mubr.bf16.vlgmr.msra.gmra.mrb[0].mxu1 %v8166_v20  ;;  %v10147_v20 = vld [vmem:[%s14255_s1 + $0xfe8] ss:$16 sps:$4 sm:$0xff]  }
 0x1d8   : > { %6804 = vmatpush1.bf16.msra.mxu0 %v10054_v27  ;;  %7460 = vmatpush1.bf16.msra.mxu1 %v10057_v28  ;;  %v10154_v27 = vld [vmem:[%s14255_s1 + $0x1004] ss:$16 sps:$4 sm:$0xff]   ;;  %v10157_v28 = vld [vmem:[%s14255_s1 + $0x100c] ss:$16 sps:$4 sm:$0xff]  }
 0x1d9   : > { %6805 = vmatprep.subr.bf16.mxu0 %v10062_v29  ;;  %7461 = vmatprep.subr.bf16.mxu1 %v10065_v23  ;;  %v12620_v29 = vld [vmem:[%s14254_s0 + $0x40] sm:$0xff]  ;;  %v8168_v23 = vcombine.low %v12419_v26, %v12419_v26  ;;  %v10163_v26 = vld [vmem:[%s14255_s1 + $0x102c] ss:$16 sps:$4 sm:$0xff]  }
 0x1da   : > { %6835 = vmatprep.mubr.bf16.mxu0 %v8169_v30  ;;  %7491 = vmatprep.mubr.bf16.mxu1 %v8169_v30  ;;  %v10152_v30 = vld [vmem:[%s14255_s1 + $0x1000] ss:$16 sps:$4 sm:$0xff]  }
 0x1dc   : > { %6806 = vmatpush1.bf16.msra.mxu0 %v10060_v31  ;;  %7462 = vmatpush1.bf16.msra.mxu1 %v10063_v32  ;;  %v10155_v31 = vld [vmem:[%s14255_s1 + $0x1008] ss:$16 sps:$4 sm:$0xff]   ;;  %v10160_v32 = vld [vmem:[%s14255_s1 + $0x1024] ss:$16 sps:$4 sm:$0xff]  }
 0x1dd   : > { %6807 = vmatprep.subr.bf16.mxu0 %v10068_v33  ;;  %7463 = vmatprep.subr.bf16.mxu1 %v10071_v34  ;;  %v8171_v33 = vcombine.high %v12620_v29, %v12620_v29  ;;  %v10158_v34 = vld [vmem:[%s14255_s1 + $0x1020] ss:$16 sps:$4 sm:$0xff]  }
 0x1e0   : > { %6808 = vmatpush1.bf16.msra.mxu0 %v10066_v35  ;;  %7464 = vmatpush1.bf16.msra.mxu1 %v10069_v36  ;;  %v10161_v35 = vld [vmem:[%s14255_s1 + $0x1028] ss:$16 sps:$4 sm:$0xff]   ;;  %v10166_v36 = vld [vmem:[%s14255_s1 + $0x1044] ss:$16 sps:$4 sm:$0xff]  }
 0x1e1   : > { %6809 = vmatprep.subr.bf16.mxu0 %v10074_v37  ;;  %7465 = vmatprep.subr.bf16.mxu1 %v10077_v38  ;;  %v10169_v37 = vld [vmem:[%s14255_s1 + $0x104c] ss:$16 sps:$4 sm:$0xff]   ;;  %v10164_v38 = vld [vmem:[%s14255_s1 + $0x1040] ss:$16 sps:$4 sm:$0xff]  }
 0x1e4   : > { %6810 = vmatpush1.bf16.msra.mxu0 %v10072_v39  ;;  %7466 = vmatpush1.bf16.msra.mxu1 %v10075_v40  ;;  %v10167_v39 = vld [vmem:[%s14255_s1 + $0x1048] ss:$16 sps:$4 sm:$0xff]   ;;  %v10172_v40 = vld [vmem:[%s14255_s1 + $0x1064] ss:$16 sps:$4 sm:$0xff]  }
 0x1e5   : > { %6811 = vmatprep.subr.bf16.mxu0 %v10080_v41  ;;  %7467 = vmatprep.subr.bf16.mxu1 %v10083_v42  ;;  %v10175_v41 = vld [vmem:[%s14255_s1 + $0x106c] ss:$16 sps:$4 sm:$0xff]   ;;  %v10170_v42 = vld [vmem:[%s14255_s1 + $0x1060] ss:$16 sps:$4 sm:$0xff]  }
 0x1e8   : > { %6812 = vmatpush1.bf16.msra.mxu0 %v10078_v43  ;;  %7468 = vmatpush1.bf16.msra.mxu1 %v10081_v44  ;;  %v10173_v43 = vld [vmem:[%s14255_s1 + $0x1068] ss:$16 sps:$4 sm:$0xff]   ;;  %v10178_v44 = vld [vmem:[%s14255_s1 + $0x1084] ss:$16 sps:$4 sm:$0xff]  }
 0x1e9   : > { %6813 = vmatprep.subr.bf16.mxu0 %v10086_v45  ;;  %7469 = vmatprep.subr.bf16.mxu1 %v10089_v46  ;;  %v10181_v45 = vld [vmem:[%s14255_s1 + $0x108c] ss:$16 sps:$4 sm:$0xff]   ;;  %v10176_v46 = vld [vmem:[%s14255_s1 + $0x1080] ss:$16 sps:$4 sm:$0xff]  }
 0x1ec   : > { %6814 = vmatpush1.bf16.msra.mxu0 %v10084_v47  ;;  %7470 = vmatpush1.bf16.msra.mxu1 %v10087_v48  ;;  %v10179_v47 = vld [vmem:[%s14255_s1 + $0x1088] ss:$16 sps:$4 sm:$0xff]   ;;  %v10184_v48 = vld [vmem:[%s14255_s1 + $0x10a4] ss:$16 sps:$4 sm:$0xff]  }
 0x1ed   : > { %6815 = vmatprep.subr.bf16.mxu0 %v10092_v49  ;;  %7471 = vmatprep.subr.bf16.mxu1 %v10095_v50  ;;  %v10187_v49 = vld [vmem:[%s14255_s1 + $0x10ac] ss:$16 sps:$4 sm:$0xff]   ;;  %v10182_v50 = vld [vmem:[%s14255_s1 + $0x10a0] ss:$16 sps:$4 sm:$0xff]  }
 0x1f0   : > { %6816 = vmatpush1.bf16.msra.mxu0 %v10090_v51  ;;  %7472 = vmatpush1.bf16.msra.mxu1 %v10093_v52  ;;  %v10185_v51 = vld [vmem:[%s14255_s1 + $0x10a8] ss:$16 sps:$4 sm:$0xff]   ;;  %v10190_v52 = vld [vmem:[%s14255_s1 + $0x10c4] ss:$16 sps:$4 sm:$0xff]  }
 0x1f1   : > { %6817 = vmatprep.subr.bf16.mxu0 %v10098_v53  ;;  %7473 = vmatprep.subr.bf16.mxu1 %v10101_v54  ;;  %v10193_v53 = vld [vmem:[%s14255_s1 + $0x10cc] ss:$16 sps:$4 sm:$0xff]   ;;  %v10188_v54 = vld [vmem:[%s14255_s1 + $0x10c0] ss:$16 sps:$4 sm:$0xff]  }
 0x1f4   : > { %6818 = vmatpush1.bf16.msra.mxu0 %v10096_v55  ;;  %7474 = vmatpush1.bf16.msra.mxu1 %v10099_v56  ;;  %v10191_v55 = vld [vmem:[%s14255_s1 + $0x10c8] ss:$16 sps:$4 sm:$0xff]   ;;  %v10196_v56 = vld [vmem:[%s14255_s1 + $0x10e4] ss:$16 sps:$4 sm:$0xff]  }
 0x1f5   : > { %6819 = vmatprep.subr.bf16.mxu0 %v10104_v57  ;;  %7475 = vmatprep.subr.bf16.mxu1 %v10107_v58  ;;  %v10199_v57 = vld [vmem:[%s14255_s1 + $0x10ec] ss:$16 sps:$4 sm:$0xff]   ;;  %v10194_v58 = vld [vmem:[%s14255_s1 + $0x10e0] ss:$16 sps:$4 sm:$0xff]  }
 0x1f8   : > { %6820 = vmatpush1.bf16.msra.mxu0 %v10102_v59  ;;  %7476 = vmatpush1.bf16.msra.mxu1 %v10105_v60  ;;  %v10197_v59 = vld [vmem:[%s14255_s1 + $0x10e8] ss:$16 sps:$4 sm:$0xff]   ;;  %v10202_v60 = vld [vmem:[%s14255_s1 + $0x1104] ss:$16 sps:$4 sm:$0xff]  }
 0x1f9   : > { %6821 = vmatprep.subr.bf16.mxu0 %v10110_v61  ;;  %7477 = vmatprep.subr.bf16.mxu1 %v10113_v62  ;;  %v10205_v61 = vld [vmem:[%s14255_s1 + $0x110c] ss:$16 sps:$4 sm:$0xff]   ;;  %v10200_v62 = vld [vmem:[%s14255_s1 + $0x1100] ss:$16 sps:$4 sm:$0xff]  }
 0x1fc   : > { %6822 = vmatpush1.bf16.msra.mxu0 %v10108_v63  ;;  %7478 = vmatpush1.bf16.msra.mxu1 %v10111_v0  ;;  %v10203_v63 = vld [vmem:[%s14255_s1 + $0x1108] ss:$16 sps:$4 sm:$0xff]   ;;  %v10208_v0 = vld [vmem:[%s14255_s1 + $0x1124] ss:$16 sps:$4 sm:$0xff]  }
 0x1fd   : > { %6823 = vmatprep.subr.bf16.mxu0 %v10116_v1  ;;  %7479 = vmatprep.subr.bf16.mxu1 %v10119_v2  ;;  %v10211_v1 = vld [vmem:[%s14255_s1 + $0x112c] ss:$16 sps:$4 sm:$0xff]   ;;  %v10206_v2 = vld [vmem:[%s14255_s1 + $0x1120] ss:$16 sps:$4 sm:$0xff]  }
 0x200   : > { %6824 = vmatpush1.bf16.msra.mxu0 %v10114_v3  ;;  %7480 = vmatpush1.bf16.msra.mxu1 %v10117_v4  ;;  %v10209_v3 = vld [vmem:[%s14255_s1 + $0x1128] ss:$16 sps:$4 sm:$0xff]   ;;  %v10214_v4 = vld [vmem:[%s14255_s1 + $0x1144] ss:$16 sps:$4 sm:$0xff]  }
 0x201   : > { %6825 = vmatprep.subr.bf16.mxu0 %v10122_v5  ;;  %7481 = vmatprep.subr.bf16.mxu1 %v10125_v6  ;;  %v10217_v5 = vld [vmem:[%s14255_s1 + $0x114c] ss:$16 sps:$4 sm:$0xff]   ;;  %v10212_v6 = vld [vmem:[%s14255_s1 + $0x1140] ss:$16 sps:$4 sm:$0xff]  }
 0x204   : > { %6826 = vmatpush1.bf16.msra.mxu0 %v10120_v7  ;;  %7482 = vmatpush1.bf16.msra.mxu1 %v10123_v8  ;;  %v10215_v7 = vld [vmem:[%s14255_s1 + $0x1148] ss:$16 sps:$4 sm:$0xff]   ;;  %v10220_v8 = vld [vmem:[%s14255_s1 + $0x1164] ss:$16 sps:$4 sm:$0xff]  }
 0x205   : > { %6827 = vmatprep.subr.bf16.mxu0 %v10128_v9  ;;  %7483 = vmatprep.subr.bf16.mxu1 %v10131_v10  ;;  %v10223_v9 = vld [vmem:[%s14255_s1 + $0x116c] ss:$16 sps:$4 sm:$0xff]   ;;  %v10218_v10 = vld [vmem:[%s14255_s1 + $0x1160] ss:$16 sps:$4 sm:$0xff]  }
 0x208   : > { %6828 = vmatpush1.bf16.msra.mxu0 %v10126_v11  ;;  %7484 = vmatpush1.bf16.msra.mxu1 %v10129_v12  ;;  %v10221_v11 = vld [vmem:[%s14255_s1 + $0x1168] ss:$16 sps:$4 sm:$0xff]   ;;  %v10226_v12 = vld [vmem:[%s14255_s1 + $0x1184] ss:$16 sps:$4 sm:$0xff]  }
 0x209   : > { %6829 = vmatprep.subr.bf16.mxu0 %v10134_v14  ;;  %7485 = vmatprep.subr.bf16.mxu1 %v10137_v15  ;;  %v10229_v14 = vld [vmem:[%s14255_s1 + $0x118c] ss:$16 sps:$4 sm:$0xff]   ;;  %v10224_v15 = vld [vmem:[%s14255_s1 + $0x1180] ss:$16 sps:$4 sm:$0xff]  }
 0x20c   : > { %6830 = vmatpush1.bf16.msra.mxu0 %v10132_v17  ;;  %7486 = vmatpush1.bf16.msra.mxu1 %v10135_v13  ;;  %v10227_v17 = vld [vmem:[%s14255_s1 + $0x1188] ss:$16 sps:$4 sm:$0xff]   ;;  %v10232_v13 = vld [vmem:[%s14255_s1 + $0x11a4] ss:$16 sps:$4 sm:$0xff]  }
 0x20d   : > { %6831 = vmatprep.subr.bf16.mxu0 %v10140_v19  ;;  %7487 = vmatprep.subr.bf16.mxu1 %v10143_v16  ;;  %v10235_v19 = vld [vmem:[%s14255_s1 + $0x11ac] ss:$16 sps:$4 sm:$0xff]   ;;  %v10230_v16 = vld [vmem:[%s14255_s1 + $0x11a0] ss:$16 sps:$4 sm:$0xff]  }
 0x210   : > { %6832 = vmatpush1.bf16.msra.mxu0 %v10138_v21  ;;  %7488 = vmatpush1.bf16.msra.mxu1 %v10141_v22  ;;  %v10233_v21 = vld [vmem:[%s14255_s1 + $0x11a8] ss:$16 sps:$4 sm:$0xff]   ;;  %v10238_v22 = vld [vmem:[%s14255_s1 + $0x11c4] ss:$16 sps:$4 sm:$0xff]  }
 0x211   : > { %6833 = vmatprep.subr.bf16.mxu0 %v10146_v18  ;;  %7489 = vmatprep.subr.bf16.mxu1 %v10149_v24  ;;  %v10241_v18 = vld [vmem:[%s14255_s1 + $0x11cc] ss:$16 sps:$4 sm:$0xff]   ;;  %v10236_v24 = vld [vmem:[%s14255_s1 + $0x11c0] ss:$16 sps:$4 sm:$0xff]  }
 0x214   : > { %6834 = vmatpush1.bf16.msra.mxu0 %v10144_v25  ;;  %7490 = vmatpush1.bf16.msra.mxu1 %v10147_v20  ;;  %v10239_v25 = vld [vmem:[%s14255_s1 + $0x11c8] ss:$16 sps:$4 sm:$0xff]   ;;  %v10244_v20 = vld [vmem:[%s14255_s1 + $0x11e4] ss:$16 sps:$4 sm:$0xff]  }
 0x215   : > { %6844 = vmatprep.subr.bf16.mxu0 %v10154_v27  ;;  %7500 = vmatprep.subr.bf16.mxu1 %v10157_v28  ;;  %v10247_v27 = vld [vmem:[%s14255_s1 + $0x11ec] ss:$16 sps:$4 sm:$0xff]   ;;  %v10242_v28 = vld [vmem:[%s14255_s1 + $0x11e0] ss:$16 sps:$4 sm:$0xff]  }
 0x217   : > { %6836 = vmatmul.mubr.bf16.vlgmr.msra.gmra.mrb[0].mxu0 %v8168_v23  ;;  %7492 = vmatmul.mubr.bf16.vlgmr.msra.gmra.mrb[0].mxu1 %v8168_v23  ;;  %v10245_v23 = vld [vmem:[%s14255_s1 + $0x11e8] ss:$16 sps:$4 sm:$0xff]  }
 0x218   : > { %6845 = vmatpush1.bf16.msra.mxu0 %v10152_v30  ;;  %7501 = vmatpush1.bf16.msra.mxu1 %v10155_v31  ;;  %v10252_v30 = vld [vmem:[%s14255_s1 + $0x1204] ss:$16 sps:$4 sm:$0xff]   ;;  %v10255_v31 = vld [vmem:[%s14255_s1 + $0x120c] ss:$16 sps:$4 sm:$0xff]  }
 0x219   : > { %6846 = vmatprep.subr.bf16.mxu0 %v10160_v32  ;;  %7502 = vmatprep.subr.bf16.mxu1 %v10163_v26  ;;  %v12821_v32 = vld [vmem:[%s14254_s0 + $0x48] sm:$0xff]  ;;  %v8170_v26 = vcombine.low %v12620_v29, %v12620_v29 }
 0x21a   : > { %6876 = vmatprep.mubr.bf16.mxu0 %v8171_v33  ;;  %7532 = vmatprep.mubr.bf16.mxu1 %v8171_v33  ;;  %v10250_v33 = vld [vmem:[%s14255_s1 + $0x1200] ss:$16 sps:$4 sm:$0xff]   ;;  %v10261_v29 = vld [vmem:[%s14255_s1 + $0x122c] ss:$16 sps:$4 sm:$0xff]  }
 0x21c   : > { %6847 = vmatpush1.bf16.msra.mxu0 %v10158_v34  ;;  %7503 = vmatpush1.bf16.msra.mxu1 %v10161_v35  ;;  %v10253_v34 = vld [vmem:[%s14255_s1 + $0x1208] ss:$16 sps:$4 sm:$0xff]   ;;  %v10258_v35 = vld [vmem:[%s14255_s1 + $0x1224] ss:$16 sps:$4 sm:$0xff]  }
 0x21d   : > { %6848 = vmatprep.subr.bf16.mxu0 %v10166_v36  ;;  %7504 = vmatprep.subr.bf16.mxu1 %v10169_v37  ;;  %v8173_v36 = vcombine.high %v12821_v32, %v12821_v32  ;;  %v10256_v37 = vld [vmem:[%s14255_s1 + $0x1220] ss:$16 sps:$4 sm:$0xff]  }
 0x220   : > { %6849 = vmatpush1.bf16.msra.mxu0 %v10164_v38  ;;  %7505 = vmatpush1.bf16.msra.mxu1 %v10167_v39  ;;  %v10259_v38 = vld [vmem:[%s14255_s1 + $0x1228] ss:$16 sps:$4 sm:$0xff]   ;;  %v10264_v39 = vld [vmem:[%s14255_s1 + $0x1244] ss:$16 sps:$4 sm:$0xff]  }
 0x221   : > { %6850 = vmatprep.subr.bf16.mxu0 %v10172_v40  ;;  %7506 = vmatprep.subr.bf16.mxu1 %v10175_v41  ;;  %v10267_v40 = vld [vmem:[%s14255_s1 + $0x124c] ss:$16 sps:$4 sm:$0xff]   ;;  %v10262_v41 = vld [vmem:[%s14255_s1 + $0x1240] ss:$16 sps:$4 sm:$0xff]  }
 0x224   : > { %6851 = vmatpush1.bf16.msra.mxu0 %v10170_v42  ;;  %7507 = vmatpush1.bf16.msra.mxu1 %v10173_v43  ;;  %v10265_v42 = vld [vmem:[%s14255_s1 + $0x1248] ss:$16 sps:$4 sm:$0xff]   ;;  %v10270_v43 = vld [vmem:[%s14255_s1 + $0x1264] ss:$16 sps:$4 sm:$0xff]  }
 0x225   : > { %6852 = vmatprep.subr.bf16.mxu0 %v10178_v44  ;;  %7508 = vmatprep.subr.bf16.mxu1 %v10181_v45  ;;  %v10273_v44 = vld [vmem:[%s14255_s1 + $0x126c] ss:$16 sps:$4 sm:$0xff]   ;;  %v10268_v45 = vld [vmem:[%s14255_s1 + $0x1260] ss:$16 sps:$4 sm:$0xff]  }
 0x228   : > { %6853 = vmatpush1.bf16.msra.mxu0 %v10176_v46  ;;  %7509 = vmatpush1.bf16.msra.mxu1 %v10179_v47  ;;  %v10271_v46 = vld [vmem:[%s14255_s1 + $0x1268] ss:$16 sps:$4 sm:$0xff]   ;;  %v10276_v47 = vld [vmem:[%s14255_s1 + $0x1284] ss:$16 sps:$4 sm:$0xff]  }
 0x229   : > { %6854 = vmatprep.subr.bf16.mxu0 %v10184_v48  ;;  %7510 = vmatprep.subr.bf16.mxu1 %v10187_v49  ;;  %v10279_v48 = vld [vmem:[%s14255_s1 + $0x128c] ss:$16 sps:$4 sm:$0xff]   ;;  %v10274_v49 = vld [vmem:[%s14255_s1 + $0x1280] ss:$16 sps:$4 sm:$0xff]  }
 0x22c   : > { %6855 = vmatpush1.bf16.msra.mxu0 %v10182_v50  ;;  %7511 = vmatpush1.bf16.msra.mxu1 %v10185_v51  ;;  %v10277_v50 = vld [vmem:[%s14255_s1 + $0x1288] ss:$16 sps:$4 sm:$0xff]   ;;  %v10282_v51 = vld [vmem:[%s14255_s1 + $0x12a4] ss:$16 sps:$4 sm:$0xff]  }
 0x22d   : > { %6856 = vmatprep.subr.bf16.mxu0 %v10190_v52  ;;  %7512 = vmatprep.subr.bf16.mxu1 %v10193_v53  ;;  %v10285_v52 = vld [vmem:[%s14255_s1 + $0x12ac] ss:$16 sps:$4 sm:$0xff]   ;;  %v10280_v53 = vld [vmem:[%s14255_s1 + $0x12a0] ss:$16 sps:$4 sm:$0xff]  }
 0x230   : > { %6857 = vmatpush1.bf16.msra.mxu0 %v10188_v54  ;;  %7513 = vmatpush1.bf16.msra.mxu1 %v10191_v55  ;;  %v10283_v54 = vld [vmem:[%s14255_s1 + $0x12a8] ss:$16 sps:$4 sm:$0xff]   ;;  %v10288_v55 = vld [vmem:[%s14255_s1 + $0x12c4] ss:$16 sps:$4 sm:$0xff]  }
 0x231   : > { %6858 = vmatprep.subr.bf16.mxu0 %v10196_v56  ;;  %7514 = vmatprep.subr.bf16.mxu1 %v10199_v57  ;;  %v10291_v56 = vld [vmem:[%s14255_s1 + $0x12cc] ss:$16 sps:$4 sm:$0xff]   ;;  %v10286_v57 = vld [vmem:[%s14255_s1 + $0x12c0] ss:$16 sps:$4 sm:$0xff]  }
 0x234   : > { %6859 = vmatpush1.bf16.msra.mxu0 %v10194_v58  ;;  %7515 = vmatpush1.bf16.msra.mxu1 %v10197_v59  ;;  %v10289_v58 = vld [vmem:[%s14255_s1 + $0x12c8] ss:$16 sps:$4 sm:$0xff]   ;;  %v10294_v59 = vld [vmem:[%s14255_s1 + $0x12e4] ss:$16 sps:$4 sm:$0xff]  }
 0x235   : > { %6860 = vmatprep.subr.bf16.mxu0 %v10202_v60  ;;  %7516 = vmatprep.subr.bf16.mxu1 %v10205_v61  ;;  %v10297_v60 = vld [vmem:[%s14255_s1 + $0x12ec] ss:$16 sps:$4 sm:$0xff]   ;;  %v10292_v61 = vld [vmem:[%s14255_s1 + $0x12e0] ss:$16 sps:$4 sm:$0xff]  }
 0x238   : > { %6861 = vmatpush1.bf16.msra.mxu0 %v10200_v62  ;;  %7517 = vmatpush1.bf16.msra.mxu1 %v10203_v63  ;;  %v10295_v62 = vld [vmem:[%s14255_s1 + $0x12e8] ss:$16 sps:$4 sm:$0xff]   ;;  %v10300_v63 = vld [vmem:[%s14255_s1 + $0x1304] ss:$16 sps:$4 sm:$0xff]  }
 0x239   : > { %6862 = vmatprep.subr.bf16.mxu0 %v10208_v0  ;;  %7518 = vmatprep.subr.bf16.mxu1 %v10211_v1  ;;  %v10303_v0 = vld [vmem:[%s14255_s1 + $0x130c] ss:$16 sps:$4 sm:$0xff]   ;;  %v10298_v1 = vld [vmem:[%s14255_s1 + $0x1300] ss:$16 sps:$4 sm:$0xff]  }
 0x23c   : > { %6863 = vmatpush1.bf16.msra.mxu0 %v10206_v2  ;;  %7519 = vmatpush1.bf16.msra.mxu1 %v10209_v3  ;;  %v10301_v2 = vld [vmem:[%s14255_s1 + $0x1308] ss:$16 sps:$4 sm:$0xff]   ;;  %v10306_v3 = vld [vmem:[%s14255_s1 + $0x1324] ss:$16 sps:$4 sm:$0xff]  }
 0x23d   : > { %6864 = vmatprep.subr.bf16.mxu0 %v10214_v4  ;;  %7520 = vmatprep.subr.bf16.mxu1 %v10217_v5  ;;  %v10309_v4 = vld [vmem:[%s14255_s1 + $0x132c] ss:$16 sps:$4 sm:$0xff]   ;;  %v10304_v5 = vld [vmem:[%s14255_s1 + $0x1320] ss:$16 sps:$4 sm:$0xff]  }
 0x240   : > { %6865 = vmatpush1.bf16.msra.mxu0 %v10212_v6  ;;  %7521 = vmatpush1.bf16.msra.mxu1 %v10215_v7  ;;  %v10307_v6 = vld [vmem:[%s14255_s1 + $0x1328] ss:$16 sps:$4 sm:$0xff]   ;;  %v10312_v7 = vld [vmem:[%s14255_s1 + $0x1344] ss:$16 sps:$4 sm:$0xff]  }
 0x241   : > { %6866 = vmatprep.subr.bf16.mxu0 %v10220_v8  ;;  %7522 = vmatprep.subr.bf16.mxu1 %v10223_v9  ;;  %v10315_v8 = vld [vmem:[%s14255_s1 + $0x134c] ss:$16 sps:$4 sm:$0xff]   ;;  %v10310_v9 = vld [vmem:[%s14255_s1 + $0x1340] ss:$16 sps:$4 sm:$0xff]  }
 0x244   : > { %6867 = vmatpush1.bf16.msra.mxu0 %v10218_v10  ;;  %7523 = vmatpush1.bf16.msra.mxu1 %v10221_v11  ;;  %v10313_v10 = vld [vmem:[%s14255_s1 + $0x1348] ss:$16 sps:$4 sm:$0xff]   ;;  %v10318_v11 = vld [vmem:[%s14255_s1 + $0x1364] ss:$16 sps:$4 sm:$0xff]  }
 0x245   : > { %6868 = vmatprep.subr.bf16.mxu0 %v10226_v12  ;;  %7524 = vmatprep.subr.bf16.mxu1 %v10229_v14  ;;  %v10321_v12 = vld [vmem:[%s14255_s1 + $0x136c] ss:$16 sps:$4 sm:$0xff]   ;;  %v10316_v14 = vld [vmem:[%s14255_s1 + $0x1360] ss:$16 sps:$4 sm:$0xff]  }
 0x248   : > { %6869 = vmatpush1.bf16.msra.mxu0 %v10224_v15  ;;  %7525 = vmatpush1.bf16.msra.mxu1 %v10227_v17  ;;  %v10319_v15 = vld [vmem:[%s14255_s1 + $0x1368] ss:$16 sps:$4 sm:$0xff]   ;;  %v10324_v17 = vld [vmem:[%s14255_s1 + $0x1384] ss:$16 sps:$4 sm:$0xff]  }
 0x249   : > { %6870 = vmatprep.subr.bf16.mxu0 %v10232_v13  ;;  %7526 = vmatprep.subr.bf16.mxu1 %v10235_v19  ;;  %v10327_v13 = vld [vmem:[%s14255_s1 + $0x138c] ss:$16 sps:$4 sm:$0xff]   ;;  %v10322_v19 = vld [vmem:[%s14255_s1 + $0x1380] ss:$16 sps:$4 sm:$0xff]  }
 0x24c   : > { %6871 = vmatpush1.bf16.msra.mxu0 %v10230_v16  ;;  %7527 = vmatpush1.bf16.msra.mxu1 %v10233_v21  ;;  %v10325_v16 = vld [vmem:[%s14255_s1 + $0x1388] ss:$16 sps:$4 sm:$0xff]   ;;  %v10330_v21 = vld [vmem:[%s14255_s1 + $0x13a4] ss:$16 sps:$4 sm:$0xff]  }
 0x24d   : > { %6872 = vmatprep.subr.bf16.mxu0 %v10238_v22  ;;  %7528 = vmatprep.subr.bf16.mxu1 %v10241_v18  ;;  %v10333_v22 = vld [vmem:[%s14255_s1 + $0x13ac] ss:$16 sps:$4 sm:$0xff]   ;;  %v10328_v18 = vld [vmem:[%s14255_s1 + $0x13a0] ss:$16 sps:$4 sm:$0xff]  }
 0x250   : > { %6873 = vmatpush1.bf16.msra.mxu0 %v10236_v24  ;;  %7529 = vmatpush1.bf16.msra.mxu1 %v10239_v25  ;;  %v10331_v24 = vld [vmem:[%s14255_s1 + $0x13a8] ss:$16 sps:$4 sm:$0xff]   ;;  %v10336_v25 = vld [vmem:[%s14255_s1 + $0x13c4] ss:$16 sps:$4 sm:$0xff]  }
 0x251   : > { %6874 = vmatprep.subr.bf16.mxu0 %v10244_v20  ;;  %7530 = vmatprep.subr.bf16.mxu1 %v10247_v27  ;;  %v10339_v20 = vld [vmem:[%s14255_s1 + $0x13cc] ss:$16 sps:$4 sm:$0xff]   ;;  %v10334_v27 = vld [vmem:[%s14255_s1 + $0x13c0] ss:$16 sps:$4 sm:$0xff]  }
 0x254   : > { %6875 = vmatpush1.bf16.msra.mxu0 %v10242_v28  ;;  %7531 = vmatpush1.bf16.msra.mxu1 %v10245_v23  ;;  %v10337_v28 = vld [vmem:[%s14255_s1 + $0x13c8] ss:$16 sps:$4 sm:$0xff]   ;;  %v10342_v23 = vld [vmem:[%s14255_s1 + $0x13e4] ss:$16 sps:$4 sm:$0xff]  }
 0x255   : > { %6885 = vmatprep.subr.bf16.mxu0 %v10252_v30  ;;  %7541 = vmatprep.subr.bf16.mxu1 %v10255_v31  ;;  %v10345_v30 = vld [vmem:[%s14255_s1 + $0x13ec] ss:$16 sps:$4 sm:$0xff]   ;;  %v10340_v31 = vld [vmem:[%s14255_s1 + $0x13e0] ss:$16 sps:$4 sm:$0xff]  }
 0x257   : > { %6877 = vmatmul.mubr.bf16.vlgmr.msra.gmra.mrb[0].mxu0 %v8170_v26  ;;  %7533 = vmatmul.mubr.bf16.vlgmr.msra.gmra.mrb[0].mxu1 %v8170_v26  ;;  %v10343_v26 = vld [vmem:[%s14255_s1 + $0x13e8] ss:$16 sps:$4 sm:$0xff]  }
 0x258   : > { %6886 = vmatpush1.bf16.msra.mxu0 %v10250_v33  ;;  %7542 = vmatpush1.bf16.msra.mxu1 %v10253_v34  ;;  %v10350_v33 = vld [vmem:[%s14255_s1 + $0x1404] ss:$16 sps:$4 sm:$0xff]   ;;  %v10353_v34 = vld [vmem:[%s14255_s1 + $0x140c] ss:$16 sps:$4 sm:$0xff]  }
 0x259   : > { %6887 = vmatprep.subr.bf16.mxu0 %v10258_v35  ;;  %7543 = vmatprep.subr.bf16.mxu1 %v10261_v29  ;;  %v8172_v35 = vcombine.low %v12821_v32, %v12821_v32  ;;  %v13024_v29 = vld [vmem:[%s14254_s0 + $0x50] sm:$0xff] }
 0x25a   : > { %6917 = vmatprep.mubr.bf16.mxu0 %v8173_v36  ;;  %7573 = vmatprep.mubr.bf16.mxu1 %v8173_v36  ;;  %v10348_v36 = vld [vmem:[%s14255_s1 + $0x1400] ss:$16 sps:$4 sm:$0xff]   ;;  %v10356_v32 = vld [vmem:[%s14255_s1 + $0x1424] ss:$16 sps:$4 sm:$0xff]  }
 0x25c   : > { %6888 = vmatpush1.bf16.msra.mxu0 %v10256_v37  ;;  %7544 = vmatpush1.bf16.msra.mxu1 %v10259_v38  ;;  %v10351_v37 = vld [vmem:[%s14255_s1 + $0x1408] ss:$16 sps:$4 sm:$0xff]   ;;  %v10359_v38 = vld [vmem:[%s14255_s1 + $0x142c] ss:$16 sps:$4 sm:$0xff]  }
 0x25d   : > { %6889 = vmatprep.subr.bf16.mxu0 %v10264_v39  ;;  %7545 = vmatprep.subr.bf16.mxu1 %v10267_v40  ;;  %v8175_v39 = vcombine.high %v13024_v29, %v13024_v29  ;;  %v10354_v40 = vld [vmem:[%s14255_s1 + $0x1420] ss:$16 sps:$4 sm:$0xff]  }
 0x260   : > { %6890 = vmatpush1.bf16.msra.mxu0 %v10262_v41  ;;  %7546 = vmatpush1.bf16.msra.mxu1 %v10265_v42  ;;  %v10357_v41 = vld [vmem:[%s14255_s1 + $0x1428] ss:$16 sps:$4 sm:$0xff]   ;;  %v10362_v42 = vld [vmem:[%s14255_s1 + $0x1444] ss:$16 sps:$4 sm:$0xff]  }
 0x261   : > { %6891 = vmatprep.subr.bf16.mxu0 %v10270_v43  ;;  %7547 = vmatprep.subr.bf16.mxu1 %v10273_v44  ;;  %v10365_v43 = vld [vmem:[%s14255_s1 + $0x144c] ss:$16 sps:$4 sm:$0xff]   ;;  %v10360_v44 = vld [vmem:[%s14255_s1 + $0x1440] ss:$16 sps:$4 sm:$0xff]  }
 0x264   : > { %6892 = vmatpush1.bf16.msra.mxu0 %v10268_v45  ;;  %7548 = vmatpush1.bf16.msra.mxu1 %v10271_v46  ;;  %v10363_v45 = vld [vmem:[%s14255_s1 + $0x1448] ss:$16 sps:$4 sm:$0xff]   ;;  %v10368_v46 = vld [vmem:[%s14255_s1 + $0x1464] ss:$16 sps:$4 sm:$0xff]  }
 0x265   : > { %6893 = vmatprep.subr.bf16.mxu0 %v10276_v47  ;;  %7549 = vmatprep.subr.bf16.mxu1 %v10279_v48  ;;  %v10371_v47 = vld [vmem:[%s14255_s1 + $0x146c] ss:$16 sps:$4 sm:$0xff]   ;;  %v10366_v48 = vld [vmem:[%s14255_s1 + $0x1460] ss:$16 sps:$4 sm:$0xff]  }
 0x268   : > { %6894 = vmatpush1.bf16.msra.mxu0 %v10274_v49  ;;  %7550 = vmatpush1.bf16.msra.mxu1 %v10277_v50  ;;  %v10369_v49 = vld [vmem:[%s14255_s1 + $0x1468] ss:$16 sps:$4 sm:$0xff]   ;;  %v10374_v50 = vld [vmem:[%s14255_s1 + $0x1484] ss:$16 sps:$4 sm:$0xff]  }
 0x269   : > { %6895 = vmatprep.subr.bf16.mxu0 %v10282_v51  ;;  %7551 = vmatprep.subr.bf16.mxu1 %v10285_v52  ;;  %v10377_v51 = vld [vmem:[%s14255_s1 + $0x148c] ss:$16 sps:$4 sm:$0xff]   ;;  %v10372_v52 = vld [vmem:[%s14255_s1 + $0x1480] ss:$16 sps:$4 sm:$0xff]  }
 0x26c   : > { %6896 = vmatpush1.bf16.msra.mxu0 %v10280_v53  ;;  %7552 = vmatpush1.bf16.msra.mxu1 %v10283_v54  ;;  %v10375_v53 = vld [vmem:[%s14255_s1 + $0x1488] ss:$16 sps:$4 sm:$0xff]   ;;  %v10380_v54 = vld [vmem:[%s14255_s1 + $0x14a4] ss:$16 sps:$4 sm:$0xff]  }
 0x26d   : > { %6897 = vmatprep.subr.bf16.mxu0 %v10288_v55  ;;  %7553 = vmatprep.subr.bf16.mxu1 %v10291_v56  ;;  %v10383_v55 = vld [vmem:[%s14255_s1 + $0x14ac] ss:$16 sps:$4 sm:$0xff]   ;;  %v10378_v56 = vld [vmem:[%s14255_s1 + $0x14a0] ss:$16 sps:$4 sm:$0xff]  }
 0x270   : > { %6898 = vmatpush1.bf16.msra.mxu0 %v10286_v57  ;;  %7554 = vmatpush1.bf16.msra.mxu1 %v10289_v58  ;;  %v10381_v57 = vld [vmem:[%s14255_s1 + $0x14a8] ss:$16 sps:$4 sm:$0xff]   ;;  %v10386_v58 = vld [vmem:[%s14255_s1 + $0x14c4] ss:$16 sps:$4 sm:$0xff]  }
 0x271   : > { %6899 = vmatprep.subr.bf16.mxu0 %v10294_v59  ;;  %7555 = vmatprep.subr.bf16.mxu1 %v10297_v60  ;;  %v10389_v59 = vld [vmem:[%s14255_s1 + $0x14cc] ss:$16 sps:$4 sm:$0xff]   ;;  %v10384_v60 = vld [vmem:[%s14255_s1 + $0x14c0] ss:$16 sps:$4 sm:$0xff]  }
 0x274   : > { %6900 = vmatpush1.bf16.msra.mxu0 %v10292_v61  ;;  %7556 = vmatpush1.bf16.msra.mxu1 %v10295_v62  ;;  %v10387_v61 = vld [vmem:[%s14255_s1 + $0x14c8] ss:$16 sps:$4 sm:$0xff]   ;;  %v10392_v62 = vld [vmem:[%s14255_s1 + $0x14e4] ss:$16 sps:$4 sm:$0xff]  }
 0x275   : > { %6901 = vmatprep.subr.bf16.mxu0 %v10300_v63  ;;  %7557 = vmatprep.subr.bf16.mxu1 %v10303_v0  ;;  %v10395_v63 = vld [vmem:[%s14255_s1 + $0x14ec] ss:$16 sps:$4 sm:$0xff]   ;;  %v10390_v0 = vld [vmem:[%s14255_s1 + $0x14e0] ss:$16 sps:$4 sm:$0xff]  }
 0x278   : > { %6902 = vmatpush1.bf16.msra.mxu0 %v10298_v1  ;;  %7558 = vmatpush1.bf16.msra.mxu1 %v10301_v2  ;;  %v10393_v1 = vld [vmem:[%s14255_s1 + $0x14e8] ss:$16 sps:$4 sm:$0xff]   ;;  %v10398_v2 = vld [vmem:[%s14255_s1 + $0x1504] ss:$16 sps:$4 sm:$0xff]  }
 0x279   : > { %6903 = vmatprep.subr.bf16.mxu0 %v10306_v3  ;;  %7559 = vmatprep.subr.bf16.mxu1 %v10309_v4  ;;  %v10401_v3 = vld [vmem:[%s14255_s1 + $0x150c] ss:$16 sps:$4 sm:$0xff]   ;;  %v10396_v4 = vld [vmem:[%s14255_s1 + $0x1500] ss:$16 sps:$4 sm:$0xff]  }
 0x27c   : > { %6904 = vmatpush1.bf16.msra.mxu0 %v10304_v5  ;;  %7560 = vmatpush1.bf16.msra.mxu1 %v10307_v6  ;;  %v10399_v5 = vld [vmem:[%s14255_s1 + $0x1508] ss:$16 sps:$4 sm:$0xff]   ;;  %v10404_v6 = vld [vmem:[%s14255_s1 + $0x1524] ss:$16 sps:$4 sm:$0xff]  }
 0x27d   : > { %6905 = vmatprep.subr.bf16.mxu0 %v10312_v7  ;;  %7561 = vmatprep.subr.bf16.mxu1 %v10315_v8  ;;  %v10407_v7 = vld [vmem:[%s14255_s1 + $0x152c] ss:$16 sps:$4 sm:$0xff]   ;;  %v10402_v8 = vld [vmem:[%s14255_s1 + $0x1520] ss:$16 sps:$4 sm:$0xff]  }
 0x280   : > { %6906 = vmatpush1.bf16.msra.mxu0 %v10310_v9  ;;  %7562 = vmatpush1.bf16.msra.mxu1 %v10313_v10  ;;  %v10405_v9 = vld [vmem:[%s14255_s1 + $0x1528] ss:$16 sps:$4 sm:$0xff]   ;;  %v10410_v10 = vld [vmem:[%s14255_s1 + $0x1544] ss:$16 sps:$4 sm:$0xff]  }
 0x281   : > { %6907 = vmatprep.subr.bf16.mxu0 %v10318_v11  ;;  %7563 = vmatprep.subr.bf16.mxu1 %v10321_v12  ;;  %v10413_v11 = vld [vmem:[%s14255_s1 + $0x154c] ss:$16 sps:$4 sm:$0xff]   ;;  %v10408_v12 = vld [vmem:[%s14255_s1 + $0x1540] ss:$16 sps:$4 sm:$0xff]  }
 0x284   : > { %6908 = vmatpush1.bf16.msra.mxu0 %v10316_v14  ;;  %7564 = vmatpush1.bf16.msra.mxu1 %v10319_v15  ;;  %v10411_v14 = vld [vmem:[%s14255_s1 + $0x1548] ss:$16 sps:$4 sm:$0xff]   ;;  %v10416_v15 = vld [vmem:[%s14255_s1 + $0x1564] ss:$16 sps:$4 sm:$0xff]  }
 0x285   : > { %6909 = vmatprep.subr.bf16.mxu0 %v10324_v17  ;;  %7565 = vmatprep.subr.bf16.mxu1 %v10327_v13  ;;  %v10419_v17 = vld [vmem:[%s14255_s1 + $0x156c] ss:$16 sps:$4 sm:$0xff]   ;;  %v10414_v13 = vld [vmem:[%s14255_s1 + $0x1560] ss:$16 sps:$4 sm:$0xff]  }
 0x288   : > { %6910 = vmatpush1.bf16.msra.mxu0 %v10322_v19  ;;  %7566 = vmatpush1.bf16.msra.mxu1 %v10325_v16  ;;  %v10417_v19 = vld [vmem:[%s14255_s1 + $0x1568] ss:$16 sps:$4 sm:$0xff]   ;;  %v10422_v16 = vld [vmem:[%s14255_s1 + $0x1584] ss:$16 sps:$4 sm:$0xff]  }
 0x289   : > { %6911 = vmatprep.subr.bf16.mxu0 %v10330_v21  ;;  %7567 = vmatprep.subr.bf16.mxu1 %v10333_v22  ;;  %v10425_v21 = vld [vmem:[%s14255_s1 + $0x158c] ss:$16 sps:$4 sm:$0xff]   ;;  %v10420_v22 = vld [vmem:[%s14255_s1 + $0x1580] ss:$16 sps:$4 sm:$0xff]  }
 0x28c   : > { %6912 = vmatpush1.bf16.msra.mxu0 %v10328_v18  ;;  %7568 = vmatpush1.bf16.msra.mxu1 %v10331_v24  ;;  %v10423_v18 = vld [vmem:[%s14255_s1 + $0x1588] ss:$16 sps:$4 sm:$0xff]   ;;  %v10428_v24 = vld [vmem:[%s14255_s1 + $0x15a4] ss:$16 sps:$4 sm:$0xff]  }
 0x28d   : > { %6913 = vmatprep.subr.bf16.mxu0 %v10336_v25  ;;  %7569 = vmatprep.subr.bf16.mxu1 %v10339_v20  ;;  %v10431_v25 = vld [vmem:[%s14255_s1 + $0x15ac] ss:$16 sps:$4 sm:$0xff]   ;;  %v10426_v20 = vld [vmem:[%s14255_s1 + $0x15a0] ss:$16 sps:$4 sm:$0xff]  }
 0x290   : > { %6914 = vmatpush1.bf16.msra.mxu0 %v10334_v27  ;;  %7570 = vmatpush1.bf16.msra.mxu1 %v10337_v28  ;;  %v10429_v27 = vld [vmem:[%s14255_s1 + $0x15a8] ss:$16 sps:$4 sm:$0xff]   ;;  %v10434_v28 = vld [vmem:[%s14255_s1 + $0x15c4] ss:$16 sps:$4 sm:$0xff]  }
 0x291   : > { %6915 = vmatprep.subr.bf16.mxu0 %v10342_v23  ;;  %7571 = vmatprep.subr.bf16.mxu1 %v10345_v30  ;;  %v10437_v23 = vld [vmem:[%s14255_s1 + $0x15cc] ss:$16 sps:$4 sm:$0xff]   ;;  %v10432_v30 = vld [vmem:[%s14255_s1 + $0x15c0] ss:$16 sps:$4 sm:$0xff]  }
 0x294   : > { %6916 = vmatpush1.bf16.msra.mxu0 %v10340_v31  ;;  %7572 = vmatpush1.bf16.msra.mxu1 %v10343_v26  ;;  %v10435_v31 = vld [vmem:[%s14255_s1 + $0x15c8] ss:$16 sps:$4 sm:$0xff]   ;;  %v10440_v26 = vld [vmem:[%s14255_s1 + $0x15e4] ss:$16 sps:$4 sm:$0xff]  }
 0x295   : > { %6926 = vmatprep.subr.bf16.mxu0 %v10350_v33  ;;  %7582 = vmatprep.subr.bf16.mxu1 %v10353_v34  ;;  %v10443_v33 = vld [vmem:[%s14255_s1 + $0x15ec] ss:$16 sps:$4 sm:$0xff]   ;;  %v10438_v34 = vld [vmem:[%s14255_s1 + $0x15e0] ss:$16 sps:$4 sm:$0xff]  }
 0x297   : > { %6918 = vmatmul.mubr.bf16.vlgmr.msra.gmra.mrb[0].mxu0 %v8172_v35  ;;  %7574 = vmatmul.mubr.bf16.vlgmr.msra.gmra.mrb[0].mxu1 %v8172_v35  ;;  %v10441_v35 = vld [vmem:[%s14255_s1 + $0x15e8] ss:$16 sps:$4 sm:$0xff]  }
 0x298   : > { %6927 = vmatpush1.bf16.msra.mxu0 %v10348_v36  ;;  %7583 = vmatpush1.bf16.msra.mxu1 %v10351_v37  ;;  %v10448_v36 = vld [vmem:[%s14255_s1 + $0x1604] ss:$16 sps:$4 sm:$0xff]   ;;  %v10451_v37 = vld [vmem:[%s14255_s1 + $0x160c] ss:$16 sps:$4 sm:$0xff]  }
 0x299   : > { %6928 = vmatprep.subr.bf16.mxu0 %v10356_v32  ;;  %7584 = vmatprep.subr.bf16.mxu1 %v10359_v38  ;;  %v8174_v32 = vcombine.low %v13024_v29, %v13024_v29  ;;  %v13225_v38 = vld [vmem:[%s14254_s0 + $0x58] sm:$0xff]  ;;  %v10454_v29 = vld [vmem:[%s14255_s1 + $0x1624] ss:$16 sps:$4 sm:$0xff]  }
 0x29a   : > { %6958 = vmatprep.mubr.bf16.mxu0 %v8175_v39  ;;  %7614 = vmatprep.mubr.bf16.mxu1 %v8175_v39  ;;  %v10446_v39 = vld [vmem:[%s14255_s1 + $0x1600] ss:$16 sps:$4 sm:$0xff]  }
 0x29c   : > { %6929 = vmatpush1.bf16.msra.mxu0 %v10354_v40  ;;  %7585 = vmatpush1.bf16.msra.mxu1 %v10357_v41  ;;  %v10449_v40 = vld [vmem:[%s14255_s1 + $0x1608] ss:$16 sps:$4 sm:$0xff]   ;;  %v10457_v41 = vld [vmem:[%s14255_s1 + $0x162c] ss:$16 sps:$4 sm:$0xff]  }
 0x29d   : > { %6930 = vmatprep.subr.bf16.mxu0 %v10362_v42  ;;  %7586 = vmatprep.subr.bf16.mxu1 %v10365_v43  ;;  %v8177_v42 = vcombine.high %v13225_v38, %v13225_v38  ;;  %v10452_v43 = vld [vmem:[%s14255_s1 + $0x1620] ss:$16 sps:$4 sm:$0xff]  }
 0x2a0   : > { %6931 = vmatpush1.bf16.msra.mxu0 %v10360_v44  ;;  %7587 = vmatpush1.bf16.msra.mxu1 %v10363_v45  ;;  %v10455_v44 = vld [vmem:[%s14255_s1 + $0x1628] ss:$16 sps:$4 sm:$0xff]   ;;  %v10460_v45 = vld [vmem:[%s14255_s1 + $0x1644] ss:$16 sps:$4 sm:$0xff]  }
 0x2a1   : > { %6932 = vmatprep.subr.bf16.mxu0 %v10368_v46  ;;  %7588 = vmatprep.subr.bf16.mxu1 %v10371_v47  ;;  %v10463_v46 = vld [vmem:[%s14255_s1 + $0x164c] ss:$16 sps:$4 sm:$0xff]   ;;  %v10458_v47 = vld [vmem:[%s14255_s1 + $0x1640] ss:$16 sps:$4 sm:$0xff]  }
 0x2a4   : > { %6933 = vmatpush1.bf16.msra.mxu0 %v10366_v48  ;;  %7589 = vmatpush1.bf16.msra.mxu1 %v10369_v49  ;;  %v10461_v48 = vld [vmem:[%s14255_s1 + $0x1648] ss:$16 sps:$4 sm:$0xff]   ;;  %v10466_v49 = vld [vmem:[%s14255_s1 + $0x1664] ss:$16 sps:$4 sm:$0xff]  }
 0x2a5   : > { %6934 = vmatprep.subr.bf16.mxu0 %v10374_v50  ;;  %7590 = vmatprep.subr.bf16.mxu1 %v10377_v51  ;;  %v10469_v50 = vld [vmem:[%s14255_s1 + $0x166c] ss:$16 sps:$4 sm:$0xff]   ;;  %v10464_v51 = vld [vmem:[%s14255_s1 + $0x1660] ss:$16 sps:$4 sm:$0xff]  }
 0x2a8   : > { %6935 = vmatpush1.bf16.msra.mxu0 %v10372_v52  ;;  %7591 = vmatpush1.bf16.msra.mxu1 %v10375_v53  ;;  %v10467_v52 = vld [vmem:[%s14255_s1 + $0x1668] ss:$16 sps:$4 sm:$0xff]   ;;  %v10472_v53 = vld [vmem:[%s14255_s1 + $0x1684] ss:$16 sps:$4 sm:$0xff]  }
 0x2a9   : > { %6936 = vmatprep.subr.bf16.mxu0 %v10380_v54  ;;  %7592 = vmatprep.subr.bf16.mxu1 %v10383_v55  ;;  %v10475_v54 = vld [vmem:[%s14255_s1 + $0x168c] ss:$16 sps:$4 sm:$0xff]   ;;  %v10470_v55 = vld [vmem:[%s14255_s1 + $0x1680] ss:$16 sps:$4 sm:$0xff]  }
 0x2ac   : > { %6937 = vmatpush1.bf16.msra.mxu0 %v10378_v56  ;;  %7593 = vmatpush1.bf16.msra.mxu1 %v10381_v57  ;;  %v10473_v56 = vld [vmem:[%s14255_s1 + $0x1688] ss:$16 sps:$4 sm:$0xff]   ;;  %v10478_v57 = vld [vmem:[%s14255_s1 + $0x16a4] ss:$16 sps:$4 sm:$0xff]  }
 0x2ad   : > { %6938 = vmatprep.subr.bf16.mxu0 %v10386_v58  ;;  %7594 = vmatprep.subr.bf16.mxu1 %v10389_v59  ;;  %v10481_v58 = vld [vmem:[%s14255_s1 + $0x16ac] ss:$16 sps:$4 sm:$0xff]   ;;  %v10476_v59 = vld [vmem:[%s14255_s1 + $0x16a0] ss:$16 sps:$4 sm:$0xff]  }
 0x2b0   : > { %6939 = vmatpush1.bf16.msra.mxu0 %v10384_v60  ;;  %7595 = vmatpush1.bf16.msra.mxu1 %v10387_v61  ;;  %v10479_v60 = vld [vmem:[%s14255_s1 + $0x16a8] ss:$16 sps:$4 sm:$0xff]   ;;  %v10484_v61 = vld [vmem:[%s14255_s1 + $0x16c4] ss:$16 sps:$4 sm:$0xff]  }
 0x2b1   : > { %6940 = vmatprep.subr.bf16.mxu0 %v10392_v62  ;;  %7596 = vmatprep.subr.bf16.mxu1 %v10395_v63  ;;  %v10487_v62 = vld [vmem:[%s14255_s1 + $0x16cc] ss:$16 sps:$4 sm:$0xff]   ;;  %v10482_v63 = vld [vmem:[%s14255_s1 + $0x16c0] ss:$16 sps:$4 sm:$0xff]  }
 0x2b4   : > { %6941 = vmatpush1.bf16.msra.mxu0 %v10390_v0  ;;  %7597 = vmatpush1.bf16.msra.mxu1 %v10393_v1  ;;  %v10485_v0 = vld [vmem:[%s14255_s1 + $0x16c8] ss:$16 sps:$4 sm:$0xff]   ;;  %v10490_v1 = vld [vmem:[%s14255_s1 + $0x16e4] ss:$16 sps:$4 sm:$0xff]  }
 0x2b5   : > { %6942 = vmatprep.subr.bf16.mxu0 %v10398_v2  ;;  %7598 = vmatprep.subr.bf16.mxu1 %v10401_v3  ;;  %v10493_v2 = vld [vmem:[%s14255_s1 + $0x16ec] ss:$16 sps:$4 sm:$0xff]   ;;  %v10488_v3 = vld [vmem:[%s14255_s1 + $0x16e0] ss:$16 sps:$4 sm:$0xff]  }
 0x2b8   : > { %6943 = vmatpush1.bf16.msra.mxu0 %v10396_v4  ;;  %7599 = vmatpush1.bf16.msra.mxu1 %v10399_v5  ;;  %v10491_v4 = vld [vmem:[%s14255_s1 + $0x16e8] ss:$16 sps:$4 sm:$0xff]   ;;  %v10496_v5 = vld [vmem:[%s14255_s1 + $0x1704] ss:$16 sps:$4 sm:$0xff]  }
 0x2b9   : > { %6944 = vmatprep.subr.bf16.mxu0 %v10404_v6  ;;  %7600 = vmatprep.subr.bf16.mxu1 %v10407_v7  ;;  %v10499_v6 = vld [vmem:[%s14255_s1 + $0x170c] ss:$16 sps:$4 sm:$0xff]   ;;  %v10494_v7 = vld [vmem:[%s14255_s1 + $0x1700] ss:$16 sps:$4 sm:$0xff]  }
 0x2bc   : > { %6945 = vmatpush1.bf16.msra.mxu0 %v10402_v8  ;;  %7601 = vmatpush1.bf16.msra.mxu1 %v10405_v9  ;;  %v10497_v8 = vld [vmem:[%s14255_s1 + $0x1708] ss:$16 sps:$4 sm:$0xff]   ;;  %v10502_v9 = vld [vmem:[%s14255_s1 + $0x1724] ss:$16 sps:$4 sm:$0xff]  }
 0x2bd   : > { %6946 = vmatprep.subr.bf16.mxu0 %v10410_v10  ;;  %7602 = vmatprep.subr.bf16.mxu1 %v10413_v11  ;;  %v10505_v10 = vld [vmem:[%s14255_s1 + $0x172c] ss:$16 sps:$4 sm:$0xff]   ;;  %v10500_v11 = vld [vmem:[%s14255_s1 + $0x1720] ss:$16 sps:$4 sm:$0xff]  }
 0x2c0   : > { %6947 = vmatpush1.bf16.msra.mxu0 %v10408_v12  ;;  %7603 = vmatpush1.bf16.msra.mxu1 %v10411_v14  ;;  %v10503_v12 = vld [vmem:[%s14255_s1 + $0x1728] ss:$16 sps:$4 sm:$0xff]   ;;  %v10508_v14 = vld [vmem:[%s14255_s1 + $0x1744] ss:$16 sps:$4 sm:$0xff]  }
 0x2c1   : > { %6948 = vmatprep.subr.bf16.mxu0 %v10416_v15  ;;  %7604 = vmatprep.subr.bf16.mxu1 %v10419_v17  ;;  %v10511_v15 = vld [vmem:[%s14255_s1 + $0x174c] ss:$16 sps:$4 sm:$0xff]   ;;  %v10506_v17 = vld [vmem:[%s14255_s1 + $0x1740] ss:$16 sps:$4 sm:$0xff]  }
 0x2c4   : > { %6949 = vmatpush1.bf16.msra.mxu0 %v10414_v13  ;;  %7605 = vmatpush1.bf16.msra.mxu1 %v10417_v19  ;;  %v10509_v13 = vld [vmem:[%s14255_s1 + $0x1748] ss:$16 sps:$4 sm:$0xff]   ;;  %v10514_v19 = vld [vmem:[%s14255_s1 + $0x1764] ss:$16 sps:$4 sm:$0xff]  }
 0x2c5   : > { %6950 = vmatprep.subr.bf16.mxu0 %v10422_v16  ;;  %7606 = vmatprep.subr.bf16.mxu1 %v10425_v21  ;;  %v10517_v16 = vld [vmem:[%s14255_s1 + $0x176c] ss:$16 sps:$4 sm:$0xff]   ;;  %v10512_v21 = vld [vmem:[%s14255_s1 + $0x1760] ss:$16 sps:$4 sm:$0xff]  }
 0x2c8   : > { %6951 = vmatpush1.bf16.msra.mxu0 %v10420_v22  ;;  %7607 = vmatpush1.bf16.msra.mxu1 %v10423_v18  ;;  %v10515_v22 = vld [vmem:[%s14255_s1 + $0x1768] ss:$16 sps:$4 sm:$0xff]   ;;  %v10520_v18 = vld [vmem:[%s14255_s1 + $0x1784] ss:$16 sps:$4 sm:$0xff]  }
 0x2c9   : > { %6952 = vmatprep.subr.bf16.mxu0 %v10428_v24  ;;  %7608 = vmatprep.subr.bf16.mxu1 %v10431_v25  ;;  %v10523_v24 = vld [vmem:[%s14255_s1 + $0x178c] ss:$16 sps:$4 sm:$0xff]   ;;  %v10518_v25 = vld [vmem:[%s14255_s1 + $0x1780] ss:$16 sps:$4 sm:$0xff]  }
 0x2cc   : > { %6953 = vmatpush1.bf16.msra.mxu0 %v10426_v20  ;;  %7609 = vmatpush1.bf16.msra.mxu1 %v10429_v27  ;;  %v10521_v20 = vld [vmem:[%s14255_s1 + $0x1788] ss:$16 sps:$4 sm:$0xff]   ;;  %v10526_v27 = vld [vmem:[%s14255_s1 + $0x17a4] ss:$16 sps:$4 sm:$0xff]  }
 0x2cd   : > { %6954 = vmatprep.subr.bf16.mxu0 %v10434_v28  ;;  %7610 = vmatprep.subr.bf16.mxu1 %v10437_v23  ;;  %v10529_v28 = vld [vmem:[%s14255_s1 + $0x17ac] ss:$16 sps:$4 sm:$0xff]   ;;  %v10524_v23 = vld [vmem:[%s14255_s1 + $0x17a0] ss:$16 sps:$4 sm:$0xff]  }
 0x2d0   : > { %6955 = vmatpush1.bf16.msra.mxu0 %v10432_v30  ;;  %7611 = vmatpush1.bf16.msra.mxu1 %v10435_v31  ;;  %v10527_v30 = vld [vmem:[%s14255_s1 + $0x17a8] ss:$16 sps:$4 sm:$0xff]   ;;  %v10532_v31 = vld [vmem:[%s14255_s1 + $0x17c4] ss:$16 sps:$4 sm:$0xff]  }
 0x2d1   : > { %6956 = vmatprep.subr.bf16.mxu0 %v10440_v26  ;;  %7612 = vmatprep.subr.bf16.mxu1 %v10443_v33  ;;  %v10535_v26 = vld [vmem:[%s14255_s1 + $0x17cc] ss:$16 sps:$4 sm:$0xff]   ;;  %v10530_v33 = vld [vmem:[%s14255_s1 + $0x17c0] ss:$16 sps:$4 sm:$0xff]  }
 0x2d4   : > { %6957 = vmatpush1.bf16.msra.mxu0 %v10438_v34  ;;  %7613 = vmatpush1.bf16.msra.mxu1 %v10441_v35  ;;  %v10533_v34 = vld [vmem:[%s14255_s1 + $0x17c8] ss:$16 sps:$4 sm:$0xff]   ;;  %v10538_v35 = vld [vmem:[%s14255_s1 + $0x17e4] ss:$16 sps:$4 sm:$0xff]  }
 0x2d5   : > { %6967 = vmatprep.subr.bf16.mxu0 %v10448_v36  ;;  %7623 = vmatprep.subr.bf16.mxu1 %v10451_v37  ;;  %v10541_v36 = vld [vmem:[%s14255_s1 + $0x17ec] ss:$16 sps:$4 sm:$0xff]   ;;  %v10536_v37 = vld [vmem:[%s14255_s1 + $0x17e0] ss:$16 sps:$4 sm:$0xff]  }
 0x2d7   : > { %6959 = vmatmul.mubr.bf16.vlgmr.msra.gmra.mrb[0].mxu0 %v8174_v32  ;;  %7615 = vmatmul.mubr.bf16.vlgmr.msra.gmra.mrb[0].mxu1 %v8174_v32  ;;  %v10539_v32 = vld [vmem:[%s14255_s1 + $0x17e8] ss:$16 sps:$4 sm:$0xff]  }
 0x2d8   : > { %6968 = vmatpush1.bf16.msra.mxu0 %v10446_v39  ;;  %7624 = vmatpush1.bf16.msra.mxu1 %v10449_v40  ;;  %v10546_v39 = vld [vmem:[%s14255_s1 + $0x1804] ss:$16 sps:$4 sm:$0xff]   ;;  %v10549_v40 = vld [vmem:[%s14255_s1 + $0x180c] ss:$16 sps:$4 sm:$0xff]  }
 0x2d9   : > { %6969 = vmatprep.subr.bf16.mxu0 %v10454_v29  ;;  %7625 = vmatprep.subr.bf16.mxu1 %v10457_v41  ;;  %v8176_v29 = vcombine.low %v13225_v38, %v13225_v38  ;;  %v13426_v41 = vld [vmem:[%s14254_s0 + $0x60] sm:$0xff] }
 0x2da   : > { %6999 = vmatprep.mubr.bf16.mxu0 %v8177_v42  ;;  %7655 = vmatprep.mubr.bf16.mxu1 %v8177_v42  ;;  %v10544_v42 = vld [vmem:[%s14255_s1 + $0x1800] ss:$16 sps:$4 sm:$0xff]   ;;  %v10552_v38 = vld [vmem:[%s14255_s1 + $0x1824] ss:$16 sps:$4 sm:$0xff]  }
 0x2dc   : > { %6970 = vmatpush1.bf16.msra.mxu0 %v10452_v43  ;;  %7626 = vmatpush1.bf16.msra.mxu1 %v10455_v44  ;;  %v10547_v43 = vld [vmem:[%s14255_s1 + $0x1808] ss:$16 sps:$4 sm:$0xff]   ;;  %v10555_v44 = vld [vmem:[%s14255_s1 + $0x182c] ss:$16 sps:$4 sm:$0xff]  }
 0x2dd   : > { %6971 = vmatprep.subr.bf16.mxu0 %v10460_v45  ;;  %7627 = vmatprep.subr.bf16.mxu1 %v10463_v46  ;;  %v8179_v45 = vcombine.high %v13426_v41, %v13426_v41  ;;  %v10550_v46 = vld [vmem:[%s14255_s1 + $0x1820] ss:$16 sps:$4 sm:$0xff]  }
 0x2e0   : > { %6972 = vmatpush1.bf16.msra.mxu0 %v10458_v47  ;;  %7628 = vmatpush1.bf16.msra.mxu1 %v10461_v48  ;;  %v10553_v47 = vld [vmem:[%s14255_s1 + $0x1828] ss:$16 sps:$4 sm:$0xff]   ;;  %v10558_v48 = vld [vmem:[%s14255_s1 + $0x1844] ss:$16 sps:$4 sm:$0xff]  }
 0x2e1   : > { %6973 = vmatprep.subr.bf16.mxu0 %v10466_v49  ;;  %7629 = vmatprep.subr.bf16.mxu1 %v10469_v50  ;;  %v10561_v49 = vld [vmem:[%s14255_s1 + $0x184c] ss:$16 sps:$4 sm:$0xff]   ;;  %v10556_v50 = vld [vmem:[%s14255_s1 + $0x1840] ss:$16 sps:$4 sm:$0xff]  }
 0x2e4   : > { %6974 = vmatpush1.bf16.msra.mxu0 %v10464_v51  ;;  %7630 = vmatpush1.bf16.msra.mxu1 %v10467_v52  ;;  %v10559_v51 = vld [vmem:[%s14255_s1 + $0x1848] ss:$16 sps:$4 sm:$0xff]   ;;  %v10564_v52 = vld [vmem:[%s14255_s1 + $0x1864] ss:$16 sps:$4 sm:$0xff]  }
 0x2e5   : > { %6975 = vmatprep.subr.bf16.mxu0 %v10472_v53  ;;  %7631 = vmatprep.subr.bf16.mxu1 %v10475_v54  ;;  %v10567_v53 = vld [vmem:[%s14255_s1 + $0x186c] ss:$16 sps:$4 sm:$0xff]   ;;  %v10562_v54 = vld [vmem:[%s14255_s1 + $0x1860] ss:$16 sps:$4 sm:$0xff]  }
 0x2e8   : > { %6976 = vmatpush1.bf16.msra.mxu0 %v10470_v55  ;;  %7632 = vmatpush1.bf16.msra.mxu1 %v10473_v56  ;;  %v10565_v55 = vld [vmem:[%s14255_s1 + $0x1868] ss:$16 sps:$4 sm:$0xff]   ;;  %v10570_v56 = vld [vmem:[%s14255_s1 + $0x1884] ss:$16 sps:$4 sm:$0xff]  }
 0x2e9   : > { %6977 = vmatprep.subr.bf16.mxu0 %v10478_v57  ;;  %7633 = vmatprep.subr.bf16.mxu1 %v10481_v58  ;;  %v10573_v57 = vld [vmem:[%s14255_s1 + $0x188c] ss:$16 sps:$4 sm:$0xff]   ;;  %v10568_v58 = vld [vmem:[%s14255_s1 + $0x1880] ss:$16 sps:$4 sm:$0xff]  }
 0x2ec   : > { %6978 = vmatpush1.bf16.msra.mxu0 %v10476_v59  ;;  %7634 = vmatpush1.bf16.msra.mxu1 %v10479_v60  ;;  %v10571_v59 = vld [vmem:[%s14255_s1 + $0x1888] ss:$16 sps:$4 sm:$0xff]   ;;  %v10576_v60 = vld [vmem:[%s14255_s1 + $0x18a4] ss:$16 sps:$4 sm:$0xff]  }
 0x2ed   : > { %6979 = vmatprep.subr.bf16.mxu0 %v10484_v61  ;;  %7635 = vmatprep.subr.bf16.mxu1 %v10487_v62  ;;  %v10579_v61 = vld [vmem:[%s14255_s1 + $0x18ac] ss:$16 sps:$4 sm:$0xff]   ;;  %v10574_v62 = vld [vmem:[%s14255_s1 + $0x18a0] ss:$16 sps:$4 sm:$0xff]  }
 0x2f0   : > { %6980 = vmatpush1.bf16.msra.mxu0 %v10482_v63  ;;  %7636 = vmatpush1.bf16.msra.mxu1 %v10485_v0  ;;  %v10577_v63 = vld [vmem:[%s14255_s1 + $0x18a8] ss:$16 sps:$4 sm:$0xff]   ;;  %v10582_v0 = vld [vmem:[%s14255_s1 + $0x18c4] ss:$16 sps:$4 sm:$0xff]  }
 0x2f1   : > { %6981 = vmatprep.subr.bf16.mxu0 %v10490_v1  ;;  %7637 = vmatprep.subr.bf16.mxu1 %v10493_v2  ;;  %v10585_v1 = vld [vmem:[%s14255_s1 + $0x18cc] ss:$16 sps:$4 sm:$0xff]   ;;  %v10580_v2 = vld [vmem:[%s14255_s1 + $0x18c0] ss:$16 sps:$4 sm:$0xff]  }
 0x2f4   : > { %6982 = vmatpush1.bf16.msra.mxu0 %v10488_v3  ;;  %7638 = vmatpush1.bf16.msra.mxu1 %v10491_v4  ;;  %v10583_v3 = vld [vmem:[%s14255_s1 + $0x18c8] ss:$16 sps:$4 sm:$0xff]   ;;  %v10588_v4 = vld [vmem:[%s14255_s1 + $0x18e4] ss:$16 sps:$4 sm:$0xff]  }
 0x2f5   : > { %6983 = vmatprep.subr.bf16.mxu0 %v10496_v5  ;;  %7639 = vmatprep.subr.bf16.mxu1 %v10499_v6  ;;  %v10591_v5 = vld [vmem:[%s14255_s1 + $0x18ec] ss:$16 sps:$4 sm:$0xff]   ;;  %v10586_v6 = vld [vmem:[%s14255_s1 + $0x18e0] ss:$16 sps:$4 sm:$0xff]  }
 0x2f8   : > { %6984 = vmatpush1.bf16.msra.mxu0 %v10494_v7  ;;  %7640 = vmatpush1.bf16.msra.mxu1 %v10497_v8  ;;  %v10589_v7 = vld [vmem:[%s14255_s1 + $0x18e8] ss:$16 sps:$4 sm:$0xff]   ;;  %v10594_v8 = vld [vmem:[%s14255_s1 + $0x1904] ss:$16 sps:$4 sm:$0xff]  }
 0x2f9   : > { %6985 = vmatprep.subr.bf16.mxu0 %v10502_v9  ;;  %7641 = vmatprep.subr.bf16.mxu1 %v10505_v10  ;;  %v10597_v9 = vld [vmem:[%s14255_s1 + $0x190c] ss:$16 sps:$4 sm:$0xff]   ;;  %v10592_v10 = vld [vmem:[%s14255_s1 + $0x1900] ss:$16 sps:$4 sm:$0xff]  }
 0x2fc   : > { %6986 = vmatpush1.bf16.msra.mxu0 %v10500_v11  ;;  %7642 = vmatpush1.bf16.msra.mxu1 %v10503_v12  ;;  %v10595_v11 = vld [vmem:[%s14255_s1 + $0x1908] ss:$16 sps:$4 sm:$0xff]   ;;  %v10600_v12 = vld [vmem:[%s14255_s1 + $0x1924] ss:$16 sps:$4 sm:$0xff]  }
 0x2fd   : > { %6987 = vmatprep.subr.bf16.mxu0 %v10508_v14  ;;  %7643 = vmatprep.subr.bf16.mxu1 %v10511_v15  ;;  %v10603_v14 = vld [vmem:[%s14255_s1 + $0x192c] ss:$16 sps:$4 sm:$0xff]   ;;  %v10598_v15 = vld [vmem:[%s14255_s1 + $0x1920] ss:$16 sps:$4 sm:$0xff]  }
 0x300   : > { %6988 = vmatpush1.bf16.msra.mxu0 %v10506_v17  ;;  %7644 = vmatpush1.bf16.msra.mxu1 %v10509_v13  ;;  %v10601_v17 = vld [vmem:[%s14255_s1 + $0x1928] ss:$16 sps:$4 sm:$0xff]   ;;  %v10606_v13 = vld [vmem:[%s14255_s1 + $0x1944] ss:$16 sps:$4 sm:$0xff]  }
 0x301   : > { %6989 = vmatprep.subr.bf16.mxu0 %v10514_v19  ;;  %7645 = vmatprep.subr.bf16.mxu1 %v10517_v16  ;;  %v10609_v19 = vld [vmem:[%s14255_s1 + $0x194c] ss:$16 sps:$4 sm:$0xff]   ;;  %v10604_v16 = vld [vmem:[%s14255_s1 + $0x1940] ss:$16 sps:$4 sm:$0xff]  }
 0x304   : > { %6990 = vmatpush1.bf16.msra.mxu0 %v10512_v21  ;;  %7646 = vmatpush1.bf16.msra.mxu1 %v10515_v22  ;;  %v10607_v21 = vld [vmem:[%s14255_s1 + $0x1948] ss:$16 sps:$4 sm:$0xff]   ;;  %v10612_v22 = vld [vmem:[%s14255_s1 + $0x1964] ss:$16 sps:$4 sm:$0xff]  }
 0x305   : > { %6991 = vmatprep.subr.bf16.mxu0 %v10520_v18  ;;  %7647 = vmatprep.subr.bf16.mxu1 %v10523_v24  ;;  %v10615_v18 = vld [vmem:[%s14255_s1 + $0x196c] ss:$16 sps:$4 sm:$0xff]   ;;  %v10610_v24 = vld [vmem:[%s14255_s1 + $0x1960] ss:$16 sps:$4 sm:$0xff]  }
 0x308   : > { %6992 = vmatpush1.bf16.msra.mxu0 %v10518_v25  ;;  %7648 = vmatpush1.bf16.msra.mxu1 %v10521_v20  ;;  %v10613_v25 = vld [vmem:[%s14255_s1 + $0x1968] ss:$16 sps:$4 sm:$0xff]   ;;  %v10618_v20 = vld [vmem:[%s14255_s1 + $0x1984] ss:$16 sps:$4 sm:$0xff]  }
 0x309   : > { %6993 = vmatprep.subr.bf16.mxu0 %v10526_v27  ;;  %7649 = vmatprep.subr.bf16.mxu1 %v10529_v28  ;;  %v10621_v27 = vld [vmem:[%s14255_s1 + $0x198c] ss:$16 sps:$4 sm:$0xff]   ;;  %v10616_v28 = vld [vmem:[%s14255_s1 + $0x1980] ss:$16 sps:$4 sm:$0xff]  }
 0x30c   : > { %6994 = vmatpush1.bf16.msra.mxu0 %v10524_v23  ;;  %7650 = vmatpush1.bf16.msra.mxu1 %v10527_v30  ;;  %v10619_v23 = vld [vmem:[%s14255_s1 + $0x1988] ss:$16 sps:$4 sm:$0xff]   ;;  %v10624_v30 = vld [vmem:[%s14255_s1 + $0x19a4] ss:$16 sps:$4 sm:$0xff]  }
 0x30d   : > { %6995 = vmatprep.subr.bf16.mxu0 %v10532_v31  ;;  %7651 = vmatprep.subr.bf16.mxu1 %v10535_v26  ;;  %v10627_v31 = vld [vmem:[%s14255_s1 + $0x19ac] ss:$16 sps:$4 sm:$0xff]   ;;  %v10622_v26 = vld [vmem:[%s14255_s1 + $0x19a0] ss:$16 sps:$4 sm:$0xff]  }
 0x310   : > { %6996 = vmatpush1.bf16.msra.mxu0 %v10530_v33  ;;  %7652 = vmatpush1.bf16.msra.mxu1 %v10533_v34  ;;  %v10625_v33 = vld [vmem:[%s14255_s1 + $0x19a8] ss:$16 sps:$4 sm:$0xff]   ;;  %v10630_v34 = vld [vmem:[%s14255_s1 + $0x19c4] ss:$16 sps:$4 sm:$0xff]  }
 0x311   : > { %6997 = vmatprep.subr.bf16.mxu0 %v10538_v35  ;;  %7653 = vmatprep.subr.bf16.mxu1 %v10541_v36  ;;  %v10633_v35 = vld [vmem:[%s14255_s1 + $0x19cc] ss:$16 sps:$4 sm:$0xff]   ;;  %v10628_v36 = vld [vmem:[%s14255_s1 + $0x19c0] ss:$16 sps:$4 sm:$0xff]  }
 0x314   : > { %6998 = vmatpush1.bf16.msra.mxu0 %v10536_v37  ;;  %7654 = vmatpush1.bf16.msra.mxu1 %v10539_v32  ;;  %v10631_v37 = vld [vmem:[%s14255_s1 + $0x19c8] ss:$16 sps:$4 sm:$0xff]   ;;  %v10636_v32 = vld [vmem:[%s14255_s1 + $0x19e4] ss:$16 sps:$4 sm:$0xff]  }
 0x315   : > { %7008 = vmatprep.subr.bf16.mxu0 %v10546_v39  ;;  %7664 = vmatprep.subr.bf16.mxu1 %v10549_v40  ;;  %v10639_v39 = vld [vmem:[%s14255_s1 + $0x19ec] ss:$16 sps:$4 sm:$0xff]   ;;  %v10634_v40 = vld [vmem:[%s14255_s1 + $0x19e0] ss:$16 sps:$4 sm:$0xff]  }
 0x317   : > { %7000 = vmatmul.mubr.bf16.vlgmr.msra.gmra.mrb[0].mxu0 %v8176_v29  ;;  %7656 = vmatmul.mubr.bf16.vlgmr.msra.gmra.mrb[0].mxu1 %v8176_v29  ;;  %v10637_v29 = vld [vmem:[%s14255_s1 + $0x19e8] ss:$16 sps:$4 sm:$0xff]  }
 0x318   : > { %7009 = vmatpush1.bf16.msra.mxu0 %v10544_v42  ;;  %7665 = vmatpush1.bf16.msra.mxu1 %v10547_v43  ;;  %v10644_v42 = vld [vmem:[%s14255_s1 + $0x1a04] ss:$16 sps:$4 sm:$0xff]   ;;  %v10647_v43 = vld [vmem:[%s14255_s1 + $0x1a0c] ss:$16 sps:$4 sm:$0xff]  }
 0x319   : > { %7010 = vmatprep.subr.bf16.mxu0 %v10552_v38  ;;  %7666 = vmatprep.subr.bf16.mxu1 %v10555_v44  ;;  %v8178_v38 = vcombine.low %v13426_v41, %v13426_v41  ;;  %v13627_v44 = vld [vmem:[%s14254_s0 + $0x68] sm:$0xff]  ;;  %v10650_v41 = vld [vmem:[%s14255_s1 + $0x1a24] ss:$16 sps:$4 sm:$0xff]  }
 0x31a   : > { %7040 = vmatprep.mubr.bf16.mxu0 %v8179_v45  ;;  %7696 = vmatprep.mubr.bf16.mxu1 %v8179_v45  ;;  %v10642_v45 = vld [vmem:[%s14255_s1 + $0x1a00] ss:$16 sps:$4 sm:$0xff]  }
 0x31c   : > { %7011 = vmatpush1.bf16.msra.mxu0 %v10550_v46  ;;  %7667 = vmatpush1.bf16.msra.mxu1 %v10553_v47  ;;  %v10645_v46 = vld [vmem:[%s14255_s1 + $0x1a08] ss:$16 sps:$4 sm:$0xff]   ;;  %v10653_v47 = vld [vmem:[%s14255_s1 + $0x1a2c] ss:$16 sps:$4 sm:$0xff]  }
 0x31d   : > { %7012 = vmatprep.subr.bf16.mxu0 %v10558_v48  ;;  %7668 = vmatprep.subr.bf16.mxu1 %v10561_v49  ;;  %v8181_v48 = vcombine.high %v13627_v44, %v13627_v44  ;;  %v10648_v49 = vld [vmem:[%s14255_s1 + $0x1a20] ss:$16 sps:$4 sm:$0xff]  }
 0x320   : > { %7013 = vmatpush1.bf16.msra.mxu0 %v10556_v50  ;;  %7669 = vmatpush1.bf16.msra.mxu1 %v10559_v51  ;;  %v10651_v50 = vld [vmem:[%s14255_s1 + $0x1a28] ss:$16 sps:$4 sm:$0xff]   ;;  %v10656_v51 = vld [vmem:[%s14255_s1 + $0x1a44] ss:$16 sps:$4 sm:$0xff]  }
 0x321   : > { %7014 = vmatprep.subr.bf16.mxu0 %v10564_v52  ;;  %7670 = vmatprep.subr.bf16.mxu1 %v10567_v53  ;;  %v10659_v52 = vld [vmem:[%s14255_s1 + $0x1a4c] ss:$16 sps:$4 sm:$0xff]   ;;  %v10654_v53 = vld [vmem:[%s14255_s1 + $0x1a40] ss:$16 sps:$4 sm:$0xff]  }
 0x324   : > { %7015 = vmatpush1.bf16.msra.mxu0 %v10562_v54  ;;  %7671 = vmatpush1.bf16.msra.mxu1 %v10565_v55  ;;  %v10657_v54 = vld [vmem:[%s14255_s1 + $0x1a48] ss:$16 sps:$4 sm:$0xff]   ;;  %v10662_v55 = vld [vmem:[%s14255_s1 + $0x1a64] ss:$16 sps:$4 sm:$0xff]  }
 0x325   : > { %7016 = vmatprep.subr.bf16.mxu0 %v10570_v56  ;;  %7672 = vmatprep.subr.bf16.mxu1 %v10573_v57  ;;  %v10665_v56 = vld [vmem:[%s14255_s1 + $0x1a6c] ss:$16 sps:$4 sm:$0xff]   ;;  %v10660_v57 = vld [vmem:[%s14255_s1 + $0x1a60] ss:$16 sps:$4 sm:$0xff]  }
 0x328   : > { %7017 = vmatpush1.bf16.msra.mxu0 %v10568_v58  ;;  %7673 = vmatpush1.bf16.msra.mxu1 %v10571_v59  ;;  %v10663_v58 = vld [vmem:[%s14255_s1 + $0x1a68] ss:$16 sps:$4 sm:$0xff]   ;;  %v10668_v59 = vld [vmem:[%s14255_s1 + $0x1a84] ss:$16 sps:$4 sm:$0xff]  }
 0x329   : > { %7018 = vmatprep.subr.bf16.mxu0 %v10576_v60  ;;  %7674 = vmatprep.subr.bf16.mxu1 %v10579_v61  ;;  %v10671_v60 = vld [vmem:[%s14255_s1 + $0x1a8c] ss:$16 sps:$4 sm:$0xff]   ;;  %v10666_v61 = vld [vmem:[%s14255_s1 + $0x1a80] ss:$16 sps:$4 sm:$0xff]  }
 0x32c   : > { %7019 = vmatpush1.bf16.msra.mxu0 %v10574_v62  ;;  %7675 = vmatpush1.bf16.msra.mxu1 %v10577_v63  ;;  %v10669_v62 = vld [vmem:[%s14255_s1 + $0x1a88] ss:$16 sps:$4 sm:$0xff]   ;;  %v10674_v63 = vld [vmem:[%s14255_s1 + $0x1aa4] ss:$16 sps:$4 sm:$0xff]  }
 0x32d   : > { %7020 = vmatprep.subr.bf16.mxu0 %v10582_v0  ;;  %7676 = vmatprep.subr.bf16.mxu1 %v10585_v1  ;;  %v10677_v0 = vld [vmem:[%s14255_s1 + $0x1aac] ss:$16 sps:$4 sm:$0xff]   ;;  %v10672_v1 = vld [vmem:[%s14255_s1 + $0x1aa0] ss:$16 sps:$4 sm:$0xff]  }
 0x330   : > { %7021 = vmatpush1.bf16.msra.mxu0 %v10580_v2  ;;  %7677 = vmatpush1.bf16.msra.mxu1 %v10583_v3  ;;  %v10675_v2 = vld [vmem:[%s14255_s1 + $0x1aa8] ss:$16 sps:$4 sm:$0xff]   ;;  %v10680_v3 = vld [vmem:[%s14255_s1 + $0x1ac4] ss:$16 sps:$4 sm:$0xff]  }
 0x331   : > { %7022 = vmatprep.subr.bf16.mxu0 %v10588_v4  ;;  %7678 = vmatprep.subr.bf16.mxu1 %v10591_v5  ;;  %v10683_v4 = vld [vmem:[%s14255_s1 + $0x1acc] ss:$16 sps:$4 sm:$0xff]   ;;  %v10678_v5 = vld [vmem:[%s14255_s1 + $0x1ac0] ss:$16 sps:$4 sm:$0xff]  }
 0x334   : > { %7023 = vmatpush1.bf16.msra.mxu0 %v10586_v6  ;;  %7679 = vmatpush1.bf16.msra.mxu1 %v10589_v7  ;;  %v10681_v6 = vld [vmem:[%s14255_s1 + $0x1ac8] ss:$16 sps:$4 sm:$0xff]   ;;  %v10686_v7 = vld [vmem:[%s14255_s1 + $0x1ae4] ss:$16 sps:$4 sm:$0xff]  }
 0x335   : > { %7024 = vmatprep.subr.bf16.mxu0 %v10594_v8  ;;  %7680 = vmatprep.subr.bf16.mxu1 %v10597_v9  ;;  %v10689_v8 = vld [vmem:[%s14255_s1 + $0x1aec] ss:$16 sps:$4 sm:$0xff]   ;;  %v10684_v9 = vld [vmem:[%s14255_s1 + $0x1ae0] ss:$16 sps:$4 sm:$0xff]  }
 0x338   : > { %7025 = vmatpush1.bf16.msra.mxu0 %v10592_v10  ;;  %7681 = vmatpush1.bf16.msra.mxu1 %v10595_v11  ;;  %v10687_v10 = vld [vmem:[%s14255_s1 + $0x1ae8] ss:$16 sps:$4 sm:$0xff]   ;;  %v10692_v11 = vld [vmem:[%s14255_s1 + $0x1b04] ss:$16 sps:$4 sm:$0xff]  }
 0x339   : > { %7026 = vmatprep.subr.bf16.mxu0 %v10600_v12  ;;  %7682 = vmatprep.subr.bf16.mxu1 %v10603_v14  ;;  %v10695_v12 = vld [vmem:[%s14255_s1 + $0x1b0c] ss:$16 sps:$4 sm:$0xff]   ;;  %v10690_v14 = vld [vmem:[%s14255_s1 + $0x1b00] ss:$16 sps:$4 sm:$0xff]  }
 0x33c   : > { %7027 = vmatpush1.bf16.msra.mxu0 %v10598_v15  ;;  %7683 = vmatpush1.bf16.msra.mxu1 %v10601_v17  ;;  %v10693_v15 = vld [vmem:[%s14255_s1 + $0x1b08] ss:$16 sps:$4 sm:$0xff]   ;;  %v10698_v17 = vld [vmem:[%s14255_s1 + $0x1b24] ss:$16 sps:$4 sm:$0xff]  }
 0x33d   : > { %7028 = vmatprep.subr.bf16.mxu0 %v10606_v13  ;;  %7684 = vmatprep.subr.bf16.mxu1 %v10609_v19  ;;  %v10701_v13 = vld [vmem:[%s14255_s1 + $0x1b2c] ss:$16 sps:$4 sm:$0xff]   ;;  %v10696_v19 = vld [vmem:[%s14255_s1 + $0x1b20] ss:$16 sps:$4 sm:$0xff]  }
 0x340   : > { %7029 = vmatpush1.bf16.msra.mxu0 %v10604_v16  ;;  %7685 = vmatpush1.bf16.msra.mxu1 %v10607_v21  ;;  %v10699_v16 = vld [vmem:[%s14255_s1 + $0x1b28] ss:$16 sps:$4 sm:$0xff]   ;;  %v10704_v21 = vld [vmem:[%s14255_s1 + $0x1b44] ss:$16 sps:$4 sm:$0xff]  }
 0x341   : > { %7030 = vmatprep.subr.bf16.mxu0 %v10612_v22  ;;  %7686 = vmatprep.subr.bf16.mxu1 %v10615_v18  ;;  %v10707_v22 = vld [vmem:[%s14255_s1 + $0x1b4c] ss:$16 sps:$4 sm:$0xff]   ;;  %v10702_v18 = vld [vmem:[%s14255_s1 + $0x1b40] ss:$16 sps:$4 sm:$0xff]  }
 0x344   : > { %7031 = vmatpush1.bf16.msra.mxu0 %v10610_v24  ;;  %7687 = vmatpush1.bf16.msra.mxu1 %v10613_v25  ;;  %v10705_v24 = vld [vmem:[%s14255_s1 + $0x1b48] ss:$16 sps:$4 sm:$0xff]   ;;  %v10710_v25 = vld [vmem:[%s14255_s1 + $0x1b64] ss:$16 sps:$4 sm:$0xff]  }
 0x345   : > { %7032 = vmatprep.subr.bf16.mxu0 %v10618_v20  ;;  %7688 = vmatprep.subr.bf16.mxu1 %v10621_v27  ;;  %v10713_v20 = vld [vmem:[%s14255_s1 + $0x1b6c] ss:$16 sps:$4 sm:$0xff]   ;;  %v10708_v27 = vld [vmem:[%s14255_s1 + $0x1b60] ss:$16 sps:$4 sm:$0xff]  }
 0x348   : > { %7033 = vmatpush1.bf16.msra.mxu0 %v10616_v28  ;;  %7689 = vmatpush1.bf16.msra.mxu1 %v10619_v23  ;;  %v10711_v28 = vld [vmem:[%s14255_s1 + $0x1b68] ss:$16 sps:$4 sm:$0xff]   ;;  %v10716_v23 = vld [vmem:[%s14255_s1 + $0x1b84] ss:$16 sps:$4 sm:$0xff]  }
 0x349   : > { %7034 = vmatprep.subr.bf16.mxu0 %v10624_v30  ;;  %7690 = vmatprep.subr.bf16.mxu1 %v10627_v31  ;;  %v10719_v30 = vld [vmem:[%s14255_s1 + $0x1b8c] ss:$16 sps:$4 sm:$0xff]   ;;  %v10714_v31 = vld [vmem:[%s14255_s1 + $0x1b80] ss:$16 sps:$4 sm:$0xff]  }
 0x34c   : > { %7035 = vmatpush1.bf16.msra.mxu0 %v10622_v26  ;;  %7691 = vmatpush1.bf16.msra.mxu1 %v10625_v33  ;;  %v10717_v26 = vld [vmem:[%s14255_s1 + $0x1b88] ss:$16 sps:$4 sm:$0xff]   ;;  %v10722_v33 = vld [vmem:[%s14255_s1 + $0x1ba4] ss:$16 sps:$4 sm:$0xff]  }
 0x34d   : > { %7036 = vmatprep.subr.bf16.mxu0 %v10630_v34  ;;  %7692 = vmatprep.subr.bf16.mxu1 %v10633_v35  ;;  %v10725_v34 = vld [vmem:[%s14255_s1 + $0x1bac] ss:$16 sps:$4 sm:$0xff]   ;;  %v10720_v35 = vld [vmem:[%s14255_s1 + $0x1ba0] ss:$16 sps:$4 sm:$0xff]  }
 0x350   : > { %7037 = vmatpush1.bf16.msra.mxu0 %v10628_v36  ;;  %7693 = vmatpush1.bf16.msra.mxu1 %v10631_v37  ;;  %v10723_v36 = vld [vmem:[%s14255_s1 + $0x1ba8] ss:$16 sps:$4 sm:$0xff]   ;;  %v10728_v37 = vld [vmem:[%s14255_s1 + $0x1bc4] ss:$16 sps:$4 sm:$0xff]  }
 0x351   : > { %7038 = vmatprep.subr.bf16.mxu0 %v10636_v32  ;;  %7694 = vmatprep.subr.bf16.mxu1 %v10639_v39  ;;  %v10731_v32 = vld [vmem:[%s14255_s1 + $0x1bcc] ss:$16 sps:$4 sm:$0xff]   ;;  %v10726_v39 = vld [vmem:[%s14255_s1 + $0x1bc0] ss:$16 sps:$4 sm:$0xff]  }
 0x354   : > { %7039 = vmatpush1.bf16.msra.mxu0 %v10634_v40  ;;  %7695 = vmatpush1.bf16.msra.mxu1 %v10637_v29  ;;  %v10729_v40 = vld [vmem:[%s14255_s1 + $0x1bc8] ss:$16 sps:$4 sm:$0xff]   ;;  %v10734_v29 = vld [vmem:[%s14255_s1 + $0x1be4] ss:$16 sps:$4 sm:$0xff]  }
 0x355   : > { %7049 = vmatprep.subr.bf16.mxu0 %v10644_v42  ;;  %7705 = vmatprep.subr.bf16.mxu1 %v10647_v43  ;;  %v10737_v42 = vld [vmem:[%s14255_s1 + $0x1bec] ss:$16 sps:$4 sm:$0xff]   ;;  %v10732_v43 = vld [vmem:[%s14255_s1 + $0x1be0] ss:$16 sps:$4 sm:$0xff]  }
 0x357   : > { %7041 = vmatmul.mubr.bf16.vlgmr.msra.gmra.mrb[0].mxu0 %v8178_v38  ;;  %7697 = vmatmul.mubr.bf16.vlgmr.msra.gmra.mrb[0].mxu1 %v8178_v38  ;;  %v10735_v38 = vld [vmem:[%s14255_s1 + $0x1be8] ss:$16 sps:$4 sm:$0xff]  }
 0x358   : > { %7050 = vmatpush1.bf16.msra.mxu0 %v10642_v45  ;;  %7706 = vmatpush1.bf16.msra.mxu1 %v10645_v46  ;;  %v10742_v45 = vld [vmem:[%s14255_s1 + $0x1c04] ss:$16 sps:$4 sm:$0xff]   ;;  %v10745_v46 = vld [vmem:[%s14255_s1 + $0x1c0c] ss:$16 sps:$4 sm:$0xff]  }
 0x359   : > { %7051 = vmatprep.subr.bf16.mxu0 %v10650_v41  ;;  %7707 = vmatprep.subr.bf16.mxu1 %v10653_v47  ;;  %v8180_v41 = vcombine.low %v13627_v44, %v13627_v44  ;;  %v13828_v47 = vld [vmem:[%s14254_s0 + $0x70] sm:$0xff] }
 0x35a   : > { %7081 = vmatprep.mubr.bf16.mxu0 %v8181_v48  ;;  %7737 = vmatprep.mubr.bf16.mxu1 %v8181_v48  ;;  %v10740_v48 = vld [vmem:[%s14255_s1 + $0x1c00] ss:$16 sps:$4 sm:$0xff]   ;;  %v10748_v44 = vld [vmem:[%s14255_s1 + $0x1c24] ss:$16 sps:$4 sm:$0xff]  }
 0x35c   : > { %7052 = vmatpush1.bf16.msra.mxu0 %v10648_v49  ;;  %7708 = vmatpush1.bf16.msra.mxu1 %v10651_v50  ;;  %v10743_v49 = vld [vmem:[%s14255_s1 + $0x1c08] ss:$16 sps:$4 sm:$0xff]   ;;  %v10751_v50 = vld [vmem:[%s14255_s1 + $0x1c2c] ss:$16 sps:$4 sm:$0xff]  }
 0x35d   : > { %7053 = vmatprep.subr.bf16.mxu0 %v10656_v51  ;;  %7709 = vmatprep.subr.bf16.mxu1 %v10659_v52  ;;  %v8183_v51 = vcombine.high %v13828_v47, %v13828_v47  ;;  %v10746_v52 = vld [vmem:[%s14255_s1 + $0x1c20] ss:$16 sps:$4 sm:$0xff]  }
 0x360   : > { %7054 = vmatpush1.bf16.msra.mxu0 %v10654_v53  ;;  %7710 = vmatpush1.bf16.msra.mxu1 %v10657_v54  ;;  %v10749_v53 = vld [vmem:[%s14255_s1 + $0x1c28] ss:$16 sps:$4 sm:$0xff]   ;;  %v10754_v54 = vld [vmem:[%s14255_s1 + $0x1c44] ss:$16 sps:$4 sm:$0xff]  }
 0x361   : > { %7055 = vmatprep.subr.bf16.mxu0 %v10662_v55  ;;  %7711 = vmatprep.subr.bf16.mxu1 %v10665_v56  ;;  %v10757_v55 = vld [vmem:[%s14255_s1 + $0x1c4c] ss:$16 sps:$4 sm:$0xff]   ;;  %v10752_v56 = vld [vmem:[%s14255_s1 + $0x1c40] ss:$16 sps:$4 sm:$0xff]  }
 0x364   : > { %7056 = vmatpush1.bf16.msra.mxu0 %v10660_v57  ;;  %7712 = vmatpush1.bf16.msra.mxu1 %v10663_v58  ;;  %v10755_v57 = vld [vmem:[%s14255_s1 + $0x1c48] ss:$16 sps:$4 sm:$0xff]   ;;  %v10760_v58 = vld [vmem:[%s14255_s1 + $0x1c64] ss:$16 sps:$4 sm:$0xff]  }
 0x365   : > { %7057 = vmatprep.subr.bf16.mxu0 %v10668_v59  ;;  %7713 = vmatprep.subr.bf16.mxu1 %v10671_v60  ;;  %v10763_v59 = vld [vmem:[%s14255_s1 + $0x1c6c] ss:$16 sps:$4 sm:$0xff]   ;;  %v10758_v60 = vld [vmem:[%s14255_s1 + $0x1c60] ss:$16 sps:$4 sm:$0xff]  }
 0x368   : > { %7058 = vmatpush1.bf16.msra.mxu0 %v10666_v61  ;;  %7714 = vmatpush1.bf16.msra.mxu1 %v10669_v62  ;;  %v10761_v61 = vld [vmem:[%s14255_s1 + $0x1c68] ss:$16 sps:$4 sm:$0xff]   ;;  %v10766_v62 = vld [vmem:[%s14255_s1 + $0x1c84] ss:$16 sps:$4 sm:$0xff]  }
 0x369   : > { %7059 = vmatprep.subr.bf16.mxu0 %v10674_v63  ;;  %7715 = vmatprep.subr.bf16.mxu1 %v10677_v0  ;;  %v10769_v63 = vld [vmem:[%s14255_s1 + $0x1c8c] ss:$16 sps:$4 sm:$0xff]   ;;  %v10764_v0 = vld [vmem:[%s14255_s1 + $0x1c80] ss:$16 sps:$4 sm:$0xff]  }
 0x36c   : > { %7060 = vmatpush1.bf16.msra.mxu0 %v10672_v1  ;;  %7716 = vmatpush1.bf16.msra.mxu1 %v10675_v2  ;;  %v10767_v1 = vld [vmem:[%s14255_s1 + $0x1c88] ss:$16 sps:$4 sm:$0xff]   ;;  %v10772_v2 = vld [vmem:[%s14255_s1 + $0x1ca4] ss:$16 sps:$4 sm:$0xff]  }
 0x36d   : > { %7061 = vmatprep.subr.bf16.mxu0 %v10680_v3  ;;  %7717 = vmatprep.subr.bf16.mxu1 %v10683_v4  ;;  %v10775_v3 = vld [vmem:[%s14255_s1 + $0x1cac] ss:$16 sps:$4 sm:$0xff]   ;;  %v10770_v4 = vld [vmem:[%s14255_s1 + $0x1ca0] ss:$16 sps:$4 sm:$0xff]  }
 0x370   : > { %7062 = vmatpush1.bf16.msra.mxu0 %v10678_v5  ;;  %7718 = vmatpush1.bf16.msra.mxu1 %v10681_v6  ;;  %v10773_v5 = vld [vmem:[%s14255_s1 + $0x1ca8] ss:$16 sps:$4 sm:$0xff]   ;;  %v10778_v6 = vld [vmem:[%s14255_s1 + $0x1cc4] ss:$16 sps:$4 sm:$0xff]  }
 0x371   : > { %7063 = vmatprep.subr.bf16.mxu0 %v10686_v7  ;;  %7719 = vmatprep.subr.bf16.mxu1 %v10689_v8  ;;  %v10781_v7 = vld [vmem:[%s14255_s1 + $0x1ccc] ss:$16 sps:$4 sm:$0xff]   ;;  %v10776_v8 = vld [vmem:[%s14255_s1 + $0x1cc0] ss:$16 sps:$4 sm:$0xff]  }
 0x374   : > { %7064 = vmatpush1.bf16.msra.mxu0 %v10684_v9  ;;  %7720 = vmatpush1.bf16.msra.mxu1 %v10687_v10  ;;  %v10779_v9 = vld [vmem:[%s14255_s1 + $0x1cc8] ss:$16 sps:$4 sm:$0xff]   ;;  %v10784_v10 = vld [vmem:[%s14255_s1 + $0x1ce4] ss:$16 sps:$4 sm:$0xff]  }
 0x375   : > { %7065 = vmatprep.subr.bf16.mxu0 %v10692_v11  ;;  %7721 = vmatprep.subr.bf16.mxu1 %v10695_v12  ;;  %v10787_v11 = vld [vmem:[%s14255_s1 + $0x1cec] ss:$16 sps:$4 sm:$0xff]   ;;  %v10782_v12 = vld [vmem:[%s14255_s1 + $0x1ce0] ss:$16 sps:$4 sm:$0xff]  }
 0x378   : > { %7066 = vmatpush1.bf16.msra.mxu0 %v10690_v14  ;;  %7722 = vmatpush1.bf16.msra.mxu1 %v10693_v15  ;;  %v10785_v14 = vld [vmem:[%s14255_s1 + $0x1ce8] ss:$16 sps:$4 sm:$0xff]   ;;  %v10790_v15 = vld [vmem:[%s14255_s1 + $0x1d04] ss:$16 sps:$4 sm:$0xff]  }
 0x379   : > { %7067 = vmatprep.subr.bf16.mxu0 %v10698_v17  ;;  %7723 = vmatprep.subr.bf16.mxu1 %v10701_v13  ;;  %v10793_v17 = vld [vmem:[%s14255_s1 + $0x1d0c] ss:$16 sps:$4 sm:$0xff]   ;;  %v10788_v13 = vld [vmem:[%s14255_s1 + $0x1d00] ss:$16 sps:$4 sm:$0xff]  }
 0x37c   : > { %7068 = vmatpush1.bf16.msra.mxu0 %v10696_v19  ;;  %7724 = vmatpush1.bf16.msra.mxu1 %v10699_v16  ;;  %v10791_v19 = vld [vmem:[%s14255_s1 + $0x1d08] ss:$16 sps:$4 sm:$0xff]   ;;  %v10796_v16 = vld [vmem:[%s14255_s1 + $0x1d24] ss:$16 sps:$4 sm:$0xff]  }
 0x37d   : > { %7069 = vmatprep.subr.bf16.mxu0 %v10704_v21  ;;  %7725 = vmatprep.subr.bf16.mxu1 %v10707_v22  ;;  %v10799_v21 = vld [vmem:[%s14255_s1 + $0x1d2c] ss:$16 sps:$4 sm:$0xff]   ;;  %v10794_v22 = vld [vmem:[%s14255_s1 + $0x1d20] ss:$16 sps:$4 sm:$0xff]  }
 0x380   : > { %7070 = vmatpush1.bf16.msra.mxu0 %v10702_v18  ;;  %7726 = vmatpush1.bf16.msra.mxu1 %v10705_v24  ;;  %v10797_v18 = vld [vmem:[%s14255_s1 + $0x1d28] ss:$16 sps:$4 sm:$0xff]   ;;  %v10802_v24 = vld [vmem:[%s14255_s1 + $0x1d44] ss:$16 sps:$4 sm:$0xff]  }
 0x381   : > { %7071 = vmatprep.subr.bf16.mxu0 %v10710_v25  ;;  %7727 = vmatprep.subr.bf16.mxu1 %v10713_v20  ;;  %v10805_v25 = vld [vmem:[%s14255_s1 + $0x1d4c] ss:$16 sps:$4 sm:$0xff]   ;;  %v10800_v20 = vld [vmem:[%s14255_s1 + $0x1d40] ss:$16 sps:$4 sm:$0xff]  }
 0x384   : > { %7072 = vmatpush1.bf16.msra.mxu0 %v10708_v27  ;;  %7728 = vmatpush1.bf16.msra.mxu1 %v10711_v28  ;;  %v10803_v27 = vld [vmem:[%s14255_s1 + $0x1d48] ss:$16 sps:$4 sm:$0xff]   ;;  %v10808_v28 = vld [vmem:[%s14255_s1 + $0x1d64] ss:$16 sps:$4 sm:$0xff]  }
 0x385   : > { %7073 = vmatprep.subr.bf16.mxu0 %v10716_v23  ;;  %7729 = vmatprep.subr.bf16.mxu1 %v10719_v30  ;;  %v10811_v23 = vld [vmem:[%s14255_s1 + $0x1d6c] ss:$16 sps:$4 sm:$0xff]   ;;  %v10806_v30 = vld [vmem:[%s14255_s1 + $0x1d60] ss:$16 sps:$4 sm:$0xff]  }
 0x388   : > { %7074 = vmatpush1.bf16.msra.mxu0 %v10714_v31  ;;  %7730 = vmatpush1.bf16.msra.mxu1 %v10717_v26  ;;  %v10809_v31 = vld [vmem:[%s14255_s1 + $0x1d68] ss:$16 sps:$4 sm:$0xff]   ;;  %v10814_v26 = vld [vmem:[%s14255_s1 + $0x1d84] ss:$16 sps:$4 sm:$0xff]  }
 0x389   : > { %7075 = vmatprep.subr.bf16.mxu0 %v10722_v33  ;;  %7731 = vmatprep.subr.bf16.mxu1 %v10725_v34  ;;  %v10817_v33 = vld [vmem:[%s14255_s1 + $0x1d8c] ss:$16 sps:$4 sm:$0xff]   ;;  %v10812_v34 = vld [vmem:[%s14255_s1 + $0x1d80] ss:$16 sps:$4 sm:$0xff]  }
 0x38c   : > { %7076 = vmatpush1.bf16.msra.mxu0 %v10720_v35  ;;  %7732 = vmatpush1.bf16.msra.mxu1 %v10723_v36  ;;  %v10815_v35 = vld [vmem:[%s14255_s1 + $0x1d88] ss:$16 sps:$4 sm:$0xff]   ;;  %v10820_v36 = vld [vmem:[%s14255_s1 + $0x1da4] ss:$16 sps:$4 sm:$0xff]  }
 0x38d   : > { %7077 = vmatprep.subr.bf16.mxu0 %v10728_v37  ;;  %7733 = vmatprep.subr.bf16.mxu1 %v10731_v32  ;;  %v10823_v37 = vld [vmem:[%s14255_s1 + $0x1dac] ss:$16 sps:$4 sm:$0xff]   ;;  %v10818_v32 = vld [vmem:[%s14255_s1 + $0x1da0] ss:$16 sps:$4 sm:$0xff]  }
 0x390   : > { %7078 = vmatpush1.bf16.msra.mxu0 %v10726_v39  ;;  %7734 = vmatpush1.bf16.msra.mxu1 %v10729_v40  ;;  %v10821_v39 = vld [vmem:[%s14255_s1 + $0x1da8] ss:$16 sps:$4 sm:$0xff]   ;;  %v10826_v40 = vld [vmem:[%s14255_s1 + $0x1dc4] ss:$16 sps:$4 sm:$0xff]  }
 0x391   : > { %7079 = vmatprep.subr.bf16.mxu0 %v10734_v29  ;;  %7735 = vmatprep.subr.bf16.mxu1 %v10737_v42  ;;  %v10829_v29 = vld [vmem:[%s14255_s1 + $0x1dcc] ss:$16 sps:$4 sm:$0xff]   ;;  %v10824_v42 = vld [vmem:[%s14255_s1 + $0x1dc0] ss:$16 sps:$4 sm:$0xff]  }
 0x394   : > { %7080 = vmatpush1.bf16.msra.mxu0 %v10732_v43  ;;  %7736 = vmatpush1.bf16.msra.mxu1 %v10735_v38  ;;  %v10827_v43 = vld [vmem:[%s14255_s1 + $0x1dc8] ss:$16 sps:$4 sm:$0xff]   ;;  %v10832_v38 = vld [vmem:[%s14255_s1 + $0x1de4] ss:$16 sps:$4 sm:$0xff]  }
 0x395   : > { %7090 = vmatprep.subr.bf16.mxu0 %v10742_v45  ;;  %7746 = vmatprep.subr.bf16.mxu1 %v10745_v46  ;;  %v10835_v45 = vld [vmem:[%s14255_s1 + $0x1dec] ss:$16 sps:$4 sm:$0xff]   ;;  %v10830_v46 = vld [vmem:[%s14255_s1 + $0x1de0] ss:$16 sps:$4 sm:$0xff]  }
 0x397   : > { %7082 = vmatmul.mubr.bf16.vlgmr.msra.gmra.mrb[0].mxu0 %v8180_v41  ;;  %7738 = vmatmul.mubr.bf16.vlgmr.msra.gmra.mrb[0].mxu1 %v8180_v41  ;;  %v10833_v41 = vld [vmem:[%s14255_s1 + $0x1de8] ss:$16 sps:$4 sm:$0xff]  }
 0x398   : > { %7091 = vmatpush1.bf16.msra.mxu0 %v10740_v48  ;;  %7747 = vmatpush1.bf16.msra.mxu1 %v10743_v49  ;;  %v10840_v48 = vld [vmem:[%s14255_s1 + $0x1e04] ss:$16 sps:$4 sm:$0xff]   ;;  %v10843_v49 = vld [vmem:[%s14255_s1 + $0x1e0c] ss:$16 sps:$4 sm:$0xff]  }
 0x399   : > { %7092 = vmatprep.subr.bf16.mxu0 %v10748_v44  ;;  %7748 = vmatprep.subr.bf16.mxu1 %v10751_v50  ;;  %v8182_v44 = vcombine.low %v13828_v47, %v13828_v47  ;;  %v14029_v50 = vld [vmem:[%s14254_s0 + $0x78] sm:$0xff]  ;;  %v10846_v47 = vld [vmem:[%s14255_s1 + $0x1e24] ss:$16 sps:$4 sm:$0xff]  }
 0x39a   : > { %7122 = vmatprep.mubr.bf16.mxu0 %v8183_v51  ;;  %7778 = vmatprep.mubr.bf16.mxu1 %v8183_v51  ;;  %v10838_v51 = vld [vmem:[%s14255_s1 + $0x1e00] ss:$16 sps:$4 sm:$0xff]  }
 0x39c   : > { %7093 = vmatpush1.bf16.msra.mxu0 %v10746_v52  ;;  %7749 = vmatpush1.bf16.msra.mxu1 %v10749_v53  ;;  %v10841_v52 = vld [vmem:[%s14255_s1 + $0x1e08] ss:$16 sps:$4 sm:$0xff]   ;;  %v10849_v53 = vld [vmem:[%s14255_s1 + $0x1e2c] ss:$16 sps:$4 sm:$0xff]  }
 0x39d   : > { %7094 = vmatprep.subr.bf16.mxu0 %v10754_v54  ;;  %7750 = vmatprep.subr.bf16.mxu1 %v10757_v55  ;;  %v8185_v54 = vcombine.high %v14029_v50, %v14029_v50  ;;  %v10844_v55 = vld [vmem:[%s14255_s1 + $0x1e20] ss:$16 sps:$4 sm:$0xff]  }
 0x3a0   : > { %7095 = vmatpush1.bf16.msra.mxu0 %v10752_v56  ;;  %7751 = vmatpush1.bf16.msra.mxu1 %v10755_v57  ;;  %v10847_v56 = vld [vmem:[%s14255_s1 + $0x1e28] ss:$16 sps:$4 sm:$0xff]   ;;  %v10852_v57 = vld [vmem:[%s14255_s1 + $0x1e44] ss:$16 sps:$4 sm:$0xff]  }
 0x3a1   : > { %7096 = vmatprep.subr.bf16.mxu0 %v10760_v58  ;;  %7752 = vmatprep.subr.bf16.mxu1 %v10763_v59  ;;  %v10855_v58 = vld [vmem:[%s14255_s1 + $0x1e4c] ss:$16 sps:$4 sm:$0xff]   ;;  %v10850_v59 = vld [vmem:[%s14255_s1 + $0x1e40] ss:$16 sps:$4 sm:$0xff]  }
 0x3a4   : > { %7097 = vmatpush1.bf16.msra.mxu0 %v10758_v60  ;;  %7753 = vmatpush1.bf16.msra.mxu1 %v10761_v61  ;;  %v10853_v60 = vld [vmem:[%s14255_s1 + $0x1e48] ss:$16 sps:$4 sm:$0xff]   ;;  %v10858_v61 = vld [vmem:[%s14255_s1 + $0x1e64] ss:$16 sps:$4 sm:$0xff]  }
 0x3a5   : > { %7098 = vmatprep.subr.bf16.mxu0 %v10766_v62  ;;  %7754 = vmatprep.subr.bf16.mxu1 %v10769_v63  ;;  %v10861_v62 = vld [vmem:[%s14255_s1 + $0x1e6c] ss:$16 sps:$4 sm:$0xff]   ;;  %v10856_v63 = vld [vmem:[%s14255_s1 + $0x1e60] ss:$16 sps:$4 sm:$0xff]  }
 0x3a8   : > { %7099 = vmatpush1.bf16.msra.mxu0 %v10764_v0  ;;  %7755 = vmatpush1.bf16.msra.mxu1 %v10767_v1  ;;  %v10859_v0 = vld [vmem:[%s14255_s1 + $0x1e68] ss:$16 sps:$4 sm:$0xff]   ;;  %v10864_v1 = vld [vmem:[%s14255_s1 + $0x1e84] ss:$16 sps:$4 sm:$0xff]  }
 0x3a9   : > { %7100 = vmatprep.subr.bf16.mxu0 %v10772_v2  ;;  %7756 = vmatprep.subr.bf16.mxu1 %v10775_v3  ;;  %v10867_v2 = vld [vmem:[%s14255_s1 + $0x1e8c] ss:$16 sps:$4 sm:$0xff]   ;;  %v10862_v3 = vld [vmem:[%s14255_s1 + $0x1e80] ss:$16 sps:$4 sm:$0xff]  }
 0x3ac   : > { %7101 = vmatpush1.bf16.msra.mxu0 %v10770_v4  ;;  %7757 = vmatpush1.bf16.msra.mxu1 %v10773_v5  ;;  %v10865_v4 = vld [vmem:[%s14255_s1 + $0x1e88] ss:$16 sps:$4 sm:$0xff]   ;;  %v10870_v5 = vld [vmem:[%s14255_s1 + $0x1ea4] ss:$16 sps:$4 sm:$0xff]  }
 0x3ad   : > { %7102 = vmatprep.subr.bf16.mxu0 %v10778_v6  ;;  %7758 = vmatprep.subr.bf16.mxu1 %v10781_v7  ;;  %v10873_v6 = vld [vmem:[%s14255_s1 + $0x1eac] ss:$16 sps:$4 sm:$0xff]   ;;  %v10868_v7 = vld [vmem:[%s14255_s1 + $0x1ea0] ss:$16 sps:$4 sm:$0xff]  }
 0x3b0   : > { %7103 = vmatpush1.bf16.msra.mxu0 %v10776_v8  ;;  %7759 = vmatpush1.bf16.msra.mxu1 %v10779_v9  ;;  %v10871_v8 = vld [vmem:[%s14255_s1 + $0x1ea8] ss:$16 sps:$4 sm:$0xff]   ;;  %v10876_v9 = vld [vmem:[%s14255_s1 + $0x1ec4] ss:$16 sps:$4 sm:$0xff]  }
 0x3b1   : > { %7104 = vmatprep.subr.bf16.mxu0 %v10784_v10  ;;  %7760 = vmatprep.subr.bf16.mxu1 %v10787_v11  ;;  %v10879_v10 = vld [vmem:[%s14255_s1 + $0x1ecc] ss:$16 sps:$4 sm:$0xff]   ;;  %v10874_v11 = vld [vmem:[%s14255_s1 + $0x1ec0] ss:$16 sps:$4 sm:$0xff]  }
 0x3b4   : > { %7105 = vmatpush1.bf16.msra.mxu0 %v10782_v12  ;;  %7761 = vmatpush1.bf16.msra.mxu1 %v10785_v14  ;;  %v10877_v12 = vld [vmem:[%s14255_s1 + $0x1ec8] ss:$16 sps:$4 sm:$0xff]   ;;  %v10882_v14 = vld [vmem:[%s14255_s1 + $0x1ee4] ss:$16 sps:$4 sm:$0xff]  }
 0x3b5   : > { %7106 = vmatprep.subr.bf16.mxu0 %v10790_v15  ;;  %7762 = vmatprep.subr.bf16.mxu1 %v10793_v17  ;;  %v10885_v15 = vld [vmem:[%s14255_s1 + $0x1eec] ss:$16 sps:$4 sm:$0xff]   ;;  %v10880_v17 = vld [vmem:[%s14255_s1 + $0x1ee0] ss:$16 sps:$4 sm:$0xff]  }
 0x3b8   : > { %7107 = vmatpush1.bf16.msra.mxu0 %v10788_v13  ;;  %7763 = vmatpush1.bf16.msra.mxu1 %v10791_v19  ;;  %v10883_v13 = vld [vmem:[%s14255_s1 + $0x1ee8] ss:$16 sps:$4 sm:$0xff]   ;;  %v10888_v19 = vld [vmem:[%s14255_s1 + $0x1f04] ss:$16 sps:$4 sm:$0xff]  }
 0x3b9   : > { %7108 = vmatprep.subr.bf16.mxu0 %v10796_v16  ;;  %7764 = vmatprep.subr.bf16.mxu1 %v10799_v21  ;;  %v10891_v16 = vld [vmem:[%s14255_s1 + $0x1f0c] ss:$16 sps:$4 sm:$0xff]   ;;  %v10886_v21 = vld [vmem:[%s14255_s1 + $0x1f00] ss:$16 sps:$4 sm:$0xff]  }
 0x3bc   : > { %7109 = vmatpush1.bf16.msra.mxu0 %v10794_v22  ;;  %7765 = vmatpush1.bf16.msra.mxu1 %v10797_v18  ;;  %v10889_v22 = vld [vmem:[%s14255_s1 + $0x1f08] ss:$16 sps:$4 sm:$0xff]   ;;  %v10894_v18 = vld [vmem:[%s14255_s1 + $0x1f24] ss:$16 sps:$4 sm:$0xff]  }
 0x3bd   : > { %7110 = vmatprep.subr.bf16.mxu0 %v10802_v24  ;;  %7766 = vmatprep.subr.bf16.mxu1 %v10805_v25  ;;  %v10897_v24 = vld [vmem:[%s14255_s1 + $0x1f2c] ss:$16 sps:$4 sm:$0xff]   ;;  %v10892_v25 = vld [vmem:[%s14255_s1 + $0x1f20] ss:$16 sps:$4 sm:$0xff]  }
 0x3c0   : > { %7111 = vmatpush1.bf16.msra.mxu0 %v10800_v20  ;;  %7767 = vmatpush1.bf16.msra.mxu1 %v10803_v27  ;;  %v10895_v20 = vld [vmem:[%s14255_s1 + $0x1f28] ss:$16 sps:$4 sm:$0xff]   ;;  %v10900_v27 = vld [vmem:[%s14255_s1 + $0x1f44] ss:$16 sps:$4 sm:$0xff]  }
 0x3c1   : > { %7112 = vmatprep.subr.bf16.mxu0 %v10808_v28  ;;  %7768 = vmatprep.subr.bf16.mxu1 %v10811_v23  ;;  %v10903_v28 = vld [vmem:[%s14255_s1 + $0x1f4c] ss:$16 sps:$4 sm:$0xff]   ;;  %v10898_v23 = vld [vmem:[%s14255_s1 + $0x1f40] ss:$16 sps:$4 sm:$0xff]  }
 0x3c4   : > { %7113 = vmatpush1.bf16.msra.mxu0 %v10806_v30  ;;  %7769 = vmatpush1.bf16.msra.mxu1 %v10809_v31  ;;  %v10901_v30 = vld [vmem:[%s14255_s1 + $0x1f48] ss:$16 sps:$4 sm:$0xff]   ;;  %v10906_v31 = vld [vmem:[%s14255_s1 + $0x1f64] ss:$16 sps:$4 sm:$0xff]  }
 0x3c5   : > { %7114 = vmatprep.subr.bf16.mxu0 %v10814_v26  ;;  %7770 = vmatprep.subr.bf16.mxu1 %v10817_v33  ;;  %v10909_v26 = vld [vmem:[%s14255_s1 + $0x1f6c] ss:$16 sps:$4 sm:$0xff]   ;;  %v10904_v33 = vld [vmem:[%s14255_s1 + $0x1f60] ss:$16 sps:$4 sm:$0xff]  }
 0x3c8   : > { %7115 = vmatpush1.bf16.msra.mxu0 %v10812_v34  ;;  %7771 = vmatpush1.bf16.msra.mxu1 %v10815_v35  ;;  %v10907_v34 = vld [vmem:[%s14255_s1 + $0x1f68] ss:$16 sps:$4 sm:$0xff]   ;;  %v10912_v35 = vld [vmem:[%s14255_s1 + $0x1f84] ss:$16 sps:$4 sm:$0xff]  }
 0x3c9   : > { %7116 = vmatprep.subr.bf16.mxu0 %v10820_v36  ;;  %7772 = vmatprep.subr.bf16.mxu1 %v10823_v37  ;;  %v10915_v36 = vld [vmem:[%s14255_s1 + $0x1f8c] ss:$16 sps:$4 sm:$0xff]   ;;  %v10910_v37 = vld [vmem:[%s14255_s1 + $0x1f80] ss:$16 sps:$4 sm:$0xff]  }
 0x3cc   : > { %7117 = vmatpush1.bf16.msra.mxu0 %v10818_v32  ;;  %7773 = vmatpush1.bf16.msra.mxu1 %v10821_v39  ;;  %v10913_v32 = vld [vmem:[%s14255_s1 + $0x1f88] ss:$16 sps:$4 sm:$0xff]   ;;  %v10918_v39 = vld [vmem:[%s14255_s1 + $0x1fa4] ss:$16 sps:$4 sm:$0xff]  }
 0x3cd   : > { %7118 = vmatprep.subr.bf16.mxu0 %v10826_v40  ;;  %7774 = vmatprep.subr.bf16.mxu1 %v10829_v29  ;;  %v10921_v40 = vld [vmem:[%s14255_s1 + $0x1fac] ss:$16 sps:$4 sm:$0xff]   ;;  %v10916_v29 = vld [vmem:[%s14255_s1 + $0x1fa0] ss:$16 sps:$4 sm:$0xff]  }
 0x3d0   : > { %7119 = vmatpush1.bf16.msra.mxu0 %v10824_v42  ;;  %7775 = vmatpush1.bf16.msra.mxu1 %v10827_v43  ;;  %v10919_v42 = vld [vmem:[%s14255_s1 + $0x1fa8] ss:$16 sps:$4 sm:$0xff]   ;;  %v10924_v43 = vld [vmem:[%s14255_s1 + $0x1fc4] ss:$16 sps:$4 sm:$0xff]  }
 0x3d1   : > { %7120 = vmatprep.subr.bf16.mxu0 %v10832_v38  ;;  %7776 = vmatprep.subr.bf16.mxu1 %v10835_v45  ;;  %v10927_v38 = vld [vmem:[%s14255_s1 + $0x1fcc] ss:$16 sps:$4 sm:$0xff]   ;;  %v10922_v45 = vld [vmem:[%s14255_s1 + $0x1fc0] ss:$16 sps:$4 sm:$0xff]  }
 0x3d4   : > { %7121 = vmatpush1.bf16.msra.mxu0 %v10830_v46  ;;  %7777 = vmatpush1.bf16.msra.mxu1 %v10833_v41  ;;  %v10925_v46 = vld [vmem:[%s14255_s1 + $0x1fc8] ss:$16 sps:$4 sm:$0xff]   ;;  %v10930_v41 = vld [vmem:[%s14255_s1 + $0x1fe4] ss:$16 sps:$4 sm:$0xff]  }
 0x3d5   : > { %7131 = vmatprep.subr.bf16.mxu0 %v10840_v48  ;;  %7787 = vmatprep.subr.bf16.mxu1 %v10843_v49  ;;  %v10933_v48 = vld [vmem:[%s14255_s1 + $0x1fec] ss:$16 sps:$4 sm:$0xff]   ;;  %v10928_v49 = vld [vmem:[%s14255_s1 + $0x1fe0] ss:$16 sps:$4 sm:$0xff]  }
 0x3d7   : > { %7123 = vmatmul.mubr.bf16.vlgmr.msra.gmra.mrb[0].mxu0 %v8182_v44  ;;  %7779 = vmatmul.mubr.bf16.vlgmr.msra.gmra.mrb[0].mxu1 %v8182_v44  ;;  %v10931_v44 = vld [vmem:[%s14255_s1 + $0x1fe8] ss:$16 sps:$4 sm:$0xff]  }
 0x3d8   : > { %7132 = vmatpush1.bf16.msra.mxu0 %v10838_v51  ;;  %7788 = vmatpush1.bf16.msra.mxu1 %v10841_v52  ;;  %v8184_v51 = vcombine.low %v14029_v50, %v14029_v50  ;;  %v10963_v52 = vmov 1966171168  }
 0x3d9   : > { %7133 = vmatprep.subr.bf16.mxu0 %v10846_v47  ;;  %7789 = vmatprep.subr.bf16.mxu1 %v10849_v53  ;;  %v7870_v47 = vunpack.c.l.s4 %v10963_v52  ;;  %v7872_v53 = vlaneseq }
 0x3da   : > { %7163 = vmatprep.mubr.bf16.mxu0 %v8185_v54  ;;  %7819 = vmatprep.mubr.bf16.mxu1 %v8185_v54 }
 0x3db   : > { %v7871_v54 = vunpack.c.0.s8 %v7870_v47  ;;  %vm7895_vm1 = vcmp.lt.s32.totalorder %v7872_v53, 512 }
 0x3dc   : > { %7134 = vmatpush1.bf16.msra.mxu0 %v10844_v55  ;;  %7790 = vmatpush1.bf16.msra.mxu1 %v10847_v56  ;;  %v7873_v55 = vshrl.u32 %v7872_v53, 7 }
 0x3dd   : > { %7135 = vmatprep.subr.bf16.mxu0 %v10852_v57  ;;  %7791 = vmatprep.subr.bf16.mxu1 %v10855_v58 }
 0x3de   : > { %v14222_v58 = vsub.s32 %v7871_v54, %v7873_v55 }
 0x3e0   : > { %7136 = vmatpush1.bf16.msra.mxu0 %v10850_v59  ;;  %7792 = vmatpush1.bf16.msra.mxu1 %v10853_v60 }
 0x3e1   : > { %7137 = vmatprep.subr.bf16.mxu0 %v10858_v61  ;;  %7793 = vmatprep.subr.bf16.mxu1 %v10861_v62 }
 0x3e4   : > { %7138 = vmatpush1.bf16.msra.mxu0 %v10856_v63  ;;  %7794 = vmatpush1.bf16.msra.mxu1 %v10859_v0 }
 0x3e5   : > { %7139 = vmatprep.subr.bf16.mxu0 %v10864_v1  ;;  %7795 = vmatprep.subr.bf16.mxu1 %v10867_v2 }
 0x3e8   : > { %7140 = vmatpush1.bf16.msra.mxu0 %v10862_v3  ;;  %7796 = vmatpush1.bf16.msra.mxu1 %v10865_v4 }
 0x3e9   : > { %7141 = vmatprep.subr.bf16.mxu0 %v10870_v5  ;;  %7797 = vmatprep.subr.bf16.mxu1 %v10873_v6 }
 0x3ec   : > { %7142 = vmatpush1.bf16.msra.mxu0 %v10868_v7  ;;  %7798 = vmatpush1.bf16.msra.mxu1 %v10871_v8 }
 0x3ed   : > { %7143 = vmatprep.subr.bf16.mxu0 %v10876_v9  ;;  %7799 = vmatprep.subr.bf16.mxu1 %v10879_v10 }
 0x3f0   : > { %7144 = vmatpush1.bf16.msra.mxu0 %v10874_v11  ;;  %7800 = vmatpush1.bf16.msra.mxu1 %v10877_v12 }
 0x3f1   : > { %7145 = vmatprep.subr.bf16.mxu0 %v10882_v14  ;;  %7801 = vmatprep.subr.bf16.mxu1 %v10885_v15 }
 0x3f4   : > { %7146 = vmatpush1.bf16.msra.mxu0 %v10880_v17  ;;  %7802 = vmatpush1.bf16.msra.mxu1 %v10883_v13 }
 0x3f5   : > { %7147 = vmatprep.subr.bf16.mxu0 %v10888_v19  ;;  %7803 = vmatprep.subr.bf16.mxu1 %v10891_v16 }
 0x3f8   : > { %7148 = vmatpush1.bf16.msra.mxu0 %v10886_v21  ;;  %7804 = vmatpush1.bf16.msra.mxu1 %v10889_v22 }
 0x3f9   : > { %7149 = vmatprep.subr.bf16.mxu0 %v10894_v18  ;;  %7805 = vmatprep.subr.bf16.mxu1 %v10897_v24 }
 0x3fc   : > { %7150 = vmatpush1.bf16.msra.mxu0 %v10892_v25  ;;  %7806 = vmatpush1.bf16.msra.mxu1 %v10895_v20 }
 0x3fd   : > { %7151 = vmatprep.subr.bf16.mxu0 %v10900_v27  ;;  %7807 = vmatprep.subr.bf16.mxu1 %v10903_v28 }
 0x400   : > { %7152 = vmatpush1.bf16.msra.mxu0 %v10898_v23  ;;  %7808 = vmatpush1.bf16.msra.mxu1 %v10901_v30 }
 0x401   : > { %7153 = vmatprep.subr.bf16.mxu0 %v10906_v31  ;;  %7809 = vmatprep.subr.bf16.mxu1 %v10909_v26 }
 0x404   : > { %7154 = vmatpush1.bf16.msra.mxu0 %v10904_v33  ;;  %7810 = vmatpush1.bf16.msra.mxu1 %v10907_v34 }
 0x405   : > { %7155 = vmatprep.subr.bf16.mxu0 %v10912_v35  ;;  %7811 = vmatprep.subr.bf16.mxu1 %v10915_v36 }
 0x408   : > { %7156 = vmatpush1.bf16.msra.mxu0 %v10910_v37  ;;  %7812 = vmatpush1.bf16.msra.mxu1 %v10913_v32 }
 0x409   : > { %7157 = vmatprep.subr.bf16.mxu0 %v10918_v39  ;;  %7813 = vmatprep.subr.bf16.mxu1 %v10921_v40 }
 0x40c   : > { %7158 = vmatpush1.bf16.msra.mxu0 %v10916_v29  ;;  %7814 = vmatpush1.bf16.msra.mxu1 %v10919_v42 }
 0x40d   : > { %7159 = vmatprep.subr.bf16.mxu0 %v10924_v43  ;;  %7815 = vmatprep.subr.bf16.mxu1 %v10927_v38 }
 0x410   : > { %7160 = vmatpush1.bf16.msra.mxu0 %v10922_v45  ;;  %7816 = vmatpush1.bf16.msra.mxu1 %v10925_v46 }
 0x411   : > { %7161 = vmatprep.subr.bf16.mxu0 %v10930_v41  ;;  %7817 = vmatprep.subr.bf16.mxu1 %v10933_v48 }
 0x414   : > { %7162 = vmatpush1.bf16.msra.mxu0 %v10928_v49  ;;  %7818 = vmatpush1.bf16.msra.mxu1 %v10931_v44 }
 0x417   : > { %7164 = vmatmul.mubr.bf16.vlgmr.msra.gmra.mrb[0].mxu0 %v8184_v51  ;;  %7820 = vmatmul.mubr.bf16.vlgmr.msra.gmra.mrb[0].mxu1 %v8184_v51 }
 0x4ea   : > { %v7165_v56 = vpop.f32.mrb[0].mxu0  ;;  %v7821_v57 = vpop.f32.mrb[0].mxu1 }
 0x4eb   : > { %7834 = vst [vmem:[#allocation2] sm:$0xff] %v7165_v56  ;;  %v7839_v59 = vrot.slane %v7165_v56, 4  ;;  %v7899_v60 = vmul.f32 %v7165_v56, %v7165_v56  ;;  %7836 = vst [vmem:[#allocation2 + $0x10] sm:$0xff] %v7821_v57  ;;  %v7851_v61 = vrot.slane %v7821_v57, 4  ;;  %v7901_v50 = vmul.f32 %v7821_v57, %v7821_v57  ;;  %v7167_v62 = vpop.f32.mrb[1].mxu0  ;;  %v7823_v63 = vpop.f32.mrb[1].mxu1 }
 0x4ec   : > { %7835 = vst [vmem:[#allocation2 + $0x8] sm:$0xff] %v7167_v62  ;;  %v7845_v0 = vrot.slane %v7167_v62, 4  ;;  %v7900_v1 = vmul.f32 %v7167_v62, %v7167_v62  ;;  %7837 = vst [vmem:[#allocation2 + $0x18] sm:$0xff] %v7823_v63  ;;  %v7857_v2 = vrot.slane %v7823_v63, 4  ;;  %v7902_v3 = vmul.f32 %v7823_v63, %v7823_v63  ;;  %v7169_v4 = vpop.f32.mrb[2].mxu0  ;;  %v7825_v5 = vpop.f32.mrb[2].mxu1 }
 0x4ed   : > { %v7840_v6 = vadd.f32 %v7839_v59, %v7165_v56  ;;  %v7903_v7 = vrot.slane %v7899_v60, 4  ;;  %v7852_v8 = vadd.f32 %v7851_v61, %v7821_v57  ;;  %v7915_v9 = vrot.slane %v7901_v50, 4  ;;  %v7170_v10 = vpop.f32.mrb[3].mxu0  ;;  %v7826_v11 = vpop.f32.mrb[3].mxu1 }
 0x4ee   : > { %v7846_v12 = vadd.f32 %v7845_v0, %v7167_v62  ;;  %v7909_v14 = vrot.slane %v7900_v1, 4  ;;  %v7858_v15 = vadd.f32 %v7857_v2, %v7823_v63  ;;  %v7921_v17 = vrot.slane %v7902_v3, 4  ;;  %v7838_v63 = vld [vmem:[#allocation3] sm:$0xf]  ;;  %v7898_v2 = vld [vmem:[#allocation4] sm:$0xf] }
 0x4ef   : > { %v7841_v13 = vrot.slane %v7840_v6, 2  ;;  %v7904_v19 = vadd.f32 %v7903_v7, %v7899_v60  ;;  %v7853_v16 = vrot.slane %v7852_v8, 2  ;;  %v7916_v21 = vadd.f32 %v7915_v9, %v7901_v50 }
 0x4f0   : > { %v7847_v22 = vrot.slane %v7846_v12, 2  ;;  %v7910_v18 = vadd.f32 %v7909_v14, %v7900_v1  ;;  %v7859_v24 = vrot.slane %v7858_v15, 2  ;;  %v7922_v25 = vadd.f32 %v7921_v17, %v7902_v3 }
 0x4f1   : > { %v7842_v20 = vadd.f32 %v7841_v13, %v7840_v6  ;;  %v7905_v27 = vrot.slane %v7904_v19, 2  ;;  %v7854_v28 = vadd.f32 %v7853_v16, %v7852_v8  ;;  %v7917_v23 = vrot.slane %v7916_v21, 2 }
 0x4f2   : > { %v7848_v30 = vadd.f32 %v7847_v22, %v7846_v12  ;;  %v7911_v31 = vrot.slane %v7910_v18, 2  ;;  %v7860_v26 = vadd.f32 %v7859_v24, %v7858_v15  ;;  %v7923_v33 = vrot.slane %v7922_v25, 2 }
 0x4f3   : > { %v7843_v34 = vrot.slane %v7842_v20, 1  ;;  %v7906_v35 = vadd.f32 %v7905_v27, %v7904_v19  ;;  %v7855_v36 = vrot.slane %v7854_v28, 1  ;;  %v7918_v37 = vadd.f32 %v7917_v23, %v7916_v21 }
 0x4f4   : > { %v7849_v32 = vrot.slane %v7848_v30, 1  ;;  %v7912_v39 = vadd.f32 %v7911_v31, %v7910_v18  ;;  %v7861_v40 = vrot.slane %v7860_v26, 1  ;;  %v7924_v29 = vadd.f32 %v7923_v33, %v7922_v25 }
 0x4f5   : > { %v7844_v42 = vadd.f32 %v7843_v34, %v7842_v20  ;;  %v7907_v43 = vrot.slane %v7906_v35, 1  ;;  %v7856_v38 = vadd.f32 %v7855_v36, %v7854_v28  ;;  %v7919_v45 = vrot.slane %v7918_v37, 1 }
 0x4f6   : > { %v7850_v46 = vadd.f32 %v7849_v32, %v7848_v30  ;;  %v7913_v41 = vrot.slane %v7912_v39, 1  ;;  %v7862_v48 = vadd.f32 %v7861_v40, %v7860_v26  ;;  %v7925_v49 = vrot.slane %v7924_v29, 1 }
 0x4f7   : > { %v7908_v44 = vadd.f32 %v7907_v43, %v7906_v35  ;;  %v7920_v51 = vadd.f32 %v7919_v45, %v7918_v37 }
 0x4f8   : > { %v7867_v52 = vcombine.low %v7844_v42, %v7850_v46  ;;  %v7914_v47 = vadd.f32 %v7913_v41, %v7912_v39  ;;  %v7868_v54 = vcombine.low %v7856_v38, %v7862_v48  ;;  %v7926_v55 = vadd.f32 %v7925_v49, %v7924_v29 }
 0x4fa   : > { %v7875_v56 = vrot.slane %v7867_v52, %v14222_v58  ;;  %v7931_v57 = vcombine.low %v7908_v44, %v7914_v47  ;;  %v7882_v59 = vrot.slane %v7868_v54, %v14222_v58  ;;  %v7932_v60 = vcombine.low %v7920_v51, %v7926_v55 }
 0x4fc   : > { %v7939_v61 = vrot.slane %v7931_v57, %v14222_v58  ;;  %v7883_v50 = vcombine.low %v7875_v56, %v7882_v59  ;;  %v7946_v62 = vrot.slane %v7932_v60, %v14222_v58 }
 0x4fe   : > { %v7890_v0 = vrot.slane %v7883_v50, %v14222_v58  ;;  %v7947_v1 = vcombine.low %v7939_v61, %v7946_v62 }
 0x500   : > { %v7892_v3 = vadd.f32 %v7890_v0, %v7838_v63  ;;  %v7954_v4 = vrot.slane %v7947_v1, %v14222_v58 }
 0x502   : > { %7897 = vst.msk [vmem:[#allocation3] sm:$0xf] %vm7895_vm1, %v7892_v3  ;;  %v7956_v5 = vadd.f32 %v7954_v4, %v7898_v2 }
 0x504   : > { %7957 = vst.msk [vmem:[#allocation4] sm:$0xf] %vm7895_vm1, %v7956_v5 }
 0x505 PF: > { %p7958_p6 = scmp.eq.s32.totalorder %s10952_s15, 1 }
 0x506   : > { %v7974_v53 = vlaneseq (%p7958_p6)  ;;  %v7970_v58 = vld [vmem:[%s14256_s2] sm:$0xf] (%p7958_p6) }
 0x507   : > { %7962 = sbr.rel (!%p7958_p6) target bundleno = 1326 (0x52e), region = 48  ;;  %v7979_v13 = vld [vmem:[%s14257_s3] sm:$0xf] (%p7958_p6) }
 0x508   : > { %vm7976_vm2 = vcmp.lt.s32.totalorder (%p7958_p6), %v7974_v53, 512 }
 0x509   : > { %v7963_v6 = vld [vmem:[#allocation3] sm:$0xf] (%p7958_p6) }
 0x50a   : > { %v7964_v8 = vmul.f32 (%p7958_p6), 0.125, %v7963_v6 }
 0x50b   : > { %v7965_v7 = vld [vmem:[#allocation4] sm:$0xf] (%p7958_p6) }
 0x50c   : > { %v7966_v9 = vmul.f32 (%p7958_p6), 0.125, %v7965_v7  ;;  %v7967_v10 = vmul.f32 (%p7958_p6), %v7964_v8, %v7964_v8 }
 0x50e   : > { %v7968_v11 = vsub.f32 %v7966_v9, %v7967_v10 }
 0x510   : > { %v7969_v12 = vmax.f32 %v7968_v11, 0.0 }
 0x512   : > { %v7971_v14 = vadd.f32 1e-05, %v7969_v12 }
 0x514   : > { %10936 = vrsqrt.f32 %v7971_v14 }
 0x51e   : > { %v10937_v15 = vpop.eup %10936 }
 0x51f   : > { %v7973_v17 = vmul.f32 %v10937_v15, %v7970_v58 }
 0x521   : > { %7978 = vst.msk [vmem:[#allocation5] sm:$0xf] %vm7976_vm2, %v7973_v17 }
 0x528   : > { %v7980_v19 = vld [vmem:[#allocation5] sm:$0xf] }
 0x529   : > { %v7981_v16 = vmul.f32 %v7980_v19, %v7964_v8 }
 0x52b   : > { %v7982_v21 = vsub.f32 %v7979_v13, %v7981_v16 }
 0x52d   : > { %7983 = vst.msk [vmem:[#allocation6] sm:$0xf] %vm7976_vm2, %v7982_v21 }
 0x52e PF: > { %p9211_p7 = scmp.ne.s32.totalorder %s10952_s15, 1 }
 0x52f   : > { %v7999_v22 = vlaneseq (!%p9211_p7)  ;;  %v7997_v24 = vld [vmem:[#allocation5] sm:$0xf] (!%p9211_p7)  ;;  %v7993_v30 = vld [vmem:[#allocation2] sm:$0xff] (!%p9211_p7)  ;;  %v7995_v36 = vld [vmem:[#allocation2 + $0x10] sm:$0xff] (!%p9211_p7) }
 0x530   : > { %7986 = sbr.rel (%p9211_p7) target bundleno = 1347 (0x543), region = 52  ;;  %v7994_v31 = vld [vmem:[#allocation2 + $0x8] sm:$0xff] (!%p9211_p7)  ;;  %v7996_v37 = vld [vmem:[#allocation2 + $0x18] sm:$0xff] (!%p9211_p7) }
 0x531   : > { %v8000_v18 = vshrl.u32 (!%p9211_p7), %v7999_v22, 7 }
 0x533   : > { %v8001_v20 = vsub.s32 (!%p9211_p7), 0, %v8000_v18  ;;  %v8005_v27 = vsub.s32 (!%p9211_p7), 1, %v8000_v18  ;;  %v8009_v28 = vsub.s32 (!%p9211_p7), 2, %v8000_v18  ;;  %v8013_v23 = vsub.s32 (!%p9211_p7), 3, %v8000_v18 }
 0x534   : > { %v8023_v25 = vld [vmem:[#allocation6] sm:$0xf] (!%p9211_p7) }
 0x535   : > { %v8002_v26 = vrot.slane (!%p9211_p7), %v7997_v24, %v8001_v20  ;;  %v8006_v33 = vrot.slane (!%p9211_p7), %v7997_v24, %v8005_v27  ;;  %v8028_v34 = vrot.slane (!%p9211_p7), %v8023_v25, %v8001_v20  ;;  %v8032_v35 = vrot.slane (!%p9211_p7), %v8023_v25, %v8005_v27 }
 0x536   : > { %v8010_v32 = vrot.slane (!%p9211_p7), %v7997_v24, %v8009_v28  ;;  %v8014_v39 = vrot.slane (!%p9211_p7), %v7997_v24, %v8013_v23  ;;  %v8036_v40 = vrot.slane (!%p9211_p7), %v8023_v25, %v8009_v28  ;;  %v8040_v29 = vrot.slane (!%p9211_p7), %v8023_v25, %v8013_v23 }
 0x537   : > { %v8019_v42 = vmul.f32 %v8002_v26, %v7993_v30  ;;  %v8020_v43 = vmul.f32 %v8006_v33, %v7994_v31 }
 0x538   : > { %v8021_v38 = vmul.f32 %v8010_v32, %v7995_v36  ;;  %v8022_v45 = vmul.f32 %v8014_v39, %v7996_v37 }
 0x539   : > { %v8045_v46 = vadd.f32 %v8028_v34, %v8019_v42  ;;  %v8046_v41 = vadd.f32 %v8032_v35, %v8020_v43 }
 0x53a   : > { %v8047_v48 = vadd.f32 %v8036_v40, %v8021_v38  ;;  %v8048_v49 = vadd.f32 %v8040_v29, %v8022_v45 }
 0x53b   : > { %v8049_v44 = vmul.f32 0.2, %v8045_v46  ;;  %v8050_v51 = vmul.f32 0.2, %v8046_v41 }
 0x53c   : > { %v8051_v52 = vmul.f32 0.2, %v8047_v48  ;;  %v8052_v47 = vmul.f32 0.2, %v8048_v49 }
 0x53d   : > { %v8053_v54 = vmax.f32 %v8045_v46, %v8049_v44  ;;  %v8054_v55 = vmax.f32 %v8046_v41, %v8050_v51 }
 0x53e   : > { %v8055_v56 = vmax.f32 %v8047_v48, %v8051_v52  ;;  %v8056_v57 = vmax.f32 %v8048_v49, %v8052_v47 }
 0x53f   : > { %v9220_v59 = vpack.c.bf16 %v8054_v55, %v8053_v54 }
 0x540   : > { %v9221_v60 = vpack.c.bf16 %v8056_v57, %v8055_v56 }
 0x541   : > { %8073 = vst [vmem:[%s14258_s4] sm:$0xff] %v9220_v59 }
 0x542   : > { %8074 = vst [vmem:[%s14258_s4 + $0x8] sm:$0xff] %v9221_v60 }
 0x543 PF: > { %s14_s17 = sadd.s32 1, %s10960_s17   ;;  %s14259_s15 = smov %s10956_s16 }
 0x544   : > { %p11_p8 = scmp.ge.s32.totalorder %s14_s17, 4   ;;  %s14260_s16 = smov %s14262_s18 }
 0x546   :  { %13 = sbr.rel (!%p11_p8) target bundleno = 2 (0x2), region = 84 }

// kernel: discriminator_forward.9
= control target key start
LH: loop header
LB: loop body
LE: loop exit
PB: predicated region body
PF: predicated region fallthrough
CT: control target
= control target key end

     0   :  { %s5188_s1 = inlined_call_operand.vmem [shape: bf16[4608,128], index: 1, kind: input, shape index: {}]   ;;  %s5189_s0 = inlined_call_operand.vmem [shape: bf16[8,4608], index: 0, kind: input, shape index: {}]   ;;  %s5190_s2 = inlined_call_operand.vmem [shape: f32[1,128], index: 2, kind: input, shape index: {}]   ;;  %s5191_s3 = inlined_call_operand.vmem [shape: bf16[8,128], index: 3, kind: output, shape index: {}]  }
   0x1   :  { %v3917_v0 = vld [vmem:[%s5188_s1 + $0x40] sm:$0xff]   ;;  %v3921_v4 = vld [vmem:[%s5188_s1 + $0x48] sm:$0xff]   ;;  %v3925_v8 = vld [vmem:[%s5188_s1 + $0x50] sm:$0xff]  }
   0x2   :  { %v3918_v1 = vld [vmem:[%s5188_s1 + $0xc0] sm:$0xff]   ;;  %3521 = vmatprep.subr.bf16.mxu0 %v3917_v0  ;;  %v3922_v5 = vld [vmem:[%s5188_s1 + $0xc8] sm:$0xff]   ;;  %v3926_v9 = vld [vmem:[%s5188_s1 + $0xd0] sm:$0xff]  }
   0x3   :  { %v3919_v2 = vld [vmem:[%s5188_s1] sm:$0xff]   ;;  %3543 = vmatprep.subr.bf16.mxu1 %v3918_v1  ;;  %v3923_v6 = vld [vmem:[%s5188_s1 + $0x8] sm:$0xff]   ;;  %v3927_v10 = vld [vmem:[%s5188_s1 + $0x10] sm:$0xff]  }
   0x4   :  { %v3920_v3 = vld [vmem:[%s5188_s1 + $0x80] sm:$0xff]   ;;  %3522 = vmatpush3.bf16.msra.mxu0 %v3919_v2  ;;  %v3924_v7 = vld [vmem:[%s5188_s1 + $0x88] sm:$0xff]   ;;  %v3928_v11 = vld [vmem:[%s5188_s1 + $0x90] sm:$0xff]  }
   0x5   :  { %3544 = vmatpush3.bf16.msra.mxu1 %v3920_v3  ;;  %3523 = vmatprep.subr.bf16.mxu0 %v3921_v4  ;;  %v3929_v12 = vld [vmem:[%s5188_s1 + $0x58] sm:$0xff]   ;;  %v3933_v16 = vld [vmem:[%s5188_s1 + $0x60] sm:$0xff]   ;;  %v3937_v20 = vld [vmem:[%s5188_s1 + $0x68] sm:$0xff]  }
   0x6   :  { %3545 = vmatprep.subr.bf16.mxu1 %v3922_v5  ;;  %v3930_v13 = vld [vmem:[%s5188_s1 + $0xd8] sm:$0xff]   ;;  %v3934_v17 = vld [vmem:[%s5188_s1 + $0xe0] sm:$0xff]   ;;  %v3938_v21 = vld [vmem:[%s5188_s1 + $0xe8] sm:$0xff]  }
   0x7   :  { %v3931_v14 = vld [vmem:[%s5188_s1 + $0x18] sm:$0xff]   ;;  %v3935_v18 = vld [vmem:[%s5188_s1 + $0x20] sm:$0xff]   ;;  %v3939_v22 = vld [vmem:[%s5188_s1 + $0x28] sm:$0xff]  }
   0x8   :  { %3524 = vmatpush3.bf16.msra.mxu0 %v3923_v6  ;;  %v3932_v15 = vld [vmem:[%s5188_s1 + $0x98] sm:$0xff]   ;;  %v3936_v19 = vld [vmem:[%s5188_s1 + $0xa0] sm:$0xff]   ;;  %v3940_v23 = vld [vmem:[%s5188_s1 + $0xa8] sm:$0xff]  }
   0x9   :  { %3546 = vmatpush3.bf16.msra.mxu1 %v3924_v7  ;;  %3525 = vmatprep.subr.bf16.mxu0 %v3925_v8  ;;  %v3941_v24 = vld [vmem:[%s5188_s1 + $0x70] sm:$0xff]   ;;  %v3945_v28 = vld [vmem:[%s5188_s1 + $0x78] sm:$0xff]   ;;  %v15_v32 = vld [vmem:[%s5189_s0] sm:$0xff] }
   0xa   :  { %3547 = vmatprep.subr.bf16.mxu1 %v3926_v9  ;;  %v3942_v25 = vld [vmem:[%s5188_s1 + $0xf0] sm:$0xff]   ;;  %v3946_v29 = vld [vmem:[%s5188_s1 + $0xf8] sm:$0xff]   ;;  %v16_v33 = vld [vmem:[%s5189_s0 + $0x8] sm:$0xff]  ;;  %v3197_v34 = vcombine.low %v15_v32, %v15_v32  ;;  %v3198_v35 = vcombine.high %v15_v32, %v15_v32 }
   0xb   :  { %v3943_v26 = vld [vmem:[%s5188_s1 + $0x30] sm:$0xff]   ;;  %v3947_v30 = vld [vmem:[%s5188_s1 + $0x38] sm:$0xff]   ;;  %v3199_v36 = vcombine.low %v16_v33, %v16_v33  ;;  %v3200_v37 = vcombine.high %v16_v33, %v16_v33  ;;  %v3953_v38 = vld [vmem:[%s5188_s1 + $0x140] sm:$0xff]  }
   0xc   :  { %3526 = vmatpush3.bf16.msra.mxu0 %v3927_v10  ;;  %v3944_v27 = vld [vmem:[%s5188_s1 + $0xb0] sm:$0xff]   ;;  %v3948_v31 = vld [vmem:[%s5188_s1 + $0xb8] sm:$0xff]   ;;  %v3954_v39 = vld [vmem:[%s5188_s1 + $0x1c0] sm:$0xff]   ;;  %2502 = vmatprep.mubr.bf16.mxu0 %v3198_v35 }
   0xd   :  { %3548 = vmatpush3.bf16.msra.mxu1 %v3928_v11  ;;  %3527 = vmatprep.subr.bf16.mxu0 %v3929_v12  ;;  %v3955_v40 = vld [vmem:[%s5188_s1 + $0x100] sm:$0xff]   ;;  %v3957_v42 = vld [vmem:[%s5188_s1 + $0x148] sm:$0xff]   ;;  %v3961_v46 = vld [vmem:[%s5188_s1 + $0x150] sm:$0xff]  }
   0xe   :  { %3549 = vmatprep.subr.bf16.mxu1 %v3930_v13  ;;  %2542 = vmatprep.mubr.bf16.mxu1 %v3200_v37  ;;  %v3956_v41 = vld [vmem:[%s5188_s1 + $0x180] sm:$0xff]   ;;  %v3958_v43 = vld [vmem:[%s5188_s1 + $0x1c8] sm:$0xff]   ;;  %v3962_v47 = vld [vmem:[%s5188_s1 + $0x1d0] sm:$0xff]  }
   0xf   :  { %v3959_v44 = vld [vmem:[%s5188_s1 + $0x108] sm:$0xff]   ;;  %v3963_v48 = vld [vmem:[%s5188_s1 + $0x110] sm:$0xff]   ;;  %v3965_v50 = vld [vmem:[%s5188_s1 + $0x158] sm:$0xff]  }
  0x10   :  { %3528 = vmatpush3.bf16.msra.mxu0 %v3931_v14  ;;  %v3960_v45 = vld [vmem:[%s5188_s1 + $0x188] sm:$0xff]   ;;  %v3964_v49 = vld [vmem:[%s5188_s1 + $0x190] sm:$0xff]   ;;  %v3966_v51 = vld [vmem:[%s5188_s1 + $0x1d8] sm:$0xff]  }
  0x11   :  { %3550 = vmatpush3.bf16.msra.mxu1 %v3932_v15  ;;  %3529 = vmatprep.subr.bf16.mxu0 %v3933_v16  ;;  %v3967_v52 = vld [vmem:[%s5188_s1 + $0x118] sm:$0xff]   ;;  %v3969_v54 = vld [vmem:[%s5188_s1 + $0x160] sm:$0xff]   ;;  %v3973_v58 = vld [vmem:[%s5188_s1 + $0x168] sm:$0xff]  }
  0x12   :  { %3551 = vmatprep.subr.bf16.mxu1 %v3934_v17  ;;  %v3968_v53 = vld [vmem:[%s5188_s1 + $0x198] sm:$0xff]   ;;  %v3970_v55 = vld [vmem:[%s5188_s1 + $0x1e0] sm:$0xff]   ;;  %v3974_v59 = vld [vmem:[%s5188_s1 + $0x1e8] sm:$0xff]  }
  0x13   :  { %v3971_v56 = vld [vmem:[%s5188_s1 + $0x120] sm:$0xff]   ;;  %v3975_v60 = vld [vmem:[%s5188_s1 + $0x128] sm:$0xff]   ;;  %v3977_v62 = vld [vmem:[%s5188_s1 + $0x170] sm:$0xff]  }
  0x14   :  { %3530 = vmatpush3.bf16.msra.mxu0 %v3935_v18  ;;  %v3972_v57 = vld [vmem:[%s5188_s1 + $0x1a0] sm:$0xff]   ;;  %v3976_v61 = vld [vmem:[%s5188_s1 + $0x1a8] sm:$0xff]   ;;  %v3978_v63 = vld [vmem:[%s5188_s1 + $0x1f0] sm:$0xff]  }
  0x15   :  { %3552 = vmatpush3.bf16.msra.mxu1 %v3936_v19  ;;  %3531 = vmatprep.subr.bf16.mxu0 %v3937_v20  ;;  %v3979_v0 = vld [vmem:[%s5188_s1 + $0x130] sm:$0xff]   ;;  %v3981_v2 = vld [vmem:[%s5188_s1 + $0x178] sm:$0xff]   ;;  %v3989_v12 = vld [vmem:[%s5188_s1 + $0x240] sm:$0xff]  }
  0x16   :  { %3553 = vmatprep.subr.bf16.mxu1 %v3938_v21  ;;  %v3980_v1 = vld [vmem:[%s5188_s1 + $0x1b0] sm:$0xff]   ;;  %v3982_v3 = vld [vmem:[%s5188_s1 + $0x1f8] sm:$0xff]   ;;  %v3990_v13 = vld [vmem:[%s5188_s1 + $0x2c0] sm:$0xff]  }
  0x17   :  { %v3983_v4 = vld [vmem:[%s5188_s1 + $0x138] sm:$0xff]   ;;  %v17_v6 = vld [vmem:[%s5189_s0 + $0x10] sm:$0xff]  ;;  %v3991_v14 = vld [vmem:[%s5188_s1 + $0x200] sm:$0xff]  }
  0x18   :  { %3532 = vmatpush3.bf16.msra.mxu0 %v3939_v22  ;;  %v3984_v5 = vld [vmem:[%s5188_s1 + $0x1b8] sm:$0xff]   ;;  %v3201_v7 = vcombine.low %v17_v6, %v17_v6  ;;  %v3202_v8 = vcombine.high %v17_v6, %v17_v6  ;;  %v3992_v15 = vld [vmem:[%s5188_s1 + $0x280] sm:$0xff]   ;;  %v3993_v16 = vld [vmem:[%s5188_s1 + $0x248] sm:$0xff]  }
  0x19   :  { %3554 = vmatpush3.bf16.msra.mxu1 %v3940_v23  ;;  %3533 = vmatprep.subr.bf16.mxu0 %v3941_v24  ;;  %v18_v9 = vld [vmem:[%s5189_s0 + $0x18] sm:$0xff]  ;;  %v3994_v17 = vld [vmem:[%s5188_s1 + $0x2c8] sm:$0xff]   ;;  %v3997_v20 = vld [vmem:[%s5188_s1 + $0x250] sm:$0xff]  }
  0x1a   :  { %3555 = vmatprep.subr.bf16.mxu1 %v3942_v25  ;;  %v3203_v10 = vcombine.low %v18_v9, %v18_v9  ;;  %v3204_v11 = vcombine.high %v18_v9, %v18_v9  ;;  %v3995_v18 = vld [vmem:[%s5188_s1 + $0x208] sm:$0xff]   ;;  %v3998_v21 = vld [vmem:[%s5188_s1 + $0x2d0] sm:$0xff]   ;;  %v4001_v24 = vld [vmem:[%s5188_s1 + $0x258] sm:$0xff]  }
  0x1b   :  { %v3996_v19 = vld [vmem:[%s5188_s1 + $0x288] sm:$0xff]   ;;  %v3999_v22 = vld [vmem:[%s5188_s1 + $0x210] sm:$0xff]   ;;  %v4002_v25 = vld [vmem:[%s5188_s1 + $0x2d8] sm:$0xff]  }
  0x1c   :  { %3534 = vmatpush3.bf16.msra.mxu0 %v3943_v26  ;;  %v4000_v23 = vld [vmem:[%s5188_s1 + $0x290] sm:$0xff]   ;;  %v4003_v26 = vld [vmem:[%s5188_s1 + $0x218] sm:$0xff]   ;;  %v4009_v32 = vld [vmem:[%s5188_s1 + $0x268] sm:$0xff]  }
  0x1d   :  { %3556 = vmatpush3.bf16.msra.mxu1 %v3944_v27  ;;  %3535 = vmatprep.subr.bf16.mxu0 %v3945_v28  ;;  %v4004_v27 = vld [vmem:[%s5188_s1 + $0x298] sm:$0xff]   ;;  %v4005_v28 = vld [vmem:[%s5188_s1 + $0x260] sm:$0xff]   ;;  %v4010_v33 = vld [vmem:[%s5188_s1 + $0x2e8] sm:$0xff]  }
  0x1e   :  { %3557 = vmatprep.subr.bf16.mxu1 %v3946_v29  ;;  %v4006_v29 = vld [vmem:[%s5188_s1 + $0x2e0] sm:$0xff]   ;;  %v4012_v35 = vld [vmem:[%s5188_s1 + $0x2a8] sm:$0xff]   ;;  %v4014_v37 = vld [vmem:[%s5188_s1 + $0x2f0] sm:$0xff]  }
  0x1f   :  { %v4045_v6 = vld [vmem:[%s5188_s1 + $0x368] sm:$0xff]  }
  0x20   :  { %3536 = vmatpush3.bf16.msra.mxu0 %v3947_v30  ;;  %v4007_v30 = vld [vmem:[%s5188_s1 + $0x220] sm:$0xff]   ;;  %v4048_v9 = vld [vmem:[%s5188_s1 + $0x3a8] sm:$0xff]  }
  0x21   :  { %3558 = vmatpush3.bf16.msra.mxu1 %v3948_v31  ;;  %3565 = vmatprep.subr.bf16.mxu0 %v3953_v38  ;;  %v4008_v31 = vld [vmem:[%s5188_s1 + $0x2a0] sm:$0xff]   ;;  %v4015_v38 = vld [vmem:[%s5188_s1 + $0x230] sm:$0xff]  }
  0x22   :  { %3587 = vmatprep.subr.bf16.mxu1 %v3954_v39  ;;  %v4016_v39 = vld [vmem:[%s5188_s1 + $0x2b0] sm:$0xff]  }
  0x23   :  { %2503 = vmatmul.mubr.bf16.vlgmr.msra.gmra.mrb[0].mxu0 %v3197_v34  ;;  %v4011_v34 = vld [vmem:[%s5188_s1 + $0x228] sm:$0xff]  }
  0x24   :  { %2543 = vmatmul.mubr.bf16.vlgmr.msra.gmra.mrb[0].mxu1 %v3199_v36  ;;  %3566 = vmatpush3.bf16.msra.mxu0 %v3955_v40  ;;  %v4013_v36 = vld [vmem:[%s5188_s1 + $0x270] sm:$0xff]   ;;  %v4017_v40 = vld [vmem:[%s5188_s1 + $0x278] sm:$0xff]  }
  0x25   :  { %3588 = vmatpush3.bf16.msra.mxu1 %v3956_v41  ;;  %3567 = vmatprep.subr.bf16.mxu0 %v3957_v42  ;;  %v4018_v41 = vld [vmem:[%s5188_s1 + $0x2f8] sm:$0xff]  }
  0x26   :  { %3589 = vmatprep.subr.bf16.mxu1 %v3958_v43  ;;  %2582 = vmatprep.mubr.bf16.mxu0 %v3202_v8  ;;  %v4019_v42 = vld [vmem:[%s5188_s1 + $0x238] sm:$0xff]   ;;  %v4047_v8 = vld [vmem:[%s5188_s1 + $0x328] sm:$0xff]  }
  0x27   :  { %2622 = vmatprep.mubr.bf16.mxu1 %v3204_v11  ;;  %v4020_v43 = vld [vmem:[%s5188_s1 + $0x2b8] sm:$0xff]   ;;  %v4050_v11 = vld [vmem:[%s5188_s1 + $0x3f0] sm:$0xff]  }
  0x28   :  { %3568 = vmatpush3.bf16.msra.mxu0 %v3959_v44  ;;  %v19_v44 = vld [vmem:[%s5189_s0 + $0x20] sm:$0xff] }
  0x29   :  { %3590 = vmatpush3.bf16.msra.mxu1 %v3960_v45  ;;  %3569 = vmatprep.subr.bf16.mxu0 %v3961_v46  ;;  %v20_v45 = vld [vmem:[%s5189_s0 + $0x28] sm:$0xff]  ;;  %v3205_v46 = vcombine.low %v19_v44, %v19_v44 }
  0x2a   :  { %3591 = vmatprep.subr.bf16.mxu1 %v3962_v47  ;;  %v3206_v47 = vcombine.high %v19_v44, %v19_v44  ;;  %v4081_v44 = vld [vmem:[%s5188_s1 + $0x468] sm:$0xff]  }
  0x2c   :  { %3570 = vmatpush3.bf16.msra.mxu0 %v3963_v48  ;;  %v3207_v48 = vcombine.low %v20_v45, %v20_v45 }
  0x2d   :  { %3592 = vmatpush3.bf16.msra.mxu1 %v3964_v49  ;;  %3571 = vmatprep.subr.bf16.mxu0 %v3965_v50  ;;  %v3208_v49 = vcombine.high %v20_v45, %v20_v45  ;;  %v4025_v50 = vld [vmem:[%s5188_s1 + $0x340] sm:$0xff]   ;;  %v4082_v45 = vld [vmem:[%s5188_s1 + $0x4e8] sm:$0xff]  }
  0x2e   :  { %3593 = vmatprep.subr.bf16.mxu1 %v3966_v51  ;;  %v4026_v51 = vld [vmem:[%s5188_s1 + $0x3c0] sm:$0xff]  }
  0x30   :  { %3572 = vmatpush3.bf16.msra.mxu0 %v3967_v52  ;;  %v4027_v52 = vld [vmem:[%s5188_s1 + $0x300] sm:$0xff]  }
  0x31   :  { %3594 = vmatpush3.bf16.msra.mxu1 %v3968_v53  ;;  %3573 = vmatprep.subr.bf16.mxu0 %v3969_v54  ;;  %v4028_v53 = vld [vmem:[%s5188_s1 + $0x380] sm:$0xff]   ;;  %v4029_v54 = vld [vmem:[%s5188_s1 + $0x348] sm:$0xff]  }
  0x32   :  { %3595 = vmatprep.subr.bf16.mxu1 %v3970_v55  ;;  %v4030_v55 = vld [vmem:[%s5188_s1 + $0x3c8] sm:$0xff]  }
  0x34   :  { %3574 = vmatpush3.bf16.msra.mxu0 %v3971_v56  ;;  %v4031_v56 = vld [vmem:[%s5188_s1 + $0x308] sm:$0xff]  }
  0x35   :  { %3596 = vmatpush3.bf16.msra.mxu1 %v3972_v57  ;;  %3575 = vmatprep.subr.bf16.mxu0 %v3973_v58  ;;  %v4032_v57 = vld [vmem:[%s5188_s1 + $0x388] sm:$0xff]   ;;  %v4033_v58 = vld [vmem:[%s5188_s1 + $0x350] sm:$0xff]  }
  0x36   :  { %3597 = vmatprep.subr.bf16.mxu1 %v3974_v59  ;;  %v4034_v59 = vld [vmem:[%s5188_s1 + $0x3d0] sm:$0xff]  }
  0x38   :  { %3576 = vmatpush3.bf16.msra.mxu0 %v3975_v60  ;;  %v4035_v60 = vld [vmem:[%s5188_s1 + $0x310] sm:$0xff]  }
  0x39   :  { %3598 = vmatpush3.bf16.msra.mxu1 %v3976_v61  ;;  %3577 = vmatprep.subr.bf16.mxu0 %v3977_v62  ;;  %v4036_v61 = vld [vmem:[%s5188_s1 + $0x390] sm:$0xff]   ;;  %v4037_v62 = vld [vmem:[%s5188_s1 + $0x358] sm:$0xff]  }
  0x3a   :  { %3599 = vmatprep.subr.bf16.mxu1 %v3978_v63  ;;  %v4038_v63 = vld [vmem:[%s5188_s1 + $0x3d8] sm:$0xff]  }
  0x3c   :  { %3578 = vmatpush3.bf16.msra.mxu0 %v3979_v0  ;;  %v4039_v0 = vld [vmem:[%s5188_s1 + $0x318] sm:$0xff]  }
  0x3d   :  { %3600 = vmatpush3.bf16.msra.mxu1 %v3980_v1  ;;  %3579 = vmatprep.subr.bf16.mxu0 %v3981_v2  ;;  %v4040_v1 = vld [vmem:[%s5188_s1 + $0x398] sm:$0xff]   ;;  %v4041_v2 = vld [vmem:[%s5188_s1 + $0x360] sm:$0xff]  }
  0x3e   :  { %3601 = vmatprep.subr.bf16.mxu1 %v3982_v3  ;;  %v4042_v3 = vld [vmem:[%s5188_s1 + $0x3e0] sm:$0xff]  }
  0x40   :  { %3580 = vmatpush3.bf16.msra.mxu0 %v3983_v4  ;;  %v4043_v4 = vld [vmem:[%s5188_s1 + $0x320] sm:$0xff]  }
  0x41   :  { %3602 = vmatpush3.bf16.msra.mxu1 %v3984_v5  ;;  %3609 = vmatprep.subr.bf16.mxu0 %v3989_v12  ;;  %v4044_v5 = vld [vmem:[%s5188_s1 + $0x3a0] sm:$0xff]   ;;  %v4051_v12 = vld [vmem:[%s5188_s1 + $0x330] sm:$0xff]  }
  0x42   :  { %3631 = vmatprep.subr.bf16.mxu1 %v3990_v13  ;;  %v4052_v13 = vld [vmem:[%s5188_s1 + $0x3b0] sm:$0xff]  }
  0x43   :  { %2583 = vmatmul.mubr.bf16.vlgmr.msra.gmra.mrb[4].mxu0 %v3201_v7  ;;  %v4046_v7 = vld [vmem:[%s5188_s1 + $0x3e8] sm:$0xff]  }
  0x44   :  { %2623 = vmatmul.mubr.bf16.vlgmr.msra.gmra.mrb[4].mxu1 %v3203_v10  ;;  %3610 = vmatpush3.bf16.msra.mxu0 %v3991_v14  ;;  %v4049_v10 = vld [vmem:[%s5188_s1 + $0x370] sm:$0xff]   ;;  %v4053_v14 = vld [vmem:[%s5188_s1 + $0x378] sm:$0xff]  }
  0x45   :  { %3632 = vmatpush3.bf16.msra.mxu1 %v3992_v15  ;;  %3611 = vmatprep.subr.bf16.mxu0 %v3993_v16  ;;  %v4054_v15 = vld [vmem:[%s5188_s1 + $0x3f8] sm:$0xff]  }
  0x46   :  { %3633 = vmatprep.subr.bf16.mxu1 %v3994_v17  ;;  %2662 = vmatprep.mubr.bf16.mxu0 %v3206_v47  ;;  %v4055_v16 = vld [vmem:[%s5188_s1 + $0x338] sm:$0xff]   ;;  %v4084_v47 = vld [vmem:[%s5188_s1 + $0x4a8] sm:$0xff]  }
  0x47   :  { %2702 = vmatprep.mubr.bf16.mxu1 %v3208_v49  ;;  %v4056_v17 = vld [vmem:[%s5188_s1 + $0x3b8] sm:$0xff]   ;;  %v4086_v49 = vld [vmem:[%s5188_s1 + $0x4f0] sm:$0xff]  }
  0x48   :  { %3612 = vmatpush3.bf16.msra.mxu0 %v3995_v18  ;;  %v21_v18 = vld [vmem:[%s5189_s0 + $0x30] sm:$0xff] }
  0x49   :  { %3634 = vmatpush3.bf16.msra.mxu1 %v3996_v19  ;;  %3613 = vmatprep.subr.bf16.mxu0 %v3997_v20  ;;  %v22_v19 = vld [vmem:[%s5189_s0 + $0x38] sm:$0xff]  ;;  %v3209_v20 = vcombine.low %v21_v18, %v21_v18 }
  0x4a   :  { %3635 = vmatprep.subr.bf16.mxu1 %v3998_v21  ;;  %v3210_v21 = vcombine.high %v21_v18, %v21_v18  ;;  %v4117_v18 = vld [vmem:[%s5188_s1 + $0x568] sm:$0xff]  }
  0x4c   :  { %3614 = vmatpush3.bf16.msra.mxu0 %v3999_v22  ;;  %v3211_v22 = vcombine.low %v22_v19, %v22_v19 }
  0x4d   :  { %3636 = vmatpush3.bf16.msra.mxu1 %v4000_v23  ;;  %3615 = vmatprep.subr.bf16.mxu0 %v4001_v24  ;;  %v4061_v23 = vld [vmem:[%s5188_s1 + $0x440] sm:$0xff]   ;;  %v3212_v24 = vcombine.high %v22_v19, %v22_v19  ;;  %v4118_v19 = vld [vmem:[%s5188_s1 + $0x5e8] sm:$0xff]  }
  0x4e   :  { %3637 = vmatprep.subr.bf16.mxu1 %v4002_v25  ;;  %v4062_v25 = vld [vmem:[%s5188_s1 + $0x4c0] sm:$0xff]  }
  0x50   :  { %3616 = vmatpush3.bf16.msra.mxu0 %v4003_v26  ;;  %v4063_v26 = vld [vmem:[%s5188_s1 + $0x400] sm:$0xff]  }
  0x51   :  { %3638 = vmatpush3.bf16.msra.mxu1 %v4004_v27  ;;  %3617 = vmatprep.subr.bf16.mxu0 %v4005_v28  ;;  %v4064_v27 = vld [vmem:[%s5188_s1 + $0x480] sm:$0xff]   ;;  %v4065_v28 = vld [vmem:[%s5188_s1 + $0x448] sm:$0xff]  }
  0x52   :  { %3639 = vmatprep.subr.bf16.mxu1 %v4006_v29  ;;  %v4066_v29 = vld [vmem:[%s5188_s1 + $0x4c8] sm:$0xff]  }
  0x54   :  { %3618 = vmatpush3.bf16.msra.mxu0 %v4007_v30  ;;  %v4067_v30 = vld [vmem:[%s5188_s1 + $0x408] sm:$0xff]  }
  0x55   :  { %3640 = vmatpush3.bf16.msra.mxu1 %v4008_v31  ;;  %3619 = vmatprep.subr.bf16.mxu0 %v4009_v32  ;;  %v4068_v31 = vld [vmem:[%s5188_s1 + $0x488] sm:$0xff]   ;;  %v4069_v32 = vld [vmem:[%s5188_s1 + $0x450] sm:$0xff]  }
  0x56   :  { %3641 = vmatprep.subr.bf16.mxu1 %v4010_v33  ;;  %v4070_v33 = vld [vmem:[%s5188_s1 + $0x4d0] sm:$0xff]  }
  0x58   :  { %3620 = vmatpush3.bf16.msra.mxu0 %v4011_v34  ;;  %v4071_v34 = vld [vmem:[%s5188_s1 + $0x410] sm:$0xff]  }
  0x59   :  { %3642 = vmatpush3.bf16.msra.mxu1 %v4012_v35  ;;  %3621 = vmatprep.subr.bf16.mxu0 %v4013_v36  ;;  %v4072_v35 = vld [vmem:[%s5188_s1 + $0x490] sm:$0xff]   ;;  %v4073_v36 = vld [vmem:[%s5188_s1 + $0x458] sm:$0xff]  }
  0x5a   :  { %3643 = vmatprep.subr.bf16.mxu1 %v4014_v37  ;;  %v4074_v37 = vld [vmem:[%s5188_s1 + $0x4d8] sm:$0xff]  }
  0x5c   :  { %3622 = vmatpush3.bf16.msra.mxu0 %v4015_v38  ;;  %v4075_v38 = vld [vmem:[%s5188_s1 + $0x418] sm:$0xff]  }
  0x5d   :  { %3644 = vmatpush3.bf16.msra.mxu1 %v4016_v39  ;;  %3623 = vmatprep.subr.bf16.mxu0 %v4017_v40  ;;  %v4076_v39 = vld [vmem:[%s5188_s1 + $0x498] sm:$0xff]   ;;  %v4077_v40 = vld [vmem:[%s5188_s1 + $0x460] sm:$0xff]  }
  0x5e   :  { %3645 = vmatprep.subr.bf16.mxu1 %v4018_v41  ;;  %v4078_v41 = vld [vmem:[%s5188_s1 + $0x4e0] sm:$0xff]  }
  0x60   :  { %3624 = vmatpush3.bf16.msra.mxu0 %v4019_v42  ;;  %v4079_v42 = vld [vmem:[%s5188_s1 + $0x420] sm:$0xff]  }
  0x61   :  { %3646 = vmatpush3.bf16.msra.mxu1 %v4020_v43  ;;  %3653 = vmatprep.subr.bf16.mxu0 %v4025_v50  ;;  %v4080_v43 = vld [vmem:[%s5188_s1 + $0x4a0] sm:$0xff]   ;;  %v4087_v50 = vld [vmem:[%s5188_s1 + $0x430] sm:$0xff]  }
  0x62   :  { %3675 = vmatprep.subr.bf16.mxu1 %v4026_v51  ;;  %v4088_v51 = vld [vmem:[%s5188_s1 + $0x4b0] sm:$0xff]  }
  0x63   :  { %2663 = vmatmul.mubr.bf16.vlgmr.msra.gmra.mrb[8].mxu0 %v3205_v46  ;;  %v4083_v46 = vld [vmem:[%s5188_s1 + $0x428] sm:$0xff]  }
  0x64   :  { %2703 = vmatmul.mubr.bf16.vlgmr.msra.gmra.mrb[8].mxu1 %v3207_v48  ;;  %3654 = vmatpush3.bf16.msra.mxu0 %v4027_v52  ;;  %v4085_v48 = vld [vmem:[%s5188_s1 + $0x470] sm:$0xff]   ;;  %v4089_v52 = vld [vmem:[%s5188_s1 + $0x478] sm:$0xff]  }
  0x65   :  { %3676 = vmatpush3.bf16.msra.mxu1 %v4028_v53  ;;  %3655 = vmatprep.subr.bf16.mxu0 %v4029_v54  ;;  %v4090_v53 = vld [vmem:[%s5188_s1 + $0x4f8] sm:$0xff]  }
  0x66   :  { %3677 = vmatprep.subr.bf16.mxu1 %v4030_v55  ;;  %2742 = vmatprep.mubr.bf16.mxu0 %v3210_v21  ;;  %v4091_v54 = vld [vmem:[%s5188_s1 + $0x438] sm:$0xff]   ;;  %v4120_v21 = vld [vmem:[%s5188_s1 + $0x5a8] sm:$0xff]  }
  0x67   :  { %2782 = vmatprep.mubr.bf16.mxu1 %v3212_v24  ;;  %v4092_v55 = vld [vmem:[%s5188_s1 + $0x4b8] sm:$0xff]   ;;  %v4123_v24 = vld [vmem:[%s5188_s1 + $0x530] sm:$0xff]  }
  0x68   :  { %3656 = vmatpush3.bf16.msra.mxu0 %v4031_v56  ;;  %v23_v56 = vld [vmem:[%s5189_s0 + $0x40] sm:$0xff] }
  0x69   :  { %3678 = vmatpush3.bf16.msra.mxu1 %v4032_v57  ;;  %3657 = vmatprep.subr.bf16.mxu0 %v4033_v58  ;;  %v3213_v57 = vcombine.low %v23_v56, %v23_v56  ;;  %v3214_v58 = vcombine.high %v23_v56, %v23_v56  ;;  %v4153_v56 = vld [vmem:[%s5188_s1 + $0x668] sm:$0xff]  }
  0x6a   :  { %3679 = vmatprep.subr.bf16.mxu1 %v4034_v59  ;;  %v24_v59 = vld [vmem:[%s5189_s0 + $0x48] sm:$0xff] }
  0x6c   :  { %3658 = vmatpush3.bf16.msra.mxu0 %v4035_v60  ;;  %v3215_v60 = vcombine.low %v24_v59, %v24_v59 }
  0x6d   :  { %3680 = vmatpush3.bf16.msra.mxu1 %v4036_v61  ;;  %3659 = vmatprep.subr.bf16.mxu0 %v4037_v62  ;;  %v3216_v61 = vcombine.high %v24_v59, %v24_v59  ;;  %v4097_v62 = vld [vmem:[%s5188_s1 + $0x540] sm:$0xff]   ;;  %v4156_v59 = vld [vmem:[%s5188_s1 + $0x6a8] sm:$0xff]  }
  0x6e   :  { %3681 = vmatprep.subr.bf16.mxu1 %v4038_v63  ;;  %v4098_v63 = vld [vmem:[%s5188_s1 + $0x5c0] sm:$0xff]  }
  0x70   :  { %3660 = vmatpush3.bf16.msra.mxu0 %v4039_v0  ;;  %v4099_v0 = vld [vmem:[%s5188_s1 + $0x500] sm:$0xff]  }
  0x71   :  { %3682 = vmatpush3.bf16.msra.mxu1 %v4040_v1  ;;  %3661 = vmatprep.subr.bf16.mxu0 %v4041_v2  ;;  %v4100_v1 = vld [vmem:[%s5188_s1 + $0x580] sm:$0xff]   ;;  %v4101_v2 = vld [vmem:[%s5188_s1 + $0x548] sm:$0xff]  }
  0x72   :  { %3683 = vmatprep.subr.bf16.mxu1 %v4042_v3  ;;  %v4102_v3 = vld [vmem:[%s5188_s1 + $0x5c8] sm:$0xff]  }
  0x74   :  { %3662 = vmatpush3.bf16.msra.mxu0 %v4043_v4  ;;  %v4103_v4 = vld [vmem:[%s5188_s1 + $0x508] sm:$0xff]  }
  0x75   :  { %3684 = vmatpush3.bf16.msra.mxu1 %v4044_v5  ;;  %3663 = vmatprep.subr.bf16.mxu0 %v4045_v6  ;;  %v4104_v5 = vld [vmem:[%s5188_s1 + $0x588] sm:$0xff]   ;;  %v4105_v6 = vld [vmem:[%s5188_s1 + $0x550] sm:$0xff]  }
  0x76   :  { %3685 = vmatprep.subr.bf16.mxu1 %v4046_v7  ;;  %v4106_v7 = vld [vmem:[%s5188_s1 + $0x5d0] sm:$0xff]  }
  0x78   :  { %3664 = vmatpush3.bf16.msra.mxu0 %v4047_v8  ;;  %v4107_v8 = vld [vmem:[%s5188_s1 + $0x510] sm:$0xff]  }
  0x79   :  { %3686 = vmatpush3.bf16.msra.mxu1 %v4048_v9  ;;  %3665 = vmatprep.subr.bf16.mxu0 %v4049_v10  ;;  %v4108_v9 = vld [vmem:[%s5188_s1 + $0x590] sm:$0xff]   ;;  %v4109_v10 = vld [vmem:[%s5188_s1 + $0x558] sm:$0xff]  }
  0x7a   :  { %3687 = vmatprep.subr.bf16.mxu1 %v4050_v11  ;;  %v4110_v11 = vld [vmem:[%s5188_s1 + $0x5d8] sm:$0xff]  }
  0x7c   :  { %3666 = vmatpush3.bf16.msra.mxu0 %v4051_v12  ;;  %v4111_v12 = vld [vmem:[%s5188_s1 + $0x518] sm:$0xff]  }
  0x7d   :  { %3688 = vmatpush3.bf16.msra.mxu1 %v4052_v13  ;;  %3667 = vmatprep.subr.bf16.mxu0 %v4053_v14  ;;  %v4112_v13 = vld [vmem:[%s5188_s1 + $0x598] sm:$0xff]   ;;  %v4113_v14 = vld [vmem:[%s5188_s1 + $0x560] sm:$0xff]  }
  0x7e   :  { %3689 = vmatprep.subr.bf16.mxu1 %v4054_v15  ;;  %v4114_v15 = vld [vmem:[%s5188_s1 + $0x5e0] sm:$0xff]  }
  0x80   :  { %3668 = vmatpush3.bf16.msra.mxu0 %v4055_v16  ;;  %v4115_v16 = vld [vmem:[%s5188_s1 + $0x520] sm:$0xff]  }
  0x81   :  { %3690 = vmatpush3.bf16.msra.mxu1 %v4056_v17  ;;  %3697 = vmatprep.subr.bf16.mxu0 %v4061_v23  ;;  %v4116_v17 = vld [vmem:[%s5188_s1 + $0x5a0] sm:$0xff]   ;;  %v4122_v23 = vld [vmem:[%s5188_s1 + $0x5f0] sm:$0xff]  }
  0x82   :  { %3719 = vmatprep.subr.bf16.mxu1 %v4062_v25  ;;  %v4124_v25 = vld [vmem:[%s5188_s1 + $0x5b0] sm:$0xff]  }
  0x83   :  { %2743 = vmatmul.mubr.bf16.vlgmr.msra.gmra.mrb[12].mxu0 %v3209_v20  ;;  %v4119_v20 = vld [vmem:[%s5188_s1 + $0x528] sm:$0xff]  }
  0x84   :  { %2783 = vmatmul.mubr.bf16.vlgmr.msra.gmra.mrb[12].mxu1 %v3211_v22  ;;  %3698 = vmatpush3.bf16.msra.mxu0 %v4063_v26  ;;  %v4121_v22 = vld [vmem:[%s5188_s1 + $0x570] sm:$0xff]   ;;  %v4125_v26 = vld [vmem:[%s5188_s1 + $0x578] sm:$0xff]  }
  0x85   :  { %3720 = vmatpush3.bf16.msra.mxu1 %v4064_v27  ;;  %3699 = vmatprep.subr.bf16.mxu0 %v4065_v28  ;;  %v4126_v27 = vld [vmem:[%s5188_s1 + $0x5f8] sm:$0xff]  }
  0x86   :  { %3721 = vmatprep.subr.bf16.mxu1 %v4066_v29  ;;  %2822 = vmatprep.mubr.bf16.mxu0 %v3214_v58  ;;  %v4127_v28 = vld [vmem:[%s5188_s1 + $0x538] sm:$0xff]   ;;  %v4155_v58 = vld [vmem:[%s5188_s1 + $0x628] sm:$0xff]  }
  0x87   :  { %2862 = vmatprep.mubr.bf16.mxu1 %v3216_v61  ;;  %v4128_v29 = vld [vmem:[%s5188_s1 + $0x5b8] sm:$0xff]   ;;  %v4158_v61 = vld [vmem:[%s5188_s1 + $0x6f0] sm:$0xff]  }
  0x88   :  { %3700 = vmatpush3.bf16.msra.mxu0 %v4067_v30  ;;  %v25_v30 = vld [vmem:[%s5189_s0 + $0x50] sm:$0xff] }
  0x89   :  { %3722 = vmatpush3.bf16.msra.mxu1 %v4068_v31  ;;  %3701 = vmatprep.subr.bf16.mxu0 %v4069_v32  ;;  %v26_v31 = vld [vmem:[%s5189_s0 + $0x58] sm:$0xff]  ;;  %v3217_v32 = vcombine.low %v25_v30, %v25_v30 }
  0x8a   :  { %3723 = vmatprep.subr.bf16.mxu1 %v4070_v33  ;;  %v3218_v33 = vcombine.high %v25_v30, %v25_v30  ;;  %v4188_v30 = vld [vmem:[%s5188_s1 + $0x7a0] sm:$0xff]  }
  0x8c   :  { %3702 = vmatpush3.bf16.msra.mxu0 %v4071_v34  ;;  %v3219_v34 = vcombine.low %v26_v31, %v26_v31 }
  0x8d   :  { %3724 = vmatpush3.bf16.msra.mxu1 %v4072_v35  ;;  %3703 = vmatprep.subr.bf16.mxu0 %v4073_v36  ;;  %v3220_v35 = vcombine.high %v26_v31, %v26_v31  ;;  %v4133_v36 = vld [vmem:[%s5188_s1 + $0x640] sm:$0xff]  }
  0x8e   :  { %3725 = vmatprep.subr.bf16.mxu1 %v4074_v37  ;;  %v4134_v37 = vld [vmem:[%s5188_s1 + $0x6c0] sm:$0xff]  }
  0x90   :  { %3704 = vmatpush3.bf16.msra.mxu0 %v4075_v38  ;;  %v4135_v38 = vld [vmem:[%s5188_s1 + $0x600] sm:$0xff]  }
  0x91   :  { %3726 = vmatpush3.bf16.msra.mxu1 %v4076_v39  ;;  %3705 = vmatprep.subr.bf16.mxu0 %v4077_v40  ;;  %v4136_v39 = vld [vmem:[%s5188_s1 + $0x680] sm:$0xff]   ;;  %v4137_v40 = vld [vmem:[%s5188_s1 + $0x648] sm:$0xff]  }
  0x92   :  { %3727 = vmatprep.subr.bf16.mxu1 %v4078_v41  ;;  %v4138_v41 = vld [vmem:[%s5188_s1 + $0x6c8] sm:$0xff]  }
  0x94   :  { %3706 = vmatpush3.bf16.msra.mxu0 %v4079_v42  ;;  %v4139_v42 = vld [vmem:[%s5188_s1 + $0x608] sm:$0xff]  }
  0x95   :  { %3728 = vmatpush3.bf16.msra.mxu1 %v4080_v43  ;;  %3707 = vmatprep.subr.bf16.mxu0 %v4081_v44  ;;  %v4140_v43 = vld [vmem:[%s5188_s1 + $0x688] sm:$0xff]   ;;  %v4141_v44 = vld [vmem:[%s5188_s1 + $0x650] sm:$0xff]  }
  0x96   :  { %3729 = vmatprep.subr.bf16.mxu1 %v4082_v45  ;;  %v4142_v45 = vld [vmem:[%s5188_s1 + $0x6d0] sm:$0xff]  }
  0x98   :  { %3708 = vmatpush3.bf16.msra.mxu0 %v4083_v46  ;;  %v4143_v46 = vld [vmem:[%s5188_s1 + $0x610] sm:$0xff]  }
  0x99   :  { %3730 = vmatpush3.bf16.msra.mxu1 %v4084_v47  ;;  %3709 = vmatprep.subr.bf16.mxu0 %v4085_v48  ;;  %v4144_v47 = vld [vmem:[%s5188_s1 + $0x690] sm:$0xff]   ;;  %v4145_v48 = vld [vmem:[%s5188_s1 + $0x658] sm:$0xff]  }
  0x9a   :  { %3731 = vmatprep.subr.bf16.mxu1 %v4086_v49  ;;  %v4146_v49 = vld [vmem:[%s5188_s1 + $0x6d8] sm:$0xff]  }
  0x9c   :  { %3710 = vmatpush3.bf16.msra.mxu0 %v4087_v50  ;;  %v4147_v50 = vld [vmem:[%s5188_s1 + $0x618] sm:$0xff]  }
  0x9d   :  { %3732 = vmatpush3.bf16.msra.mxu1 %v4088_v51  ;;  %3711 = vmatprep.subr.bf16.mxu0 %v4089_v52  ;;  %v4148_v51 = vld [vmem:[%s5188_s1 + $0x698] sm:$0xff]   ;;  %v4149_v52 = vld [vmem:[%s5188_s1 + $0x660] sm:$0xff]  }
  0x9e   :  { %3733 = vmatprep.subr.bf16.mxu1 %v4090_v53  ;;  %v4150_v53 = vld [vmem:[%s5188_s1 + $0x6e0] sm:$0xff]  }
  0xa0   :  { %3712 = vmatpush3.bf16.msra.mxu0 %v4091_v54  ;;  %v4151_v54 = vld [vmem:[%s5188_s1 + $0x620] sm:$0xff]  }
  0xa1   :  { %3734 = vmatpush3.bf16.msra.mxu1 %v4092_v55  ;;  %3741 = vmatprep.subr.bf16.mxu0 %v4097_v62  ;;  %v4152_v55 = vld [vmem:[%s5188_s1 + $0x6a0] sm:$0xff]   ;;  %v4159_v62 = vld [vmem:[%s5188_s1 + $0x630] sm:$0xff]  }
  0xa2   :  { %3763 = vmatprep.subr.bf16.mxu1 %v4098_v63  ;;  %v4160_v63 = vld [vmem:[%s5188_s1 + $0x6b0] sm:$0xff]  }
  0xa3   :  { %2823 = vmatmul.mubr.bf16.vlgmr.msra.gmra.mrb[16].mxu0 %v3213_v57  ;;  %v4154_v57 = vld [vmem:[%s5188_s1 + $0x6e8] sm:$0xff]  }
  0xa4   :  { %2863 = vmatmul.mubr.bf16.vlgmr.msra.gmra.mrb[16].mxu1 %v3215_v60  ;;  %3742 = vmatpush3.bf16.msra.mxu0 %v4099_v0  ;;  %v4157_v60 = vld [vmem:[%s5188_s1 + $0x670] sm:$0xff]   ;;  %v4161_v0 = vld [vmem:[%s5188_s1 + $0x678] sm:$0xff]  }
  0xa5   :  { %3764 = vmatpush3.bf16.msra.mxu1 %v4100_v1  ;;  %3743 = vmatprep.subr.bf16.mxu0 %v4101_v2  ;;  %v4162_v1 = vld [vmem:[%s5188_s1 + $0x6f8] sm:$0xff]  }
  0xa6   :  { %3765 = vmatprep.subr.bf16.mxu1 %v4102_v3  ;;  %2902 = vmatprep.mubr.bf16.mxu0 %v3218_v33  ;;  %v4163_v2 = vld [vmem:[%s5188_s1 + $0x638] sm:$0xff]  }
  0xa7   :  { %2942 = vmatprep.mubr.bf16.mxu1 %v3220_v35  ;;  %v4164_v3 = vld [vmem:[%s5188_s1 + $0x6b8] sm:$0xff]  }
  0xa8   :  { %3744 = vmatpush3.bf16.msra.mxu0 %v4103_v4  ;;  %v27_v4 = vld [vmem:[%s5189_s0 + $0x60] sm:$0xff] }
  0xa9   :  { %3766 = vmatpush3.bf16.msra.mxu1 %v4104_v5  ;;  %3745 = vmatprep.subr.bf16.mxu0 %v4105_v6  ;;  %v28_v5 = vld [vmem:[%s5189_s0 + $0x68] sm:$0xff]  ;;  %v3221_v6 = vcombine.low %v27_v4, %v27_v4 }
  0xaa   :  { %3767 = vmatprep.subr.bf16.mxu1 %v4106_v7  ;;  %v3222_v7 = vcombine.high %v27_v4, %v27_v4  ;;  %v4212_v4 = vld [vmem:[%s5188_s1 + $0x888] sm:$0xff]  }
  0xac   :  { %3746 = vmatpush3.bf16.msra.mxu0 %v4107_v8  ;;  %v3223_v8 = vcombine.low %v28_v5, %v28_v5 }
  0xad   :  { %3768 = vmatpush3.bf16.msra.mxu1 %v4108_v9  ;;  %3747 = vmatprep.subr.bf16.mxu0 %v4109_v10  ;;  %v4169_v9 = vld [vmem:[%s5188_s1 + $0x740] sm:$0xff]   ;;  %v3224_v10 = vcombine.high %v28_v5, %v28_v5  ;;  %v4213_v5 = vld [vmem:[%s5188_s1 + $0x850] sm:$0xff]  }
  0xae   :  { %3769 = vmatprep.subr.bf16.mxu1 %v4110_v11  ;;  %v4170_v11 = vld [vmem:[%s5188_s1 + $0x7c0] sm:$0xff]  }
  0xb0   :  { %3748 = vmatpush3.bf16.msra.mxu0 %v4111_v12  ;;  %v4171_v12 = vld [vmem:[%s5188_s1 + $0x700] sm:$0xff]  }
  0xb1   :  { %3770 = vmatpush3.bf16.msra.mxu1 %v4112_v13  ;;  %3749 = vmatprep.subr.bf16.mxu0 %v4113_v14  ;;  %v4172_v13 = vld [vmem:[%s5188_s1 + $0x780] sm:$0xff]   ;;  %v4173_v14 = vld [vmem:[%s5188_s1 + $0x748] sm:$0xff]  }
  0xb2   :  { %3771 = vmatprep.subr.bf16.mxu1 %v4114_v15  ;;  %v4174_v15 = vld [vmem:[%s5188_s1 + $0x7c8] sm:$0xff]  }
  0xb4   :  { %3750 = vmatpush3.bf16.msra.mxu0 %v4115_v16  ;;  %v4175_v16 = vld [vmem:[%s5188_s1 + $0x708] sm:$0xff]  }
  0xb5   :  { %3772 = vmatpush3.bf16.msra.mxu1 %v4116_v17  ;;  %3751 = vmatprep.subr.bf16.mxu0 %v4117_v18  ;;  %v4176_v17 = vld [vmem:[%s5188_s1 + $0x788] sm:$0xff]   ;;  %v4177_v18 = vld [vmem:[%s5188_s1 + $0x750] sm:$0xff]  }
  0xb6   :  { %3773 = vmatprep.subr.bf16.mxu1 %v4118_v19  ;;  %v4178_v19 = vld [vmem:[%s5188_s1 + $0x7d0] sm:$0xff]  }
  0xb8   :  { %3752 = vmatpush3.bf16.msra.mxu0 %v4119_v20  ;;  %v4179_v20 = vld [vmem:[%s5188_s1 + $0x710] sm:$0xff]  }
  0xb9   :  { %3774 = vmatpush3.bf16.msra.mxu1 %v4120_v21  ;;  %3753 = vmatprep.subr.bf16.mxu0 %v4121_v22  ;;  %v4180_v21 = vld [vmem:[%s5188_s1 + $0x790] sm:$0xff]   ;;  %v4181_v22 = vld [vmem:[%s5188_s1 + $0x758] sm:$0xff]  }
  0xba   :  { %3775 = vmatprep.subr.bf16.mxu1 %v4122_v23  ;;  %v4182_v23 = vld [vmem:[%s5188_s1 + $0x7d8] sm:$0xff]  }
  0xbc   :  { %3754 = vmatpush3.bf16.msra.mxu0 %v4123_v24  ;;  %v4183_v24 = vld [vmem:[%s5188_s1 + $0x718] sm:$0xff]  }
  0xbd   :  { %3776 = vmatpush3.bf16.msra.mxu1 %v4124_v25  ;;  %3755 = vmatprep.subr.bf16.mxu0 %v4125_v26  ;;  %v4184_v25 = vld [vmem:[%s5188_s1 + $0x798] sm:$0xff]   ;;  %v4185_v26 = vld [vmem:[%s5188_s1 + $0x760] sm:$0xff]  }
  0xbe   :  { %3777 = vmatprep.subr.bf16.mxu1 %v4126_v27  ;;  %v4186_v27 = vld [vmem:[%s5188_s1 + $0x7e0] sm:$0xff]  }
  0xc0   :  { %3756 = vmatpush3.bf16.msra.mxu0 %v4127_v28  ;;  %v4187_v28 = vld [vmem:[%s5188_s1 + $0x720] sm:$0xff]  }
  0xc1   :  { %3778 = vmatpush3.bf16.msra.mxu1 %v4128_v29  ;;  %3785 = vmatprep.subr.bf16.mxu0 %v4133_v36 }
  0xc2   :  { %3807 = vmatprep.subr.bf16.mxu1 %v4134_v37  ;;  %v4189_v37 = vld [vmem:[%s5188_s1 + $0x768] sm:$0xff]  }
  0xc3   :  { %2903 = vmatmul.mubr.bf16.vlgmr.msra.gmra.mrb[20].mxu0 %v3217_v32  ;;  %v3196_v32 = vld [vmem:[%s5190_s2] ss:$0 sm:$0xff] }
  0xc4   :  { %2943 = vmatmul.mubr.bf16.vlgmr.msra.gmra.mrb[20].mxu1 %v3219_v34  ;;  %3786 = vmatpush3.bf16.msra.mxu0 %v4135_v38 }
  0xc5   :  { %3808 = vmatpush3.bf16.msra.mxu1 %v4136_v39  ;;  %3787 = vmatprep.subr.bf16.mxu0 %v4137_v40  ;;  %v4190_v39 = vld [vmem:[%s5188_s1 + $0x7e8] sm:$0xff]  }
  0xc6   :  { %3809 = vmatprep.subr.bf16.mxu1 %v4138_v41  ;;  %2982 = vmatprep.mubr.bf16.mxu0 %v3222_v7  ;;  %v4215_v7 = vld [vmem:[%s5188_s1 + $0x810] sm:$0xff]  }
  0xc7   :  { %3022 = vmatprep.mubr.bf16.mxu1 %v3224_v10  ;;  %v4218_v10 = vld [vmem:[%s5188_s1 + $0x8d8] sm:$0xff]  }
  0xc8   :  { %3788 = vmatpush3.bf16.msra.mxu0 %v4139_v42  ;;  %v4191_v42 = vld [vmem:[%s5188_s1 + $0x728] sm:$0xff]  }
  0xc9   :  { %3810 = vmatpush3.bf16.msra.mxu1 %v4140_v43  ;;  %3789 = vmatprep.subr.bf16.mxu0 %v4141_v44  ;;  %v4192_v44 = vld [vmem:[%s5188_s1 + $0x7a8] sm:$0xff]  }
  0xca   :  { %3811 = vmatprep.subr.bf16.mxu1 %v4142_v45 }
  0xcc   :  { %3790 = vmatpush3.bf16.msra.mxu0 %v4143_v46 }
  0xcd   :  { %3812 = vmatpush3.bf16.msra.mxu1 %v4144_v47  ;;  %3791 = vmatprep.subr.bf16.mxu0 %v4145_v48  ;;  %v4193_v47 = vld [vmem:[%s5188_s1 + $0x770] sm:$0xff]  }
  0xce   :  { %3813 = vmatprep.subr.bf16.mxu1 %v4146_v49  ;;  %v4194_v48 = vld [vmem:[%s5188_s1 + $0x7f0] sm:$0xff]  }
  0xcf   :  { %v4195_v49 = vld [vmem:[%s5188_s1 + $0x730] sm:$0xff]  }
  0xd0   :  { %3792 = vmatpush3.bf16.msra.mxu0 %v4147_v50  ;;  %v4196_v50 = vld [vmem:[%s5188_s1 + $0x7b0] sm:$0xff]  }
  0xd1   :  { %3814 = vmatpush3.bf16.msra.mxu1 %v4148_v51  ;;  %3793 = vmatprep.subr.bf16.mxu0 %v4149_v52  ;;  %v4197_v51 = vld [vmem:[%s5188_s1 + $0x778] sm:$0xff]  }
  0xd2   :  { %3815 = vmatprep.subr.bf16.mxu1 %v4150_v53  ;;  %v4198_v52 = vld [vmem:[%s5188_s1 + $0x7f8] sm:$0xff]  }
  0xd3   :  { %v4199_v53 = vld [vmem:[%s5188_s1 + $0x738] sm:$0xff]  }
  0xd4   :  { %3794 = vmatpush3.bf16.msra.mxu0 %v4151_v54  ;;  %v4200_v54 = vld [vmem:[%s5188_s1 + $0x7b8] sm:$0xff]  }
  0xd5   :  { %3816 = vmatpush3.bf16.msra.mxu1 %v4152_v55  ;;  %3795 = vmatprep.subr.bf16.mxu0 %v4153_v56  ;;  %v29_v55 = vld [vmem:[%s5189_s0 + $0x70] sm:$0xff]  ;;  %v30_v56 = vld [vmem:[%s5189_s0 + $0x78] sm:$0xff] }
  0xd6   :  { %3817 = vmatprep.subr.bf16.mxu1 %v4154_v57  ;;  %v3225_v57 = vcombine.low %v29_v55, %v29_v55 }
  0xd8   :  { %3796 = vmatpush3.bf16.msra.mxu0 %v4155_v58  ;;  %v3226_v58 = vcombine.high %v29_v55, %v29_v55 }
  0xd9   :  { %3818 = vmatpush3.bf16.msra.mxu1 %v4156_v59  ;;  %3797 = vmatprep.subr.bf16.mxu0 %v4157_v60  ;;  %v3227_v59 = vcombine.low %v30_v56, %v30_v56  ;;  %v3228_v60 = vcombine.high %v30_v56, %v30_v56 }
  0xda   :  { %3819 = vmatprep.subr.bf16.mxu1 %v4158_v61  ;;  %v4205_v61 = vld [vmem:[%s5188_s1 + $0x840] sm:$0xff]  }
  0xdc   :  { %3798 = vmatpush3.bf16.msra.mxu0 %v4159_v62  ;;  %v4206_v62 = vld [vmem:[%s5188_s1 + $0x8c0] sm:$0xff]  }
  0xdd   :  { %3820 = vmatpush3.bf16.msra.mxu1 %v4160_v63  ;;  %3799 = vmatprep.subr.bf16.mxu0 %v4161_v0  ;;  %v4207_v63 = vld [vmem:[%s5188_s1 + $0x800] sm:$0xff]  }
  0xde   :  { %3821 = vmatprep.subr.bf16.mxu1 %v4162_v1  ;;  %v4208_v0 = vld [vmem:[%s5188_s1 + $0x880] sm:$0xff]   ;;  %v4209_v1 = vld [vmem:[%s5188_s1 + $0x848] sm:$0xff]  }
  0xe0   :  { %3800 = vmatpush3.bf16.msra.mxu0 %v4163_v2  ;;  %v4210_v2 = vld [vmem:[%s5188_s1 + $0x8c8] sm:$0xff]  }
  0xe1   :  { %3822 = vmatpush3.bf16.msra.mxu1 %v4164_v3  ;;  %3829 = vmatprep.subr.bf16.mxu0 %v4169_v9  ;;  %v4211_v3 = vld [vmem:[%s5188_s1 + $0x808] sm:$0xff]   ;;  %v4217_v9 = vld [vmem:[%s5188_s1 + $0x858] sm:$0xff]  }
  0xe2   :  { %3851 = vmatprep.subr.bf16.mxu1 %v4170_v11  ;;  %v4219_v11 = vld [vmem:[%s5188_s1 + $0x818] sm:$0xff]  }
  0xe3   :  { %2983 = vmatmul.mubr.bf16.vlgmr.msra.gmra.mrb[24].mxu0 %v3221_v6  ;;  %v4214_v6 = vld [vmem:[%s5188_s1 + $0x8d0] sm:$0xff]  }
  0xe4   :  { %3023 = vmatmul.mubr.bf16.vlgmr.msra.gmra.mrb[24].mxu1 %v3223_v8  ;;  %3830 = vmatpush3.bf16.msra.mxu0 %v4171_v12  ;;  %v4216_v8 = vld [vmem:[%s5188_s1 + $0x890] sm:$0xff]   ;;  %v4220_v12 = vld [vmem:[%s5188_s1 + $0x898] sm:$0xff]  }
  0xe5   :  { %3852 = vmatpush3.bf16.msra.mxu1 %v4172_v13  ;;  %3831 = vmatprep.subr.bf16.mxu0 %v4173_v14  ;;  %v4221_v13 = vld [vmem:[%s5188_s1 + $0x860] sm:$0xff]  }
  0xe6   :  { %3853 = vmatprep.subr.bf16.mxu1 %v4174_v15  ;;  %3062 = vmatprep.mubr.bf16.mxu0 %v3226_v58  ;;  %v4222_v14 = vld [vmem:[%s5188_s1 + $0x8e0] sm:$0xff]  }
  0xe7   :  { %3102 = vmatprep.mubr.bf16.mxu1 %v3228_v60  ;;  %v4223_v15 = vld [vmem:[%s5188_s1 + $0x820] sm:$0xff]  }
  0xe8   :  { %3832 = vmatpush3.bf16.msra.mxu0 %v4175_v16 }
  0xe9   :  { %3854 = vmatpush3.bf16.msra.mxu1 %v4176_v17  ;;  %3833 = vmatprep.subr.bf16.mxu0 %v4177_v18  ;;  %v4224_v17 = vld [vmem:[%s5188_s1 + $0x8a0] sm:$0xff]  }
  0xea   :  { %3855 = vmatprep.subr.bf16.mxu1 %v4178_v19 }
  0xec   :  { %3834 = vmatpush3.bf16.msra.mxu0 %v4179_v20 }
  0xed   :  { %3856 = vmatpush3.bf16.msra.mxu1 %v4180_v21  ;;  %3835 = vmatprep.subr.bf16.mxu0 %v4181_v22 }
  0xee   :  { %3857 = vmatprep.subr.bf16.mxu1 %v4182_v23  ;;  %v4225_v23 = vld [vmem:[%s5188_s1 + $0x868] sm:$0xff]  }
  0xf0   :  { %3836 = vmatpush3.bf16.msra.mxu0 %v4183_v24 }
  0xf1   :  { %3858 = vmatpush3.bf16.msra.mxu1 %v4184_v25  ;;  %3837 = vmatprep.subr.bf16.mxu0 %v4185_v26  ;;  %v4226_v25 = vld [vmem:[%s5188_s1 + $0x8e8] sm:$0xff]  }
  0xf2   :  { %3859 = vmatprep.subr.bf16.mxu1 %v4186_v27 }
  0xf4   :  { %3838 = vmatpush3.bf16.msra.mxu0 %v4187_v28  ;;  %v4227_v28 = vld [vmem:[%s5188_s1 + $0x828] sm:$0xff]  }
  0xf5   :  { %3860 = vmatpush3.bf16.msra.mxu1 %v4188_v30  ;;  %3839 = vmatprep.subr.bf16.mxu0 %v4189_v37  ;;  %v4228_v30 = vld [vmem:[%s5188_s1 + $0x8a8] sm:$0xff]   ;;  %v4233_v37 = vld [vmem:[%s5188_s1 + $0x878] sm:$0xff]  }
  0xf6   :  { %v3537_v29 = vpop.f32.mrb[0].mxu0  ;;  %3861 = vmatprep.subr.bf16.mxu1 %v4190_v39  ;;  %v4235_v39 = vld [vmem:[%s5188_s1 + $0x838] sm:$0xff]  }
  0xf7   :  { %v3559_v31 = vpop.f32.mrb[0].mxu1  ;;  %v3538_v33 = vpop.f32.mrb[1].mxu0 }
  0xf8   :  { %v3560_v34 = vpop.f32.mrb[1].mxu1  ;;  %v3539_v35 = vadd.f32 %v3538_v33, %v3537_v29  ;;  %v3540_v38 = vpop.f32.mrb[2].mxu0  ;;  %3840 = vmatpush3.bf16.msra.mxu0 %v4191_v42  ;;  %v4229_v33 = vld [vmem:[%s5188_s1 + $0x870] sm:$0xff]   ;;  %v32_v42 = vld [vmem:[%s5189_s0 + $0x88] sm:$0xff] }
  0xf9   :  { %v3561_v36 = vadd.f32 %v3560_v34, %v3559_v31  ;;  %v3562_v40 = vpop.f32.mrb[2].mxu1  ;;  %v3541_v43 = vpop.f32.mrb[3].mxu0  ;;  %3862 = vmatpush3.bf16.msra.mxu1 %v4192_v44  ;;  %3841 = vmatprep.subr.bf16.mxu0 %v4193_v47  ;;  %v4230_v34 = vld [vmem:[%s5188_s1 + $0x8f0] sm:$0xff]   ;;  %v4234_v38 = vld [vmem:[%s5188_s1 + $0x8f8] sm:$0xff]  }
  0xfa   :  { %v2505_v41 = vadd.f32 %v3539_v35, %v3196_v32  ;;  %v3563_v45 = vpop.f32.mrb[3].mxu1  ;;  %3863 = vmatprep.subr.bf16.mxu1 %v4194_v48  ;;  %v4231_v35 = vld [vmem:[%s5188_s1 + $0x830] sm:$0xff]   ;;  %v4236_v40 = vld [vmem:[%s5188_s1 + $0x8b8] sm:$0xff]  }
  0xfb   :  { %v3231_v45 = vcombine.low %v32_v42, %v32_v42 }
  0xfc   :  { %v5050_v46 = vadd.f32 %v3561_v36, %v2505_v41  ;;  %3842 = vmatpush3.bf16.msra.mxu0 %v4195_v49  ;;  %v4232_v36 = vld [vmem:[%s5188_s1 + $0x8b0] sm:$0xff]   ;;  %v31_v41 = vld [vmem:[%s5189_s0 + $0x80] sm:$0xff] }
  0xfd   :  { %3864 = vmatpush3.bf16.msra.mxu1 %v4196_v50  ;;  %3843 = vmatprep.subr.bf16.mxu0 %v4197_v51  ;;  %v3229_v43 = vcombine.low %v31_v41, %v31_v41  ;;  %v3230_v44 = vcombine.high %v31_v41, %v31_v41 }
  0xfe   :  { %3865 = vmatprep.subr.bf16.mxu1 %v4198_v52 }
 0x100   :  { %3844 = vmatpush3.bf16.msra.mxu0 %v4199_v53 }
 0x101   :  { %3866 = vmatpush3.bf16.msra.mxu1 %v4200_v54  ;;  %3873 = vmatprep.subr.bf16.mxu0 %v4205_v61 }
 0x102   :  { %3895 = vmatprep.subr.bf16.mxu1 %v4206_v62 }
 0x103   :  { %3063 = vmatmul.mubr.bf16.vlgmr.msra.gmra.mrb[28].mxu0 %v3225_v57 }
 0x104   :  { %3103 = vmatmul.mubr.bf16.vlgmr.msra.gmra.mrb[28].mxu1 %v3227_v59  ;;  %3874 = vmatpush3.bf16.msra.mxu0 %v4207_v63 }
 0x105   :  { %3896 = vmatpush3.bf16.msra.mxu1 %v4208_v0  ;;  %3875 = vmatprep.subr.bf16.mxu0 %v4209_v1 }
 0x106   :  { %3897 = vmatprep.subr.bf16.mxu1 %v4210_v2  ;;  %3142 = vmatprep.mubr.bf16.mxu0 %v3230_v44 }
 0x108   :  { %3876 = vmatpush3.bf16.msra.mxu0 %v4211_v3 }
 0x109   :  { %3898 = vmatpush3.bf16.msra.mxu1 %v4212_v4  ;;  %3877 = vmatprep.subr.bf16.mxu0 %v4213_v5 }
 0x10a   :  { %3899 = vmatprep.subr.bf16.mxu1 %v4214_v6 }
 0x10c   :  { %3878 = vmatpush3.bf16.msra.mxu0 %v4215_v7 }
 0x10d   :  { %3900 = vmatpush3.bf16.msra.mxu1 %v4216_v8  ;;  %3879 = vmatprep.subr.bf16.mxu0 %v4217_v9 }
 0x10e   :  { %3901 = vmatprep.subr.bf16.mxu1 %v4218_v10 }
 0x110   :  { %3880 = vmatpush3.bf16.msra.mxu0 %v4219_v11 }
 0x111   :  { %3902 = vmatpush3.bf16.msra.mxu1 %v4220_v12  ;;  %3881 = vmatprep.subr.bf16.mxu0 %v4221_v13 }
 0x112   :  { %3903 = vmatprep.subr.bf16.mxu1 %v4222_v14 }
 0x114   :  { %3882 = vmatpush3.bf16.msra.mxu0 %v4223_v15 }
 0x115   :  { %3904 = vmatpush3.bf16.msra.mxu1 %v4224_v17  ;;  %3883 = vmatprep.subr.bf16.mxu0 %v4225_v23 }
 0x116   :  { %v3581_v16 = vpop.f32.mrb[4].mxu0  ;;  %3905 = vmatprep.subr.bf16.mxu1 %v4226_v25 }
 0x117   :  { %v3603_v18 = vpop.f32.mrb[4].mxu1  ;;  %v3582_v19 = vpop.f32.mrb[5].mxu0 }
 0x118   :  { %v3604_v20 = vpop.f32.mrb[5].mxu1  ;;  %v3583_v21 = vadd.f32 %v3582_v19, %v3581_v16  ;;  %v3584_v24 = vpop.f32.mrb[6].mxu0  ;;  %3884 = vmatpush3.bf16.msra.mxu0 %v4227_v28 }
 0x119   :  { %v3605_v22 = vadd.f32 %v3604_v20, %v3603_v18  ;;  %v3606_v26 = vpop.f32.mrb[6].mxu1  ;;  %v3585_v29 = vpop.f32.mrb[7].mxu0  ;;  %3906 = vmatpush3.bf16.msra.mxu1 %v4228_v30  ;;  %3885 = vmatprep.subr.bf16.mxu0 %v4229_v33 }
 0x11a   :  { %v2585_v27 = vadd.f32 %v3583_v21, %v5050_v46  ;;  %v3607_v31 = vpop.f32.mrb[7].mxu1  ;;  %3907 = vmatprep.subr.bf16.mxu1 %v4230_v34  ;;  %v3232_v46 = vcombine.high %v32_v42, %v32_v42 }
 0x11c   :  { %v2625_v32 = vadd.f32 %v3605_v22, %v2585_v27  ;;  %3886 = vmatpush3.bf16.msra.mxu0 %v4231_v35  ;;  %3182 = vmatprep.mubr.bf16.mxu1 %v3232_v46 }
 0x11d   :  { %3908 = vmatpush3.bf16.msra.mxu1 %v4232_v36  ;;  %3887 = vmatprep.subr.bf16.mxu0 %v4233_v37 }
 0x11e   :  { %3909 = vmatprep.subr.bf16.mxu1 %v4234_v38 }
 0x120   :  { %3888 = vmatpush3.bf16.msra.mxu0 %v4235_v39 }
 0x121   :  { %3910 = vmatpush3.bf16.msra.mxu1 %v4236_v40 }
 0x123   :  { %3143 = vmatmul.mubr.bf16.vlgmr.msra.gmra.mrb[32].mxu0 %v3229_v43 }
 0x124   :  { %3183 = vmatmul.mubr.bf16.vlgmr.msra.gmra.mrb[32].mxu1 %v3231_v45 }
 0x136   :  { %v3625_v47 = vpop.f32.mrb[8].mxu0 }
 0x137   :  { %v3647_v48 = vpop.f32.mrb[8].mxu1  ;;  %v3626_v49 = vpop.f32.mrb[9].mxu0 }
 0x138   :  { %v3627_v50 = vadd.f32 %v3626_v49, %v3625_v47  ;;  %v3648_v51 = vpop.f32.mrb[9].mxu1  ;;  %v3628_v52 = vpop.f32.mrb[10].mxu0 }
 0x139   :  { %v3649_v53 = vadd.f32 %v3648_v51, %v3647_v48  ;;  %v3650_v54 = vpop.f32.mrb[10].mxu1  ;;  %v3629_v55 = vpop.f32.mrb[11].mxu0 }
 0x13a   :  { %v2665_v56 = vadd.f32 %v3627_v50, %v2625_v32  ;;  %v3651_v57 = vpop.f32.mrb[11].mxu1 }
 0x13c   :  { %v2705_v58 = vadd.f32 %v3649_v53, %v2665_v56 }
 0x156   :  { %v3669_v59 = vpop.f32.mrb[12].mxu0 }
 0x157   :  { %v3691_v60 = vpop.f32.mrb[12].mxu1  ;;  %v3670_v61 = vpop.f32.mrb[13].mxu0 }
 0x158   :  { %v3671_v62 = vadd.f32 %v3670_v61, %v3669_v59  ;;  %v3692_v63 = vpop.f32.mrb[13].mxu1  ;;  %v3672_v0 = vpop.f32.mrb[14].mxu0 }
 0x159   :  { %v3693_v1 = vadd.f32 %v3692_v63, %v3691_v60  ;;  %v3694_v2 = vpop.f32.mrb[14].mxu1  ;;  %v3673_v3 = vpop.f32.mrb[15].mxu0 }
 0x15a   :  { %v2745_v4 = vadd.f32 %v3671_v62, %v2705_v58  ;;  %v3695_v5 = vpop.f32.mrb[15].mxu1 }
 0x15c   :  { %v2785_v6 = vadd.f32 %v3693_v1, %v2745_v4 }
 0x176   :  { %v3713_v7 = vpop.f32.mrb[16].mxu0 }
 0x177   :  { %v3735_v8 = vpop.f32.mrb[16].mxu1  ;;  %v3714_v9 = vpop.f32.mrb[17].mxu0 }
 0x178   :  { %v3736_v10 = vpop.f32.mrb[17].mxu1  ;;  %v3715_v11 = vadd.f32 %v3714_v9, %v3713_v7  ;;  %v3716_v13 = vpop.f32.mrb[18].mxu0 }
 0x179   :  { %v3737_v12 = vadd.f32 %v3736_v10, %v3735_v8  ;;  %v3738_v14 = vpop.f32.mrb[18].mxu1  ;;  %v3717_v15 = vpop.f32.mrb[19].mxu0 }
 0x17a   :  { %v3739_v16 = vpop.f32.mrb[19].mxu1  ;;  %v2825_v17 = vadd.f32 %v3715_v11, %v2785_v6 }
 0x17c   :  { %v2865_v18 = vadd.f32 %v3737_v12, %v2825_v17 }
 0x196   :  { %v3757_v19 = vpop.f32.mrb[20].mxu0 }
 0x197   :  { %v3779_v20 = vpop.f32.mrb[20].mxu1  ;;  %v3758_v21 = vpop.f32.mrb[21].mxu0 }
 0x198   :  { %v3759_v22 = vadd.f32 %v3758_v21, %v3757_v19  ;;  %v3780_v23 = vpop.f32.mrb[21].mxu1  ;;  %v3760_v24 = vpop.f32.mrb[22].mxu0 }
 0x199   :  { %v3781_v25 = vadd.f32 %v3780_v23, %v3779_v20  ;;  %v3782_v26 = vpop.f32.mrb[22].mxu1  ;;  %v3761_v27 = vpop.f32.mrb[23].mxu0 }
 0x19a   :  { %v2905_v28 = vadd.f32 %v3759_v22, %v2865_v18  ;;  %v3783_v29 = vpop.f32.mrb[23].mxu1 }
 0x19c   :  { %v2945_v30 = vadd.f32 %v3781_v25, %v2905_v28 }
 0x1b6   :  { %v3801_v31 = vpop.f32.mrb[24].mxu0 }
 0x1b7   :  { %v3823_v32 = vpop.f32.mrb[24].mxu1  ;;  %v3802_v33 = vpop.f32.mrb[25].mxu0 }
 0x1b8   :  { %v3803_v34 = vadd.f32 %v3802_v33, %v3801_v31  ;;  %v3824_v35 = vpop.f32.mrb[25].mxu1  ;;  %v3804_v36 = vpop.f32.mrb[26].mxu0 }
 0x1b9   :  { %v3825_v37 = vadd.f32 %v3824_v35, %v3823_v32  ;;  %v3826_v38 = vpop.f32.mrb[26].mxu1  ;;  %v3805_v39 = vpop.f32.mrb[27].mxu0 }
 0x1ba   :  { %v2985_v40 = vadd.f32 %v3803_v34, %v2945_v30  ;;  %v3827_v41 = vpop.f32.mrb[27].mxu1 }
 0x1bc   :  { %v3025_v42 = vadd.f32 %v3825_v37, %v2985_v40 }
 0x1d6   :  { %v3845_v43 = vpop.f32.mrb[28].mxu0 }
 0x1d7   :  { %v3867_v44 = vpop.f32.mrb[28].mxu1  ;;  %v3846_v45 = vpop.f32.mrb[29].mxu0 }
 0x1d8   :  { %v3847_v46 = vadd.f32 %v3846_v45, %v3845_v43  ;;  %v3868_v47 = vpop.f32.mrb[29].mxu1  ;;  %v3848_v48 = vpop.f32.mrb[30].mxu0 }
 0x1d9   :  { %v3869_v49 = vadd.f32 %v3868_v47, %v3867_v44  ;;  %v3870_v50 = vpop.f32.mrb[30].mxu1  ;;  %v3849_v51 = vpop.f32.mrb[31].mxu0 }
 0x1da   :  { %v3065_v52 = vadd.f32 %v3847_v46, %v3025_v42  ;;  %v3871_v53 = vpop.f32.mrb[31].mxu1 }
 0x1dc   :  { %v3105_v54 = vadd.f32 %v3869_v49, %v3065_v52 }
 0x1f6   :  { %v3889_v55 = vpop.f32.mrb[32].mxu0 }
 0x1f7   :  { %v3911_v56 = vpop.f32.mrb[32].mxu1  ;;  %v3890_v57 = vpop.f32.mrb[33].mxu0 }
 0x1f8   :  { %v3891_v58 = vadd.f32 %v3890_v57, %v3889_v55  ;;  %v3912_v59 = vpop.f32.mrb[33].mxu1  ;;  %v3892_v60 = vpop.f32.mrb[34].mxu0 }
 0x1f9   :  { %v3913_v61 = vadd.f32 %v3912_v59, %v3911_v56  ;;  %v3914_v62 = vpop.f32.mrb[34].mxu1  ;;  %v3893_v63 = vpop.f32.mrb[35].mxu0 }
 0x1fa   :  { %v3145_v0 = vadd.f32 %v3891_v58, %v3105_v54  ;;  %v3915_v1 = vpop.f32.mrb[35].mxu1 }
 0x1fc   :  { %v3185_v2 = vadd.f32 %v3913_v61, %v3145_v0 }
 0x1fe   :  { %v3190_v3 = vpack.c.bf16 %v3185_v2, %v3185_v2 }
 0x200   :  { %3191 = vst [vmem:[%s5191_s3] sm:$0xf] %v3190_v3 }

</bundles_post_ra>
